<compile_context>
chip_gen: v5e
topology: v5e:2x2
jax: 0.10.0
libtpu: 0.0.40
codegen_flags: <defaults>
</compile_context>

<pallas_src>
import jax
import jax.numpy as jnp
from jax.experimental import pallas as pl
from jax.experimental.pallas import tpu as pltpu


# ----------------------------------------------------------------------------
# Fused forward kernel: runs the whole network for one image per grid step.
# ----------------------------------------------------------------------------
def _fused_depth_kernel(x_ref,
                        we1, be1, we2, be2, we3, be3,
                        wu1, bu1, wd1, bd1,
                        wu2, bu2, wd2, bd2,
                        o_ref):

    def conv3x3(x, w_ref, b_ref, relu):
        """3x3 'same' conv: 9 taps folded into K (im2col) -> one matmul."""
        Hc, Wc, C = x.shape
        Kpad, Cout = w_ref.shape
        dt = x.dtype
        # spatial halo built in VMEM (padding=1)
        zrow = jnp.zeros((1, Wc, C), dt)
        xh = jnp.concatenate([zrow, x, zrow], axis=0)                 # (H+2, W,   C)
        zcol = jnp.zeros((Hc + 2, 1, C), dt)
        xp = jnp.concatenate([zcol, xh, zcol], axis=1)                # (H+2, W+2, C)
        # fold vertical taps: K index = ky*C + c
        x3 = jnp.concatenate([xp[0:Hc], xp[1:Hc + 1], xp[2:Hc + 2]], axis=-1)
        # fold horizontal taps: K index = kx*3C + ky*C + c
        x9 = jnp.concatenate([x3[:, 0:Wc], x3[:, 1:Wc + 1], x3[:, 2:Wc + 2]],
                             axis=-1)                                 # (H, W, 9C)
        patch = x9.reshape(Hc * Wc, 9 * C)
        if Kpad > 9 * C:                                              # pad K to mult of 128
            patch = jnp.concatenate(
                [patch, jnp.zeros((Hc * Wc, Kpad - 9 * C), dt)], axis=-1)
        acc = jnp.dot(patch, w_ref[...],
                      preferred_element_type=jnp.float32) + b_ref[...]
        if relu:
            acc = jnp.maximum(acc, 0.0)
        return acc.reshape(Hc, Wc, Cout)                              # f32

    def maxpool2(y):
        Hc, Wc, C = y.shape
        y = y.reshape(Hc // 2, 2, Wc // 2, 2, C)
        return jnp.max(jnp.max(y, axis=3), axis=1)                    # (H/2, W/2, C)

    def tconv2x2_relu(x, w_ref, b_ref):
        """ConvTranspose2d(k=2, s=2) + ReLU: one wide dot (N = 4*Cout), then
        sub-pixel interleave assembled in VMEM."""
        Hc, Wc, C = x.shape
        Cout = w_ref.shape[1] // 4
        y = jnp.dot(x.reshape(Hc * Wc, C), w_ref[...],
                    preferred_element_type=jnp.float32)
        y = jnp.maximum(y + b_ref[...], 0.0).astype(jnp.bfloat16)     # bias+ReLU once
        ys = [y[:, k * Cout:(k + 1) * Cout] for k in range(4)]        # k = dy*2 + dx

        def w_interleave(a, b):                                       # -> (H, 2W, Cout)
            a4 = a.reshape(Hc, Wc, 1, Cout)
            b4 = b.reshape(Hc, Wc, 1, Cout)
            return jnp.concatenate([a4, b4], axis=2).reshape(Hc, 2 * Wc, Cout)

        r0 = w_interleave(ys[0], ys[1])                               # output rows dy=0
        r1 = w_interleave(ys[2], ys[3])                               # output rows dy=1
        u = jnp.concatenate([r0[:, None], r1[:, None]], axis=1)
        return u.reshape(2 * Hc, 2 * Wc, Cout)                        # bf16

    x = x_ref[0].astype(jnp.bfloat16)                                 # (16,16,8)

    # encoder
    h = conv3x3(x, we1, be1, relu=True).astype(jnp.bfloat16)          # (16,16,16)
    h = conv3x3(h, we2, be2, relu=True)                               # (16,16,32) f32
    h = maxpool2(h).astype(jnp.bfloat16)                              # ( 8, 8,32)
    h = conv3x3(h, we3, be3, relu=True)                               # ( 8, 8,64) f32
    h = maxpool2(h).astype(jnp.bfloat16)                              # ( 4, 4,64)
    # decoder
    h = tconv2x2_relu(h, wu1, bu1)                                    # ( 8, 8,32)
    h = conv3x3(h, wd1, bd1, relu=True).astype(jnp.bfloat16)          # ( 8, 8,16)
    h = tconv2x2_relu(h, wu2, bu2)                                    # (16,16, 8)
    out = conv3x3(h, wd2, bd2, relu=False)                            # (16,16, 8) f32 (ch 0 real)

    o_ref[0] = out.astype(o_ref.dtype)


def depth_net_pallas(x_nhwc, prepped):
    B, H, W, Ci = x_nhwc.shape

    def full_spec(arr):
        return pl.BlockSpec(arr.shape, lambda n: (0,) * arr.ndim)

    weight_order = ["e1", "e2", "e3", "u1", "d1", "u2", "d2"]
    args, in_specs = [], [pl.BlockSpec((1, H, W, Ci), lambda n: (n, 0, 0, 0))]
    for k in weight_order:
        w, b = prepped[k + "_w"], prepped[k + "_b"]
        args += [w, b]
        in_specs += [full_spec(w), full_spec(b)]

    return pl.pallas_call(
        _fused_depth_kernel,
        grid=(B,),
        in_specs=in_specs,
        out_specs=pl.BlockSpec((1, H, W, 8), lambda n: (n, 0, 0, 0)),
        out_shape=jax.ShapeDtypeStruct((B, H, W, 8), jnp.float32),
        compiler_params=pltpu.CompilerParams(
            dimension_semantics=("parallel",),
            vmem_limit_bytes=32 * 1024 * 1024),
    )(x_nhwc, *args)


# ----------------------------------------------------------------------------
# Parameter preparation (PyTorch layouts -> im2col / sub-pixel kernel layouts).
# ----------------------------------------------------------------------------
def _next_mult_128(n):
    return ((n + 127) // 128) * 128


def _prep_conv(w_oihw, b, *, cin_pad=None, cout_pad=None):
    O, I, KH, KW = w_oihw.shape
    if cin_pad is not None and cin_pad > I:
        w_oihw = jnp.pad(w_oihw, ((0, 0), (0, cin_pad - I), (0, 0), (0, 0)))
        I = cin_pad
    # row index = kx*(3I) + ky*I + i  (matches in-kernel im2col fold order)
    w = jnp.transpose(w_oihw, (3, 2, 1, 0)).reshape(KH * KW * I, O)
    if cout_pad is not None and cout_pad > O:
        w = jnp.pad(w, ((0, 0), (0, cout_pad - O)))
        b = jnp.pad(b, (0, cout_pad - O))
    kpad = _next_mult_128(w.shape[0])
    w = jnp.pad(w, ((0, kpad - w.shape[0]), (0, 0))).astype(jnp.bfloat16)
    return w, jnp.asarray(b, jnp.float32)[None, :]


def _prep_tconv(w_iokk, b):
    I, O, KH, KW = w_iokk.shape
    # column index = (dy*2 + dx)*O + o
    w = jnp.transpose(w_iokk, (0, 2, 3, 1)).reshape(I, KH * KW * O).astype(jnp.bfloat16)
    b4 = jnp.tile(jnp.asarray(b, jnp.float32), KH * KW)[None, :]
    return w, b4


def prepare_params(p):
    out = {}
    out["e1_w"], out["e1_b"] = _prep_conv(p["e1_w"], p["e1_b"], cin_pad=8)   # K 72->128
    out["e2_w"], out["e2_b"] = _prep_conv(p["e2_w"], p["e2_b"])              # K 144->256
    out["e3_w"], out["e3_b"] = _prep_conv(p["e3_w"], p["e3_b"])              # K 288->384
    out["d1_w"], out["d1_b"] = _prep_conv(p["d1_w"], p["d1_b"])              # K 288->384
    out["d2_w"], out["d2_b"] = _prep_conv(p["d2_w"], p["d2_b"], cout_pad=8)  # K 72->128, N 1->8
    out["u1_w"], out["u1_b"] = _prep_tconv(p["u1_w"], p["u1_b"])             # (64,128)
    out["u2_w"], out["u2_b"] = _prep_tconv(p["u2_w"], p["u2_b"])             # (16, 32)
    return out


# ----------------------------------------------------------------------------
# Full forward pass (NCHW in / NCHW out, matching the PyTorch module).
# ----------------------------------------------------------------------------
@jax.jit
def depth_net_forward(prepped, x_nchw):
    x = jnp.transpose(x_nchw, (0, 2, 3, 1))                           # NHWC f32
    x = jnp.pad(x, ((0, 0), (0, 0), (0, 0), (0, 8 - x.shape[-1])))    # C: 3 -> 8 only
    y = depth_net_pallas(x, prepped)                                  # (B,H,W,8) f32
    return jnp.transpose(y[..., :1], (0, 3, 1, 2))                    # (B,1,H,W)


# ----------------------------------------------------------------------------
# Pure-JAX f32 reference (lax.conv) for correctness checking.
# ----------------------------------------------------------------------------
def _ref_conv3x3(x, w_oihw, b):
    w = jnp.transpose(w_oihw, (2, 3, 1, 0))                           # HWIO
    y = jax.lax.conv_general_dilated(x, w, (1, 1), "SAME",
                                     dimension_numbers=("NHWC", "HWIO", "NHWC"))
    return y + b


def _ref_tconv2x2(x, w_iokk, b):
    B, H, W, C = x.shape
    O = w_iokk.shape[1]
    y = jnp.einsum("bhwc,coij->bhiwjo", x, w_iokk)
    return y.reshape(B, 2 * H, 2 * W, O) + b


def _ref_pool(x):
    B, H, W, C = x.shape
    return jnp.max(x.reshape(B, H // 2, 2, W // 2, 2, C), axis=(2, 4))


def ref_forward(p, x_nchw):
    h = jnp.transpose(x_nchw, (0, 2, 3, 1))
    h = jax.nn.relu(_ref_conv3x3(h, p["e1_w"], p["e1_b"]))
    h = jax.nn.relu(_ref_conv3x3(h, p["e2_w"], p["e2_b"]))
    h = _ref_pool(h)
    h = jax.nn.relu(_ref_conv3x3(h, p["e3_w"], p["e3_b"]))
    h = _ref_pool(h)
    h = jax.nn.relu(_ref_tconv2x2(h, p["u1_w"], p["u1_b"]))
    h = jax.nn.relu(_ref_conv3x3(h, p["d1_w"], p["d1_b"]))
    h = jax.nn.relu(_ref_tconv2x2(h, p["u2_w"], p["u2_b"]))
    h = _ref_conv3x3(h, p["d2_w"], p["d2_b"])
    return jnp.transpose(h, (0, 3, 1, 2))


# ----------------------------------------------------------------------------
# Deterministic parameter init (shapes from SimpleDepthEstimationNet).
# ----------------------------------------------------------------------------
def init_params(key):
    ks = jax.random.split(key, 14)
    n = lambda k, s, scale=0.1: scale * jax.random.normal(k, s, jnp.float32)
    return {
        "e1_w": n(ks[0], (16, 3, 3, 3)),   "e1_b": n(ks[1], (16,)),
        "e2_w": n(ks[2], (32, 16, 3, 3)),  "e2_b": n(ks[3], (32,)),
        "e3_w": n(ks[4], (64, 32, 3, 3)),  "e3_b": n(ks[5], (64,)),
        "u1_w": n(ks[6], (64, 32, 2, 2)),  "u1_b": n(ks[7], (32,)),
        "d1_w": n(ks[8], (16, 32, 3, 3)),  "d1_b": n(ks[9], (16,)),
        "u2_w": n(ks[10], (16, 8, 2, 2)),  "u2_b": n(ks[11], (8,)),
        "d2_w": n(ks[12], (1, 8, 3, 3)),   "d2_b": n(ks[13], (1,)),
    }


if __name__ == "__main__":
    key = jax.random.PRNGKey(0)
    kp, kx = jax.random.split(key)

    params = init_params(kp)
    prepped = prepare_params(params)

    x = jax.random.normal(kx, (2, 3, 16, 16), jnp.float32)

    out = jax.block_until_ready(depth_net_forward(prepped, x))
    assert out.shape == (2, 1, 16, 16), out.shape

    ref = jax.block_until_ready(ref_forward(params, x))
    max_err = float(jnp.max(jnp.abs(out - ref)))
    assert max_err < 5e-2, f"max_err={max_err}"   # bf16 MXU path vs f32 reference

    print("KERNEL_OK")
</pallas_src>

<mosaic_0001>
module attributes {stable_mosaic.version = 11 : i64} {
  func.func @_fused_depth_kernel(%arg0: i32, %arg1: memref<1x16x16x8xf32, #tpu.memory_space<vmem>>, %arg2: memref<128x16xbf16, #tpu.memory_space<vmem>>, %arg3: memref<1x16xf32, #tpu.memory_space<vmem>>, %arg4: memref<256x32xbf16, #tpu.memory_space<vmem>>, %arg5: memref<1x32xf32, #tpu.memory_space<vmem>>, %arg6: memref<384x64xbf16, #tpu.memory_space<vmem>>, %arg7: memref<1x64xf32, #tpu.memory_space<vmem>>, %arg8: memref<64x128xbf16, #tpu.memory_space<vmem>>, %arg9: memref<1x128xf32, #tpu.memory_space<vmem>>, %arg10: memref<384x16xbf16, #tpu.memory_space<vmem>>, %arg11: memref<1x16xf32, #tpu.memory_space<vmem>>, %arg12: memref<16x32xbf16, #tpu.memory_space<vmem>>, %arg13: memref<1x32xf32, #tpu.memory_space<vmem>>, %arg14: memref<128x8xbf16, #tpu.memory_space<vmem>>, %arg15: memref<1x8xf32, #tpu.memory_space<vmem>>, %arg16: memref<1x16x16x8xf32, #tpu.memory_space<vmem>>) attributes {dimension_semantics = [#tpu.dimension_semantics<parallel>], iteration_bounds = array<i64: 2>, scalar_prefetch = 0 : i64, scratch_operands = 0 : i64, tpu.core_type = #tpu.core_type<tc>, window_params = [{transform_indices = @transform_0, window_bounds = array<i64: 1, 16, 16, 8>}, {pipeline_mode = #tpu.pipeline_mode<synchronous>, transform_indices = @transform_1, window_bounds = array<i64: 128, 16>}, {pipeline_mode = #tpu.pipeline_mode<synchronous>, transform_indices = @transform_2, window_bounds = array<i64: 1, 16>}, {pipeline_mode = #tpu.pipeline_mode<synchronous>, transform_indices = @transform_3, window_bounds = array<i64: 256, 32>}, {pipeline_mode = #tpu.pipeline_mode<synchronous>, transform_indices = @transform_4, window_bounds = array<i64: 1, 32>}, {pipeline_mode = #tpu.pipeline_mode<synchronous>, transform_indices = @transform_5, window_bounds = array<i64: 384, 64>}, {pipeline_mode = #tpu.pipeline_mode<synchronous>, transform_indices = @transform_6, window_bounds = array<i64: 1, 64>}, {pipeline_mode = #tpu.pipeline_mode<synchronous>, transform_indices = @transform_7, window_bounds = array<i64: 64, 128>}, {pipeline_mode = #tpu.pipeline_mode<synchronous>, transform_indices = @transform_8, window_bounds = array<i64: 1, 128>}, {pipeline_mode = #tpu.pipeline_mode<synchronous>, transform_indices = @transform_9, window_bounds = array<i64: 384, 16>}, {pipeline_mode = #tpu.pipeline_mode<synchronous>, transform_indices = @transform_10, window_bounds = array<i64: 1, 16>}, {pipeline_mode = #tpu.pipeline_mode<synchronous>, transform_indices = @transform_11, window_bounds = array<i64: 16, 32>}, {pipeline_mode = #tpu.pipeline_mode<synchronous>, transform_indices = @transform_12, window_bounds = array<i64: 1, 32>}, {pipeline_mode = #tpu.pipeline_mode<synchronous>, transform_indices = @transform_13, window_bounds = array<i64: 128, 8>}, {pipeline_mode = #tpu.pipeline_mode<synchronous>, transform_indices = @transform_14, window_bounds = array<i64: 1, 8>}, {transform_indices = @transform_15, window_bounds = array<i64: 1, 16, 16, 8>}]} {
    %c0 = arith.constant 0 : index
    %c0_0 = arith.constant 0 : index
    %c0_1 = arith.constant 0 : index
    %c0_2 = arith.constant 0 : index
    %0 = vector.load %arg1[%c0, %c0_0, %c0_1, %c0_2] : memref<1x16x16x8xf32, #tpu.memory_space<vmem>>, vector<1x16x16x8xf32>
    %1 = vector.shape_cast %0 : vector<1x16x16x8xf32> to vector<16x16x8xf32>
    %2 = arith.truncf %1 : vector<16x16x8xf32> to vector<16x16x8xbf16>
    %cst = arith.constant 0.000000e+00 : bf16
    %3 = vector.broadcast %cst : bf16 to vector<1x16x8xbf16>
    %4 = tpu.concatenate %3, %2, %3 in 0 : vector<1x16x8xbf16>, vector<16x16x8xbf16>, vector<1x16x8xbf16> -> vector<18x16x8xbf16>
    %cst_3 = arith.constant 0.000000e+00 : bf16
    %5 = vector.broadcast %cst_3 : bf16 to vector<18x1x8xbf16>
    %6 = tpu.concatenate %5, %4, %5 in 1 : vector<18x1x8xbf16>, vector<18x16x8xbf16>, vector<18x1x8xbf16> -> vector<18x18x8xbf16>
    %7 = vector.extract_strided_slice %6 {offsets = [0, 0, 0], sizes = [16, 18, 8], strides = [1, 1, 1]} : vector<18x18x8xbf16> to vector<16x18x8xbf16>
    %8 = vector.extract_strided_slice %6 {offsets = [1, 0, 0], sizes = [16, 18, 8], strides = [1, 1, 1]} : vector<18x18x8xbf16> to vector<16x18x8xbf16>
    %9 = vector.extract_strided_slice %6 {offsets = [2, 0, 0], sizes = [16, 18, 8], strides = [1, 1, 1]} : vector<18x18x8xbf16> to vector<16x18x8xbf16>
    %10 = tpu.concatenate %7, %8, %9 in 2 : vector<16x18x8xbf16>, vector<16x18x8xbf16>, vector<16x18x8xbf16> -> vector<16x18x24xbf16>
    %11 = vector.extract_strided_slice %10 {offsets = [0, 0, 0], sizes = [16, 16, 24], strides = [1, 1, 1]} : vector<16x18x24xbf16> to vector<16x16x24xbf16>
    %12 = vector.extract_strided_slice %10 {offsets = [0, 1, 0], sizes = [16, 16, 24], strides = [1, 1, 1]} : vector<16x18x24xbf16> to vector<16x16x24xbf16>
    %13 = vector.extract_strided_slice %10 {offsets = [0, 2, 0], sizes = [16, 16, 24], strides = [1, 1, 1]} : vector<16x18x24xbf16> to vector<16x16x24xbf16>
    %14 = tpu.concatenate %11, %12, %13 in 2 : vector<16x16x24xbf16>, vector<16x16x24xbf16>, vector<16x16x24xbf16> -> vector<16x16x72xbf16>
    %15 = vector.shape_cast %14 : vector<16x16x72xbf16> to vector<256x72xbf16>
    %cst_4 = arith.constant 0.000000e+00 : bf16
    %16 = vector.broadcast %cst_4 : bf16 to vector<256x56xbf16>
    %17 = tpu.concatenate %15, %16 in 1 : vector<256x72xbf16>, vector<256x56xbf16> -> vector<256x128xbf16>
    %c0_5 = arith.constant 0 : index
    %c0_6 = arith.constant 0 : index
    %18 = vector.load %arg2[%c0_5, %c0_6] : memref<128x16xbf16, #tpu.memory_space<vmem>>, vector<128x16xbf16>
    %cst_7 = arith.constant dense<0.000000e+00> : vector<256x16xf32>
    %19 = tpu.matmul %17, %18, %cst_7 {dimension_numbers = #tpu.dot_dimension_numbers<[1], [0], [0], [1], [0, 0, 1, 1], [], []>} : vector<256x128xbf16>, vector<128x16xbf16>, vector<256x16xf32> -> vector<256x16xf32>
    %c0_8 = arith.constant 0 : index
    %c0_9 = arith.constant 0 : index
    %20 = vector.load %arg3[%c0_8, %c0_9] : memref<1x16xf32, #tpu.memory_space<vmem>>, vector<1x16xf32>
    %21 = vector.broadcast %20 : vector<1x16xf32> to vector<256x16xf32>
    %22 = arith.addf %19, %21 : vector<256x16xf32>
    %cst_10 = arith.constant 0.000000e+00 : f32
    %23 = vector.broadcast %cst_10 : f32 to vector<256x16xf32>
    %24 = arith.maximumf %22, %23 : vector<256x16xf32>
    %25 = vector.shape_cast %24 : vector<256x16xf32> to vector<16x16x16xf32>
    %26 = arith.truncf %25 : vector<16x16x16xf32> to vector<16x16x16xbf16>
    %cst_11 = arith.constant 0.000000e+00 : bf16
    %27 = vector.broadcast %cst_11 : bf16 to vector<1x16x16xbf16>
    %28 = tpu.concatenate %27, %26, %27 in 0 : vector<1x16x16xbf16>, vector<16x16x16xbf16>, vector<1x16x16xbf16> -> vector<18x16x16xbf16>
    %cst_12 = arith.constant 0.000000e+00 : bf16
    %29 = vector.broadcast %cst_12 : bf16 to vector<18x1x16xbf16>
    %30 = tpu.concatenate %29, %28, %29 in 1 : vector<18x1x16xbf16>, vector<18x16x16xbf16>, vector<18x1x16xbf16> -> vector<18x18x16xbf16>
    %31 = vector.extract_strided_slice %30 {offsets = [0, 0, 0], sizes = [16, 18, 16], strides = [1, 1, 1]} : vector<18x18x16xbf16> to vector<16x18x16xbf16>
    %32 = vector.extract_strided_slice %30 {offsets = [1, 0, 0], sizes = [16, 18, 16], strides = [1, 1, 1]} : vector<18x18x16xbf16> to vector<16x18x16xbf16>
    %33 = vector.extract_strided_slice %30 {offsets = [2, 0, 0], sizes = [16, 18, 16], strides = [1, 1, 1]} : vector<18x18x16xbf16> to vector<16x18x16xbf16>
    %34 = tpu.concatenate %31, %32, %33 in 2 : vector<16x18x16xbf16>, vector<16x18x16xbf16>, vector<16x18x16xbf16> -> vector<16x18x48xbf16>
    %35 = vector.extract_strided_slice %34 {offsets = [0, 0, 0], sizes = [16, 16, 48], strides = [1, 1, 1]} : vector<16x18x48xbf16> to vector<16x16x48xbf16>
    %36 = vector.extract_strided_slice %34 {offsets = [0, 1, 0], sizes = [16, 16, 48], strides = [1, 1, 1]} : vector<16x18x48xbf16> to vector<16x16x48xbf16>
    %37 = vector.extract_strided_slice %34 {offsets = [0, 2, 0], sizes = [16, 16, 48], strides = [1, 1, 1]} : vector<16x18x48xbf16> to vector<16x16x48xbf16>
    %38 = tpu.concatenate %35, %36, %37 in 2 : vector<16x16x48xbf16>, vector<16x16x48xbf16>, vector<16x16x48xbf16> -> vector<16x16x144xbf16>
    %39 = vector.shape_cast %38 : vector<16x16x144xbf16> to vector<256x144xbf16>
    %cst_13 = arith.constant 0.000000e+00 : bf16
    %40 = vector.broadcast %cst_13 : bf16 to vector<256x112xbf16>
    %41 = tpu.concatenate %39, %40 in 1 : vector<256x144xbf16>, vector<256x112xbf16> -> vector<256x256xbf16>
    %c0_14 = arith.constant 0 : index
    %c0_15 = arith.constant 0 : index
    %42 = vector.load %arg4[%c0_14, %c0_15] : memref<256x32xbf16, #tpu.memory_space<vmem>>, vector<256x32xbf16>
    %cst_16 = arith.constant dense<0.000000e+00> : vector<256x32xf32>
    %43 = tpu.matmul %41, %42, %cst_16 {dimension_numbers = #tpu.dot_dimension_numbers<[1], [0], [0], [1], [0, 0, 1, 1], [], []>} : vector<256x256xbf16>, vector<256x32xbf16>, vector<256x32xf32> -> vector<256x32xf32>
    %c0_17 = arith.constant 0 : index
    %c0_18 = arith.constant 0 : index
    %44 = vector.load %arg5[%c0_17, %c0_18] : memref<1x32xf32, #tpu.memory_space<vmem>>, vector<1x32xf32>
    %45 = vector.broadcast %44 : vector<1x32xf32> to vector<256x32xf32>
    %46 = arith.addf %43, %45 : vector<256x32xf32>
    %cst_19 = arith.constant 0.000000e+00 : f32
    %47 = vector.broadcast %cst_19 : f32 to vector<256x32xf32>
    %48 = arith.maximumf %46, %47 : vector<256x32xf32>
    %49 = vector.shape_cast %48 : vector<256x32xf32> to vector<16x16x32xf32>
    %50 = vector.shape_cast %49 : vector<16x16x32xf32> to vector<8x2x8x2x32xf32>
    %cst_20 = arith.constant dense<0xFF800000> : vector<8x2x8x32xf32>
    %51 = vector.multi_reduction <maximumf>, %50, %cst_20 [3] : vector<8x2x8x2x32xf32> to vector<8x2x8x32xf32>
    %cst_21 = arith.constant dense<0xFF800000> : vector<8x8x32xf32>
    %52 = vector.multi_reduction <maximumf>, %51, %cst_21 [1] : vector<8x2x8x32xf32> to vector<8x8x32xf32>
    %53 = arith.truncf %52 : vector<8x8x32xf32> to vector<8x8x32xbf16>
    %cst_22 = arith.constant 0.000000e+00 : bf16
    %54 = vector.broadcast %cst_22 : bf16 to vector<1x8x32xbf16>
    %55 = tpu.concatenate %54, %53, %54 in 0 : vector<1x8x32xbf16>, vector<8x8x32xbf16>, vector<1x8x32xbf16> -> vector<10x8x32xbf16>
    %cst_23 = arith.constant 0.000000e+00 : bf16
    %56 = vector.broadcast %cst_23 : bf16 to vector<10x1x32xbf16>
    %57 = tpu.concatenate %56, %55, %56 in 1 : vector<10x1x32xbf16>, vector<10x8x32xbf16>, vector<10x1x32xbf16> -> vector<10x10x32xbf16>
    %58 = vector.extract_strided_slice %57 {offsets = [0, 0, 0], sizes = [8, 10, 32], strides = [1, 1, 1]} : vector<10x10x32xbf16> to vector<8x10x32xbf16>
    %59 = vector.extract_strided_slice %57 {offsets = [1, 0, 0], sizes = [8, 10, 32], strides = [1, 1, 1]} : vector<10x10x32xbf16> to vector<8x10x32xbf16>
    %60 = vector.extract_strided_slice %57 {offsets = [2, 0, 0], sizes = [8, 10, 32], strides = [1, 1, 1]} : vector<10x10x32xbf16> to vector<8x10x32xbf16>
    %61 = tpu.concatenate %58, %59, %60 in 2 : vector<8x10x32xbf16>, vector<8x10x32xbf16>, vector<8x10x32xbf16> -> vector<8x10x96xbf16>
    %62 = vector.extract_strided_slice %61 {offsets = [0, 0, 0], sizes = [8, 8, 96], strides = [1, 1, 1]} : vector<8x10x96xbf16> to vector<8x8x96xbf16>
    %63 = vector.extract_strided_slice %61 {offsets = [0, 1, 0], sizes = [8, 8, 96], strides = [1, 1, 1]} : vector<8x10x96xbf16> to vector<8x8x96xbf16>
    %64 = vector.extract_strided_slice %61 {offsets = [0, 2, 0], sizes = [8, 8, 96], strides = [1, 1, 1]} : vector<8x10x96xbf16> to vector<8x8x96xbf16>
    %65 = tpu.concatenate %62, %63, %64 in 2 : vector<8x8x96xbf16>, vector<8x8x96xbf16>, vector<8x8x96xbf16> -> vector<8x8x288xbf16>
    %66 = vector.shape_cast %65 : vector<8x8x288xbf16> to vector<64x288xbf16>
    %cst_24 = arith.constant 0.000000e+00 : bf16
    %67 = vector.broadcast %cst_24 : bf16 to vector<64x96xbf16>
    %68 = tpu.concatenate %66, %67 in 1 : vector<64x288xbf16>, vector<64x96xbf16> -> vector<64x384xbf16>
    %c0_25 = arith.constant 0 : index
    %c0_26 = arith.constant 0 : index
    %69 = vector.load %arg6[%c0_25, %c0_26] : memref<384x64xbf16, #tpu.memory_space<vmem>>, vector<384x64xbf16>
    %cst_27 = arith.constant dense<0.000000e+00> : vector<64x64xf32>
    %70 = tpu.matmul %68, %69, %cst_27 {dimension_numbers = #tpu.dot_dimension_numbers<[1], [0], [0], [1], [0, 0, 1, 1], [], []>} : vector<64x384xbf16>, vector<384x64xbf16>, vector<64x64xf32> -> vector<64x64xf32>
    %c0_28 = arith.constant 0 : index
    %c0_29 = arith.constant 0 : index
    %71 = vector.load %arg7[%c0_28, %c0_29] : memref<1x64xf32, #tpu.memory_space<vmem>>, vector<1x64xf32>
    %72 = vector.broadcast %71 : vector<1x64xf32> to vector<64x64xf32>
    %73 = arith.addf %70, %72 : vector<64x64xf32>
    %cst_30 = arith.constant 0.000000e+00 : f32
    %74 = vector.broadcast %cst_30 : f32 to vector<64x64xf32>
    %75 = arith.maximumf %73, %74 : vector<64x64xf32>
    %76 = vector.shape_cast %75 : vector<64x64xf32> to vector<8x8x64xf32>
    %77 = vector.shape_cast %76 : vector<8x8x64xf32> to vector<4x2x4x2x64xf32>
    %cst_31 = arith.constant dense<0xFF800000> : vector<4x2x4x64xf32>
    %78 = vector.multi_reduction <maximumf>, %77, %cst_31 [3] : vector<4x2x4x2x64xf32> to vector<4x2x4x64xf32>
    %cst_32 = arith.constant dense<0xFF800000> : vector<4x4x64xf32>
    %79 = vector.multi_reduction <maximumf>, %78, %cst_32 [1] : vector<4x2x4x64xf32> to vector<4x4x64xf32>
    %80 = arith.truncf %79 : vector<4x4x64xf32> to vector<4x4x64xbf16>
    %81 = vector.shape_cast %80 : vector<4x4x64xbf16> to vector<16x64xbf16>
    %c0_33 = arith.constant 0 : index
    %c0_34 = arith.constant 0 : index
    %82 = vector.load %arg8[%c0_33, %c0_34] : memref<64x128xbf16, #tpu.memory_space<vmem>>, vector<64x128xbf16>
    %cst_35 = arith.constant dense<0.000000e+00> : vector<16x128xf32>
    %83 = tpu.matmul %81, %82, %cst_35 {dimension_numbers = #tpu.dot_dimension_numbers<[1], [0], [0], [1], [0, 0, 1, 1], [], []>} : vector<16x64xbf16>, vector<64x128xbf16>, vector<16x128xf32> -> vector<16x128xf32>
    %c0_36 = arith.constant 0 : index
    %c0_37 = arith.constant 0 : index
    %84 = vector.load %arg9[%c0_36, %c0_37] : memref<1x128xf32, #tpu.memory_space<vmem>>, vector<1x128xf32>
    %85 = vector.broadcast %84 : vector<1x128xf32> to vector<16x128xf32>
    %86 = arith.addf %83, %85 : vector<16x128xf32>
    %cst_38 = arith.constant 0.000000e+00 : f32
    %87 = vector.broadcast %cst_38 : f32 to vector<16x128xf32>
    %88 = arith.maximumf %86, %87 : vector<16x128xf32>
    %89 = arith.truncf %88 : vector<16x128xf32> to vector<16x128xbf16>
    %90 = vector.extract_strided_slice %89 {offsets = [0, 0], sizes = [16, 32], strides = [1, 1]} : vector<16x128xbf16> to vector<16x32xbf16>
    %91 = vector.extract_strided_slice %89 {offsets = [0, 32], sizes = [16, 32], strides = [1, 1]} : vector<16x128xbf16> to vector<16x32xbf16>
    %92 = vector.extract_strided_slice %89 {offsets = [0, 64], sizes = [16, 32], strides = [1, 1]} : vector<16x128xbf16> to vector<16x32xbf16>
    %93 = vector.extract_strided_slice %89 {offsets = [0, 96], sizes = [16, 32], strides = [1, 1]} : vector<16x128xbf16> to vector<16x32xbf16>
    %94 = vector.shape_cast %90 : vector<16x32xbf16> to vector<4x4x1x32xbf16>
    %95 = vector.shape_cast %91 : vector<16x32xbf16> to vector<4x4x1x32xbf16>
    %96 = tpu.concatenate %94, %95 in 2 : vector<4x4x1x32xbf16>, vector<4x4x1x32xbf16> -> vector<4x4x2x32xbf16>
    %97 = vector.shape_cast %96 : vector<4x4x2x32xbf16> to vector<4x8x32xbf16>
    %98 = vector.shape_cast %92 : vector<16x32xbf16> to vector<4x4x1x32xbf16>
    %99 = vector.shape_cast %93 : vector<16x32xbf16> to vector<4x4x1x32xbf16>
    %100 = tpu.concatenate %98, %99 in 2 : vector<4x4x1x32xbf16>, vector<4x4x1x32xbf16> -> vector<4x4x2x32xbf16>
    %101 = vector.shape_cast %100 : vector<4x4x2x32xbf16> to vector<4x8x32xbf16>
    %102 = vector.shape_cast %97 : vector<4x8x32xbf16> to vector<4x1x8x32xbf16>
    %103 = vector.shape_cast %101 : vector<4x8x32xbf16> to vector<4x1x8x32xbf16>
    %104 = tpu.concatenate %102, %103 in 1 : vector<4x1x8x32xbf16>, vector<4x1x8x32xbf16> -> vector<4x2x8x32xbf16>
    %105 = vector.shape_cast %104 : vector<4x2x8x32xbf16> to vector<8x8x32xbf16>
    %cst_39 = arith.constant 0.000000e+00 : bf16
    %106 = vector.broadcast %cst_39 : bf16 to vector<1x8x32xbf16>
    %107 = tpu.concatenate %106, %105, %106 in 0 : vector<1x8x32xbf16>, vector<8x8x32xbf16>, vector<1x8x32xbf16> -> vector<10x8x32xbf16>
    %cst_40 = arith.constant 0.000000e+00 : bf16
    %108 = vector.broadcast %cst_40 : bf16 to vector<10x1x32xbf16>
    %109 = tpu.concatenate %108, %107, %108 in 1 : vector<10x1x32xbf16>, vector<10x8x32xbf16>, vector<10x1x32xbf16> -> vector<10x10x32xbf16>
    %110 = vector.extract_strided_slice %109 {offsets = [0, 0, 0], sizes = [8, 10, 32], strides = [1, 1, 1]} : vector<10x10x32xbf16> to vector<8x10x32xbf16>
    %111 = vector.extract_strided_slice %109 {offsets = [1, 0, 0], sizes = [8, 10, 32], strides = [1, 1, 1]} : vector<10x10x32xbf16> to vector<8x10x32xbf16>
    %112 = vector.extract_strided_slice %109 {offsets = [2, 0, 0], sizes = [8, 10, 32], strides = [1, 1, 1]} : vector<10x10x32xbf16> to vector<8x10x32xbf16>
    %113 = tpu.concatenate %110, %111, %112 in 2 : vector<8x10x32xbf16>, vector<8x10x32xbf16>, vector<8x10x32xbf16> -> vector<8x10x96xbf16>
    %114 = vector.extract_strided_slice %113 {offsets = [0, 0, 0], sizes = [8, 8, 96], strides = [1, 1, 1]} : vector<8x10x96xbf16> to vector<8x8x96xbf16>
    %115 = vector.extract_strided_slice %113 {offsets = [0, 1, 0], sizes = [8, 8, 96], strides = [1, 1, 1]} : vector<8x10x96xbf16> to vector<8x8x96xbf16>
    %116 = vector.extract_strided_slice %113 {offsets = [0, 2, 0], sizes = [8, 8, 96], strides = [1, 1, 1]} : vector<8x10x96xbf16> to vector<8x8x96xbf16>
    %117 = tpu.concatenate %114, %115, %116 in 2 : vector<8x8x96xbf16>, vector<8x8x96xbf16>, vector<8x8x96xbf16> -> vector<8x8x288xbf16>
    %118 = vector.shape_cast %117 : vector<8x8x288xbf16> to vector<64x288xbf16>
    %cst_41 = arith.constant 0.000000e+00 : bf16
    %119 = vector.broadcast %cst_41 : bf16 to vector<64x96xbf16>
    %120 = tpu.concatenate %118, %119 in 1 : vector<64x288xbf16>, vector<64x96xbf16> -> vector<64x384xbf16>
    %c0_42 = arith.constant 0 : index
    %c0_43 = arith.constant 0 : index
    %121 = vector.load %arg10[%c0_42, %c0_43] : memref<384x16xbf16, #tpu.memory_space<vmem>>, vector<384x16xbf16>
    %cst_44 = arith.constant dense<0.000000e+00> : vector<64x16xf32>
    %122 = tpu.matmul %120, %121, %cst_44 {dimension_numbers = #tpu.dot_dimension_numbers<[1], [0], [0], [1], [0, 0, 1, 1], [], []>} : vector<64x384xbf16>, vector<384x16xbf16>, vector<64x16xf32> -> vector<64x16xf32>
    %c0_45 = arith.constant 0 : index
    %c0_46 = arith.constant 0 : index
    %123 = vector.load %arg11[%c0_45, %c0_46] : memref<1x16xf32, #tpu.memory_space<vmem>>, vector<1x16xf32>
    %124 = vector.broadcast %123 : vector<1x16xf32> to vector<64x16xf32>
    %125 = arith.addf %122, %124 : vector<64x16xf32>
    %cst_47 = arith.constant 0.000000e+00 : f32
    %126 = vector.broadcast %cst_47 : f32 to vector<64x16xf32>
    %127 = arith.maximumf %125, %126 : vector<64x16xf32>
    %128 = vector.shape_cast %127 : vector<64x16xf32> to vector<8x8x16xf32>
    %129 = arith.truncf %128 : vector<8x8x16xf32> to vector<8x8x16xbf16>
    %130 = vector.shape_cast %129 : vector<8x8x16xbf16> to vector<64x16xbf16>
    %c0_48 = arith.constant 0 : index
    %c0_49 = arith.constant 0 : index
    %131 = vector.load %arg12[%c0_48, %c0_49] : memref<16x32xbf16, #tpu.memory_space<vmem>>, vector<16x32xbf16>
    %cst_50 = arith.constant dense<0.000000e+00> : vector<64x32xf32>
    %132 = tpu.matmul %130, %131, %cst_50 {dimension_numbers = #tpu.dot_dimension_numbers<[1], [0], [0], [1], [0, 0, 1, 1], [], []>} : vector<64x16xbf16>, vector<16x32xbf16>, vector<64x32xf32> -> vector<64x32xf32>
    %c0_51 = arith.constant 0 : index
    %c0_52 = arith.constant 0 : index
    %133 = vector.load %arg13[%c0_51, %c0_52] : memref<1x32xf32, #tpu.memory_space<vmem>>, vector<1x32xf32>
    %134 = vector.broadcast %133 : vector<1x32xf32> to vector<64x32xf32>
    %135 = arith.addf %132, %134 : vector<64x32xf32>
    %cst_53 = arith.constant 0.000000e+00 : f32
    %136 = vector.broadcast %cst_53 : f32 to vector<64x32xf32>
    %137 = arith.maximumf %135, %136 : vector<64x32xf32>
    %138 = arith.truncf %137 : vector<64x32xf32> to vector<64x32xbf16>
    %139 = vector.extract_strided_slice %138 {offsets = [0, 0], sizes = [64, 8], strides = [1, 1]} : vector<64x32xbf16> to vector<64x8xbf16>
    %140 = vector.extract_strided_slice %138 {offsets = [0, 8], sizes = [64, 8], strides = [1, 1]} : vector<64x32xbf16> to vector<64x8xbf16>
    %141 = vector.extract_strided_slice %138 {offsets = [0, 16], sizes = [64, 8], strides = [1, 1]} : vector<64x32xbf16> to vector<64x8xbf16>
    %142 = vector.extract_strided_slice %138 {offsets = [0, 24], sizes = [64, 8], strides = [1, 1]} : vector<64x32xbf16> to vector<64x8xbf16>
    %143 = vector.shape_cast %139 : vector<64x8xbf16> to vector<8x8x1x8xbf16>
    %144 = vector.shape_cast %140 : vector<64x8xbf16> to vector<8x8x1x8xbf16>
    %145 = tpu.concatenate %143, %144 in 2 : vector<8x8x1x8xbf16>, vector<8x8x1x8xbf16> -> vector<8x8x2x8xbf16>
    %146 = vector.shape_cast %145 : vector<8x8x2x8xbf16> to vector<8x16x8xbf16>
    %147 = vector.shape_cast %141 : vector<64x8xbf16> to vector<8x8x1x8xbf16>
    %148 = vector.shape_cast %142 : vector<64x8xbf16> to vector<8x8x1x8xbf16>
    %149 = tpu.concatenate %147, %148 in 2 : vector<8x8x1x8xbf16>, vector<8x8x1x8xbf16> -> vector<8x8x2x8xbf16>
    %150 = vector.shape_cast %149 : vector<8x8x2x8xbf16> to vector<8x16x8xbf16>
    %151 = vector.shape_cast %146 : vector<8x16x8xbf16> to vector<8x1x16x8xbf16>
    %152 = vector.shape_cast %150 : vector<8x16x8xbf16> to vector<8x1x16x8xbf16>
    %153 = tpu.concatenate %151, %152 in 1 : vector<8x1x16x8xbf16>, vector<8x1x16x8xbf16> -> vector<8x2x16x8xbf16>
    %154 = vector.shape_cast %153 : vector<8x2x16x8xbf16> to vector<16x16x8xbf16>
    %cst_54 = arith.constant 0.000000e+00 : bf16
    %155 = vector.broadcast %cst_54 : bf16 to vector<1x16x8xbf16>
    %156 = tpu.concatenate %155, %154, %155 in 0 : vector<1x16x8xbf16>, vector<16x16x8xbf16>, vector<1x16x8xbf16> -> vector<18x16x8xbf16>
    %cst_55 = arith.constant 0.000000e+00 : bf16
    %157 = vector.broadcast %cst_55 : bf16 to vector<18x1x8xbf16>
    %158 = tpu.concatenate %157, %156, %157 in 1 : vector<18x1x8xbf16>, vector<18x16x8xbf16>, vector<18x1x8xbf16> -> vector<18x18x8xbf16>
    %159 = vector.extract_strided_slice %158 {offsets = [0, 0, 0], sizes = [16, 18, 8], strides = [1, 1, 1]} : vector<18x18x8xbf16> to vector<16x18x8xbf16>
    %160 = vector.extract_strided_slice %158 {offsets = [1, 0, 0], sizes = [16, 18, 8], strides = [1, 1, 1]} : vector<18x18x8xbf16> to vector<16x18x8xbf16>
    %161 = vector.extract_strided_slice %158 {offsets = [2, 0, 0], sizes = [16, 18, 8], strides = [1, 1, 1]} : vector<18x18x8xbf16> to vector<16x18x8xbf16>
    %162 = tpu.concatenate %159, %160, %161 in 2 : vector<16x18x8xbf16>, vector<16x18x8xbf16>, vector<16x18x8xbf16> -> vector<16x18x24xbf16>
    %163 = vector.extract_strided_slice %162 {offsets = [0, 0, 0], sizes = [16, 16, 24], strides = [1, 1, 1]} : vector<16x18x24xbf16> to vector<16x16x24xbf16>
    %164 = vector.extract_strided_slice %162 {offsets = [0, 1, 0], sizes = [16, 16, 24], strides = [1, 1, 1]} : vector<16x18x24xbf16> to vector<16x16x24xbf16>
    %165 = vector.extract_strided_slice %162 {offsets = [0, 2, 0], sizes = [16, 16, 24], strides = [1, 1, 1]} : vector<16x18x24xbf16> to vector<16x16x24xbf16>
    %166 = tpu.concatenate %163, %164, %165 in 2 : vector<16x16x24xbf16>, vector<16x16x24xbf16>, vector<16x16x24xbf16> -> vector<16x16x72xbf16>
    %167 = vector.shape_cast %166 : vector<16x16x72xbf16> to vector<256x72xbf16>
    %cst_56 = arith.constant 0.000000e+00 : bf16
    %168 = vector.broadcast %cst_56 : bf16 to vector<256x56xbf16>
    %169 = tpu.concatenate %167, %168 in 1 : vector<256x72xbf16>, vector<256x56xbf16> -> vector<256x128xbf16>
    %c0_57 = arith.constant 0 : index
    %c0_58 = arith.constant 0 : index
    %170 = vector.load %arg14[%c0_57, %c0_58] : memref<128x8xbf16, #tpu.memory_space<vmem>>, vector<128x8xbf16>
    %cst_59 = arith.constant dense<0.000000e+00> : vector<256x8xf32>
    %171 = tpu.matmul %169, %170, %cst_59 {dimension_numbers = #tpu.dot_dimension_numbers<[1], [0], [0], [1], [0, 0, 1, 1], [], []>} : vector<256x128xbf16>, vector<128x8xbf16>, vector<256x8xf32> -> vector<256x8xf32>
    %c0_60 = arith.constant 0 : index
    %c0_61 = arith.constant 0 : index
    %172 = vector.load %arg15[%c0_60, %c0_61] : memref<1x8xf32, #tpu.memory_space<vmem>>, vector<1x8xf32>
    %173 = vector.broadcast %172 : vector<1x8xf32> to vector<256x8xf32>
    %174 = arith.addf %171, %173 : vector<256x8xf32>
    %175 = vector.shape_cast %174 : vector<256x8xf32> to vector<16x16x8xf32>
    %c0_62 = arith.constant 0 : index
    %c0_63 = arith.constant 0 : index
    %c0_64 = arith.constant 0 : index
    %c0_65 = arith.constant 0 : index
    %176 = vector.load %arg16[%c0_62, %c0_63, %c0_64, %c0_65] : memref<1x16x16x8xf32, #tpu.memory_space<vmem>>, vector<1x16x16x8xf32>
    %177 = vector.shape_cast %176 : vector<1x16x16x8xf32> to vector<16x16x8xf32>
    %178 = vector.shape_cast %175 : vector<16x16x8xf32> to vector<1x16x16x8xf32>
    tpu.vector_store %arg16[%c0_62, %c0_63, %c0_64, %c0_65], %178 {strides = array<i32>} : memref<1x16x16x8xf32, #tpu.memory_space<vmem>>, vector<1x16x16x8xf32>,
    return
  }
  func.func @transform_0(%arg0: i32) -> (i32, i32, i32, i32) {
    %c0_i32 = arith.constant 0 : i32
    %c0_i32_0 = arith.constant 0 : i32
    %c0_i32_1 = arith.constant 0 : i32
    %c0_i32_2 = arith.constant 0 : i32
    return %arg0, %c0_i32, %c0_i32_0, %c0_i32_1 : i32, i32, i32, i32
  }
  func.func @transform_1(%arg0: i32) -> (i32, i32) {
    %c0_i32 = arith.constant 0 : i32
    %c0_i32_0 = arith.constant 0 : i32
    %c0_i32_1 = arith.constant 0 : i32
    return %c0_i32, %c0_i32_0 : i32, i32
  }
  func.func @transform_2(%arg0: i32) -> (i32, i32) {
    %c0_i32 = arith.constant 0 : i32
    %c0_i32_0 = arith.constant 0 : i32
    %c0_i32_1 = arith.constant 0 : i32
    return %c0_i32, %c0_i32_0 : i32, i32
  }
  func.func @transform_3(%arg0: i32) -> (i32, i32) {
    %c0_i32 = arith.constant 0 : i32
    %c0_i32_0 = arith.constant 0 : i32
    %c0_i32_1 = arith.constant 0 : i32
    return %c0_i32, %c0_i32_0 : i32, i32
  }
  func.func @transform_4(%arg0: i32) -> (i32, i32) {
    %c0_i32 = arith.constant 0 : i32
    %c0_i32_0 = arith.constant 0 : i32
    %c0_i32_1 = arith.constant 0 : i32
    return %c0_i32, %c0_i32_0 : i32, i32
  }
  func.func @transform_5(%arg0: i32) -> (i32, i32) {
    %c0_i32 = arith.constant 0 : i32
    %c0_i32_0 = arith.constant 0 : i32
    %c0_i32_1 = arith.constant 0 : i32
    return %c0_i32, %c0_i32_0 : i32, i32
  }
  func.func @transform_6(%arg0: i32) -> (i32, i32) {
    %c0_i32 = arith.constant 0 : i32
    %c0_i32_0 = arith.constant 0 : i32
    %c0_i32_1 = arith.constant 0 : i32
    return %c0_i32, %c0_i32_0 : i32, i32
  }
  func.func @transform_7(%arg0: i32) -> (i32, i32) {
    %c0_i32 = arith.constant 0 : i32
    %c0_i32_0 = arith.constant 0 : i32
    %c0_i32_1 = arith.constant 0 : i32
    return %c0_i32, %c0_i32_0 : i32, i32
  }
  func.func @transform_8(%arg0: i32) -> (i32, i32) {
    %c0_i32 = arith.constant 0 : i32
    %c0_i32_0 = arith.constant 0 : i32
    %c0_i32_1 = arith.constant 0 : i32
    return %c0_i32, %c0_i32_0 : i32, i32
  }
  func.func @transform_9(%arg0: i32) -> (i32, i32) {
    %c0_i32 = arith.constant 0 : i32
    %c0_i32_0 = arith.constant 0 : i32
    %c0_i32_1 = arith.constant 0 : i32
    return %c0_i32, %c0_i32_0 : i32, i32
  }
  func.func @transform_10(%arg0: i32) -> (i32, i32) {
    %c0_i32 = arith.constant 0 : i32
    %c0_i32_0 = arith.constant 0 : i32
    %c0_i32_1 = arith.constant 0 : i32
    return %c0_i32, %c0_i32_0 : i32, i32
  }
  func.func @transform_11(%arg0: i32) -> (i32, i32) {
    %c0_i32 = arith.constant 0 : i32
    %c0_i32_0 = arith.constant 0 : i32
    %c0_i32_1 = arith.constant 0 : i32
    return %c0_i32, %c0_i32_0 : i32, i32
  }
  func.func @transform_12(%arg0: i32) -> (i32, i32) {
    %c0_i32 = arith.constant 0 : i32
    %c0_i32_0 = arith.constant 0 : i32
    %c0_i32_1 = arith.constant 0 : i32
    return %c0_i32, %c0_i32_0 : i32, i32
  }
  func.func @transform_13(%arg0: i32) -> (i32, i32) {
    %c0_i32 = arith.constant 0 : i32
    %c0_i32_0 = arith.constant 0 : i32
    %c0_i32_1 = arith.constant 0 : i32
    return %c0_i32, %c0_i32_0 : i32, i32
  }
  func.func @transform_14(%arg0: i32) -> (i32, i32) {
    %c0_i32 = arith.constant 0 : i32
    %c0_i32_0 = arith.constant 0 : i32
    %c0_i32_1 = arith.constant 0 : i32
    return %c0_i32, %c0_i32_0 : i32, i32
  }
  func.func @transform_15(%arg0: i32) -> (i32, i32, i32, i32) {
    %c0_i32 = arith.constant 0 : i32
    %c0_i32_0 = arith.constant 0 : i32
    %c0_i32_1 = arith.constant 0 : i32
    %c0_i32_2 = arith.constant 0 : i32
    return %arg0, %c0_i32, %c0_i32_0, %c0_i32_1 : i32, i32, i32, i32
  }
}

</mosaic_0001>

<bundles_post_ra>
// kernel: depth_net_forward.1
= control target key start
LH: loop header
LB: loop body
LE: loop exit
PB: predicated region body
PF: predicated region fallthrough
CT: control target
= control target key end

     0   :  { %s9797_s18 = smov 0   ;;  %s14391_s0 = inlined_call_operand.vmem [shape: f32[2,16,16,8], index: 0, kind: input, shape index: {}]   ;;  %s14392_s1 = inlined_call_operand.vmem [shape: bf16[128,16], index: 1, kind: input, shape index: {}]   ;;  %s14393_s2 = inlined_call_operand.vmem [shape: f32[1,16], index: 2, kind: input, shape index: {}]   ;;  %s14394_s3 = inlined_call_operand.vmem [shape: bf16[256,32], index: 3, kind: input, shape index: {}]   ;;  %s14395_s4 = inlined_call_operand.vmem [shape: f32[1,32], index: 4, kind: input, shape index: {}]   ;;  %s14396_s5 = inlined_call_operand.vmem [shape: bf16[384,64], index: 5, kind: input, shape index: {}]   ;;  %s14397_s6 = inlined_call_operand.vmem [shape: f32[1,64], index: 6, kind: input, shape index: {}]   ;;  %s14398_s7 = inlined_call_operand.vmem [shape: bf16[64,128], index: 7, kind: input, shape index: {}]   ;;  %s14399_s8 = inlined_call_operand.vmem [shape: f32[1,128], index: 8, kind: input, shape index: {}]   ;;  %s14400_s9 = inlined_call_operand.vmem [shape: bf16[384,16], index: 9, kind: input, shape index: {}]   ;;  %s14401_s10 = inlined_call_operand.vmem [shape: f32[1,16], index: 10, kind: input, shape index: {}]   ;;  %s14402_s11 = inlined_call_operand.vmem [shape: bf16[16,32], index: 11, kind: input, shape index: {}]   ;;  %s14403_s12 = inlined_call_operand.vmem [shape: f32[1,32], index: 12, kind: input, shape index: {}]   ;;  %s14404_s13 = inlined_call_operand.vmem [shape: bf16[128,8], index: 13, kind: input, shape index: {}]   ;;  %s14405_s14 = inlined_call_operand.vmem [shape: f32[1,8], index: 14, kind: input, shape index: {}]   ;;  %s14406_s15 = inlined_call_operand.vmem [shape: f32[2,16,16,8], index: 15, kind: output, shape index: {}]  }
   0x1 LB: > { %s9113_s19 = sadd.s32 4294967295, %s9705_s18   ;;  %p9117_p0 = scmp.ge.s32.totalorder %s9705_s18, 1  ;;  %s9705_s18 = sphi %s9797_s18, %s25_s18  }
   0x2   : > { %p437_p1 = scmp.lt.s32.totalorder %s9705_s18, 3 }
   0x4   : > { %p438_p2 = pnand %p9117_p0, %p437_p1 }
   0x6   : > { %441 = sbr.rel (%p438_p2) target bundleno = 4559 (0x11cf), region = 80 }
   0xb   : > { %p485_p3 = scmp.lt.s32.totalorder %s9113_s19, 1  ;;  %vm14426_vm0 = vcmask 1040384   ;;  %vm794_vm1 = vsmask.f32 256  ;;  %v14484_v23 = vmov 0  ;;  %s14438_s24 = smov 8  }
   0xc   : > { %vm9822_vm2 = vmand %vm14426_vm0, %vm794_vm1  ;;  %s14436_s25 = smov 16   ;;  %vm1089_vm3 = vcmask 130048   ;;  %vm14425_vm4 = vcmask 64512   ;;  %vm1379_vm5 = vcmask 1046528   ;;  %s14433_s26 = smov 48   ;;  %vm14408_vm7 = vcmask 195584  }
   0xd   : > { %s14744_s19 = smov (!%p485_p3, %s9113_s19), 1  ;;  %v14485_v23 = vsel %vm9822_vm2, 4294967295, %v14484_v23  ;;  %vm14435_vm6 = vsmask.f32 7424  ;;  %s14431_s27 = smov 24   ;;  %vm14429_vm8 = vcmask 392192  }
   0xe   : > { %s14430_s20 = sshll.u32 %s14744_s19, 8  ;;  %14486 = vst [vmem:[#allocation2_spill] sm:$0xff] %v14485_v23  ;;  %vm14407_vm9 = vcmask 588800   ;;  %s9712_s16 = smov 32   ;;  %vm2290_vm10 = vcmask 261120   ;;  %vm2691_vm11 = vcmask 785408  }
   0xf   : > { %s9813_s23 = scalar_lea.vmem %s14391_s0, %s14430_s20  ;;  %s9713_s17 = smov 96   ;;  %vm3338_vm12 = vcmask 254976   ;;  %vm4683_vm13 = vcmask 1041409   ;;  %vm4685_vm14 = vcmask 1042434   ;;  %vm4687_vm15 = vcmask 1043459  }
  0x10   : > { %v496_v0 = vld [vmem:[%s9813_s23] sm:$0xff]  ;;  %v497_v1 = vld [vmem:[%s9813_s23 + $0x8] sm:$0xff]  ;;  %v498_v2 = vld [vmem:[%s9813_s23 + $0x10] sm:$0xff]  ;;  %vm4689_vm1 = vcmask 1044484   ;;  %vm4826_vm0 = vcmask 1044480   ;;  %s14594_s20 = smov 16  }
  0x11   : > { %v528_v3 = vpack.c.bf16 %v496_v0, %v496_v0  ;;  %v529_v4 = vpack.c.bf16 %v497_v1, %v497_v1  ;;  %v499_v5 = vld [vmem:[%s9813_s23 + $0x18] sm:$0xff]  ;;  %v530_v6 = vpack.c.bf16 %v498_v2, %v498_v2  ;;  %v500_v7 = vld [vmem:[%s9813_s23 + $0x20] sm:$0xff]  ;;  %v501_v8 = vld [vmem:[%s9813_s23 + $0x28] sm:$0xff] }
  0x12   : > { %v531_v9 = vpack.c.bf16 %v499_v5, %v499_v5  ;;  %v532_v10 = vpack.c.bf16 %v500_v7, %v500_v7  ;;  %v533_v11 = vpack.c.bf16 %v501_v8, %v501_v8  ;;  %v502_v26 = vld [vmem:[%s9813_s23 + $0x30] sm:$0xff]  ;;  %v503_v27 = vld [vmem:[%s9813_s23 + $0x38] sm:$0xff]  ;;  %v504_v53 = vld [vmem:[%s9813_s23 + $0x40] sm:$0xff] }
  0x13   : > { %v592_v12 = vunpack.c.l.b16 %v528_v3  ;;  %v593_v13 = vunpack.c.l.b16 %v529_v4  ;;  %v594_v14 = vunpack.c.l.b16 %v530_v6  ;;  %v534_v33 = vpack.c.bf16 %v502_v26, %v502_v26  ;;  %v505_v54 = vld [vmem:[%s9813_s23 + $0x48] sm:$0xff]  ;;  %v506_v1 = vld [vmem:[%s9813_s23 + $0x50] sm:$0xff]  ;;  %v507_v2 = vld [vmem:[%s9813_s23 + $0x58] sm:$0xff] }
  0x14   : > { %v595_v15 = vunpack.c.l.b16 %v531_v9  ;;  %v596_v16 = vunpack.c.l.b16 %v532_v10  ;;  %v597_v17 = vunpack.c.l.b16 %v533_v11  ;;  %v535_v34 = vpack.c.bf16 %v503_v27, %v503_v27 }
  0x15   : > { %v624_v18 = vpack.c.b16 %v593_v13, %v592_v12  ;;  %v598_v40 = vunpack.c.l.b16 %v534_v33  ;;  %v536_v55 = vpack.c.bf16 %v504_v53, %v504_v53  ;;  %v537_v56 = vpack.c.bf16 %v505_v54, %v505_v54 }
  0x16   : > { %v625_v19 = vpack.c.b16 %v595_v15, %v594_v14  ;;  %v626_v20 = vpack.c.b16 %v597_v17, %v596_v16  ;;  %v599_v41 = vunpack.c.l.b16 %v535_v34  ;;  %v538_v3 = vpack.c.bf16 %v506_v1, %v506_v1 }
  0x17   : > { %v648_v21 = vshrl.u32 %v624_v18, 16  ;;  %v651_v22 = vshll.u32 %v624_v18, 16  ;;  %v600_v57 = vunpack.c.l.b16 %v536_v55  ;;  %v601_v58 = vunpack.c.l.b16 %v537_v56 }
  0x18   : > { %v655_v24 = vshrl.u32 %v625_v19, 16  ;;  %v658_v25 = vshll.u32 %v625_v19, 16  ;;  %v662_v30 = vshrl.u32 %v626_v20, 16  ;;  %v665_v36 = vshll.u32 %v626_v20, 16 }
  0x19   : > { %v650_v28 = vrot.slane %v648_v21, 7  ;;  %v627_v44 = vpack.c.b16 %v599_v41, %v598_v40  ;;  %v628_v59 = vpack.c.b16 %v601_v58, %v600_v57  ;;  %v539_v4 = vpack.c.bf16 %v507_v2, %v507_v2 }
  0x1a   : > { %v657_v29 = vrot.slane %v655_v24, 7  ;;  %v664_v39 = vrot.slane %v662_v30, 7  ;;  %v602_v6 = vunpack.c.l.b16 %v538_v3  ;;  %v9709_v9 = vmov 0  }
  0x1b   : > { %v9830_v31 = vsel %vm9822_vm2, %v650_v28, 0  ;;  %v653_v32 = vor.u32 %v651_v22, %v650_v28  ;;  %v669_v46 = vshrl.u32 %v627_v44, 16  ;;  %v672_v49 = vshll.u32 %v627_v44, 16 }
  0x1c   : > { %864 = vrot.lane.b32.xlu1 %v9830_v31, %s14438_s24  ;;  %v660_v35 = vor.u32 %v658_v25, %v657_v29  ;;  %v667_v42 = vor.u32 %v665_v36, %v664_v39  ;;  %v9848_v43 = vsel %vm9822_vm2, %v657_v29, 0  ;;  %v9862_v47 = vsel %vm9822_vm2, %v664_v39, 0 }
  0x1d   : > { %v9836_v37 = vsel %vm9822_vm2, 0, %v653_v32  ;;  %v671_v48 = vrot.slane %v669_v46, 7  ;;  %v676_v60 = vshrl.u32 %v628_v59, 16  ;;  %v679_v62 = vshll.u32 %v628_v59, 16  ;;  %v508_v59 = vld [vmem:[%s9813_s23 + $0x60] sm:$0xff] }
  0x1e   : > { %862 = vrot.lane.b32.xlu0 %v9836_v37, %s14438_s24  ;;  %v9842_v38 = vsel %vm9822_vm2, 0, %v660_v35  ;;  %v9854_v45 = vsel %vm9822_vm2, 0, %v667_v42  ;;  %v603_v7 = vunpack.c.l.b16 %v539_v4  ;;  %v643_v10 = vrot.slane %v9709_v9, 7  ;;  %v9573_v4 = vld [vmem:[%s14392_s1 + $0x30] sm:$0xff] }
  0x1f   : > { %866 = vrot.lane.b32.xlu2 %v9842_v38, %s14438_s24  ;;  %v674_v50 = vor.u32 %v672_v49, %v671_v48  ;;  %v9878_v52 = vsel %vm9822_vm2, %v671_v48, 0  ;;  %v678_v61 = vrot.slane %v676_v60, 7  ;;  %v509_v60 = vld [vmem:[%s9813_s23 + $0x68] sm:$0xff]  ;;  %v540_v2 = vpack.c.bf16 %v508_v59, %v508_v59 }
  0x20   : > { %v629_v12 = vpack.c.b16 %v603_v7, %v602_v6  ;;  %v9904_v14 = vsel %vm9822_vm2, %v643_v10, 0  ;;  %v9908_v16 = vsel %vm9822_vm2, 0, %v643_v10  ;;  %v541_v3 = vpack.c.bf16 %v509_v60, %v509_v60 }
  0x21   : > { %v9872_v51 = vsel %vm9822_vm2, 0, %v674_v50  ;;  %v681_v63 = vor.u32 %v679_v62, %v678_v61  ;;  %v9898_v11 = vsel %vm9822_vm2, %v678_v61, 0  ;;  %14487 = vst [vmem:[#allocation3_spill] sm:$0xff] %v9904_v14  ;;  %v9574_v61 = vld [vmem:[%s14392_s1 + $0x38] sm:$0xff] }
  0x22   : > { %v683_v15 = vshrl.u32 %v629_v12, 16  ;;  %14488 = vst [vmem:[#allocation4_spill] sm:$0xff] %v9908_v16  ;;  %v686_v18 = vshll.u32 %v629_v12, 16  ;;  %1627 = vmatpush.bf16.msra.mxu0 %v9574_v61  ;;  %v605_v9 = vunpack.c.l.b16 %v541_v3 }
  0x23   : > { %v9890_v0 = vsel %vm9822_vm2, 0, %v681_v63 }
  0x24   : > { %930 = vrot.lane.b32.xlu1 %v9848_v43, %s14436_s25  ;;  %v685_v17 = vrot.slane %v683_v15, 7 }
  0x26   : > { %928 = vrot.lane.b32.xlu0 %v9842_v38, %s14436_s25  ;;  %v688_v22 = vor.u32 %v686_v18, %v685_v17  ;;  %v9940_v49 = vsel %vm9822_vm2, %v685_v17, 0  ;;  %1628 = vmatpush.bf16.msra.mxu0 %v9573_v4 }
  0x27   : > { %932 = vrot.lane.b32.xlu2 %v9854_v45, %s14436_s25 }
  0x28   : > { %v9920_v27 = vsel %vm9822_vm2, 0, %v688_v22 }
  0x2c   : > { %934 = vrot.lane.b32.xlu1 %v9862_v47, %s14436_s25 }
  0x2e   : > { %868 = vrot.lane.b32.xlu0 %v9848_v43, %s14438_s24 }
  0x2f   : > { %870 = vrot.lane.b32.xlu2 %v9854_v45, %s14438_s24 }
  0x34   : > { %872 = vrot.lane.b32.xlu1 %v9862_v47, %s14438_s24 }
  0x36   : > { %936 = vrot.lane.b32.xlu0 %v9872_v51, %s14436_s25 }
  0x37   : > { %938 = vrot.lane.b32.xlu2 %v9878_v52, %s14436_s25 }
  0x3e   : > { %874 = vrot.lane.b32.xlu0 %v9872_v51, %s14438_s24 }
  0x3f   : > { %940 = vrot.lane.b32.xlu2 %v9890_v0, %s14436_s25 }
  0x47   : > { %942 = vrot.lane.b32.xlu2 %v9898_v11, %s14436_s25 }
  0x4f   : > { %944 = vrot.lane.b32.xlu2 %v9920_v27, %s14436_s25 }
  0x57   : > { %946 = vrot.lane.b32.xlu2 %v9940_v49, %s14436_s25 }
  0x79   : > { %v867_v13 = vpop.permute.xlu2 %866 }
  0x7a   : > { %v1001_v36 = vsel %vm14425_vm4, %v9836_v37, %v867_v13 }
  0x81   : > { %v933_v39 = vpop.permute.xlu2 %932 }
  0x82   : > { %v9932_v42 = vsel %vm1089_vm3, %v1001_v36, %v933_v39 }
  0x83   : > { %v1167_v50 = vshll.u32 %v9932_v42, 16  ;;  %v1165_v54 = vshrl.u32 %v9932_v42, 16 }
  0x85   : > { %v1169_v56 = vrot.slane %v1167_v50, 1 }
  0x87   : > { %v1170_v63 = vor.u32 %v1169_v56, %v1165_v54 }
  0x89   : > { %v871_v55 = vpop.permute.xlu2 %870 }
  0x8e   : > { %v865_v5 = vpop.permute.xlu1 %864 }
  0x8f   : > { %v998_v19 = vsel %vm14425_vm4, %v9904_v14, %v865_v5  ;;  %v1007_v5 = vsel %vm14425_vm4, %v9842_v38, %v871_v55  ;;  %v9572_v38 = vld [vmem:[%s14392_s1 + $0x28] sm:$0xff] }
  0x90   : > { %v863_v8 = vpop.permute.xlu0 %862  ;;  %1629 = vmatpush.bf16.msra.mxu0 %v9572_v38  ;;  %v515_v38 = vld [vmem:[%s9813_s23 + $0x98] sm:$0xff] }
  0x91   : > { %v995_v24 = vsel %vm14425_vm4, %v9908_v16, %v863_v8  ;;  %v604_v8 = vunpack.c.l.b16 %v540_v2  ;;  %v939_v15 = vpop.permute.xlu2 %938 }
  0x93   : > { %v630_v17 = vpack.c.b16 %v605_v9, %v604_v8 }
  0x95   : > { %v690_v18 = vshrl.u32 %v630_v17, 16 }
  0x96   : > { %v931_v20 = vpop.permute.xlu1 %930 }
  0x97   : > { %v1093_v21 = vsel %vm1089_vm3, %v998_v19, %v931_v20  ;;  %v693_v19 = vshll.u32 %v630_v17, 16  ;;  %v692_v22 = vrot.slane %v690_v18, 7  ;;  %v514_v17 = vld [vmem:[%s9813_s23 + $0x90] sm:$0xff] }
  0x98   : > { %v929_v25 = vpop.permute.xlu0 %928  ;;  %v1161_v28 = vshll.u32 %v1093_v21, 16  ;;  %v1381_v29 = vrot.slane %v1093_v21, 1  ;;  %v546_v18 = vpack.c.bf16 %v514_v17, %v514_v17 }
  0x99   : > { %v9916_v26 = vsel %vm1089_vm3, %v995_v24, %v929_v25  ;;  %v695_v25 = vor.u32 %v693_v19, %v692_v22  ;;  %v547_v19 = vpack.c.bf16 %v515_v38, %v515_v38 }
  0x9a   : > { %v1157_v30 = vshll.u32 %v9916_v26, 16  ;;  %v1380_v32 = vrot.slane %v9916_v26, 1  ;;  %v1155_v33 = vshrl.u32 %v9916_v26, 16  ;;  %v1163_v40 = vrot.slane %v1161_v28, 1 }
  0x9c   : > { %v1159_v34 = vrot.slane %v1157_v30, 1  ;;  %v1382_v35 = vsel %vm1379_vm5, %v1380_v32, %v1381_v29 }
  0x9d   : > { %1428 = vrot.lane.b32.xlu0 %v1382_v35, %s14433_s26 }
  0x9e   : > { %v1160_v41 = vor.u32 %v1159_v34, %v1155_v33  ;;  %v935_v48 = vpop.permute.xlu1 %934  ;;  %v9985_v33 = vsel %vm9822_vm2, 0, %v695_v25  ;;  %v9570_v34 = vld [vmem:[%s14392_s1 + $0x18] sm:$0xff] }
  0x9f   : > { %948 = vrot.lane.b32.xlu2 %v9985_v33, %s14436_s25 }
  0xa0   : > { %v1164_v44 = vsel %vm14435_vm6, %v1160_v41, %v1163_v40  ;;  %v869_v46 = vpop.permute.xlu0 %868  ;;  %v9569_v40 = vld [vmem:[%s14392_s1 + $0x10] sm:$0xff]  ;;  %v10001_v41 = vsel %vm9822_vm2, %v692_v22, 0  ;;  %v611_v22 = vunpack.c.l.b16 %v547_v19 }
  0xa1   : > { %1315 = vrot.lane.b32.xlu1 %v1164_v44, %s14431_s27  ;;  %v1004_v37 = vsel %vm14425_vm4, %v9830_v31, %v869_v46  ;;  %v1383_v31 = vrot.slane %v9932_v42, 1  ;;  %v9568_v46 = vld [vmem:[%s14392_s1 + $0x8] sm:$0xff] }
  0xa2   : > { %v1097_v53 = vsel %vm1089_vm3, %v1004_v37, %v935_v48  ;;  %v510_v48 = vld [vmem:[%s9813_s23 + $0x70] sm:$0xff]  ;;  %v511_v37 = vld [vmem:[%s9813_s23 + $0x78] sm:$0xff] }
  0xa3   : > { %v1171_v57 = vshll.u32 %v1097_v53, 16  ;;  %v1384_v58 = vrot.slane %v1097_v53, 1  ;;  %v542_v50 = vpack.c.bf16 %v510_v48, %v510_v48  ;;  %v543_v53 = vpack.c.bf16 %v511_v37, %v511_v37  ;;  %v516_v37 = vld [vmem:[%s9813_s23 + $0xa0] sm:$0xff] }
  0xa5   : > { %878 = vrot.lane.b32.xlu0 %v9890_v0, %s14438_s24  ;;  %v1173_v62 = vrot.slane %v1171_v57, 1  ;;  %v1385_v1 = vsel %vm1379_vm5, %v1383_v31, %v1384_v58  ;;  %v606_v54 = vunpack.c.l.b16 %v542_v50  ;;  %v607_v55 = vunpack.c.l.b16 %v543_v53  ;;  %v9567_v57 = vld [vmem:[%s14392_s1] sm:$0xff]  ;;  %v517_v50 = vld [vmem:[%s9813_s23 + $0xa8] sm:$0xff] }
  0xa6   : > { %v873_v7 = vpop.permute.xlu1 %872  ;;  %v548_v53 = vpack.c.bf16 %v516_v37, %v516_v37 }
  0xa7   : > { %v1174_v10 = vsel %vm14435_vm6, %v1170_v63, %v1173_v62  ;;  %v1010_v13 = vsel %vm14425_vm4, %v9848_v43, %v873_v7  ;;  %v9571_v43 = vld [vmem:[%s14392_s1 + $0x20] sm:$0xff]  ;;  %950 = vrot.lane.b32.xlu2 %v10001_v41, %s14436_s25  ;;  %v631_v56 = vpack.c.b16 %v607_v55, %v606_v54  ;;  %v513_v63 = vld [vmem:[%s9813_s23 + $0x88] sm:$0xff]  ;;  %v549_v54 = vpack.c.bf16 %v517_v50, %v517_v50 }
  0xa8   : > { %v937_v6 = vpop.permute.xlu0 %936  ;;  %v1101_v21 = vsel %vm1089_vm3, %v1010_v13, %v939_v15  ;;  %1630 = vmatpush.bf16.msra.mxu0 %v9571_v43  ;;  %v512_v62 = vld [vmem:[%s9813_s23 + $0x80] sm:$0xff]  ;;  %v545_v2 = vpack.c.bf16 %v513_v63, %v513_v63  ;;  %v612_v55 = vunpack.c.l.b16 %v548_v53 }
  0xa9   : > { %876 = vrot.lane.b32.xlu1 %v9878_v52, %s14438_s24  ;;  %v9966_v12 = vsel %vm1089_vm3, %v1007_v5, %v937_v6  ;;  %v1181_v24 = vshll.u32 %v1101_v21, 16  ;;  %v1387_v32 = vrot.slane %v1101_v21, 1  ;;  %v697_v31 = vshrl.u32 %v631_v56, 16 }
  0xaa   : > { %v1177_v20 = vshll.u32 %v9966_v12, 16  ;;  %v1175_v28 = vshrl.u32 %v9966_v12, 16  ;;  %v1386_v30 = vrot.slane %v9966_v12, 1  ;;  %v700_v59 = vshll.u32 %v631_v56, 16 }
  0xab   : > { %v1183_v35 = vrot.slane %v1181_v24, 1  ;;  %v699_v58 = vrot.slane %v697_v31, 7  ;;  %v609_v4 = vunpack.c.l.b16 %v545_v2  ;;  %v610_v21 = vunpack.c.l.b16 %v546_v18 }
  0xac   : > { %v1179_v29 = vrot.slane %v1177_v20, 1  ;;  %v1388_v39 = vsel %vm1379_vm5, %v1386_v30, %v1387_v32  ;;  %1631 = vmatpush.bf16.msra.mxu0 %v9570_v34  ;;  %v941_v20 = vpop.permute.xlu2 %940 }
  0xad   : > { %1430 = vrot.lane.b32.xlu0 %v1385_v1, %s14433_s26  ;;  %v702_v60 = vor.u32 %v700_v59, %v699_v58  ;;  %v544_v1 = vpack.c.bf16 %v512_v62, %v512_v62  ;;  %v10029_v5 = vsel %vm9822_vm2, %v699_v58, 0  ;;  %v633_v24 = vpack.c.b16 %v611_v22, %v610_v21 }
  0xae   : > { %v1180_v36 = vor.u32 %v1179_v29, %v1175_v28 }
  0xaf   : > { %v10021_v61 = vsel %vm9822_vm2, 0, %v702_v60  ;;  %v608_v3 = vunpack.c.l.b16 %v544_v1  ;;  %v711_v25 = vshrl.u32 %v633_v24, 16  ;;  %v714_v30 = vshll.u32 %v633_v24, 16 }
  0xb0   : > { %v1184_v44 = vsel %vm14435_vm6, %v1180_v36, %v1183_v35  ;;  %1632 = vmatpush.bf16.msra.mxu0 %v9569_v40  ;;  %952 = vrot.lane.b32.xlu2 %v10021_v61, %s14436_s25  ;;  %v875_v15 = vpop.permute.xlu0 %874 }
  0xb1   : > { %1317 = vrot.lane.b32.xlu1 %v1174_v10, %s14431_s27  ;;  %v632_v6 = vpack.c.b16 %v609_v4, %v608_v3  ;;  %v713_v29 = vrot.slane %v711_v25, 7  ;;  %v1013_v32 = vsel %vm14425_vm4, %v9854_v45, %v875_v15  ;;  %v518_v25 = vld [vmem:[%s9813_s23 + $0xb0] sm:$0xff] }
  0xb3   : > { %v704_v7 = vshrl.u32 %v632_v6, 16  ;;  %v707_v9 = vshll.u32 %v632_v6, 16  ;;  %v716_v35 = vor.u32 %v714_v30, %v713_v29  ;;  %v10070_v60 = vsel %vm9822_vm2, %v713_v29, 0 }
  0xb4   : > { %1633 = vmatpush.bf16.msra.mxu0 %v9568_v46  ;;  %v943_v34 = vpop.permute.xlu2 %942 }
  0xb5   : > { %882 = vrot.lane.b32.xlu0 %v9920_v27, %s14438_s24  ;;  %v706_v8 = vrot.slane %v704_v7, 7 }
  0xb7   : > { %v709_v10 = vor.u32 %v707_v9, %v706_v8  ;;  %v10043_v43 = vsel %vm9822_vm2, %v706_v8, 0 }
  0xb8   : > { %1634 = vmatpush.bf16.msra.mxu0 %v9567_v57  ;;  %954 = vrot.lane.b32.xlu2 %v10029_v5, %s14436_s25  ;;  %v613_v57 = vunpack.c.l.b16 %v549_v54 }
  0xb9   : > { %880 = vrot.lane.b32.xlu1 %v9898_v11, %s14438_s24  ;;  %v10035_v13 = vsel %vm9822_vm2, 0, %v709_v10 }
  0xba   : > { %v634_v63 = vpack.c.b16 %v613_v57, %v612_v55 }
  0xbc   : > { %v945_v59 = vpop.permute.xlu2 %944  ;;  %v718_v7 = vshrl.u32 %v634_v63, 16  ;;  %v721_v10 = vshll.u32 %v634_v63, 16 }
  0xbd   : > { %1432 = vrot.lane.b32.xlu0 %v1388_v39, %s14433_s26  ;;  %v10050_v39 = vsel %vm1089_vm3, %v1013_v32, %v941_v20 }
  0xbe   : > { %v1187_v45 = vshll.u32 %v10050_v39, 16  ;;  %v1389_v1 = vrot.slane %v10050_v39, 1  ;;  %v720_v15 = vrot.slane %v718_v7, 7 }
  0xc0   : > { %956 = vrot.lane.b32.xlu2 %v10035_v13, %s14436_s25  ;;  %v1189_v56 = vrot.slane %v1187_v45, 1  ;;  %v723_v19 = vor.u32 %v721_v10, %v720_v15  ;;  %v520_v45 = vld [vmem:[%s9813_s23 + $0xc0] sm:$0xff] }
  0xc1   : > { %1319 = vrot.lane.b32.xlu1 %v1184_v44, %s14431_s27  ;;  %v10056_v44 = vsel %vm9822_vm2, 0, %v716_v35  ;;  %v552_v53 = vpack.c.bf16 %v520_v45, %v520_v45 }
  0xc2   : > { %v10090_v21 = vsel %vm9822_vm2, 0, %v723_v19 }
  0xc4   : > { %v947_v24 = vpop.permute.xlu2 %946 }
  0xc5   : > { %886 = vrot.lane.b32.xlu0 %v9985_v33, %s14438_s24 }
  0xc8   : > { %958 = vrot.lane.b32.xlu2 %v10043_v43, %s14436_s25 }
  0xc9   : > { %884 = vrot.lane.b32.xlu1 %v9940_v49, %s14438_s24 }
  0xd0   : > { %960 = vrot.lane.b32.xlu2 %v10056_v44, %s14436_s25 }
  0xd8   : > { %962 = vrot.lane.b32.xlu2 %v10070_v60, %s14436_s25 }
  0xe0   : > { %964 = vrot.lane.b32.xlu2 %v10090_v21, %s14436_s25 }
 0x10f   : > { %v1429_v28 = vpop.permute.xlu0 %1428 }
 0x113   : > { %v1316_v36 = vpop.permute.xlu1 %1315 }
 0x114   : > { %v1462_v40 = vsel %vm14408_vm7, %v9916_v26, %v1316_v36  ;;  %v1185_v26 = vshrl.u32 %v10050_v39, 16 }
 0x115   : > { %v1495_v46 = vsel %vm14429_vm8, %v1462_v40, %v1429_v28  ;;  %v519_v28 = vld [vmem:[%s9813_s23 + $0xb8] sm:$0xff]  ;;  %v10105_v40 = vsel %vm9822_vm2, %v720_v15, 0 }
 0x116   : > { %9154 = vmatmul.msk.bf16.vlgmr.msra.gmra.mxu0 %vm14407_vm9, %v1495_v46  ;;  %v1190_v4 = vor.u32 %v1189_v56, %v1185_v26  ;;  %v551_v30 = vpack.c.bf16 %v519_v28, %v519_v28  ;;  %966 = vrot.lane.b32.xlu2 %v10105_v40, %s14436_s25 }
 0x117   : > { %v879_v48 = vpop.permute.xlu0 %878 }
 0x118   : > { %v615_v46 = vunpack.c.l.b16 %v551_v30 }
 0x11b   : > { %v877_v31 = vpop.permute.xlu1 %876 }
 0x11c   : > { %v1016_v58 = vsel %vm14425_vm4, %v9862_v47, %v877_v31  ;;  %v1019_v47 = vsel %vm14425_vm4, %v9872_v51, %v879_v48  ;;  %v521_v48 = vld [vmem:[%s9813_s23 + $0xc8] sm:$0xff] }
 0x11d   : > { %v1105_v62 = vsel %vm1089_vm3, %v1016_v58, %v943_v34  ;;  %v10083_v18 = vsel %vm1089_vm3, %v1019_v47, %v945_v59  ;;  %v553_v54 = vpack.c.bf16 %v521_v48, %v521_v48 }
 0x11e   : > { %v1191_v2 = vshll.u32 %v1105_v62, 16  ;;  %v1390_v3 = vrot.slane %v1105_v62, 1  ;;  %v1197_v22 = vshll.u32 %v10083_v18, 16  ;;  %v1195_v32 = vshrl.u32 %v10083_v18, 16 }
 0x11f   : > { %v1431_v6 = vpop.permute.xlu0 %1430  ;;  %v1392_v37 = vrot.slane %v10083_v18, 1  ;;  %v616_v62 = vunpack.c.l.b16 %v552_v53  ;;  %v617_v63 = vunpack.c.l.b16 %v553_v54 }
 0x120   : > { %v1193_v8 = vrot.slane %v1191_v2, 1  ;;  %v1391_v9 = vsel %vm1379_vm5, %v1389_v1, %v1390_v3  ;;  %v1199_v34 = vrot.slane %v1197_v22, 1 }
 0x121   : > { %1434 = vrot.lane.b32.xlu0 %v1391_v9, %s14433_s26  ;;  %v636_v10 = vpack.c.b16 %v617_v63, %v616_v62 }
 0x122   : > { %v1194_v17 = vsel %vm14435_vm6, %v1190_v4, %v1193_v8  ;;  %v1200_v57 = vor.u32 %v1199_v34, %v1195_v32 }
 0x123   : > { %1321 = vrot.lane.b32.xlu1 %v1194_v17, %s14431_s27  ;;  %v1318_v38 = vpop.permute.xlu1 %1317  ;;  %v732_v19 = vshrl.u32 %v636_v10, 16  ;;  %v735_v30 = vshll.u32 %v636_v10, 16 }
 0x124   : > { %v1464_v51 = vsel %vm14408_vm7, %v9932_v42, %v1318_v38  ;;  %v550_v42 = vpack.c.bf16 %v518_v25, %v518_v25 }
 0x125   : > { %v1497_v20 = vsel %vm14429_vm8, %v1464_v51, %v1431_v6  ;;  %v522_v51 = vld [vmem:[%s9813_s23 + $0xd0] sm:$0xff] }
 0x126   : > { %9155 = vmatmul.msk.bf16.gmra.mxu0 %vm14407_vm9, %v1497_v20  ;;  %v614_v35 = vunpack.c.l.b16 %v550_v42  ;;  %v523_v20 = vld [vmem:[%s9813_s23 + $0xd8] sm:$0xff]  ;;  %v554_v25 = vpack.c.bf16 %v522_v51, %v522_v51  ;;  %v734_v42 = vrot.slane %v732_v19, 7  ;;  %v526_v19 = vld [vmem:[%s9813_s23 + $0xf0] sm:$0xff] }
 0x127   : > { %v883_v29 = vpop.permute.xlu0 %882  ;;  %v555_v32 = vpack.c.bf16 %v523_v20, %v523_v20  ;;  %v527_v51 = vld [vmem:[%s9813_s23 + $0xf8] sm:$0xff]  ;;  %v558_v20 = vpack.c.bf16 %v526_v19, %v526_v19 }
 0x128   : > { %v635_v26 = vpack.c.b16 %v615_v46, %v614_v35  ;;  %v1025_v2 = vsel %vm14425_vm4, %v9890_v0, %v883_v29  ;;  %v10170_v62 = vsel %vm9822_vm2, %v734_v42, 0 }
 0x129   : > { %890 = vrot.lane.b32.xlu0 %v10021_v61, %s14438_s24  ;;  %v619_v53 = vunpack.c.l.b16 %v555_v32 }
 0x12a   : > { %v725_v58 = vshrl.u32 %v635_v26, 16  ;;  %v728_v59 = vshll.u32 %v635_v26, 16 }
 0x12b   : > { %888 = vrot.lane.b32.xlu1 %v10001_v41, %s14438_s24  ;;  %v881_v36 = vpop.permute.xlu1 %880 }
 0x12c   : > { %v1022_v50 = vsel %vm14425_vm4, %v9878_v52, %v881_v36  ;;  %v949_v52 = vpop.permute.xlu2 %948  ;;  %v727_v4 = vrot.slane %v725_v58, 7  ;;  %v525_v58 = vld [vmem:[%s9813_s23 + $0xe8] sm:$0xff] }
 0x12d   : > { %v1109_v55 = vsel %vm1089_vm3, %v1022_v50, %v947_v24  ;;  %v10122_v47 = vsel %vm1089_vm3, %v1025_v2, %v949_v52  ;;  %v618_v50 = vunpack.c.l.b16 %v554_v25  ;;  %v557_v2 = vpack.c.bf16 %v525_v58, %v525_v58 }
 0x12e   : > { %v1201_v56 = vshll.u32 %v1109_v55, 16  ;;  %v1393_v31 = vrot.slane %v1109_v55, 1  ;;  %v730_v9 = vor.u32 %v728_v59, %v727_v4  ;;  %v1207_v38 = vshll.u32 %v10122_v47, 16 }
 0x12f   : > { %v1433_v7 = vpop.permute.xlu0 %1432  ;;  %v10144_v29 = vsel %vm9822_vm2, %v727_v4, 0  ;;  %v1395_v34 = vrot.slane %v10122_v47, 1  ;;  %v621_v4 = vunpack.c.l.b16 %v557_v2 }
 0x130   : > { %v1203_v1 = vrot.slane %v1201_v56, 1  ;;  %v1394_v3 = vsel %vm1379_vm5, %v1392_v37, %v1393_v31  ;;  %v10129_v17 = vsel %vm9822_vm2, 0, %v730_v9  ;;  %v1209_v22 = vrot.slane %v1207_v38, 1 }
 0x131   : > { %1436 = vrot.lane.b32.xlu0 %v1394_v3, %s14433_s26  ;;  %968 = vrot.lane.b32.xlu2 %v10129_v17, %s14436_s25  ;;  %v737_v37 = vor.u32 %v735_v30, %v734_v42  ;;  %v637_v56 = vpack.c.b16 %v619_v53, %v618_v50 }
 0x132   : > { %v1204_v6 = vsel %vm14435_vm6, %v1200_v57, %v1203_v1  ;;  %v524_v57 = vld [vmem:[%s9813_s23 + $0xe0] sm:$0xff]  ;;  %s9714_s23 = smov 64  }
 0x133   : > { %1323 = vrot.lane.b32.xlu1 %v1204_v6, %s14431_s27  ;;  %v1320_v8 = vpop.permute.xlu1 %1319  ;;  %v10158_v26 = vsel %vm9822_vm2, 0, %v737_v37  ;;  %v739_v31 = vshrl.u32 %v637_v56, 16  ;;  %v742_v59 = vshll.u32 %v637_v56, 16  ;;  %v556_v1 = vpack.c.bf16 %v524_v57, %v524_v57  ;;  %v10221_v37 = vld [vmem:[%s14393_s2] ss:$0 sm:$0xff] }
 0x134   : > { %v1466_v0 = vsel %vm14408_vm7, %v9966_v12, %v1320_v8  ;;  %v1205_v12 = vshrl.u32 %v10122_v47, 16  ;;  %v951_v24 = vpop.permute.xlu2 %950 }
 0x135   : > { %v1499_v15 = vsel %vm14429_vm8, %v1466_v0, %v1433_v7  ;;  %v741_v63 = vrot.slane %v739_v31, 7  ;;  %v620_v3 = vunpack.c.l.b16 %v556_v1 }
 0x136   : > { %9156 = vmatmul.msk.bf16.gmra.mxu0 %vm14407_vm9, %v1499_v15  ;;  %v1210_v48 = vor.u32 %v1209_v22, %v1205_v12  ;;  %v559_v12 = vpack.c.bf16 %v527_v51, %v527_v51  ;;  %v622_v22 = vunpack.c.l.b16 %v558_v20 }
 0x137   : > { %v744_v52 = vor.u32 %v742_v59, %v741_v63  ;;  %v638_v7 = vpack.c.b16 %v621_v4, %v620_v3  ;;  %v10182_v9 = vsel %vm9822_vm2, %v741_v63, 0 }
 0x139   : > { %894 = vrot.lane.b32.xlu0 %v10035_v13, %s14438_s24  ;;  %970 = vrot.lane.b32.xlu2 %v10144_v29, %s14436_s25  ;;  %v10176_v6 = vsel %vm9822_vm2, 0, %v744_v52  ;;  %v746_v8 = vshrl.u32 %v638_v7, 16  ;;  %v749_v0 = vshll.u32 %v638_v7, 16 }
 0x13b   : > { %892 = vrot.lane.b32.xlu1 %v10029_v5, %s14438_s24  ;;  %v885_v28 = vpop.permute.xlu1 %884  ;;  %v748_v10 = vrot.slane %v746_v8, 7 }
 0x13c   : > { %v1028_v35 = vsel %vm14425_vm4, %v9898_v11, %v885_v28 }
 0x13d   : > { %v1113_v36 = vsel %vm1089_vm3, %v1028_v35, %v951_v24  ;;  %v751_v15 = vor.u32 %v749_v0, %v748_v10  ;;  %v623_v24 = vunpack.c.l.b16 %v559_v12  ;;  %v10196_v25 = vsel %vm9822_vm2, %v748_v10, 0 }
 0x13e   : > { %v1211_v46 = vshll.u32 %v1113_v36, 16  ;;  %v1396_v45 = vrot.slane %v1113_v36, 1 }
 0x13f   : > { %v10188_v38 = vsel %vm9822_vm2, 0, %v751_v15  ;;  %v639_v28 = vpack.c.b16 %v623_v24, %v622_v22 }
 0x140   : > { %v1213_v54 = vrot.slane %v1211_v46, 1  ;;  %v1397_v55 = vsel %vm1379_vm5, %v1395_v34, %v1396_v45  ;;  %v10214_v46 = vpack.i.bf16 %v9904_v14, %v9908_v16  ;;  %v887_v45 = vpop.permute.xlu0 %886 }
 0x141   : > { %1438 = vrot.lane.b32.xlu0 %v1397_v55, %s14433_s26  ;;  %972 = vrot.lane.b32.xlu2 %v10158_v26, %s14436_s25  ;;  %v753_v42 = vshrl.u32 %v639_v28, 16  ;;  %v756_v32 = vshll.u32 %v639_v28, 16  ;;  %v1031_v50 = vsel %vm14425_vm4, %v9920_v27, %v887_v45 }
 0x142   : > { %v1214_v11 = vsel %vm14435_vm6, %v1210_v48, %v1213_v54  ;;  %v953_v48 = vpop.permute.xlu2 %952 }
 0x143   : > { %1325 = vrot.lane.b32.xlu1 %v1214_v11, %s14431_s27  ;;  %v755_v30 = vrot.slane %v753_v42, 7  ;;  %v10227_v31 = vsel %vm1089_vm3, %v1031_v50, %v953_v48 }
 0x144   : > { %v1217_v59 = vshll.u32 %v10227_v31, 16  ;;  %v1215_v52 = vshrl.u32 %v10227_v31, 16  ;;  %v1398_v20 = vrot.slane %v10227_v31, 1 }
 0x145   : > { %v758_v34 = vor.u32 %v756_v32, %v755_v30  ;;  %v10208_v36 = vsel %vm9822_vm2, %v755_v30, 0 }
 0x146   : > { %v1219_v7 = vrot.slane %v1217_v59, 1 }
 0x147   : > { %v10202_v35 = vsel %vm9822_vm2, 0, %v758_v34 }
 0x148   : > { %v1220_v22 = vor.u32 %v1219_v7, %v1215_v52 }
 0x149   : > { %898 = vrot.lane.b32.xlu0 %v10056_v44, %s14438_s24  ;;  %974 = vrot.lane.b32.xlu2 %v10170_v62, %s14436_s25 }
 0x14a   : > { %v955_v56 = vpop.permute.xlu2 %954 }
 0x14b   : > { %896 = vrot.lane.b32.xlu1 %v10043_v43, %s14438_s24 }
 0x151   : > { %976 = vrot.lane.b32.xlu2 %v10176_v6, %s14436_s25 }
 0x152   : > { %v957_v0 = vpop.permute.xlu2 %956 }
 0x159   : > { %978 = vrot.lane.b32.xlu2 %v10182_v9, %s14436_s25 }
 0x161   : > { %980 = vrot.lane.b32.xlu2 %v10188_v38, %s14436_s25 }
 0x169   : > { %982 = vrot.lane.b32.xlu2 %v10196_v25, %s14436_s25 }
 0x171   : > { %984 = vrot.lane.b32.xlu2 %v10202_v35, %s14436_s25 }
 0x179   : > { %986 = vrot.lane.b32.xlu2 %v10208_v36, %s14436_s25 }
 0x181   : > { %9679 = vrot.lane.b32.xlu2 %v10214_v46, %s14436_s25 }
 0x193   : > { %v1636_v53 = vpop.f32.mrf.mxu0  ;;  %v1435_v54 = vpop.permute.xlu0 %1434 }
 0x194   : > { %v1637_v55 = vadd.f32 %v10221_v37, %v1636_v53 }
 0x195   : > { %v1322_v11 = vpop.permute.xlu1 %1321 }
 0x196   : > { %v1468_v57 = vsel %vm14408_vm7, %v10050_v39, %v1322_v11  ;;  %v1716_v63 = vmax.f32 %v1637_v55, 0.0 }
 0x197   : > { %v1501_v58 = vsel %vm14429_vm8, %v1468_v57, %v1435_v54 }
 0x198   : > { %9157 = vmatmul.msk.bf16.gmra.mxu0 %vm14407_vm9, %v1501_v58  ;;  %v1748_v3 = vpack.c.bf16 %v1716_v63, %v1716_v63 }
 0x19a   : > { %v1812_v12 = vunpack.c.l.b16 %v1748_v3 }
 0x19b   : > { %v1638_v27 = vpop.f32.mrf.mxu0  ;;  %v891_v1 = vpop.permute.xlu0 %890 }
 0x19c   : > { %v1639_v2 = vadd.f32 %v10221_v37, %v1638_v27  ;;  %v1037_v42 = vsel %vm14425_vm4, %v9985_v33, %v891_v1 }
 0x19d   : > { %v889_v4 = vpop.permute.xlu1 %888  ;;  %v10246_v45 = vsel %vm1089_vm3, %v1037_v42, %v957_v0 }
 0x19e   : > { %v1717_v8 = vmax.f32 %v1639_v2, 0.0  ;;  %v1034_v39 = vsel %vm14425_vm4, %v9940_v49, %v889_v4  ;;  %v1227_v54 = vshll.u32 %v10246_v45, 16  ;;  %v1225_v59 = vshrl.u32 %v10246_v45, 16 }
 0x19f   : > { %v1117_v10 = vsel %vm1089_vm3, %v1034_v39, %v955_v56  ;;  %v959_v56 = vpop.permute.xlu2 %958  ;;  %v1401_v2 = vrot.slane %v10246_v45, 1 }
 0x1a0   : > { %v1749_v15 = vpack.c.bf16 %v1717_v8, %v1717_v8  ;;  %v1221_v19 = vshll.u32 %v1117_v10, 16  ;;  %v1399_v51 = vrot.slane %v1117_v10, 1  ;;  %v1229_v63 = vrot.slane %v1227_v54, 1 }
 0x1a2   : > { %v1813_v24 = vunpack.c.l.b16 %v1749_v15  ;;  %v1223_v28 = vrot.slane %v1221_v19, 1  ;;  %v1400_v30 = vsel %vm1379_vm5, %v1398_v20, %v1399_v51  ;;  %v1230_v7 = vor.u32 %v1229_v63, %v1225_v59 }
 0x1a3   : > { %1440 = vrot.lane.b32.xlu0 %v1400_v30, %s14433_s26  ;;  %v1437_v49 = vpop.permute.xlu0 %1436 }
 0x1a4   : > { %v1844_v32 = vpack.c.b16 %v1813_v24, %v1812_v12  ;;  %v1224_v34 = vsel %vm14435_vm6, %v1220_v22, %v1223_v28 }
 0x1a5   : > { %1327 = vrot.lane.b32.xlu1 %v1224_v34, %s14431_s27  ;;  %v1324_v48 = vpop.permute.xlu1 %1323 }
 0x1a6   : > { %v1470_v50 = vsel %vm14408_vm7, %v10083_v18, %v1324_v48  ;;  %v1861_v53 = vshrl.u32 %v1844_v32, 16  ;;  %v1864_v11 = vshll.u32 %v1844_v32, 16 }
 0x1a7   : > { %v1503_v33 = vsel %vm14429_vm8, %v1470_v50, %v1437_v49  ;;  %v961_v0 = vpop.permute.xlu2 %960 }
 0x1a8   : > { %9158 = vmatmul.msk.bf16.gmra.mxu0 %vm14407_vm9, %v1503_v33  ;;  %v10254_v55 = vrot.slane %v1861_v53, 7 }
 0x1aa   : > { %v1866_v57 = vor.u32 %v1864_v11, %v10254_v55 }
 0x1ab   : > { %v895_v58 = vpop.permute.xlu0 %894  ;;  %902 = vrot.lane.b32.xlu0 %v10090_v21, %s14438_s24 }
 0x1ac   : > { %v10262_v18 = vsel %vm9822_vm2, 0, %v1866_v57  ;;  %v1043_v39 = vsel %vm14425_vm4, %v10021_v61, %v895_v58 }
 0x1ad   : > { %2068 = vrot.lane.b32.xlu2 %v10262_v18, %s14436_s25  ;;  %900 = vrot.lane.b32.xlu1 %v10070_v60, %s14438_s24  ;;  %v893_v27 = vpop.permute.xlu1 %892 }
 0x1ae   : > { %v1040_v1 = vsel %vm14425_vm4, %v10001_v41, %v893_v27  ;;  %v10278_v41 = vsel %vm1089_vm3, %v1043_v39, %v961_v0 }
 0x1af   : > { %v1121_v52 = vsel %vm1089_vm3, %v1040_v1, %v959_v56  ;;  %v1237_v61 = vshll.u32 %v10278_v41, 16  ;;  %v1235_v22 = vshrl.u32 %v10278_v41, 16  ;;  %v963_v42 = vpop.permute.xlu2 %962  ;;  %v1404_v30 = vrot.slane %v10278_v41, 1 }
 0x1b0   : > { %v1231_v3 = vshll.u32 %v1121_v52, 16  ;;  %v1402_v4 = vrot.slane %v1121_v52, 1 }
 0x1b1   : > { %v1239_v24 = vrot.slane %v1237_v61, 1 }
 0x1b2   : > { %v1233_v8 = vrot.slane %v1231_v3, 1  ;;  %v1403_v10 = vsel %vm1379_vm5, %v1401_v2, %v1402_v4 }
 0x1b3   : > { %1442 = vrot.lane.b32.xlu0 %v1403_v10, %s14433_s26  ;;  %v1439_v19 = vpop.permute.xlu0 %1438  ;;  %v1240_v48 = vor.u32 %v1239_v24, %v1235_v22 }
 0x1b4   : > { %v1234_v15 = vsel %vm14435_vm6, %v1230_v7, %v1233_v8 }
 0x1b5   : > { %1329 = vrot.lane.b32.xlu1 %v1234_v15, %s14431_s27  ;;  %v1326_v51 = vpop.permute.xlu1 %1325 }
 0x1b6   : > { %v1472_v20 = vsel %vm14408_vm7, %v10122_v47, %v1326_v51 }
 0x1b7   : > { %v1505_v12 = vsel %vm14429_vm8, %v1472_v20, %v1439_v19  ;;  %v965_v54 = vpop.permute.xlu2 %964 }
 0x1b8   : > { %9159 = vmatmul.msk.bf16.gmra.mxu0 %vm14407_vm9, %v1505_v12 }
 0x1bb   : > { %906 = vrot.lane.b32.xlu0 %v10129_v17, %s14438_s24 }
 0x1bd   : > { %904 = vrot.lane.b32.xlu1 %v10105_v40, %s14438_s24  ;;  %v897_v28 = vpop.permute.xlu1 %896 }
 0x1be   : > { %v1046_v47 = vsel %vm14425_vm4, %v10029_v5, %v897_v28  ;;  %v899_v5 = vpop.permute.xlu0 %898 }
 0x1bf   : > { %v1125_v49 = vsel %vm1089_vm3, %v1046_v47, %v963_v42  ;;  %v1049_v56 = vsel %vm14425_vm4, %v10035_v13, %v899_v5  ;;  %v967_v58 = vpop.permute.xlu2 %966 }
 0x1c0   : > { %v1241_v32 = vshll.u32 %v1125_v49, 16  ;;  %v1405_v34 = vrot.slane %v1125_v49, 1  ;;  %v10308_v63 = vsel %vm1089_vm3, %v1049_v56, %v965_v54 }
 0x1c1   : > { %v1247_v1 = vshll.u32 %v10308_v63, 16  ;;  %v1245_v3 = vshrl.u32 %v10308_v63, 16  ;;  %v1407_v10 = vrot.slane %v10308_v63, 1 }
 0x1c2   : > { %v1243_v50 = vrot.slane %v1241_v32, 1  ;;  %v1406_v53 = vsel %vm1379_vm5, %v1404_v30, %v1405_v34 }
 0x1c3   : > { %1444 = vrot.lane.b32.xlu0 %v1406_v53, %s14433_s26  ;;  %v1249_v4 = vrot.slane %v1247_v1, 1 }
 0x1c4   : > { %v1244_v33 = vsel %vm14435_vm6, %v1240_v48, %v1243_v50 }
 0x1c5   : > { %1331 = vrot.lane.b32.xlu1 %v1244_v33, %s14431_s27  ;;  %v1250_v51 = vor.u32 %v1249_v4, %v1245_v3 }
 0x1cb   : > { %910 = vrot.lane.b32.xlu0 %v10158_v26, %s14438_s24 }
 0x1cd   : > { %908 = vrot.lane.b32.xlu1 %v10144_v29, %s14438_s24 }
 0x215   : > { %v1441_v11 = vpop.permute.xlu0 %1440 }
 0x217   : > { %v1328_v57 = vpop.permute.xlu1 %1327 }
 0x218   : > { %v1474_v59 = vsel %vm14408_vm7, %v10227_v31, %v1328_v57  ;;  %v969_v31 = vpop.permute.xlu2 %968 }
 0x219   : > { %v1507_v27 = vsel %vm14429_vm8, %v1474_v59, %v1441_v11 }
 0x21a   : > { %9160 = vmatmul.msk.bf16.gmra.mxu0 %vm14407_vm9, %v1507_v27 }
 0x21d   : > { %v903_v2 = vpop.permute.xlu0 %902 }
 0x21e   : > { %v1055_v15 = vsel %vm14425_vm4, %v10056_v44, %v903_v2 }
 0x21f   : > { %v901_v52 = vpop.permute.xlu1 %900  ;;  %v10324_v12 = vsel %vm1089_vm3, %v1055_v15, %v969_v31 }
 0x220   : > { %v1052_v13 = vsel %vm14425_vm4, %v10043_v43, %v901_v52  ;;  %v1257_v44 = vshll.u32 %v10324_v12, 16  ;;  %v971_v28 = vpop.permute.xlu2 %970  ;;  %v1255_v47 = vshrl.u32 %v10324_v12, 16  ;;  %v1410_v32 = vrot.slane %v10324_v12, 1 }
 0x221   : > { %v1129_v7 = vsel %vm1089_vm3, %v1052_v13, %v967_v58 }
 0x222   : > { %v1251_v8 = vshll.u32 %v1129_v7, 16  ;;  %v1408_v39 = vrot.slane %v1129_v7, 1  ;;  %v1259_v30 = vrot.slane %v1257_v44, 1 }
 0x224   : > { %v1253_v0 = vrot.slane %v1251_v8, 1  ;;  %v1409_v19 = vsel %vm1379_vm5, %v1407_v10, %v1408_v39  ;;  %v1260_v53 = vor.u32 %v1259_v30, %v1255_v47 }
 0x225   : > { %1446 = vrot.lane.b32.xlu0 %v1409_v19, %s14433_s26  ;;  %v1443_v20 = vpop.permute.xlu0 %1442 }
 0x226   : > { %v1254_v43 = vsel %vm14435_vm6, %v1250_v51, %v1253_v0 }
 0x227   : > { %1333 = vrot.lane.b32.xlu1 %v1254_v43, %s14431_s27  ;;  %v1330_v61 = vpop.permute.xlu1 %1329 }
 0x228   : > { %v1476_v22 = vsel %vm14408_vm7, %v10246_v45, %v1330_v61  ;;  %v973_v11 = vpop.permute.xlu2 %972 }
 0x229   : > { %v1509_v24 = vsel %vm14429_vm8, %v1476_v22, %v1443_v20 }
 0x22a   : > { %9161 = vmatmul.msk.bf16.gmra.mxu0 %vm14407_vm9, %v1509_v24 }
 0x22d   : > { %v907_v42 = vpop.permute.xlu0 %906  ;;  %914 = vrot.lane.b32.xlu0 %v10176_v6, %s14438_s24 }
 0x22e   : > { %v1061_v5 = vsel %vm14425_vm4, %v10090_v21, %v907_v42 }
 0x22f   : > { %912 = vrot.lane.b32.xlu1 %v10170_v62, %s14438_s24  ;;  %v905_v49 = vpop.permute.xlu1 %904 }
 0x230   : > { %v1058_v45 = vsel %vm14425_vm4, %v10070_v60, %v905_v49  ;;  %v10347_v60 = vsel %vm1089_vm3, %v1061_v5, %v973_v11  ;;  %v975_v3 = vpop.permute.xlu2 %974 }
 0x231   : > { %v1133_v34 = vsel %vm1089_vm3, %v1058_v45, %v971_v28  ;;  %v1267_v21 = vshll.u32 %v10347_v60, 16  ;;  %v1265_v1 = vshrl.u32 %v10347_v60, 16  ;;  %v1413_v13 = vrot.slane %v10347_v60, 1 }
 0x232   : > { %v1261_v48 = vshll.u32 %v1133_v34, 16  ;;  %v1411_v50 = vrot.slane %v1133_v34, 1 }
 0x233   : > { %v1269_v2 = vrot.slane %v1267_v21, 1 }
 0x234   : > { %v1263_v33 = vrot.slane %v1261_v48, 1  ;;  %v1412_v54 = vsel %vm1379_vm5, %v1410_v32, %v1411_v50 }
 0x235   : > { %1448 = vrot.lane.b32.xlu0 %v1412_v54, %s14433_s26  ;;  %v1445_v57 = vpop.permute.xlu0 %1444  ;;  %v1270_v8 = vor.u32 %v1269_v2, %v1265_v1 }
 0x236   : > { %v1264_v56 = vsel %vm14435_vm6, %v1260_v53, %v1263_v33 }
 0x237   : > { %1335 = vrot.lane.b32.xlu1 %v1264_v56, %s14431_s27  ;;  %v1332_v58 = vpop.permute.xlu1 %1331 }
 0x238   : > { %v1478_v59 = vsel %vm14408_vm7, %v10278_v41, %v1332_v58  ;;  %v977_v51 = vpop.permute.xlu2 %976 }
 0x239   : > { %v1511_v27 = vsel %vm14429_vm8, %v1478_v59, %v1445_v57 }
 0x23a   : > { %9162 = vmatmul.msk.bf16.gmra.mxu0 %vm14407_vm9, %v1511_v27 }
 0x23d   : > { %918 = vrot.lane.b32.xlu0 %v10188_v38, %s14438_s24  ;;  %v911_v15 = vpop.permute.xlu0 %910 }
 0x23e   : > { %v1067_v61 = vsel %vm14425_vm4, %v10129_v17, %v911_v15 }
 0x23f   : > { %916 = vrot.lane.b32.xlu1 %v10182_v9, %s14438_s24  ;;  %v909_v52 = vpop.permute.xlu1 %908  ;;  %v10379_v42 = vsel %vm1089_vm3, %v1067_v61, %v977_v51 }
 0x240   : > { %v1064_v41 = vsel %vm14425_vm4, %v10105_v40, %v909_v52  ;;  %v1641_v40 = vpop.f32.mrf.mxu0  ;;  %v979_v28 = vpop.permute.xlu2 %978  ;;  %v1277_v45 = vshll.u32 %v10379_v42, 16  ;;  %v1275_v50 = vshrl.u32 %v10379_v42, 16  ;;  %v1416_v58 = vrot.slane %v10379_v42, 1 }
 0x241   : > { %v1137_v4 = vsel %vm1089_vm3, %v1064_v41, %v975_v3  ;;  %v1642_v22 = vadd.f32 %v10221_v37, %v1641_v40 }
 0x242   : > { %v1271_v7 = vshll.u32 %v1137_v4, 16  ;;  %v1414_v31 = vrot.slane %v1137_v4, 1  ;;  %v1279_v53 = vrot.slane %v1277_v45, 1 }
 0x243   : > { %v1718_v49 = vmax.f32 %v1642_v22, 0.0 }
 0x244   : > { %v1273_v39 = vrot.slane %v1271_v7, 1  ;;  %v1415_v10 = vsel %vm1379_vm5, %v1413_v13, %v1414_v31  ;;  %v1280_v2 = vor.u32 %v1279_v53, %v1275_v50 }
 0x245   : > { %1450 = vrot.lane.b32.xlu0 %v1415_v10, %s14433_s26  ;;  %v1750_v34 = vpack.c.bf16 %v1718_v49, %v1718_v49 }
 0x246   : > { %v1274_v0 = vsel %vm14435_vm6, %v1270_v8, %v1273_v39 }
 0x247   : > { %1337 = vrot.lane.b32.xlu1 %v1274_v0, %s14431_s27  ;;  %v1814_v59 = vunpack.c.l.b16 %v1750_v34 }
 0x248   : > { %v1643_v19 = vpop.f32.mrf.mxu0  ;;  %v981_v11 = vpop.permute.xlu2 %980 }
 0x249   : > { %v1644_v43 = vadd.f32 %v10221_v37, %v1643_v19 }
 0x24b   : > { %v1719_v30 = vmax.f32 %v1644_v43, 0.0 }
 0x24d   : > { %922 = vrot.lane.b32.xlu0 %v10202_v35, %s14438_s24  ;;  %v1751_v32 = vpack.c.bf16 %v1719_v30, %v1719_v30 }
 0x24f   : > { %920 = vrot.lane.b32.xlu1 %v10196_v25, %s14438_s24  ;;  %v1815_v54 = vunpack.c.l.b16 %v1751_v32 }
 0x250   : > { %v1646_v24 = vpop.f32.mrf.mxu0  ;;  %v983_v15 = vpop.permute.xlu2 %982 }
 0x251   : > { %v1845_v3 = vpack.c.b16 %v1815_v54, %v1814_v59  ;;  %v1647_v13 = vadd.f32 %v10221_v37, %v1646_v24 }
 0x253   : > { %v1868_v0 = vshrl.u32 %v1845_v3, 16  ;;  %v1720_v40 = vmax.f32 %v1647_v13, 0.0 }
 0x255   : > { %v1870_v43 = vrot.slane %v1868_v0, 7  ;;  %v1752_v22 = vpack.c.bf16 %v1720_v40, %v1720_v40 }
 0x257   : > { %v1816_v32 = vunpack.c.l.b16 %v1752_v22 }
 0x258   : > { %v1648_v33 = vpop.f32.mrf.mxu0 }
 0x260   : > { %v1651_v8 = vpop.f32.mrf.mxu0 }
 0x268   : > { %v1653_v34 = vpop.f32.mrf.mxu0 }
 0x269   : > { %v1654_v53 = vadd.f32 %v10221_v37, %v1653_v34 }
 0x297   : > { %v1447_v20 = vpop.permute.xlu0 %1446 }
 0x299   : > { %v1334_v44 = vpop.permute.xlu1 %1333 }
 0x29a   : > { %v1480_v35 = vsel %vm14408_vm7, %v10308_v63, %v1334_v44 }
 0x29b   : > { %v1513_v47 = vsel %vm14429_vm8, %v1480_v35, %v1447_v20 }
 0x29c   : > { %9163 = vmatmul.msk.bf16.gmra.mxu0 %vm14407_vm9, %v1513_v47 }
 0x29f   : > { %v915_v17 = vpop.permute.xlu0 %914 }
 0x2a0   : > { %v1073_v21 = vsel %vm14425_vm4, %v10158_v26, %v915_v17 }
 0x2a1   : > { %v913_v48 = vpop.permute.xlu1 %912  ;;  %v10397_v4 = vsel %vm1089_vm3, %v1073_v21, %v981_v11 }
 0x2a2   : > { %v1070_v63 = vsel %vm14425_vm4, %v10144_v29, %v913_v48  ;;  %v1649_v29 = vadd.f32 %v10221_v37, %v1648_v33  ;;  %v1287_v10 = vshll.u32 %v10397_v4, 16  ;;  %v1285_v20 = vshrl.u32 %v10397_v4, 16 }
 0x2a3   : > { %v1141_v5 = vsel %vm1089_vm3, %v1070_v63, %v979_v28  ;;  %v1419_v44 = vrot.slane %v10397_v4, 1  ;;  %v1871_v28 = vshll.u32 %v1845_v3, 16  ;;  %v10444_v3 = vsel %vm9822_vm2, %v1870_v43, 0 }
 0x2a4   : > { %v1281_v56 = vshll.u32 %v1141_v5, 16  ;;  %v1417_v57 = vrot.slane %v1141_v5, 1  ;;  %v1721_v31 = vmax.f32 %v1649_v29, 0.0  ;;  %v1289_v61 = vrot.slane %v1287_v10, 1 }
 0x2a5   : > { %v1873_v45 = vor.u32 %v1871_v28, %v1870_v43 }
 0x2a6   : > { %v1283_v27 = vrot.slane %v1281_v56, 1  ;;  %v1418_v1 = vsel %vm1379_vm5, %v1416_v58, %v1417_v57  ;;  %v1753_v19 = vpack.c.bf16 %v1721_v31, %v1721_v31  ;;  %v1290_v17 = vor.u32 %v1289_v61, %v1285_v20 }
 0x2a7   : > { %1452 = vrot.lane.b32.xlu0 %v1418_v1, %s14433_s26  ;;  %v1449_v52 = vpop.permute.xlu0 %1448  ;;  %v10419_v33 = vsel %vm9822_vm2, 0, %v1873_v45  ;;  %v1652_v56 = vadd.f32 %v10221_v37, %v1651_v8 }
 0x2a8   : > { %v1284_v41 = vsel %vm14435_vm6, %v1280_v2, %v1283_v27  ;;  %v1817_v35 = vunpack.c.l.b16 %v1753_v19  ;;  %v1723_v27 = vmax.f32 %v1654_v53, 0.0  ;;  %v10439_v2 = vsel %vm9822_vm2, %v10254_v55, 0 }
 0x2a9   : > { %1339 = vrot.lane.b32.xlu1 %v1284_v41, %s14431_s27  ;;  %v1336_v7 = vpop.permute.xlu1 %1335  ;;  %v1722_v1 = vmax.f32 %v1652_v56, 0.0 }
 0x2aa   : > { %v1482_v26 = vsel %vm14408_vm7, %v10324_v12, %v1336_v7  ;;  %v1846_v63 = vpack.c.b16 %v1817_v35, %v1816_v32 }
 0x2ab   : > { %v1515_v39 = vsel %vm14429_vm8, %v1482_v26, %v1449_v52  ;;  %v1755_v52 = vpack.c.bf16 %v1723_v27, %v1723_v27  ;;  %v1754_v55 = vpack.c.bf16 %v1722_v1, %v1722_v1 }
 0x2ac   : > { %9164 = vmatmul.msk.bf16.gmra.mxu0 %vm14407_vm9, %v1515_v39  ;;  %v1875_v59 = vshrl.u32 %v1846_v63, 16  ;;  %v1878_v7 = vshll.u32 %v1846_v63, 16 }
 0x2ad   : > { %v1819_v0 = vunpack.c.l.b16 %v1755_v52 }
 0x2ae   : > { %v1877_v29 = vrot.slane %v1875_v59, 7 }
 0x2af   : > { %v919_v51 = vpop.permute.xlu0 %918 }
 0x2b0   : > { %v1880_v10 = vor.u32 %v1878_v7, %v1877_v29 }
 0x2b1   : > { %924 = vrot.lane.b32.xlu1 %v10208_v36, %s14438_s24  ;;  %v917_v12 = vpop.permute.xlu1 %916  ;;  %v1079_v36 = vsel %vm14425_vm4, %v10176_v6, %v919_v51  ;;  %v1818_v51 = vunpack.c.l.b16 %v1754_v55  ;;  %s14670_s24 = sshll.u32 %s14744_s19, 8 }
 0x2b2   : > { %v1076_v24 = vsel %vm14425_vm4, %v10170_v62, %v917_v12  ;;  %v985_v62 = vpop.permute.xlu2 %984  ;;  %v10458_v22 = vsel %vm9822_vm2, 0, %v1880_v10  ;;  %s14174_s21 = scalar_lea.vmem %s14406_s15, %s14670_s24 }
 0x2b3   : > { %v1145_v47 = vsel %vm1089_vm3, %v1076_v24, %v983_v15  ;;  %v10423_v11 = vsel %vm1089_vm3, %v1079_v36, %v985_v62  ;;  %v1847_v61 = vpack.c.b16 %v1819_v0, %v1818_v51  ;;  %v10468_v24 = vsel %vm9822_vm2, %v1877_v29, 0 }
 0x2b4   : > { %v1291_v30 = vshll.u32 %v1145_v47, 16  ;;  %v1420_v49 = vrot.slane %v1145_v47, 1  ;;  %v1297_v21 = vshll.u32 %v10423_v11, 16  ;;  %v1422_v8 = vrot.slane %v10423_v11, 1 }
 0x2b5   : > { %v1882_v12 = vshrl.u32 %v1847_v61, 16  ;;  %v1885_v28 = vshll.u32 %v1847_v61, 16 }
 0x2b6   : > { %v1293_v48 = vrot.slane %v1291_v30, 1  ;;  %v1421_v50 = vsel %vm1379_vm5, %v1419_v44, %v1420_v49  ;;  %v1299_v41 = vrot.slane %v1297_v21, 1  ;;  %v1656_v49 = vpop.f32.mrf.mxu0 }
 0x2b7   : > { %1454 = vrot.lane.b32.xlu2 %v1421_v50, %s14433_s26  ;;  %v1451_v54 = vpop.permute.xlu0 %1450  ;;  %v1884_v44 = vrot.slane %v1882_v12, 7 }
 0x2b8   : > { %v1294_v5 = vsel %vm14435_vm6, %v1290_v17, %v1293_v48 }
 0x2b9   : > { %2132 = vrot.lane.b32.xlu1 %v10419_v33, %s9712_s16  ;;  %1341 = vrot.lane.b32.xlu0 %v1294_v5, %s14431_s27  ;;  %v1338_v6 = vpop.permute.xlu1 %1337  ;;  %v1887_v35 = vor.u32 %v1885_v28, %v1884_v44  ;;  %v10482_v30 = vsel %vm9822_vm2, %v1884_v44, 0 }
 0x2ba   : > { %v1484_v57 = vsel %vm14408_vm7, %v10347_v60, %v1338_v6  ;;  %v1295_v60 = vshrl.u32 %v10423_v11, 16  ;;  %v987_v26 = vpop.permute.xlu2 %986 }
 0x2bb   : > { %v1517_v58 = vsel %vm14429_vm8, %v1484_v57, %v1451_v54  ;;  %v10476_v47 = vsel %vm9822_vm2, 0, %v1887_v35  ;;  %v1657_v57 = vadd.f32 %v10221_v37, %v1656_v49 }
 0x2bc   : > { %9165 = vmatmul.msk.bf16.gmra.mxu0 %vm14407_vm9, %v1517_v58  ;;  %v1300_v19 = vor.u32 %v1299_v41, %v1295_v60 }
 0x2bd   : > { %v1724_v29 = vmax.f32 %v1657_v57, 0.0 }
 0x2be   : > { %v1658_v45 = vpop.f32.mrf.mxu0 }
 0x2bf   : > { %2072 = vrot.lane.b32.xlu2 %v10419_v33, %s14436_s25  ;;  %v923_v17 = vpop.permute.xlu0 %922  ;;  %v1659_v6 = vadd.f32 %v10221_v37, %v1658_v45  ;;  %v1756_v10 = vpack.c.bf16 %v1724_v29, %v1724_v29 }
 0x2c0   : > { %v1085_v36 = vsel %vm14425_vm4, %v10188_v38, %v923_v17 }
 0x2c1   : > { %2134 = vrot.lane.b32.xlu1 %v10444_v3, %s9712_s16  ;;  %2070 = vrot.lane.b32.xlu0 %v10439_v2, %s14436_s25  ;;  %v921_v13 = vpop.permute.xlu1 %920 }
 0x2c2   : > { %v1082_v31 = vsel %vm14425_vm4, %v10182_v9, %v921_v13  ;;  %v10486_v34 = vpop.permute.xlu2 %9679 }
 0x2c3   : > { %v1149_v39 = vsel %vm1089_vm3, %v1082_v31, %v987_v26  ;;  %14489 = vst [vmem:[#allocation5_spill] sm:$0xff] %v10486_v34  ;;  %v14410_v48 = vunpack.i.l.bf16 %v10486_v34  ;;  %v14409_v58 = vunpack.i.h.bf16 %v10486_v34 }
 0x2c4   : > { %v1301_v40 = vshll.u32 %v1149_v39, 16  ;;  %v1423_v15 = vrot.slane %v1149_v39, 1 }
 0x2c5   : > { %v10496_v53 = vsel %vm1089_vm3, %v1085_v36, %v14410_v48 }
 0x2c6   : > { %v1303_v20 = vrot.slane %v1301_v40, 1  ;;  %v1424_v43 = vsel %vm1379_vm5, %v1422_v8, %v1423_v15  ;;  %v1661_v32 = vpop.f32.mrf.mxu0  ;;  %v1307_v38 = vshll.u32 %v10496_v53, 16  ;;  %v1305_v27 = vshrl.u32 %v10496_v53, 16 }
 0x2c7   : > { %1456 = vrot.lane.b32.xlu2 %v1424_v43, %s14433_s26  ;;  %v1425_v7 = vrot.slane %v10496_v53, 1  ;;  %v1662_v35 = vadd.f32 %v10221_v37, %v1661_v32 }
 0x2c8   : > { %v1304_v9 = vsel %vm14435_vm6, %v1300_v19, %v1303_v20  ;;  %v1309_v1 = vrot.slane %v1307_v38, 1  ;;  %v1820_v20 = vunpack.c.l.b16 %v1756_v10 }
 0x2c9   : > { %2136 = vrot.lane.b32.xlu1 %v10458_v22, %s9712_s16  ;;  %1343 = vrot.lane.b32.xlu0 %v1304_v9, %s14431_s27 }
 0x2ca   : > { %v2069_v56 = vpop.permute.xlu2 %2068  ;;  %v1310_v39 = vor.u32 %v1309_v1, %v1305_v27 }
 0x2cb   : > { %v2197_v19 = vsel %vm1089_vm3, %v9908_v16, %v2069_v56 }
 0x2ce   : > { %v1663_v54 = vpop.f32.mrf.mxu0 }
 0x2cf   : > { %2076 = vrot.lane.b32.xlu2 %v10458_v22, %s14436_s25  ;;  %v1664_v12 = vadd.f32 %v10221_v37, %v1663_v54 }
 0x2d1   : > { %2138 = vrot.lane.b32.xlu1 %v10468_v24, %s9712_s16  ;;  %2074 = vrot.lane.b32.xlu0 %v10444_v3, %s14436_s25  ;;  %v1727_v36 = vmax.f32 %v1664_v12, 0.0 }
 0x2d3   : > { %v1759_v57 = vpack.c.bf16 %v1727_v36, %v1727_v36 }
 0x2d6   : > { %v10510_v60 = vpop.f32.mrf.mxu0 }
 0x2d9   : > { %2140 = vrot.lane.b32.xlu1 %v10476_v47, %s9712_s16 }
 0x2de   : > { %v10527_v44 = vpop.f32.mrf.mxu0 }
 0x2e1   : > { %2142 = vrot.lane.b32.xlu1 %v10482_v30, %s9712_s16 }
 0x2e6   : > { %v10540_v1 = vpop.f32.mrf.mxu0 }
 0x311   : > { %v1455_v55 = vpop.permute.xlu2 %1454 }
 0x319   : > { %v1453_v63 = vpop.permute.xlu0 %1452  ;;  %v2073_v49 = vpop.permute.xlu2 %2072 }
 0x31b   : > { %v1340_v50 = vpop.permute.xlu1 %1339 }
 0x31c   : > { %v1486_v62 = vsel %vm14408_vm7, %v10379_v42, %v1340_v50  ;;  %v1725_v42 = vmax.f32 %v1659_v6, 0.0 }
 0x31d   : > { %v1519_v5 = vsel %vm14429_vm8, %v1486_v62, %v1453_v63  ;;  %v1726_v62 = vmax.f32 %v1662_v35, 0.0 }
 0x31e   : > { %9166 = vmatmul.msk.bf16.gmra.mxu0 %vm14407_vm9, %v1519_v5  ;;  %v1757_v26 = vpack.c.bf16 %v1725_v42, %v1725_v42 }
 0x320   : > { %v1821_v0 = vunpack.c.l.b16 %v1757_v26  ;;  %v2202_v26 = vsel %vm1089_vm3, %v10262_v18, %v2073_v49 }
 0x322   : > { %v1848_v9 = vpack.c.b16 %v1821_v0, %v1820_v20 }
 0x323   : > { %v925_v59 = vpop.permute.xlu1 %924 }
 0x324   : > { %v1088_v21 = vsel %vm14425_vm4, %v10196_v25, %v925_v59  ;;  %v1889_v17 = vshrl.u32 %v1848_v9, 16  ;;  %vm14427_vm4 = vcmask 1047559  }
 0x325   : > { %v1153_v52 = vsel %vm1089_vm3, %v1088_v21, %v14409_v58  ;;  %v1758_v21 = vpack.c.bf16 %v1726_v62, %v1726_v62 }
 0x326   : > { %v1311_v41 = vshll.u32 %v1153_v52, 16  ;;  %v1426_v13 = vrot.slane %v1153_v52, 1  ;;  %v1891_v38 = vrot.slane %v1889_v17, 7  ;;  %v1892_v52 = vshll.u32 %v1848_v9, 16  ;;  %v1673_v9 = vpop.f32.mrf.mxu0 }
 0x328   : > { %v1313_v31 = vrot.slane %v1311_v41, 1  ;;  %v1427_v8 = vsel %vm1379_vm5, %v1425_v7, %v1426_v13  ;;  %v1823_v7 = vunpack.c.l.b16 %v1759_v57  ;;  %v10564_v18 = vsel %vm9822_vm2, %v1891_v38, 0 }
 0x329   : > { %1458 = vrot.lane.b32.xlu2 %v1427_v8, %s14433_s26  ;;  %v1894_v8 = vor.u32 %v1892_v52, %v1891_v38 }
 0x32a   : > { %v1314_v25 = vsel %vm14435_vm6, %v1310_v39, %v1313_v31 }
 0x32b   : > { %v1342_v40 = vpop.permute.xlu0 %1341  ;;  %1345 = vrot.lane.b32.xlu0 %v1314_v25, %s14431_s27  ;;  %v2133_v15 = vpop.permute.xlu1 %2132  ;;  %v1822_v25 = vunpack.c.l.b16 %v1758_v21  ;;  %s14602_s27 = smov 24  }
 0x32c   : > { %v1488_v51 = vsel %vm14408_vm7, %v10397_v4, %v1342_v40  ;;  %v10522_v43 = vsel %vm2290_vm10, %v2197_v19, %v2133_v15  ;;  %v10558_v15 = vsel %vm9822_vm2, 0, %v1894_v8 }
 0x32d   : > { %v1521_v61 = vsel %vm14429_vm8, %v1488_v51, %v1455_v55  ;;  %v2357_v28 = vshll.u32 %v10522_v43, 16  ;;  %v2355_v54 = vshrl.u32 %v10522_v43, 16  ;;  %v2579_v6 = vrot.slane %v10522_v43, 1  ;;  %v1457_v55 = vpop.permute.xlu2 %1456 }
 0x32e   : > { %9167 = vmatmul.msk.bf16.gmra.mxu0 %vm14407_vm9, %v1521_v61  ;;  %v1849_v0 = vpack.c.b16 %v1823_v7, %v1822_v25  ;;  %v1672_v7 = vadd.f32 %v10221_v37, %v10540_v1 }
 0x32f   : > { %v2359_v50 = vrot.slane %v2357_v28, 1 }
 0x330   : > { %v1896_v61 = vshrl.u32 %v1849_v0, 16  ;;  %v1899_v62 = vshll.u32 %v1849_v0, 16  ;;  %v1730_v8 = vmax.f32 %v1672_v7, 0.0 }
 0x331   : > { %v2360_v27 = vor.u32 %v2359_v50, %v2355_v54 }
 0x332   : > { %v1898_v50 = vrot.slane %v1896_v61, 7  ;;  %v1762_v1 = vpack.c.bf16 %v1730_v8, %v1730_v8 }
 0x333   : > { %v2071_v45 = vpop.permute.xlu0 %2070  ;;  %2078 = vrot.lane.b32.xlu0 %v10468_v24, %s14436_s25  ;;  %v2135_v4 = vpop.permute.xlu1 %2134 }
 0x334   : > { %v2199_v63 = vsel %vm1089_vm3, %v9904_v14, %v2071_v45  ;;  %v1901_v54 = vor.u32 %v1899_v62, %v1898_v50  ;;  %v10593_v57 = vsel %vm9822_vm2, %v1898_v50, 0  ;;  %v1826_v61 = vunpack.c.l.b16 %v1762_v1 }
 0x335   : > { %v2294_v5 = vsel %vm2290_vm10, %v2199_v63, %v2135_v4 }
 0x336   : > { %v2361_v32 = vshll.u32 %v2294_v5, 16  ;;  %v2580_v56 = vrot.slane %v2294_v5, 1  ;;  %v1667_v5 = vadd.f32 %v10221_v37, %v10510_v60  ;;  %v10587_v38 = vsel %vm9822_vm2, 0, %v1901_v54  ;;  %v9590_v60 = vld [vmem:[%s14394_s3 + $0x78] sm:$0xff] }
 0x337   : > { %2993 = vmatpush.bf16.msra.mxu2 %v9590_v60 }
 0x338   : > { %v2363_v42 = vrot.slane %v2361_v32, 1  ;;  %v2581_v59 = vsel %vm1379_vm5, %v2579_v6, %v2580_v56  ;;  %v1676_v32 = vpop.f32.mrf.mxu0  ;;  %v1728_v56 = vmax.f32 %v1667_v5, 0.0 }
 0x339   : > { %2627 = vrot.lane.b32.xlu2 %v2581_v59, %s9713_s17  ;;  %v9589_v59 = vld [vmem:[%s14394_s3 + $0x70] sm:$0xff] }
 0x33a   : > { %v2364_v29 = vsel %vm14435_vm6, %v2360_v27, %v2363_v42  ;;  %v1760_v42 = vpack.c.bf16 %v1728_v56, %v1728_v56 }
 0x33b   : > { %v1344_v41 = vpop.permute.xlu0 %1343  ;;  %2080 = vrot.lane.b32.xlu0 %v10476_v47, %s14436_s25  ;;  %2515 = vrot.lane.b32.xlu1 %v2364_v29, %s14433_s26  ;;  %v2137_v13 = vpop.permute.xlu1 %2136 }
 0x33c   : > { %v1490_v31 = vsel %vm14408_vm7, %v10423_v11, %v1344_v41  ;;  %v10551_v39 = vsel %vm2290_vm10, %v2202_v26, %v2137_v13  ;;  %v1824_v21 = vunpack.c.l.b16 %v1760_v42  ;;  %2994 = vmatpush.bf16.msra.mxu2 %v9589_v59  ;;  %v1674_v41 = vadd.f32 %v10221_v37, %v1673_v9  ;;  %v9588_v13 = vld [vmem:[%s14394_s3 + $0x68] sm:$0xff]  ;;  %v9587_v26 = vld [vmem:[%s14394_s3 + $0x60] sm:$0xff] }
 0x33d   : > { %v1523_v10 = vsel %vm14429_vm8, %v1490_v31, %v1457_v55  ;;  %v2367_v40 = vshll.u32 %v10551_v39, 16  ;;  %v2365_v28 = vshrl.u32 %v10551_v39, 16  ;;  %v2582_v35 = vrot.slane %v10551_v39, 1  ;;  %v9580_v42 = vld [vmem:[%s14394_s3 + $0x28] sm:$0xff] }
 0x33e   : > { %9168 = vmatmul.msk.bf16.gmra.mxu0 %vm14407_vm9, %v1523_v10  ;;  %v1731_v55 = vmax.f32 %v1674_v41, 0.0 }
 0x33f   : > { %v2369_v51 = vrot.slane %v2367_v40, 1  ;;  %v9586_v40 = vld [vmem:[%s14394_s3 + $0x58] sm:$0xff] }
 0x340   : > { %v1678_v29 = vpop.f32.mrf.mxu0  ;;  %2995 = vmatpush.bf16.msra.mxu2 %v9588_v13  ;;  %v1763_v25 = vpack.c.bf16 %v1731_v55, %v1731_v55  ;;  %v9579_v13 = vld [vmem:[%s14394_s3 + $0x20] sm:$0xff] }
 0x341   : > { %2144 = vrot.lane.b32.xlu2 %v10558_v15, %s9712_s16  ;;  %v2370_v36 = vor.u32 %v2369_v51, %v2365_v28 }
 0x342   : > { %v1827_v51 = vunpack.c.l.b16 %v1763_v25 }
 0x343   : > { %v2075_v11 = vpop.permute.xlu0 %2074  ;;  %2082 = vrot.lane.b32.xlu0 %v10482_v30, %s14436_s25  ;;  %2146 = vrot.lane.b32.xlu1 %v10564_v18, %s9712_s16  ;;  %v2139_v19 = vpop.permute.xlu1 %2138 }
 0x344   : > { %v2205_v20 = vsel %vm1089_vm3, %v10439_v2, %v2075_v11  ;;  %v1669_v2 = vadd.f32 %v10221_v37, %v10527_v44  ;;  %2996 = vmatpush.bf16.msra.mxu2 %v9587_v26  ;;  %v1851_v9 = vpack.c.b16 %v1827_v51, %v1826_v61 }
 0x345   : > { %v2298_v12 = vsel %vm2290_vm10, %v2205_v20, %v2139_v19  ;;  %v9585_v19 = vld [vmem:[%s14394_s3 + $0x50] sm:$0xff] }
 0x346   : > { %v2371_v49 = vshll.u32 %v2298_v12, 16  ;;  %v2583_v45 = vrot.slane %v2298_v12, 1  ;;  %v1729_v6 = vmax.f32 %v1669_v2, 0.0  ;;  %v1679_v12 = vadd.f32 %v10221_v37, %v1678_v29 }
 0x347   : > { %v1910_v50 = vshrl.u32 %v1851_v9, 16 }
 0x348   : > { %v2373_v4 = vrot.slane %v2371_v49, 1  ;;  %v2584_v17 = vsel %vm1379_vm5, %v2582_v35, %v2583_v45  ;;  %v1761_v44 = vpack.c.bf16 %v1729_v6, %v1729_v6  ;;  %v1681_v10 = vpop.f32.mrf.mxu0  ;;  %2997 = vmatpush.bf16.msra.mxu2 %v9586_v40  ;;  %v9584_v49 = vld [vmem:[%s14394_s3 + $0x48] sm:$0xff]  ;;  %v9582_v45 = vld [vmem:[%s14394_s3 + $0x38] sm:$0xff]  ;;  %v1913_v6 = vshll.u32 %v1851_v9, 16 }
 0x349   : > { %2629 = vrot.lane.b32.xlu2 %v2584_v17, %s9713_s17  ;;  %2904 = vmatpush.bf16.msra.mxu1 %v9582_v45  ;;  %v9583_v17 = vld [vmem:[%s14394_s3 + $0x40] sm:$0xff]  ;;  %v1912_v5 = vrot.slane %v1910_v50, 7 }
 0x34a   : > { %v2374_v63 = vsel %vm14435_vm6, %v2370_v36, %v2373_v4  ;;  %v1825_v27 = vunpack.c.l.b16 %v1761_v44  ;;  %v1677_v4 = vadd.f32 %v10221_v37, %v1676_v32  ;;  %v1733_v36 = vmax.f32 %v1679_v12, 0.0  ;;  %v9581_v32 = vld [vmem:[%s14394_s3 + $0x30] sm:$0xff]  ;;  %v9576_v12 = vld [vmem:[%s14394_s3 + $0x8] sm:$0xff] }
 0x34b   : > { %2084 = vrot.lane.b32.xlu0 %v10558_v15, %s14436_s25  ;;  %2517 = vrot.lane.b32.xlu1 %v2374_v63, %s14433_s26  ;;  %v1915_v60 = vor.u32 %v1913_v6, %v1912_v5  ;;  %v10674_v25 = vsel %vm9822_vm2, %v1912_v5, 0 }
 0x34c   : > { %v1850_v52 = vpack.c.b16 %v1825_v27, %v1824_v21  ;;  %2998 = vmatpush.bf16.msra.mxu2 %v9585_v19  ;;  %v1732_v2 = vmax.f32 %v1677_v4, 0.0  ;;  %v1765_v63 = vpack.c.bf16 %v1733_v36, %v1733_v36  ;;  %v9575_v36 = vld [vmem:[%s14394_s3] sm:$0xff] }
 0x34d   : > { %2905 = vmatpush.bf16.msra.mxu1 %v9581_v32  ;;  %v10656_v29 = vsel %vm9822_vm2, 0, %v1915_v60 }
 0x34e   : > { %v1903_v31 = vshrl.u32 %v1850_v52, 16  ;;  %v1906_v11 = vshll.u32 %v1850_v52, 16  ;;  %v1764_v54 = vpack.c.bf16 %v1732_v2, %v1732_v2  ;;  %v1829_v44 = vunpack.c.l.b16 %v1765_v63  ;;  %v10663_v52 = vld [vmem:[%s14393_s2] ss:$0 sm:$0xff] }
 0x34f   : > { %v1682_v41 = vadd.f32 %v10663_v52, %v1681_v10  ;;  %v2077_v10 = vpop.permute.xlu2 %2076 }
 0x350   : > { %v1905_v0 = vrot.slane %v1903_v31, 7  ;;  %v1683_v35 = vpop.f32.mrf.mxu0  ;;  %2999 = vmatpush.bf16.msra.mxu2 %v9584_v49  ;;  %v1828_v59 = vunpack.c.l.b16 %v1764_v54  ;;  %v9578_v31 = vld [vmem:[%s14394_s3 + $0x18] sm:$0xff] }
 0x351   : > { %2148 = vrot.lane.b32.xlu2 %v10587_v38, %s9712_s16  ;;  %v1684_v21 = vadd.f32 %v10221_v37, %v1683_v35  ;;  %2906 = vmatpush.bf16.msra.mxu1 %v9580_v42  ;;  %v1734_v55 = vmax.f32 %v1682_v41, 0.0  ;;  %v2141_v41 = vpop.permute.xlu1 %2140 }
 0x352   : > { %v1908_v20 = vor.u32 %v1906_v11, %v1905_v0  ;;  %v10643_v62 = vsel %vm9822_vm2, %v1905_v0, 0  ;;  %v1852_v27 = vpack.c.b16 %v1829_v44, %v1828_v59  ;;  %v9577_v11 = vld [vmem:[%s14394_s3 + $0x10] sm:$0xff] }
 0x353   : > { %2086 = vrot.lane.b32.xlu0 %v10564_v18, %s14436_s25  ;;  %2150 = vrot.lane.b32.xlu1 %v10593_v57, %s9712_s16  ;;  %v1735_v37 = vmax.f32 %v1684_v21, 0.0  ;;  %v1766_v40 = vpack.c.bf16 %v1734_v55, %v1734_v55 }
 0x354   : > { %v10627_v28 = vsel %vm9822_vm2, 0, %v1908_v20  ;;  %3000 = vmatpush.bf16.msra.mxu2 %v9583_v17  ;;  %v1917_v7 = vshrl.u32 %v1852_v27, 16  ;;  %v1920_v1 = vshll.u32 %v1852_v27, 16 }
 0x355   : > { %2907 = vmatpush.bf16.msra.mxu1 %v9579_v13  ;;  %v1767_v8 = vpack.c.bf16 %v1735_v37, %v1735_v37  ;;  %v1830_v20 = vunpack.c.l.b16 %v1766_v40 }
 0x356   : > { %v1919_v0 = vrot.slane %v1917_v7, 7 }
 0x357   : > { %v1831_v19 = vunpack.c.l.b16 %v1767_v8  ;;  %v2208_v8 = vsel %vm1089_vm3, %v10419_v33, %v2077_v10 }
 0x358   : > { %v1686_v56 = vpop.f32.mrf.mxu0  ;;  %v1922_v51 = vor.u32 %v1920_v1, %v1919_v0  ;;  %v10697_v5 = vsel %vm9822_vm2, %v1919_v0, 0 }
 0x359   : > { %2908 = vmatpush.bf16.msra.mxu1 %v9578_v31  ;;  %v1853_v35 = vpack.c.b16 %v1831_v19, %v1830_v20  ;;  %v1687_v45 = vadd.f32 %v10663_v52, %v1686_v56 }
 0x35a   : > { %v10687_v49 = vsel %vm9822_vm2, 0, %v1922_v51 }
 0x35b   : > { %2088 = vrot.lane.b32.xlu0 %v10587_v38, %s14436_s25  ;;  %v1924_v50 = vshrl.u32 %v1853_v35, 16  ;;  %v1736_v2 = vmax.f32 %v1687_v45, 0.0  ;;  %v1927_v44 = vshll.u32 %v1853_v35, 16  ;;  %v2143_v35 = vpop.permute.xlu1 %2142 }
 0x35d   : > { %2909 = vmatpush.bf16.msra.mxu1 %v9577_v11  ;;  %v1926_v54 = vrot.slane %v1924_v50, 7  ;;  %v1768_v6 = vpack.c.bf16 %v1736_v2, %v1736_v2  ;;  %v10718_v11 = vsel %vm2290_vm10, %v2208_v8, %v2141_v41 }
 0x35f   : > { %v1929_v42 = vor.u32 %v1927_v44, %v1926_v54  ;;  %v1832_v59 = vunpack.c.l.b16 %v1768_v6  ;;  %v2585_v6 = vrot.slane %v10718_v11, 1 }
 0x360   : > { %v1688_v26 = vpop.f32.mrf.mxu0 }
 0x361   : > { %v1689_v61 = vadd.f32 %v10663_v52, %v1688_v26  ;;  %2910 = vmatpush.bf16.msra.mxu1 %v9576_v12  ;;  %v10708_v13 = vsel %vm9822_vm2, 0, %v1929_v42 }
 0x363   : > { %2090 = vrot.lane.b32.xlu0 %v10593_v57, %s14436_s25  ;;  %v1737_v17 = vmax.f32 %v1689_v61, 0.0  ;;  %v2377_v61 = vshll.u32 %v10718_v11, 16 }
 0x365   : > { %2911 = vmatpush.bf16.msra.mxu1 %v9575_v36  ;;  %v1769_v63 = vpack.c.bf16 %v1737_v17, %v1737_v17  ;;  %v2379_v36 = vrot.slane %v2377_v61, 1 }
 0x367   : > { %v1833_v60 = vunpack.c.l.b16 %v1769_v63 }
 0x368   : > { %v1691_v9 = vpop.f32.mrf.mxu0 }
 0x369   : > { %v1854_v27 = vpack.c.b16 %v1833_v60, %v1832_v59  ;;  %v1692_v37 = vadd.f32 %v10663_v52, %v1691_v9  ;;  %v10725_v9 = vsel %vm9822_vm2, %v1926_v54, 0  ;;  %v2375_v54 = vshrl.u32 %v10718_v11, 16 }
 0x36b   : > { %2092 = vrot.lane.b32.xlu0 %v10627_v28, %s14436_s25  ;;  %v1931_v55 = vshrl.u32 %v1854_v27, 16  ;;  %v1738_v1 = vmax.f32 %v1692_v37, 0.0  ;;  %v1934_v33 = vshll.u32 %v1854_v27, 16 }
 0x36d   : > { %v1933_v51 = vrot.slane %v1931_v55, 7  ;;  %v1770_v10 = vpack.c.bf16 %v1738_v1, %v1738_v1 }
 0x36f   : > { %v1834_v2 = vunpack.c.l.b16 %v1770_v10 }
 0x370   : > { %v1693_v32 = vpop.f32.mrf.mxu0 }
 0x371   : > { %v1694_v21 = vadd.f32 %v10663_v52, %v1693_v32 }
 0x373   : > { %2094 = vrot.lane.b32.xlu0 %v10643_v62, %s14436_s25  ;;  %v1739_v0 = vmax.f32 %v1694_v21, 0.0 }
 0x375   : > { %v1771_v20 = vpack.c.bf16 %v1739_v0, %v1739_v0 }
 0x377   : > { %v1835_v17 = vunpack.c.l.b16 %v1771_v20 }
 0x379   : > { %v1855_v59 = vpack.c.b16 %v1835_v17, %v1834_v2 }
 0x37b   : > { %2096 = vrot.lane.b32.xlu0 %v10656_v29, %s14436_s25 }
 0x383   : > { %2098 = vrot.lane.b32.xlu0 %v10674_v25, %s14436_s25  ;;  %v1459_v4 = vpop.permute.xlu2 %1458 }
 0x38b   : > { %2100 = vrot.lane.b32.xlu0 %v10687_v49, %s14436_s25 }
 0x393   : > { %2102 = vrot.lane.b32.xlu0 %v10697_v5, %s14436_s25  ;;  %v10701_v56 = vpop.permute.xlu2 %2627 }
 0x394   : > { %9234 = vmatmul.msk.bf16.vlgmr.msra.gmra.mxu2 %vm1089_vm3, %v10701_v56 }
 0x39b   : > { %v1696_v7 = vpop.f32.mrf.mxu0  ;;  %2104 = vrot.lane.b32.xlu0 %v10708_v13, %s14436_s25  ;;  %v2145_v26 = vpop.permute.xlu2 %2144 }
 0x39c   : > { %v1697_v41 = vadd.f32 %v10663_v52, %v1696_v7 }
 0x39d   : > { %v1346_v31 = vpop.permute.xlu0 %1345 }
 0x39e   : > { %v1492_v40 = vsel %vm14408_vm7, %v10496_v53, %v1346_v31  ;;  %vm14428_vm7 = vcmask 1046534  }
 0x39f   : > { %v1525_v19 = vsel %vm14429_vm8, %v1492_v40, %v1459_v4  ;;  %v1936_v4 = vor.u32 %v1934_v33, %v1933_v51  ;;  %v1938_v40 = vshrl.u32 %v1855_v59, 16 }
 0x3a0   : > { %9169 = vmatmul.msk.bf16.gmra.mxu0 %vm14407_vm9, %v1525_v19  ;;  %v1740_v19 = vmax.f32 %v1697_v41, 0.0  ;;  %vm4691_vm9 = vcmask 1045509  }
 0x3a1   : > { %v10741_v42 = vsel %vm9822_vm2, 0, %v1936_v4 }
 0x3a3   : > { %v1698_v12 = vpop.f32.mrf.mxu0  ;;  %2106 = vrot.lane.b32.xlu0 %v10725_v9, %s14436_s25  ;;  %v10729_v53 = vpop.permute.xlu2 %2629 }
 0x3a4   : > { %9235 = vmatmul.msk.bf16.gmra.mxu2 %vm1089_vm3, %v10729_v53  ;;  %v1699_v60 = vadd.f32 %v10663_v52, %v1698_v12  ;;  %v10762_v12 = vsel %vm9822_vm2, %v1933_v51, 0 }
 0x3a5   : > { %v2079_v45 = vpop.permute.xlu0 %2078 }
 0x3a6   : > { %v2211_v50 = vsel %vm1089_vm3, %v10444_v3, %v2079_v45  ;;  %v2380_v3 = vor.u32 %v2379_v36, %v2375_v54  ;;  %v1741_v31 = vmax.f32 %v1699_v60, 0.0 }
 0x3a7   : > { %v2302_v63 = vsel %vm2290_vm10, %v2211_v50, %v2143_v35  ;;  %v1772_v35 = vpack.c.bf16 %v1740_v19, %v1740_v19 }
 0x3a8   : > { %v2381_v32 = vshll.u32 %v2302_v63, 16  ;;  %v2586_v44 = vrot.slane %v2302_v63, 1  ;;  %v1773_v61 = vpack.c.bf16 %v1741_v31, %v1741_v31 }
 0x3a9   : > { %v1836_v50 = vunpack.c.l.b16 %v1772_v35 }
 0x3aa   : > { %v2383_v27 = vrot.slane %v2381_v32, 1  ;;  %v2587_v21 = vsel %vm1379_vm5, %v2585_v6, %v2586_v44 }
 0x3ab   : > { %v1701_v37 = vpop.f32.mrf.mxu0  ;;  %2108 = vrot.lane.b32.xlu0 %v10741_v42, %s14436_s25  ;;  %2631 = vrot.lane.b32.xlu2 %v2587_v21, %s9713_s17 }
 0x3ac   : > { %v2384_v55 = vsel %vm14435_vm6, %v2380_v3, %v2383_v27  ;;  %v1702_v3 = vadd.f32 %v10663_v52, %v1701_v37 }
 0x3ad   : > { %v2081_v8 = vpop.permute.xlu0 %2080  ;;  %2519 = vrot.lane.b32.xlu1 %v2384_v55, %s14433_s26  ;;  %v2516_v0 = vpop.permute.xlu1 %2515 }
 0x3ae   : > { %v2214_v1 = vsel %vm1089_vm3, %v10458_v22, %v2081_v8  ;;  %v2660_v20 = vsel %vm14429_vm8, %v10522_v43, %v2516_v0  ;;  %v1940_v22 = vrot.slane %v1938_v40, 7  ;;  %v1941_v43 = vshll.u32 %v1855_v59, 16 }
 0x3af   : > { %v10753_v7 = vsel %vm2290_vm10, %v2214_v1, %v2145_v26  ;;  %v2693_v33 = vsel %vm2691_vm11, %v2660_v20, %v10701_v56  ;;  %v1837_v26 = vunpack.c.l.b16 %v1773_v61  ;;  %v2149_v1 = vpop.permute.xlu2 %2148  ;;  %v1742_v20 = vmax.f32 %v1702_v3, 0.0 }
 0x3b0   : > { %v2387_v10 = vshll.u32 %v10753_v7, 16  ;;  %2912 = vmatmul.bf16.vlgmr.msra.gmra.mxu1 %v2693_v33  ;;  %v1943_v17 = vor.u32 %v1941_v43, %v1940_v22  ;;  %v2385_v63 = vshrl.u32 %v10753_v7, 16  ;;  %v2588_v32 = vrot.slane %v10753_v7, 1 }
 0x3b1   : > { %v1856_v44 = vpack.c.b16 %v1837_v26, %v1836_v50  ;;  %v10799_v43 = vsel %vm9822_vm2, %v1940_v22, 0  ;;  %v1774_v26 = vpack.c.bf16 %v1742_v20, %v1742_v20 }
 0x3b2   : > { %v2389_v36 = vrot.slane %v2387_v10, 1  ;;  %v10778_v27 = vsel %vm9822_vm2, 0, %v1943_v17 }
 0x3b3   : > { %v1703_v45 = vpop.f32.mrf.mxu0  ;;  %2110 = vrot.lane.b32.xlu0 %v10762_v12, %s14436_s25  ;;  %2152 = vrot.lane.b32.xlu2 %v10627_v28, %s9712_s16  ;;  %v1945_v31 = vshrl.u32 %v1856_v44, 16  ;;  %v1838_v17 = vunpack.c.l.b16 %v1774_v26 }
 0x3b4   : > { %v1704_v60 = vadd.f32 %v10663_v52, %v1703_v45  ;;  %v2390_v21 = vor.u32 %v2389_v36, %v2385_v63 }
 0x3b5   : > { %v2083_v4 = vpop.permute.xlu0 %2082  ;;  %2154 = vrot.lane.b32.xlu1 %v10643_v62, %s9712_s16  ;;  %v2147_v56 = vpop.permute.xlu1 %2146  ;;  %v1947_v33 = vrot.slane %v1945_v31, 7 }
 0x3b6   : > { %v2217_v51 = vsel %vm1089_vm3, %v10468_v24, %v2083_v4  ;;  %v1743_v8 = vmax.f32 %v1704_v60, 0.0 }
 0x3b7   : > { %v2306_v2 = vsel %vm2290_vm10, %v2217_v51, %v2147_v56 }
 0x3b8   : > { %v2391_v54 = vshll.u32 %v2306_v2, 16  ;;  %v2589_v6 = vrot.slane %v2306_v2, 1  ;;  %v1775_v10 = vpack.c.bf16 %v1743_v8, %v1743_v8 }
 0x3ba   : > { %v2393_v59 = vrot.slane %v2391_v54, 1  ;;  %v2590_v24 = vsel %vm1379_vm5, %v2588_v32, %v2589_v6 }
 0x3bb   : > { %2112 = vrot.lane.b32.xlu0 %v10778_v27, %s14436_s25  ;;  %2633 = vrot.lane.b32.xlu2 %v2590_v24, %s9713_s17  ;;  %v1706_v41 = vpop.f32.mrf.mxu0 }
 0x3bc   : > { %v2394_v55 = vsel %vm14435_vm6, %v2390_v21, %v2393_v59  ;;  %v1707_v21 = vadd.f32 %v10663_v52, %v1706_v41 }
 0x3bd   : > { %v2085_v0 = vpop.permute.xlu0 %2084  ;;  %2521 = vrot.lane.b32.xlu1 %v2394_v55, %s14433_s26  ;;  %v2518_v40 = vpop.permute.xlu1 %2517 }
 0x3be   : > { %v2220_v19 = vsel %vm1089_vm3, %v10476_v47, %v2085_v0  ;;  %v2662_v61 = vsel %vm14429_vm8, %v10551_v39, %v2518_v40  ;;  %v1948_v47 = vshll.u32 %v1856_v44, 16  ;;  %v1839_v39 = vunpack.c.l.b16 %v1775_v10 }
 0x3bf   : > { %v10790_v37 = vsel %vm2290_vm10, %v2220_v19, %v2149_v1  ;;  %v2696_v35 = vsel %vm2691_vm11, %v2662_v61, %v10729_v53  ;;  %v1744_v8 = vmax.f32 %v1707_v21, 0.0  ;;  %v10826_v1 = vsel %vm9822_vm2, %v1947_v33, 0 }
 0x3c0   : > { %v2397_v45 = vshll.u32 %v10790_v37, 16  ;;  %2917 = vmatmul.bf16.gmra.mxu1 %v2696_v35  ;;  %v1950_v56 = vor.u32 %v1948_v47, %v1947_v33  ;;  %v2395_v2 = vshrl.u32 %v10790_v37, 16  ;;  %v2591_v6 = vrot.slane %v10790_v37, 1 }
 0x3c1   : > { %v1857_v32 = vpack.c.b16 %v1839_v39, %v1838_v17  ;;  %v1776_v19 = vpack.c.bf16 %v1744_v8, %v1744_v8 }
 0x3c2   : > { %v2399_v22 = vrot.slane %v2397_v45, 1  ;;  %v10814_v44 = vsel %vm9822_vm2, 0, %v1950_v56 }
 0x3c3   : > { %2114 = vrot.lane.b32.xlu0 %v10799_v43, %s14436_s25  ;;  %2156 = vrot.lane.b32.xlu2 %v10656_v29, %s9712_s16  ;;  %v1708_v36 = vpop.f32.mrf.mxu0  ;;  %v1952_v55 = vshrl.u32 %v1857_v32, 16  ;;  %v1955_v41 = vshll.u32 %v1857_v32, 16  ;;  %v1840_v10 = vunpack.c.l.b16 %v1776_v19 }
 0x3c4   : > { %v1709_v60 = vadd.f32 %v10663_v52, %v1708_v36  ;;  %v2400_v24 = vor.u32 %v2399_v22, %v2395_v2 }
 0x3c5   : > { %v2087_v4 = vpop.permute.xlu0 %2086  ;;  %2158 = vrot.lane.b32.xlu1 %v10674_v25, %s9712_s16  ;;  %v2151_v53 = vpop.permute.xlu1 %2150  ;;  %v1954_v0 = vrot.slane %v1952_v55, 7 }
 0x3c6   : > { %v2223_v51 = vsel %vm1089_vm3, %v10482_v30, %v2087_v4  ;;  %v1745_v31 = vmax.f32 %v1709_v60, 0.0 }
 0x3c7   : > { %v2310_v50 = vsel %vm2290_vm10, %v2223_v51, %v2151_v53  ;;  %v1957_v61 = vor.u32 %v1955_v41, %v1954_v0  ;;  %v10842_v26 = vsel %vm9822_vm2, %v1954_v0, 0 }
 0x3c8   : > { %v2401_v63 = vshll.u32 %v2310_v50, 16  ;;  %v2592_v54 = vrot.slane %v2310_v50, 1  ;;  %v1777_v40 = vpack.c.bf16 %v1745_v31, %v1745_v31  ;;  %14491 = vst [vmem:[#allocation7_spill] sm:$0xff] %v10842_v26 }
 0x3c9   : > { %v10836_v45 = vsel %vm9822_vm2, 0, %v1957_v61 }
 0x3ca   : > { %v2403_v59 = vrot.slane %v2401_v63, 1  ;;  %v2593_v30 = vsel %vm1379_vm5, %v2591_v6, %v2592_v54  ;;  %v1841_v20 = vunpack.c.l.b16 %v1777_v40  ;;  %14490 = vst [vmem:[#allocation6_spill] sm:$0xff] %v10836_v45 }
 0x3cb   : > { %2116 = vrot.lane.b32.xlu0 %v10814_v44, %s14436_s25  ;;  %2635 = vrot.lane.b32.xlu2 %v2593_v30, %s9713_s17 }
 0x3cc   : > { %v2404_v3 = vsel %vm14435_vm6, %v2400_v24, %v2403_v59  ;;  %v1858_v35 = vpack.c.b16 %v1841_v20, %v1840_v10 }
 0x3cd   : > { %2523 = vrot.lane.b32.xlu1 %v2404_v3, %s14433_s26  ;;  %v2089_v36 = vpop.permute.xlu0 %2088 }
 0x3ce   : > { %v1959_v33 = vshrl.u32 %v1858_v35, 16  ;;  %v1962_v39 = vshll.u32 %v1858_v35, 16  ;;  %v2226_v63 = vsel %vm1089_vm3, %v10558_v15, %v2089_v36 }
 0x3d0   : > { %v1961_v47 = vrot.slane %v1959_v33, 7 }
 0x3d2   : > { %v1964_v4 = vor.u32 %v1962_v39, %v1961_v47  ;;  %v10854_v56 = vsel %vm9822_vm2, %v1961_v47, 0 }
 0x3d3   : > { %2118 = vrot.lane.b32.xlu0 %v10826_v1, %s14436_s25  ;;  %2160 = vrot.lane.b32.xlu2 %v10687_v49, %s9712_s16  ;;  %14493 = vst [vmem:[#allocation9_spill] sm:$0xff] %v10854_v56 }
 0x3d4   : > { %v10848_v53 = vsel %vm9822_vm2, 0, %v1964_v4  ;;  %v10885_v4 = vld [vmem:[%s14395_s4] ss:$0 sm:$0xff] }
 0x3d5   : > { %2162 = vrot.lane.b32.xlu1 %v10697_v5, %s9712_s16  ;;  %14492 = vst [vmem:[#allocation8_spill] sm:$0xff] %v10848_v53  ;;  %v2091_v24 = vpop.permute.xlu0 %2090 }
 0x3d6   : > { %v2229_v31 = vsel %vm1089_vm3, %v10564_v18, %v2091_v24 }
 0x3db   : > { %2120 = vrot.lane.b32.xlu0 %v10836_v45, %s14436_s25 }
 0x3e3   : > { %2122 = vrot.lane.b32.xlu0 %v10842_v26, %s14436_s25 }
 0x3eb   : > { %2124 = vrot.lane.b32.xlu0 %v10848_v53, %s14436_s25 }
 0x3f3   : > { %2126 = vrot.lane.b32.xlu0 %v10854_v56, %s14436_s25 }
 0x405   : > { %v2632_v51 = vpop.permute.xlu2 %2631 }
 0x406   : > { %9236 = vmatmul.msk.bf16.gmra.mxu2 %vm1089_vm3, %v2632_v51 }
 0x40d   : > { %v2153_v22 = vpop.permute.xlu2 %2152 }
 0x40e   : > { %v10863_v6 = vsel %vm2290_vm10, %v2226_v63, %v2153_v22 }
 0x40f   : > { %v2407_v30 = vshll.u32 %v10863_v6, 16  ;;  %v2405_v19 = vshrl.u32 %v10863_v6, 16  ;;  %v2594_v20 = vrot.slane %v10863_v6, 1 }
 0x411   : > { %v2409_v8 = vrot.slane %v2407_v30, 1 }
 0x413   : > { %v2410_v18 = vor.u32 %v2409_v8, %v2405_v19 }
 0x415   : > { %v2634_v17 = vpop.permute.xlu2 %2633 }
 0x416   : > { %9237 = vmatmul.msk.bf16.gmra.mxu2 %vm1089_vm3, %v2634_v17 }
 0x41d   : > { %v1711_v50 = vpop.f32.mrf.mxu0  ;;  %v2157_v2 = vpop.permute.xlu2 %2156 }
 0x41e   : > { %v1712_v32 = vadd.f32 %v10663_v52, %v1711_v50  ;;  %v2093_v50 = vpop.permute.xlu0 %2092 }
 0x41f   : > { %v2520_v54 = vpop.permute.xlu1 %2519 }
 0x420   : > { %v2664_v60 = vsel %vm14429_vm8, %v10718_v11, %v2520_v54  ;;  %v1746_v21 = vmax.f32 %v1712_v32, 0.0 }
 0x421   : > { %v2699_v59 = vsel %vm2691_vm11, %v2664_v60, %v2632_v51  ;;  %v3002_v60 = vpop.f32.mrf.mxu2 }
 0x422   : > { %2922 = vmatmul.bf16.gmra.mxu1 %v2699_v59  ;;  %v1778_v0 = vpack.c.bf16 %v1746_v21, %v1746_v21 }
 0x424   : > { %v1842_v47 = vunpack.c.l.b16 %v1778_v0 }
 0x425   : > { %v1713_v3 = vpop.f32.mrf.mxu0  ;;  %v10871_v15 = vpop.permute.xlu2 %2635 }
 0x426   : > { %v1714_v55 = vadd.f32 %v10663_v52, %v1713_v3  ;;  %9238 = vmatmul.msk.bf16.gmra.mxu2 %vm1089_vm3, %v10871_v15 }
 0x427   : > { %v2155_v11 = vpop.permute.xlu1 %2154 }
 0x428   : > { %v1747_v40 = vmax.f32 %v1714_v55, 0.0  ;;  %v2314_v41 = vsel %vm2290_vm10, %v2229_v31, %v2155_v11 }
 0x429   : > { %v2411_v61 = vshll.u32 %v2314_v41, 16  ;;  %v2595_v52 = vrot.slane %v2314_v41, 1 }
 0x42a   : > { %v1779_v10 = vpack.c.bf16 %v1747_v40, %v1747_v40 }
 0x42b   : > { %v2413_v35 = vrot.slane %v2411_v61, 1  ;;  %v2596_v33 = vsel %vm1379_vm5, %v2594_v20, %v2595_v52 }
 0x42c   : > { %v1843_v39 = vunpack.c.l.b16 %v1779_v10  ;;  %2637 = vrot.lane.b32.xlu2 %v2596_v33, %s9713_s17 }
 0x42d   : > { %v2414_v51 = vsel %vm14435_vm6, %v2410_v18, %v2413_v35  ;;  %v2913_v36 = vpop.f32.mrf.mxu1  ;;  %v10914_v35 = vpop.f32.mrf.mxu2 }
 0x42e   : > { %v1859_v22 = vpack.c.b16 %v1843_v39, %v1842_v47  ;;  %2525 = vrot.lane.b32.xlu1 %v2414_v51, %s14433_s26  ;;  %v2914_v54 = vadd.f32 %v10885_v4, %v2913_v36 }
 0x42f   : > { %v2522_v32 = vpop.permute.xlu1 %2521 }
 0x430   : > { %v1966_v63 = vshrl.u32 %v1859_v22, 16  ;;  %v2666_v59 = vsel %vm14429_vm8, %v10753_v7, %v2522_v32  ;;  %v1969_v24 = vshll.u32 %v1859_v22, 16  ;;  %v3003_v21 = vadd.f32 %v3002_v60, %v2914_v54 }
 0x431   : > { %v2702_v3 = vsel %vm2691_vm11, %v2666_v59, %v2634_v17  ;;  %v2232_v7 = vsel %vm1089_vm3, %v10587_v38, %v2093_v50  ;;  %v2095_v17 = vpop.permute.xlu0 %2094 }
 0x432   : > { %v1968_v30 = vrot.slane %v1966_v63, 7  ;;  %2927 = vmatmul.bf16.gmra.mxu1 %v2702_v3  ;;  %v3082_v31 = vmax.f32 %v3003_v21, 0.0  ;;  %v10906_v11 = vsel %vm2290_vm10, %v2232_v7, %v2157_v2  ;;  %v2235_v61 = vsel %vm1089_vm3, %v10593_v57, %v2095_v17 }
 0x433   : > { %v2417_v52 = vshll.u32 %v10906_v11, 16  ;;  %v2415_v50 = vshrl.u32 %v10906_v11, 16  ;;  %v2597_v59 = vrot.slane %v10906_v11, 1 }
 0x434   : > { %2164 = vrot.lane.b32.xlu2 %v10708_v13, %s9712_s16  ;;  %v1971_v55 = vor.u32 %v1969_v24, %v1968_v30  ;;  %v3146_v40 = vrot.slane %v3082_v31, 2  ;;  %v3147_v41 = vrot.slane %v3082_v31, 4  ;;  %v3148_v20 = vrot.slane %v3082_v31, 6 }
 0x435   : > { %v10908_v0 = vpop.f32.mrf.mxu1  ;;  %v3339_v10 = vsel %vm3338_vm12, %v3082_v31, -inf  ;;  %v10921_v18 = vsel %vm9822_vm2, %v1968_v30, 0  ;;  %v2419_v57 = vrot.slane %v2417_v52, 1 }
 0x436   : > { %2166 = vrot.lane.b32.xlu1 %v10725_v9, %s9712_s16  ;;  %v10899_v8 = vsel %vm9822_vm2, 0, %v1971_v55  ;;  %v3346_v2 = vsel %vm3338_vm12, %v3146_v40, -inf  ;;  %v3353_v33 = vsel %vm3338_vm12, %v3147_v41, -inf  ;;  %v3340_v47 = vrot.slane %v3339_v10, 4  ;;  %v3007_v41 = vpop.f32.mrf.mxu2 }
 0x437   : > { %2128 = vrot.lane.b32.xlu0 %v10899_v8, %s14436_s25  ;;  %v2159_v19 = vpop.permute.xlu1 %2158  ;;  %v3360_v39 = vsel %vm3338_vm12, %v3148_v20, -inf  ;;  %v3347_v22 = vrot.slane %v3346_v2, 4  ;;  %v3354_v36 = vrot.slane %v3353_v33, 4  ;;  %v2420_v24 = vor.u32 %v2419_v57, %v2415_v50 }
 0x438   : > { %v2318_v38 = vsel %vm2290_vm10, %v2235_v61, %v2159_v19  ;;  %v3361_v63 = vrot.slane %v3360_v39, 4  ;;  %v3341_v32 = vmax.f32 %v3339_v10, %v3340_v47 }
 0x439   : > { %v2421_v51 = vshll.u32 %v2318_v38, 16  ;;  %v2598_v54 = vrot.slane %v2318_v38, 1  ;;  %v3348_v21 = vmax.f32 %v3346_v2, %v3347_v22  ;;  %v3355_v3 = vmax.f32 %v3353_v33, %v3354_v36  ;;  %v2097_v47 = vpop.permute.xlu0 %2096 }
 0x43a   : > { %v3362_v31 = vmax.f32 %v3360_v39, %v3361_v63  ;;  %v3342_v19 = vrot.slane %v3341_v32, 2 }
 0x43b   : > { %v2423_v30 = vrot.slane %v2421_v51, 1  ;;  %v2599_v7 = vsel %vm1379_vm5, %v2597_v59, %v2598_v54  ;;  %v3349_v52 = vrot.slane %v3348_v21, 2  ;;  %v3356_v10 = vrot.slane %v3355_v3, 2 }
 0x43c   : > { %2639 = vrot.lane.b32.xlu2 %v2599_v7, %s9713_s17  ;;  %v3363_v38 = vrot.slane %v3362_v31, 2  ;;  %v3343_v39 = vmax.f32 %v3341_v32, %v3342_v19 }
 0x43d   : > { %v2918_v60 = vpop.f32.mrf.mxu1  ;;  %v2424_v40 = vsel %vm14435_vm6, %v2420_v24, %v2423_v30  ;;  %v3350_v50 = vmax.f32 %v3348_v21, %v3349_v52  ;;  %v3357_v63 = vmax.f32 %v3355_v3, %v3356_v10  ;;  %v2161_v3 = vpop.permute.xlu2 %2160 }
 0x43e   : > { %v2919_v17 = vadd.f32 %v10885_v4, %v2918_v60  ;;  %2527 = vrot.lane.b32.xlu1 %v2424_v40, %s14433_s26  ;;  %v3364_v60 = vmax.f32 %v3362_v31, %v3363_v38  ;;  %v3344_v21 = vrot.slane %v3343_v39, 1 }
 0x43f   : > { %2130 = vrot.lane.b32.xlu0 %v10921_v18, %s14436_s25  ;;  %v2524_v55 = vpop.permute.xlu1 %2523  ;;  %v3351_v19 = vrot.slane %v3350_v50, 1 }
 0x440   : > { %v3008_v20 = vadd.f32 %v3007_v41, %v2919_v17  ;;  %v2668_v61 = vsel %vm14429_vm8, %v10790_v37, %v2524_v55  ;;  %v2238_v41 = vsel %vm1089_vm3, %v10627_v28, %v2097_v47 }
 0x441   : > { %v2705_v33 = vsel %vm2691_vm11, %v2668_v61, %v10871_v15  ;;  %v3365_v61 = vrot.slane %v3364_v60, 1 }
 0x442   : > { %v3084_v2 = vmax.f32 %v3008_v20, 0.0  ;;  %2932 = vmatmul.bf16.gmra.mxu1 %v2705_v33  ;;  %v3358_v20 = vrot.slane %v3357_v63, 1  ;;  %v3345_v33 = vmax.f32 %v3343_v39, %v3344_v21 }
 0x444   : > { %v3152_v57 = vrot.slane %v3084_v2, 2  ;;  %v3153_v51 = vrot.slane %v3084_v2, 4  ;;  %v3154_v22 = vrot.slane %v3084_v2, 6  ;;  %v3395_v36 = vsel %vm3338_vm12, %v3084_v2, -inf  ;;  %2168 = vrot.lane.b32.xlu2 %v10741_v42, %s9712_s16 }
 0x445   : > { %v3396_v54 = vrot.slane %v3395_v36, 4  ;;  %v4235_v39 = vsel %vm2290_vm10, %v3345_v33, -inf }
 0x446   : > { %v3402_v37 = vsel %vm3338_vm12, %v3152_v57, -inf  ;;  %v3409_v59 = vsel %vm3338_vm12, %v3153_v51, -inf  ;;  %v3416_v30 = vsel %vm3338_vm12, %v3154_v22, -inf  ;;  %2170 = vrot.lane.b32.xlu1 %v10762_v12, %s9712_s16  ;;  %v10948_v57 = vsel %vm2290_vm10, %v2238_v41, %v2161_v3  ;;  %v2099_v51 = vpop.permute.xlu0 %2098 }
 0x447   : > { %v3397_v24 = vmax.f32 %v3395_v36, %v3396_v54  ;;  %v3403_v15 = vrot.slane %v3402_v37, 4  ;;  %v3410_v55 = vrot.slane %v3409_v59, 4  ;;  %v3417_v32 = vrot.slane %v3416_v30, 4 }
 0x448   : > { %v2427_v21 = vshll.u32 %v10948_v57, 16 }
 0x449   : > { %v3398_v7 = vrot.slane %v3397_v24, 2  ;;  %v3404_v31 = vmax.f32 %v3402_v37, %v3403_v15  ;;  %v3411_v17 = vmax.f32 %v3409_v59, %v3410_v55  ;;  %v3418_v40 = vmax.f32 %v3416_v30, %v3417_v32 }
 0x44a   : > { %v3352_v59 = vmax.f32 %v3350_v50, %v3351_v19  ;;  %v3359_v30 = vmax.f32 %v3357_v63, %v3358_v20  ;;  %v3366_v15 = vmax.f32 %v3364_v60, %v3365_v61 }
 0x44b   : > { %v3399_v52 = vmax.f32 %v3397_v24, %v3398_v7  ;;  %v3405_v10 = vrot.slane %v3404_v31, 2  ;;  %v3412_v38 = vrot.slane %v3411_v17, 2  ;;  %v3419_v2 = vrot.slane %v3418_v40, 2  ;;  %v2163_v24 = vpop.permute.xlu1 %2162 }
 0x44c   : > { %v2241_v7 = vsel %vm1089_vm3, %v10643_v62, %v2099_v51  ;;  %v4238_v50 = vsel %vm2290_vm10, %v3352_v59, -inf  ;;  %v4241_v63 = vsel %vm2290_vm10, %v3359_v30, -inf  ;;  %v4244_v19 = vsel %vm2290_vm10, %v3366_v15, -inf }
 0x44d   : > { %v3400_v22 = vrot.slane %v3399_v52, 1  ;;  %v3406_v36 = vmax.f32 %v3404_v31, %v3405_v10  ;;  %v3413_v54 = vmax.f32 %v3411_v17, %v3412_v38  ;;  %v3420_v37 = vmax.f32 %v3418_v40, %v3419_v2 }
 0x44e   : > { %v2322_v40 = vsel %vm2290_vm10, %v2241_v7, %v2163_v24  ;;  %v2429_v2 = vrot.slane %v2427_v21, 1 }
 0x44f   : > { %v3401_v28 = vmax.f32 %v3399_v52, %v3400_v22  ;;  %v3407_v47 = vrot.slane %v3406_v36, 1  ;;  %v3414_v55 = vrot.slane %v3413_v54, 1  ;;  %v3421_v32 = vrot.slane %v3420_v37, 1 }
 0x450   : > { %v2431_v33 = vshll.u32 %v2322_v40, 16  ;;  %v2601_v51 = vrot.slane %v2322_v40, 1  ;;  %v2425_v22 = vshrl.u32 %v10948_v57, 16 }
 0x451   : > { %v3408_v3 = vmax.f32 %v3406_v36, %v3407_v47  ;;  %v3415_v41 = vmax.f32 %v3413_v54, %v3414_v55  ;;  %v3422_v31 = vmax.f32 %v3420_v37, %v3421_v32  ;;  %v4236_v17 = vsel %vm2290_vm10, %v3401_v28, -inf }
 0x452   : > { %v4237_v60 = vmax.f32 %v4235_v39, %v4236_v17  ;;  %v2600_v36 = vrot.slane %v10948_v57, 1  ;;  %v2430_v54 = vor.u32 %v2429_v2, %v2425_v22  ;;  %v2433_v37 = vrot.slane %v2431_v33, 1 }
 0x453   : > { %v4239_v62 = vsel %vm2290_vm10, %v3408_v3, -inf  ;;  %v4242_v20 = vsel %vm2290_vm10, %v3415_v41, -inf  ;;  %v4245_v61 = vsel %vm2290_vm10, %v3422_v31, -inf }
 0x454   : > { %v4240_v52 = vmax.f32 %v4238_v50, %v4239_v62  ;;  %v4243_v10 = vmax.f32 %v4241_v63, %v4242_v20  ;;  %v4246_v38 = vmax.f32 %v4244_v19, %v4245_v61  ;;  %v2602_v59 = vsel %vm1379_vm5, %v2600_v36, %v2601_v51  ;;  %v2101_v62 = vpop.permute.xlu0 %2100 }
 0x455   : > { %2641 = vrot.lane.b32.xlu2 %v2602_v59, %s9713_s17  ;;  %v2434_v30 = vsel %vm14435_vm6, %v2430_v54, %v2433_v37  ;;  %v4427_v47 = vpack.c.bf16 %v4237_v60, %v4237_v60 }
 0x456   : > { %2529 = vrot.lane.b32.xlu1 %v2434_v30, %s14433_s26  ;;  %v4428_v15 = vpack.c.bf16 %v4240_v52, %v4240_v52  ;;  %v4429_v28 = vpack.c.bf16 %v4243_v10, %v4243_v10  ;;  %v4430_v55 = vpack.c.bf16 %v4246_v38, %v4246_v38  ;;  %v2244_v10 = vsel %vm1089_vm3, %v10656_v29, %v2101_v62 }
 0x457   : > { %v4555_v7 = vperm.slane %v4427_v47, 0 }
 0x458   : > { %v4556_v32 = vperm.slane %v4428_v15, 0  ;;  %v4557_v24 = vperm.slane %v4429_v28, 0  ;;  %v4558_v39 = vperm.slane %v4430_v55, 0 }
 0x459   : > { %v4619_v41 = vunpack.c.l.b16 %v4555_v7 }
 0x45a   : > { %v4620_v21 = vunpack.c.l.b16 %v4556_v32  ;;  %v4621_v3 = vunpack.c.l.b16 %v4557_v24  ;;  %v4622_v31 = vunpack.c.l.b16 %v4558_v39 }
 0x45c   : > { %v4684_v17 = vsel %vm4683_vm13, %v4620_v21, %v4619_v41  ;;  %v2103_v38 = vpop.permute.xlu0 %2102 }
 0x45d   : > { %2172 = vrot.lane.b32.xlu2 %v10778_v27, %s9712_s16  ;;  %v4686_v50 = vsel %vm4685_vm14, %v4621_v3, %v4684_v17  ;;  %v2247_v51 = vsel %vm1089_vm3, %v10674_v25, %v2103_v38 }
 0x45e   : > { %2174 = vrot.lane.b32.xlu1 %v10799_v43, %s9712_s16  ;;  %v10975_v63 = vsel %vm4687_vm15, %v4622_v31, %v4686_v50 }
 0x464   : > { %v2105_v39 = vpop.permute.xlu0 %2104 }
 0x465   : > { %v2250_v3 = vsel %vm1089_vm3, %v10687_v49, %v2105_v39 }
 0x46c   : > { %v2107_v21 = vpop.permute.xlu0 %2106 }
 0x46d   : > { %v2253_v50 = vsel %vm1089_vm3, %v10697_v5, %v2107_v21 }
 0x474   : > { %v2109_v17 = vpop.permute.xlu0 %2108 }
 0x486   : > { %v2638_v60 = vpop.permute.xlu2 %2637 }
 0x487   : > { %9239 = vmatmul.msk.bf16.gmra.mxu2 %vm1089_vm3, %v2638_v60 }
 0x48e   : > { %v2165_v40 = vpop.permute.xlu2 %2164 }
 0x48f   : > { %v10985_v2 = vsel %vm2290_vm10, %v2244_v10, %v2165_v40 }
 0x490   : > { %v2437_v22 = vshll.u32 %v10985_v2, 16  ;;  %v2435_v30 = vshrl.u32 %v10985_v2, 16  ;;  %v2603_v29 = vrot.slane %v10985_v2, 1 }
 0x492   : > { %v2439_v54 = vrot.slane %v2437_v22, 1  ;;  %v2111_v22 = vpop.permute.xlu0 %2110 }
 0x494   : > { %v2440_v28 = vor.u32 %v2439_v54, %v2435_v30  ;;  %v2920_v54 = vpop.f32.mrf.mxu1 }
 0x495   : > { %v2921_v30 = vadd.f32 %v10885_v4, %v2920_v54 }
 0x496   : > { %v2640_v61 = vpop.permute.xlu2 %2639 }
 0x497   : > { %9240 = vmatmul.msk.bf16.gmra.mxu2 %vm1089_vm3, %v2640_v61 }
 0x49e   : > { %v2169_v37 = vpop.permute.xlu2 %2168 }
 0x4a0   : > { %v2526_v19 = vpop.permute.xlu1 %2525 }
 0x4a1   : > { %v2670_v20 = vsel %vm14429_vm8, %v10863_v6, %v2526_v19 }
 0x4a2   : > { %v2708_v52 = vsel %vm2691_vm11, %v2670_v20, %v2638_v60 }
 0x4a3   : > { %2937 = vmatmul.bf16.gmra.mxu1 %v2708_v52 }
 0x4a8   : > { %v2167_v33 = vpop.permute.xlu1 %2166 }
 0x4a9   : > { %v2326_v6 = vsel %vm2290_vm10, %v2247_v51, %v2167_v33 }
 0x4aa   : > { %v2441_v36 = vshll.u32 %v2326_v6, 16  ;;  %v2604_v59 = vrot.slane %v2326_v6, 1 }
 0x4ac   : > { %v2443_v15 = vrot.slane %v2441_v36, 1  ;;  %v2605_v47 = vsel %vm1379_vm5, %v2603_v29, %v2604_v59  ;;  %v11033_v59 = vpop.permute.xlu0 %2112 }
 0x4ad   : > { %2643 = vrot.lane.b32.xlu2 %v2605_v47, %s9713_s17 }
 0x4ae   : > { %v2444_v25 = vsel %vm14435_vm6, %v2440_v28, %v2443_v15  ;;  %v2259_v15 = vsel %vm1089_vm3, %v10725_v9, %v2111_v22  ;;  %v3009_v28 = vpop.f32.mrf.mxu2 }
 0x4af   : > { %2531 = vrot.lane.b32.xlu1 %v2444_v25, %s14433_s26  ;;  %v2642_v7 = vpop.permute.xlu2 %2641 }
 0x4b0   : > { %v2528_v55 = vpop.permute.xlu1 %2527  ;;  %9241 = vmatmul.msk.bf16.gmra.mxu2 %vm1089_vm3, %v2642_v7 }
 0x4b1   : > { %v2672_v32 = vsel %vm14429_vm8, %v10906_v11, %v2528_v55  ;;  %v11008_v11 = vsel %vm2290_vm10, %v2250_v3, %v2169_v37  ;;  %v3010_v55 = vadd.f32 %v3009_v28, %v2921_v30 }
 0x4b2   : > { %v2711_v24 = vsel %vm2691_vm11, %v2672_v32, %v2640_v61  ;;  %v2447_v31 = vshll.u32 %v11008_v11, 16  ;;  %v2445_v19 = vshrl.u32 %v11008_v11, 16  ;;  %v2606_v62 = vrot.slane %v11008_v11, 1 }
 0x4b3   : > { %2942 = vmatmul.bf16.gmra.mxu1 %v2711_v24 }
 0x4b4   : > { %v2449_v60 = vrot.slane %v2447_v31, 1  ;;  %v3085_v31 = vmax.f32 %v3010_v55, 0.0 }
 0x4b5   : > { %2176 = vrot.lane.b32.xlu2 %v10814_v44, %s9712_s16 }
 0x4b6   : > { %v2450_v10 = vor.u32 %v2449_v60, %v2445_v19  ;;  %v3423_v60 = vsel %vm3338_vm12, %v3085_v31, -inf  ;;  %v3155_v19 = vrot.slane %v3085_v31, 2 }
 0x4b7   : > { %2178 = vrot.lane.b32.xlu1 %v10826_v1, %s9712_s16  ;;  %v2173_v6 = vpop.permute.xlu2 %2172 }
 0x4b8   : > { %v2171_v41 = vpop.permute.xlu1 %2170 }
 0x4b9   : > { %v2330_v40 = vsel %vm2290_vm10, %v2253_v50, %v2171_v41 }
 0x4ba   : > { %v2451_v20 = vshll.u32 %v2330_v40, 16  ;;  %v2607_v61 = vrot.slane %v2330_v40, 1 }
 0x4bc   : > { %v2453_v38 = vrot.slane %v2451_v20, 1  ;;  %v2608_v33 = vsel %vm1379_vm5, %v2606_v62, %v2607_v61  ;;  %v3156_v61 = vrot.slane %v3085_v31, 4 }
 0x4bd   : > { %2645 = vrot.lane.b32.xlu2 %v2608_v33, %s9713_s17 }
 0x4be   : > { %v2454_v5 = vsel %vm14435_vm6, %v2450_v10, %v2453_v38  ;;  %v3430_v10 = vsel %vm3338_vm12, %v3155_v19, -inf  ;;  %v2923_v38 = vpop.f32.mrf.mxu1  ;;  %v3437_v54 = vsel %vm3338_vm12, %v3156_v61, -inf }
 0x4bf   : > { %2533 = vrot.lane.b32.xlu1 %v2454_v5, %s14433_s26 }
 0x4c5   : > { %2180 = vrot.lane.b32.xlu2 %v10836_v45, %s9712_s16 }
 0x4c7   : > { %2182 = vrot.lane.b32.xlu1 %v10842_v26, %s9712_s16 }
 0x4c8   : > { %v2530_v49 = vpop.permute.xlu1 %2529 }
 0x4c9   : > { %v2674_v52 = vsel %vm14429_vm8, %v10948_v57, %v2530_v49  ;;  %v2256_v57 = vsel %vm1089_vm3, %v10708_v13, %v2109_v17  ;;  %v2916_v13 = vadd.f32 %v10885_v4, %v10908_v0  ;;  %v11047_v17 = vpop.permute.xlu0 %2114  ;;  %v3157_v49 = vrot.slane %v3085_v31, 6 }
 0x4ca   : > { %v2714_v51 = vsel %vm2691_vm11, %v2674_v52, %v2642_v7  ;;  %v11028_v36 = vsel %vm2290_vm10, %v2256_v57, %v2173_v6  ;;  %v3431_v57 = vrot.slane %v3430_v10, 4 }
 0x4cb   : > { %2947 = vmatmul.bf16.gmra.mxu1 %v2714_v51  ;;  %v2457_v37 = vshll.u32 %v11028_v36, 16  ;;  %v2455_v32 = vshrl.u32 %v11028_v36, 16  ;;  %v2609_v24 = vrot.slane %v11028_v36, 1  ;;  %v3005_v21 = vadd.f32 %v10914_v35, %v2916_v13 }
 0x4cc   : > { %v3424_v35 = vrot.slane %v3423_v60, 4  ;;  %v3444_v30 = vsel %vm3338_vm12, %v3157_v49, -inf  ;;  %v3432_v55 = vmax.f32 %v3430_v10, %v3431_v57 }
 0x4cd   : > { %v2459_v47 = vrot.slane %v2457_v37, 1  ;;  %v3083_v50 = vmax.f32 %v3005_v21, 0.0 }
 0x4ce   : > { %v3425_v52 = vmax.f32 %v3423_v60, %v3424_v35 }
 0x4cf   : > { %v2460_v3 = vor.u32 %v2459_v47, %v2455_v32  ;;  %v3367_v40 = vsel %vm3338_vm12, %v3083_v50, -inf  ;;  %v3149_v62 = vrot.slane %v3083_v50, 2  ;;  %v3150_v33 = vrot.slane %v3083_v50, 4 }
 0x4d0   : > { %v2175_v29 = vpop.permute.xlu1 %2174  ;;  %v3368_v20 = vrot.slane %v3367_v40, 4  ;;  %v3151_v5 = vrot.slane %v3083_v50, 6  ;;  %v3426_v37 = vrot.slane %v3425_v52, 2  ;;  %v3438_v47 = vrot.slane %v3437_v54, 4 }
 0x4d1   : > { %v2334_v25 = vsel %vm2290_vm10, %v2259_v15, %v2175_v29  ;;  %v11057_v51 = vpop.permute.xlu0 %2116  ;;  %v3374_v6 = vsel %vm3338_vm12, %v3149_v62, -inf  ;;  %v3381_v15 = vsel %vm3338_vm12, %v3150_v33, -inf  ;;  %v3445_v32 = vrot.slane %v3444_v30, 4 }
 0x4d2   : > { %v2461_v7 = vshll.u32 %v2334_v25, 16  ;;  %v2610_v39 = vrot.slane %v2334_v25, 1  ;;  %v3369_v22 = vmax.f32 %v3367_v40, %v3368_v20  ;;  %v3375_v29 = vrot.slane %v3374_v6, 4  ;;  %v3012_v25 = vpop.f32.mrf.mxu2 }
 0x4d3   : > { %v3388_v28 = vsel %vm3338_vm12, %v3151_v5, -inf  ;;  %v3446_v50 = vmax.f32 %v3444_v30, %v3445_v32 }
 0x4d4   : > { %v2463_v41 = vrot.slane %v2461_v7, 1  ;;  %v2611_v9 = vsel %vm1379_vm5, %v2609_v24, %v2610_v39  ;;  %v3370_v13 = vrot.slane %v3369_v22, 2  ;;  %v3382_v24 = vrot.slane %v3381_v15, 4 }
 0x4d5   : > { %2647 = vrot.lane.b32.xlu2 %v2611_v9, %s9713_s17  ;;  %v3427_v7 = vmax.f32 %v3425_v52, %v3426_v37  ;;  %v3376_v39 = vmax.f32 %v3374_v6, %v3375_v29  ;;  %v3389_v21 = vrot.slane %v3388_v28, 4  ;;  %v2925_v9 = vpop.f32.mrf.mxu1  ;;  %v3447_v49 = vrot.slane %v3446_v50, 2 }
 0x4d6   : > { %v2464_v0 = vsel %vm14435_vm6, %v2460_v3, %v2463_v41  ;;  %v3371_v3 = vmax.f32 %v3369_v22, %v3370_v13  ;;  %v3439_v41 = vmax.f32 %v3437_v54, %v3438_v47  ;;  %v3383_v60 = vmax.f32 %v3381_v15, %v3382_v24 }
 0x4d7   : > { %2535 = vrot.lane.b32.xlu1 %v2464_v0, %s14433_s26  ;;  %v3433_v0 = vrot.slane %v3432_v55, 2  ;;  %v3428_v40 = vrot.slane %v3427_v7, 1  ;;  %v3377_v19 = vrot.slane %v3376_v39, 2  ;;  %v3390_v35 = vmax.f32 %v3388_v28, %v3389_v21 }
 0x4d8   : > { %v3372_v62 = vrot.slane %v3371_v3, 1  ;;  %v3440_v20 = vrot.slane %v3439_v41, 2  ;;  %v3384_v10 = vrot.slane %v3383_v60, 2  ;;  %v2924_v22 = vadd.f32 %v10885_v4, %v2923_v38 }
 0x4d9   : > { %v11064_v31 = vpop.permute.xlu0 %2118  ;;  %v3434_v61 = vmax.f32 %v3432_v55, %v3433_v0  ;;  %v3429_v33 = vmax.f32 %v3427_v7, %v3428_v40  ;;  %v3378_v5 = vmax.f32 %v3376_v39, %v3377_v19  ;;  %v3391_v6 = vrot.slane %v3390_v35, 2 }
 0x4da   : > { %v3014_v52 = vpop.f32.mrf.mxu2  ;;  %v3373_v57 = vmax.f32 %v3371_v3, %v3372_v62  ;;  %v3441_v54 = vmax.f32 %v3439_v41, %v3440_v20  ;;  %v3448_v29 = vmax.f32 %v3446_v50, %v3447_v49  ;;  %v3385_v30 = vmax.f32 %v3383_v60, %v3384_v10 }
 0x4db   : > { %v3435_v37 = vrot.slane %v3434_v61, 1  ;;  %v4248_v15 = vsel %vm2290_vm10, %v3429_v33, -inf  ;;  %v3379_v28 = vrot.slane %v3378_v5, 1  ;;  %v3392_v47 = vmax.f32 %v3390_v35, %v3391_v6 }
 0x4dc   : > { %v3013_v55 = vadd.f32 %v3012_v25, %v2924_v22  ;;  %v4247_v24 = vsel %vm2290_vm10, %v3373_v57, -inf  ;;  %v3442_v7 = vrot.slane %v3441_v54, 1  ;;  %v3449_v39 = vrot.slane %v3448_v29, 1 }
 0x4dd   : > { %2184 = vrot.lane.b32.xlu2 %v10848_v53, %s9712_s16  ;;  %v2928_v13 = vpop.f32.mrf.mxu1  ;;  %v3436_v21 = vmax.f32 %v3434_v61, %v3435_v37  ;;  %v4249_v0 = vmax.f32 %v4247_v24, %v4248_v15  ;;  %v3386_v3 = vrot.slane %v3385_v30, 1  ;;  %v3380_v50 = vmax.f32 %v3378_v5, %v3379_v28 }
 0x4de   : > { %v2929_v38 = vadd.f32 %v10885_v4, %v2928_v13  ;;  %v3393_v60 = vrot.slane %v3392_v47, 1  ;;  %v3086_v40 = vmax.f32 %v3013_v55, 0.0  ;;  %v3443_v19 = vmax.f32 %v3441_v54, %v3442_v7 }
 0x4df   : > { %2186 = vrot.lane.b32.xlu1 %v10854_v56, %s9712_s16  ;;  %v3450_v25 = vmax.f32 %v3448_v29, %v3449_v39  ;;  %v4251_v62 = vsel %vm2290_vm10, %v3436_v21, -inf  ;;  %v4431_v20 = vpack.c.bf16 %v4249_v0, %v4249_v0  ;;  %v11078_v49 = vsel %vm1089_vm3, %v10741_v42, %v11033_v59 }
 0x4e0   : > { %v11083_v10 = vsel %vm1089_vm3, %v10762_v12, %v11047_v17  ;;  %v3387_v33 = vmax.f32 %v3385_v30, %v3386_v3  ;;  %v3394_v5 = vmax.f32 %v3392_v47, %v3393_v60  ;;  %v4250_v6 = vsel %vm2290_vm10, %v3380_v50, -inf }
 0x4e1   : > { %v2121_v32 = vpop.permute.xlu0 %2120  ;;  %v3451_v22 = vsel %vm3338_vm12, %v3086_v40, -inf  ;;  %v2926_v57 = vadd.f32 %v10885_v4, %v2925_v9  ;;  %v11091_v54 = vsel %vm1089_vm3, %v10778_v27, %v11057_v51  ;;  %v3158_v42 = vrot.slane %v3086_v40, 2 }
 0x4e2   : > { %v3017_v35 = vpop.f32.mrf.mxu2  ;;  %v4252_v59 = vmax.f32 %v4250_v6, %v4251_v62  ;;  %v4254_v37 = vsel %vm2290_vm10, %v3443_v19, -inf  ;;  %v4559_v29 = vperm.slane %v4431_v20, 0  ;;  %v3159_v17 = vrot.slane %v3086_v40, 4 }
 0x4e3   : > { %v3018_v61 = vadd.f32 %v3017_v35, %v2929_v38  ;;  %v4257_v15 = vsel %vm2290_vm10, %v3450_v25, -inf  ;;  %v11098_v13 = vsel %vm1089_vm3, %v10799_v43, %v11064_v31  ;;  %v11102_v9 = vsel %vm1089_vm3, %v10814_v44, %v2121_v32 }
 0x4e4   : > { %v3452_v27 = vrot.slane %v3451_v22, 4  ;;  %v4253_v51 = vsel %vm2290_vm10, %v3387_v33, -inf  ;;  %v3160_v28 = vrot.slane %v3086_v40, 6  ;;  %v3015_v47 = vadd.f32 %v3014_v52, %v2926_v57 }
 0x4e5   : > { %v3088_v30 = vmax.f32 %v3018_v61, 0.0  ;;  %v2930_v55 = vpop.f32.mrf.mxu1  ;;  %v4255_v24 = vmax.f32 %v4253_v51, %v4254_v37  ;;  %v4256_v7 = vsel %vm2290_vm10, %v3394_v5, -inf  ;;  %v3458_v43 = vsel %vm3338_vm12, %v3158_v42, -inf }
 0x4e6   : > { %v4258_v31 = vmax.f32 %v4256_v7, %v4257_v15  ;;  %v4432_v39 = vpack.c.bf16 %v4252_v59, %v4252_v59  ;;  %v4623_v0 = vunpack.c.l.b16 %v4559_v29  ;;  %v3465_v44 = vsel %vm3338_vm12, %v3159_v17, -inf }
 0x4e7   : > { %v3164_v32 = vrot.slane %v3088_v30, 2  ;;  %v3165_v38 = vrot.slane %v3088_v30, 4  ;;  %v3453_v3 = vmax.f32 %v3451_v22, %v3452_v27  ;;  %v3166_v50 = vrot.slane %v3088_v30, 6 }
 0x4e8   : > { %v3507_v52 = vsel %vm3338_vm12, %v3088_v30, -inf  ;;  %v2931_v60 = vadd.f32 %v10885_v4, %v2930_v55  ;;  %v3459_v40 = vrot.slane %v3458_v43, 4  ;;  %v3472_v19 = vsel %vm3338_vm12, %v3160_v28, -inf }
 0x4e9   : > { %v2123_v12 = vpop.permute.xlu0 %2122  ;;  %v4433_v35 = vpack.c.bf16 %v4255_v24, %v4255_v24  ;;  %v4434_v25 = vpack.c.bf16 %v4258_v31, %v4258_v31  ;;  %v4560_v62 = vperm.slane %v4432_v39, 0  ;;  %v3466_v20 = vrot.slane %v3465_v44, 4 }
 0x4ea   : > { %v11108_v21 = vsel %vm1089_vm3, %v10826_v1, %v2123_v12  ;;  %v3087_v1 = vmax.f32 %v3015_v47, 0.0  ;;  %v3019_v61 = vpop.f32.mrf.mxu2  ;;  %v3508_v33 = vrot.slane %v3507_v52, 4  ;;  %v3514_v5 = vsel %vm3338_vm12, %v3164_v32, -inf }
 0x4eb   : > { %v3521_v6 = vsel %vm3338_vm12, %v3165_v38, -inf  ;;  %v3454_v22 = vrot.slane %v3453_v3, 2  ;;  %v3473_v57 = vrot.slane %v3472_v19, 4  ;;  %v3528_v42 = vsel %vm3338_vm12, %v3166_v50, -inf }
 0x4ec   : > { %v3020_v59 = vadd.f32 %v3019_v61, %v2931_v60  ;;  %v3460_v37 = vmax.f32 %v3458_v43, %v3459_v40  ;;  %v3161_v29 = vrot.slane %v3087_v1, 2  ;;  %v3162_v12 = vrot.slane %v3087_v1, 4 }
 0x4ed   : > { %v4561_v17 = vperm.slane %v4433_v35, 0  ;;  %v3479_v30 = vsel %vm3338_vm12, %v3087_v1, -inf  ;;  %v3515_v15 = vrot.slane %v3514_v5, 4  ;;  %v3522_v27 = vrot.slane %v3521_v6, 4 }
 0x4ee   : > { %v11119_v51 = vperm.slane %v4434_v25, 0  ;;  %v3467_v28 = vmax.f32 %v3465_v44, %v3466_v20  ;;  %v3509_v47 = vmax.f32 %v3507_v52, %v3508_v33  ;;  %v3529_v55 = vrot.slane %v3528_v42, 4 }
 0x4ef   : > { %v4624_v24 = vunpack.c.l.b16 %v4560_v62  ;;  %v3455_v7 = vmax.f32 %v3453_v3, %v3454_v22  ;;  %v3474_v31 = vmax.f32 %v3472_v19, %v3473_v57  ;;  %v11121_v39 = vmax.f32 %v3020_v59, 0.0 }
 0x4f0   : > { %v4690_v43 = vsel %vm4689_vm1, %v4623_v0, %v10975_v63  ;;  %v3461_v32 = vrot.slane %v3460_v37, 2  ;;  %v3480_v38 = vrot.slane %v3479_v30, 4  ;;  %v3486_v50 = vsel %vm3338_vm12, %v3161_v29, -inf }
 0x4f1   : > { %v3493_v60 = vsel %vm3338_vm12, %v3162_v12, -inf  ;;  %v3163_v40 = vrot.slane %v3087_v1, 6  ;;  %v3516_v35 = vmax.f32 %v3514_v5, %v3515_v15  ;;  %v3523_v44 = vmax.f32 %v3521_v6, %v3522_v27 }
 0x4f2   : > { %v4625_v52 = vunpack.c.l.b16 %v4561_v17  ;;  %v3468_v25 = vrot.slane %v3467_v28, 2  ;;  %v3510_v20 = vrot.slane %v3509_v47, 2  ;;  %v3530_v62 = vmax.f32 %v3528_v42, %v3529_v55 }
 0x4f3   : > { %v3487_v61 = vrot.slane %v3486_v50, 4  ;;  %v3494_v33 = vrot.slane %v3493_v60, 4  ;;  %v3535_v63 = vsel %vm3338_vm12, %v11121_v39, -inf  ;;  %v4692_v0 = vsel %vm4691_vm9, %v4624_v24, %v4690_v43 }
 0x4f4   : > { %v3456_v22 = vrot.slane %v3455_v7, 1  ;;  %v3462_v57 = vmax.f32 %v3460_v37, %v3461_v32  ;;  %v3475_v1 = vrot.slane %v3474_v31, 2  ;;  %v3481_v5 = vmax.f32 %v3479_v30, %v3480_v38 }
 0x4f5   : > { %v3500_v59 = vsel %vm3338_vm12, %v3163_v40, -inf  ;;  %v3517_v29 = vrot.slane %v3516_v35, 2  ;;  %v3524_v42 = vrot.slane %v3523_v44, 2  ;;  %v3469_v17 = vmax.f32 %v3467_v28, %v3468_v25 }
 0x4f6   : > { %v3511_v15 = vmax.f32 %v3509_v47, %v3510_v20  ;;  %v3531_v27 = vrot.slane %v3530_v62, 2  ;;  %v3536_v55 = vrot.slane %v3535_v63, 4  ;;  %v3488_v58 = vmax.f32 %v3486_v50, %v3487_v61  ;;  %v2933_v20 = vpop.f32.mrf.mxu1 }
 0x4f7   : > { %v3495_v48 = vmax.f32 %v3493_v60, %v3494_v33  ;;  %v3167_v24 = vrot.slane %v11121_v39, 2  ;;  %v3463_v30 = vrot.slane %v3462_v57, 1  ;;  %v3476_v43 = vmax.f32 %v3474_v31, %v3475_v1 }
 0x4f8   : > { %v3482_v32 = vrot.slane %v3481_v5, 2  ;;  %v3501_v38 = vrot.slane %v3500_v59, 4  ;;  %v3518_v40 = vmax.f32 %v3516_v35, %v3517_v29  ;;  %v3525_v19 = vmax.f32 %v3523_v44, %v3524_v42 }
 0x4f9   : > { %v11141_v28 = vsel %vm14428_vm7, %v4625_v52, %v4692_v0  ;;  %v3457_v47 = vmax.f32 %v3455_v7, %v3456_v22  ;;  %v3512_v50 = vrot.slane %v3511_v15, 1  ;;  %v3532_v60 = vmax.f32 %v3530_v62, %v3531_v27 }
 0x4fa   : > { %v3537_v25 = vmax.f32 %v3535_v63, %v3536_v55  ;;  %v3470_v61 = vrot.slane %v3469_v17, 1  ;;  %v3489_v33 = vrot.slane %v3488_v58, 2  ;;  %v3542_v31 = vsel %vm3338_vm12, %v3167_v24, -inf }
 0x4fb   : > { %v3464_v1 = vmax.f32 %v3462_v57, %v3463_v30  ;;  %v3502_v35 = vmax.f32 %v3500_v59, %v3501_v38  ;;  %v3519_v29 = vrot.slane %v3518_v40, 1  ;;  %v3526_v42 = vrot.slane %v3525_v19, 1  ;;  %v3022_v30 = vpop.f32.mrf.mxu2 }
 0x4fc   : > { %v3169_v52 = vrot.slane %v11121_v39, 6  ;;  %v3513_v62 = vmax.f32 %v3511_v15, %v3512_v50  ;;  %v3533_v63 = vrot.slane %v3532_v60, 1  ;;  %v3538_v0 = vrot.slane %v3537_v25, 2 }
 0x4fd   : > { %v3543_v22 = vrot.slane %v3542_v31, 4  ;;  %v3471_v27 = vmax.f32 %v3469_v17, %v3470_v61  ;;  %v4259_v57 = vsel %vm2290_vm10, %v3457_v47, -inf  ;;  %v4262_v24 = vsel %vm2290_vm10, %v3464_v1, -inf }
 0x4fe   : > { %v3520_v38 = vmax.f32 %v3518_v40, %v3519_v29  ;;  %v3556_v34 = vsel %vm3338_vm12, %v3169_v52, -inf  ;;  %v3534_v15 = vmax.f32 %v3532_v60, %v3533_v63  ;;  %v4260_v50 = vsel %vm2290_vm10, %v3513_v62, -inf }
 0x4ff   : > { %v3539_v14 = vmax.f32 %v3537_v25, %v3538_v0  ;;  %v3544_v17 = vmax.f32 %v3542_v31, %v3543_v22  ;;  %v3557_v1 = vrot.slane %v3556_v34, 4 }
 0x500   : > { %v4263_v25 = vsel %vm2290_vm10, %v3520_v38, -inf }
 0x501   : > { %v4264_v62 = vmax.f32 %v4262_v24, %v4263_v25 }
 0x507   : > { %v11070_v41 = vpop.permute.xlu2 %2643 }
 0x508   : > { %9242 = vmatmul.msk.bf16.gmra.mxu2 %vm1089_vm3, %v11070_v41 }
 0x50f   : > { %v11127_v3 = vpop.permute.xlu2 %2176 }
 0x517   : > { %v11144_v44 = vpop.permute.xlu2 %2645 }
 0x518   : > { %9243 = vmatmul.msk.bf16.gmra.mxu2 %vm1089_vm3, %v11144_v44 }
 0x51f   : > { %v11171_v22 = vpop.permute.xlu2 %2180 }
 0x521   : > { %v2532_v6 = vpop.permute.xlu1 %2531 }
 0x522   : > { %v2676_v12 = vsel %vm14429_vm8, %v10985_v2, %v2532_v6  ;;  %v3168_v2 = vrot.slane %v11121_v39, 4  ;;  %v3477_v6 = vrot.slane %v3476_v43, 1 }
 0x523   : > { %v2717_v37 = vsel %vm2691_vm11, %v2676_v12, %v11070_v41  ;;  %v3496_v41 = vrot.slane %v3495_v48, 2  ;;  %v3483_v12 = vmax.f32 %v3481_v5, %v3482_v32  ;;  %v3490_v5 = vmax.f32 %v3488_v58, %v3489_v33  ;;  %v2935_v33 = vpop.f32.mrf.mxu1 }
 0x524   : > { %2952 = vmatmul.bf16.gmra.mxu1 %v2717_v37  ;;  %v3549_v7 = vsel %vm3338_vm12, %v3168_v2, -inf  ;;  %v3478_v55 = vmax.f32 %v3476_v43, %v3477_v6  ;;  %v3503_v37 = vrot.slane %v3502_v35, 2  ;;  %v3527_v2 = vmax.f32 %v3525_v19, %v3526_v42 }
 0x525   : > { %v3497_v59 = vmax.f32 %v3495_v48, %v3496_v41  ;;  %v3550_v39 = vrot.slane %v3549_v7, 4  ;;  %v3484_v32 = vrot.slane %v3483_v12, 1  ;;  %v3491_v61 = vrot.slane %v3490_v5, 1 }
 0x526   : > { %v2934_v48 = vadd.f32 %v10885_v4, %v2933_v20  ;;  %v11158_v58 = vsel %vm2290_vm10, %v11078_v49, %v11127_v3  ;;  %v4265_v43 = vsel %vm2290_vm10, %v3471_v27, -inf  ;;  %v4268_v19 = vsel %vm2290_vm10, %v3478_v55, -inf }
 0x527   : > { %v3498_v47 = vrot.slane %v3497_v59, 1  ;;  %14494 = vst [vmem:[#allocation10_spill] sm:$0xff] %v11158_v58  ;;  %v11162_v40 = vmax.f32 %v3502_v35, %v3503_v37  ;;  %v3551_v60 = vmax.f32 %v3549_v7, %v3550_v39  ;;  %v4261_v41 = vmax.f32 %v4259_v57, %v4260_v50  ;;  %v3024_v39 = vpop.f32.mrf.mxu2 }
 0x528   : > { %v4266_v31 = vsel %vm2290_vm10, %v3527_v2, -inf  ;;  %v4269_v4 = vsel %vm2290_vm10, %v3534_v15, -inf  ;;  %v3540_v20 = vrot.slane %v3539_v14, 1  ;;  %v3545_v6 = vrot.slane %v3544_v17, 2 }
 0x529   : > { %v2467_v49 = vshll.u32 %v11158_v58, 16  ;;  %v2179_v3 = vpop.permute.xlu1 %2178  ;;  %v3485_v29 = vmax.f32 %v3483_v12, %v3484_v32  ;;  %v3492_v42 = vmax.f32 %v3490_v5, %v3491_v61  ;;  %v11168_v52 = vmax.f32 %v3497_v59, %v3498_v47  ;;  %v11178_v5 = vld [vmem:[%s14395_s4] ss:$0 sm:$0xff] }
 0x52a   : > { %v3023_v35 = vadd.f32 %v3022_v30, %v2934_v48  ;;  %v3505_v7 = vrot.slane %v11162_v40, 1  ;;  %v4267_v63 = vmax.f32 %v4265_v43, %v4266_v31  ;;  %v3552_v0 = vrot.slane %v3551_v60, 2 }
 0x52b   : > { %v4270_v27 = vmax.f32 %v4268_v19, %v4269_v4  ;;  %v4435_v57 = vpack.c.bf16 %v4261_v41, %v4261_v41  ;;  %v3558_v55 = vmax.f32 %v3556_v34, %v3557_v1  ;;  %v2338_v37 = vsel %vm2290_vm10, %v11083_v10, %v2179_v3 }
 0x52c   : > { %v3541_v38 = vmax.f32 %v3539_v14, %v3540_v20  ;;  %v3546_v12 = vmax.f32 %v3544_v17, %v3545_v6  ;;  %v2936_v59 = vadd.f32 %v11178_v5, %v2935_v33  ;;  %v2469_v24 = vrot.slane %v2467_v49, 1  ;;  %v2938_v14 = vpop.f32.mrf.mxu1 }
 0x52d   : > { %v3090_v30 = vmax.f32 %v3023_v35, 0.0  ;;  %v2612_v32 = vrot.slane %v11158_v58, 1  ;;  %v2471_v2 = vshll.u32 %v2338_v37, 16  ;;  %v2613_v15 = vrot.slane %v2338_v37, 1 }
 0x52e   : > { %v4436_v34 = vpack.c.bf16 %v4264_v62, %v4264_v62  ;;  %v4437_v50 = vpack.c.bf16 %v4267_v63, %v4267_v63  ;;  %v3553_v61 = vmax.f32 %v3551_v60, %v3552_v0  ;;  %v2465_v10 = vshrl.u32 %v11158_v58, 16 }
 0x52f   : > { %v4438_v17 = vpack.c.bf16 %v4270_v27, %v4270_v27  ;;  %v3559_v47 = vrot.slane %v3558_v55, 2  ;;  %v2473_v48 = vrot.slane %v2471_v2, 1  ;;  %v2614_v43 = vsel %vm1379_vm5, %v2612_v32, %v2613_v15 }
 0x530   : > { %v4271_v19 = vsel %vm2290_vm10, %v3485_v29, -inf  ;;  %v4272_v33 = vsel %vm2290_vm10, %v3541_v38, -inf  ;;  %v3025_v41 = vadd.f32 %v3024_v39, %v2936_v59  ;;  %v2470_v25 = vor.u32 %v2469_v24, %v2465_v10  ;;  %2649 = vrot.lane.b32.xlu2 %v2614_v43, %s9713_s17  ;;  %v3027_v39 = vpop.f32.mrf.mxu2  ;;  %v11202_v38 = vpop.permute.xlu2 %2647 }
 0x531   : > { %v3170_v31 = vrot.slane %v3090_v30, 2  ;;  %v3171_v1 = vrot.slane %v3090_v30, 4  ;;  %v3563_v60 = vsel %vm3338_vm12, %v3090_v30, -inf  ;;  %v2939_v4 = vadd.f32 %v11178_v5, %v2938_v14  ;;  %9244 = vmatmul.msk.bf16.gmra.mxu2 %vm1089_vm3, %v11202_v38 }
 0x532   : > { %v11189_v20 = vperm.slane %v4435_v57, 0  ;;  %v3547_v6 = vrot.slane %v3546_v12, 1  ;;  %v3554_v49 = vrot.slane %v3553_v61, 1  ;;  %v2474_v3 = vsel %vm14435_vm6, %v2470_v25, %v2473_v48 }
 0x533   : > { %v11192_v35 = vperm.slane %v4436_v34, 0  ;;  %v11194_v29 = vperm.slane %v4437_v50, 0  ;;  %v11196_v62 = vperm.slane %v4438_v17, 0  ;;  %v3560_v63 = vmax.f32 %v3558_v55, %v3559_v47  ;;  %2537 = vrot.lane.b32.xlu1 %v2474_v3, %s14433_s26 }
 0x534   : > { %v11200_v0 = vsel %vm2290_vm10, %v3492_v42, -inf  ;;  %v4273_v27 = vmax.f32 %v4271_v19, %v4272_v33  ;;  %v3172_v37 = vrot.slane %v3090_v30, 6  ;;  %v3564_v57 = vrot.slane %v3563_v60, 4  ;;  %v2534_v19 = vpop.permute.xlu1 %2533 }
 0x535   : > { %v3570_v59 = vsel %vm3338_vm12, %v3170_v31, -inf  ;;  %v3577_v24 = vsel %vm3338_vm12, %v3171_v1, -inf  ;;  %v3091_v32 = vmax.f32 %v3025_v41, 0.0  ;;  %v3028_v2 = vadd.f32 %v3027_v39, %v2939_v4  ;;  %v2940_v4 = vpop.f32.mrf.mxu1 }
 0x536   : > { %v3506_v55 = vmax.f32 %v11162_v40, %v3505_v7  ;;  %v3548_v15 = vmax.f32 %v3546_v12, %v3547_v6  ;;  %v3555_v34 = vmax.f32 %v3553_v61, %v3554_v49  ;;  %v3561_v14 = vrot.slane %v3560_v63, 1 }
 0x537   : > { %v3565_v17 = vmax.f32 %v3563_v60, %v3564_v57  ;;  %v3571_v47 = vrot.slane %v3570_v59, 4  ;;  %v3578_v48 = vrot.slane %v3577_v24, 4  ;;  %v3584_v43 = vsel %vm3338_vm12, %v3172_v37, -inf }
 0x538   : > { %2188 = vrot.lane.b32.xlu2 %v10899_v8, %s9712_s16  ;;  %v4439_v40 = vpack.c.bf16 %v4273_v27, %v4273_v27  ;;  %v3173_v7 = vrot.slane %v3091_v32, 2  ;;  %v3092_v12 = vmax.f32 %v3028_v2, 0.0  ;;  %v2678_v61 = vsel %vm14429_vm8, %v11008_v11, %v2534_v19 }
 0x539   : > { %v11219_v33 = vsel %vm2290_vm10, %v3548_v15, -inf  ;;  %v3174_v41 = vrot.slane %v3091_v32, 4  ;;  %v11224_v25 = vsel %vm2290_vm10, %v11091_v54, %v11171_v22  ;;  %v2720_v31 = vsel %vm2691_vm11, %v2678_v61, %v11144_v44 }
 0x53a   : > { %14495 = vst [vmem:[#allocation11_spill] sm:$0xff] %v11224_v25  ;;  %v11228_v1 = vmax.f32 %v3560_v63, %v3561_v14  ;;  %v3585_v8 = vrot.slane %v3584_v43, 4  ;;  %v3175_v60 = vrot.slane %v3091_v32, 6  ;;  %2957 = vmatmul.bf16.gmra.mxu1 %v2720_v31  ;;  %v11234_v11 = vsel %vm2290_vm10, %v11168_v52, -inf }
 0x53b   : > { %2190 = vrot.lane.b32.xlu1 %v10921_v18, %s9712_s16  ;;  %v3566_v6 = vrot.slane %v3565_v17, 2  ;;  %v3572_v49 = vmax.f32 %v3570_v59, %v3571_v47  ;;  %v3579_v54 = vmax.f32 %v3577_v24, %v3578_v48  ;;  %v3591_v22 = vsel %vm3338_vm12, %v3091_v32, -inf }
 0x53c   : > { %v11237_v3 = vperm.slane %v4439_v40, 0  ;;  %v3598_v44 = vsel %vm3338_vm12, %v3173_v7, -inf  ;;  %v2477_v63 = vshll.u32 %v11224_v25, 16  ;;  %v3176_v27 = vrot.slane %v3092_v12, 2  ;;  %v2183_v48 = vpop.permute.xlu1 %2182  ;;  %v3029_v40 = vpop.f32.mrf.mxu2 }
 0x53d   : > { %v3605_v37 = vsel %vm3338_vm12, %v3174_v41, -inf  ;;  %v3177_v57 = vrot.slane %v3092_v12, 4  ;;  %v3178_v18 = vrot.slane %v3092_v12, 6  ;;  %v4278_v39 = vsel %vm2290_vm10, %v3555_v34, -inf  ;;  %v11255_v42 = vpop.f32.mrf.mxu1 }
 0x53e   : > { %v3586_v52 = vmax.f32 %v3584_v43, %v3585_v8  ;;  %v3592_v2 = vrot.slane %v3591_v22, 4  ;;  %v3612_v59 = vsel %vm3338_vm12, %v3175_v60, -inf  ;;  %v11245_v24 = vsel %vm2290_vm10, %v3506_v55, -inf }
 0x53f   : > { %v3567_v32 = vmax.f32 %v3565_v17, %v3566_v6  ;;  %v3573_v15 = vrot.slane %v3572_v49, 2  ;;  %v3580_v14 = vrot.slane %v3579_v54, 2  ;;  %v3599_v47 = vrot.slane %v3598_v44, 4 }
 0x540   : > { %v3606_v19 = vrot.slane %v3605_v37, 4  ;;  %v2479_v7 = vrot.slane %v2477_v63, 1  ;;  %v3619_v61 = vsel %vm3338_vm12, %v3092_v12, -inf  ;;  %v3626_v41 = vsel %vm3338_vm12, %v3176_v27, -inf }
 0x541   : > { %v3613_v34 = vrot.slane %v3612_v59, 4  ;;  %v3633_v43 = vsel %vm3338_vm12, %v3177_v57, -inf  ;;  %v3640_v31 = vsel %vm3338_vm12, %v3178_v18, -inf  ;;  %v2342_v55 = vsel %vm2290_vm10, %v11098_v13, %v2183_v48 }
 0x542   : > { %v2475_v17 = vshrl.u32 %v11224_v25, 16  ;;  %v2615_v8 = vrot.slane %v11224_v25, 1  ;;  %v2481_v60 = vshll.u32 %v2342_v55, 16  ;;  %v2616_v6 = vrot.slane %v2342_v55, 1 }
 0x543   : > { %v3587_v10 = vrot.slane %v3586_v52, 2  ;;  %v3593_v63 = vmax.f32 %v3591_v22, %v3592_v2  ;;  %v3620_v50 = vrot.slane %v3619_v61, 4  ;;  %v3627_v12 = vrot.slane %v3626_v41, 4 }
 0x544   : > { %v3574_v30 = vmax.f32 %v3572_v49, %v3573_v15  ;;  %v2480_v27 = vor.u32 %v2479_v7, %v2475_v17  ;;  %v2483_v57 = vrot.slane %v2481_v60, 1  ;;  %v2617_v18 = vsel %vm1379_vm5, %v2615_v8, %v2616_v6  ;;  %v11267_v8 = vpop.f32.mrf.mxu2 }
 0x545   : > { %v3581_v16 = vmax.f32 %v3579_v54, %v3580_v14  ;;  %v3600_v23 = vmax.f32 %v3598_v44, %v3599_v47  ;;  %v3634_v13 = vrot.slane %v3633_v43, 4  ;;  %v3641_v48 = vrot.slane %v3640_v31, 4  ;;  %2651 = vrot.lane.b32.xlu2 %v2617_v18, %s9713_s17 }
 0x546   : > { %v3607_v25 = vmax.f32 %v3605_v37, %v3606_v19  ;;  %v3614_v26 = vmax.f32 %v3612_v59, %v3613_v34  ;;  %v2941_v55 = vadd.f32 %v11178_v5, %v2940_v4  ;;  %v2484_v22 = vsel %vm14435_vm6, %v2480_v27, %v2483_v57 }
 0x547   : > { %v4631_v49 = vunpack.c.l.b16 %v11237_v3  ;;  %v3621_v2 = vmax.f32 %v3619_v61, %v3620_v50  ;;  %v3628_v15 = vmax.f32 %v3626_v41, %v3627_v12  ;;  %2539 = vrot.lane.b32.xlu1 %v2484_v22, %s14433_s26  ;;  %v11265_v54 = vmax.f32 %v11200_v0, %v11219_v33 }
 0x548   : > { %v3568_v44 = vrot.slane %v3567_v32, 1  ;;  %v3575_v14 = vrot.slane %v3574_v30, 1  ;;  %v3588_v47 = vmax.f32 %v3586_v52, %v3587_v10  ;;  %v3594_v7 = vrot.slane %v3593_v63, 2 }
 0x549   : > { %v3601_v37 = vrot.slane %v3600_v23, 2  ;;  %v3635_v59 = vmax.f32 %v3633_v43, %v3634_v13  ;;  %v3642_v19 = vmax.f32 %v3640_v31, %v3641_v48  ;;  %v3582_v4 = vrot.slane %v3581_v16, 1  ;;  %v2536_v27 = vpop.permute.xlu1 %2535  ;;  %v11276_v13 = vpop.f32.mrf.mxu1 }
 0x54a   : > { %v3608_v34 = vrot.slane %v3607_v25, 2  ;;  %v3615_v17 = vrot.slane %v3614_v26, 2  ;;  %v3030_v50 = vadd.f32 %v3029_v40, %v2941_v55  ;;  %v3622_v61 = vrot.slane %v3621_v2, 2 }
 0x54b   : > { %v3629_v41 = vrot.slane %v3628_v15, 2  ;;  %v4279_v60 = vmax.f32 %v11234_v11, %v4278_v39  ;;  %v4281_v0 = vsel %vm2290_vm10, %v11228_v1, -inf  ;;  %v3569_v33 = vmax.f32 %v3567_v32, %v3568_v44 }
 0x54c   : > { %v3576_v6 = vmax.f32 %v3574_v30, %v3575_v14  ;;  %v3589_v10 = vrot.slane %v3588_v47, 1  ;;  %v3595_v52 = vmax.f32 %v3593_v63, %v3594_v7  ;;  %v3602_v12 = vmax.f32 %v3600_v23, %v3601_v37 }
 0x54d   : > { %v3636_v43 = vrot.slane %v3635_v59, 2  ;;  %v3643_v31 = vrot.slane %v3642_v19, 2  ;;  %9684 = vrot.lane.b32.xlu2 %v10214_v46, %s9712_s16  ;;  %v4440_v40 = vpack.c.bf16 %v11265_v54, %v11265_v54  ;;  %v3583_v57 = vmax.f32 %v3581_v16, %v3582_v4 }
 0x54e   : > { %v3609_v18 = vmax.f32 %v3607_v25, %v3608_v34  ;;  %v3616_v11 = vmax.f32 %v3614_v26, %v3615_v17  ;;  %v3093_v39 = vmax.f32 %v3030_v50, 0.0  ;;  %v3623_v1 = vmax.f32 %v3621_v2, %v3622_v61  ;;  %v2185_v61 = vpop.permute.xlu2 %2184 }
 0x54f   : > { %v3630_v30 = vmax.f32 %v3628_v15, %v3629_v41  ;;  %v2680_v23 = vsel %vm14429_vm8, %v11028_v36, %v2536_v27  ;;  %v4282_v32 = vmax.f32 %v11245_v24, %v4281_v0  ;;  %v3590_v63 = vmax.f32 %v3588_v47, %v3589_v10 }
 0x550   : > { %v4283_v48 = vsel %vm2290_vm10, %v3569_v33, -inf  ;;  %v4286_v46 = vsel %vm2290_vm10, %v3576_v6, -inf  ;;  %v3596_v55 = vrot.slane %v3595_v52, 1  ;;  %v3603_v22 = vrot.slane %v3602_v12, 1 }
 0x551   : > { %v3637_v16 = vmax.f32 %v3635_v59, %v3636_v43  ;;  %v3644_v25 = vmax.f32 %v3642_v19, %v3643_v31  ;;  %v2723_v26 = vsel %vm2691_vm11, %v2680_v23, %v11202_v38  ;;  %v11286_v2 = vsel %vm2290_vm10, %v3583_v57, -inf  ;;  %v11290_v59 = vpop.f32.mrf.mxu2 }
 0x552   : > { %v3610_v15 = vrot.slane %v3609_v18, 1  ;;  %v3617_v54 = vrot.slane %v3616_v11, 1  ;;  %v3179_v36 = vrot.slane %v3093_v39, 2  ;;  %2962 = vmatmul.bf16.gmra.mxu1 %v2723_v26  ;;  %v3624_v24 = vrot.slane %v3623_v1, 1 }
 0x553   : > { %v3631_v44 = vrot.slane %v3630_v30, 1  ;;  %v3180_v14 = vrot.slane %v3093_v39, 4  ;;  %v3647_v47 = vsel %vm3338_vm12, %v3093_v39, -inf  ;;  %v4292_v7 = vsel %vm2290_vm10, %v3590_v63, -inf }
 0x554   : > { %v3597_v37 = vmax.f32 %v3595_v52, %v3596_v55  ;;  %v4441_v19 = vpack.c.bf16 %v4279_v60, %v4279_v60  ;;  %v4442_v4 = vpack.c.bf16 %v4282_v32, %v4282_v32  ;;  %v3604_v38 = vmax.f32 %v3602_v12, %v3603_v22 }
 0x555   : > { %v3638_v34 = vrot.slane %v3637_v16, 1  ;;  %v3645_v17 = vrot.slane %v3644_v25, 1  ;;  %v3181_v50 = vrot.slane %v3093_v39, 6  ;;  %v3611_v41 = vmax.f32 %v3609_v18, %v3610_v15  ;;  %v2948_v18 = vpop.f32.mrf.mxu1 }
 0x556   : > { %v11292_v0 = vmax.f32 %v3616_v11, %v3617_v54  ;;  %v3648_v33 = vrot.slane %v3647_v47, 4  ;;  %v14496_v6 = vunpack.c.l.b16 %v11189_v20  ;;  %v14497_v10 = vunpack.c.l.b16 %v11192_v35 }
 0x557   : > { %v3625_v52 = vmax.f32 %v3623_v1, %v3624_v24  ;;  %v3632_v31 = vmax.f32 %v3630_v30, %v3631_v44  ;;  %v3654_v60 = vsel %vm3338_vm12, %v3179_v36, -inf  ;;  %v3661_v12 = vsel %vm3338_vm12, %v3180_v14, -inf }
 0x558   : > { %v4697_v43 = vsel %vm4683_vm13, %v14497_v10, %v14496_v6  ;;  %v11302_v27 = vsel %vm2290_vm10, %v3597_v37, -inf  ;;  %v11306_v57 = vsel %vm2290_vm10, %v11102_v9, %v2185_v61  ;;  %v11308_v11 = vperm.slane %v4440_v40, 0 }
 0x559   : > { %14498 = vst [vmem:[#allocation12_spill] sm:$0xff] %v11306_v57  ;;  %v11310_v20 = vperm.slane %v4441_v19, 0  ;;  %v11313_v35 = vsel %vm2290_vm10, %v3604_v38, -inf  ;;  %v3639_v39 = vmax.f32 %v3637_v16, %v3638_v34  ;;  %v3646_v1 = vmax.f32 %v3644_v25, %v3645_v17  ;;  %v2187_v25 = vpop.permute.xlu1 %2186  ;;  %v3037_v17 = vpop.f32.mrf.mxu2 }
 0x55a   : > { %v3668_v30 = vsel %vm3338_vm12, %v3181_v50, -inf  ;;  %v3649_v23 = vmax.f32 %v3647_v47, %v3648_v33  ;;  %v3655_v32 = vrot.slane %v3654_v60, 4  ;;  %v3662_v63 = vrot.slane %v3661_v12, 4 }
 0x55b   : > { %v14499_v55 = vunpack.c.l.b16 %v11194_v29  ;;  %v4284_v22 = vsel %vm2290_vm10, %v3625_v52, -inf  ;;  %v4287_v40 = vsel %vm2290_vm10, %v3632_v31, -inf  ;;  %v2487_v26 = vshll.u32 %v11306_v57, 16 }
 0x55c   : > { %v2949_v15 = vadd.f32 %v11178_v5, %v2948_v18  ;;  %v3669_v54 = vrot.slane %v3668_v30, 4  ;;  %v2944_v16 = vadd.f32 %v11178_v5, %v11255_v42  ;;  %v11325_v36 = vperm.slane %v4442_v4, 0 }
 0x55d   : > { %v4698_v9 = vsel %vm4685_vm14, %v14499_v55, %v4697_v43  ;;  %v11328_v24 = vsel %vm2290_vm10, %v3611_v41, -inf  ;;  %v4290_v29 = vsel %vm2290_vm10, %v3639_v39, -inf  ;;  %v4293_v44 = vsel %vm2290_vm10, %v3646_v1, -inf }
 0x55e   : > { %v4632_v14 = vunpack.c.l.b16 %v11308_v11  ;;  %v14500_v47 = vunpack.c.l.b16 %v11196_v62  ;;  %v4285_v19 = vmax.f32 %v4283_v48, %v4284_v22  ;;  %v4288_v38 = vmax.f32 %v4286_v46, %v4287_v40  ;;  %v2950_v11 = vpop.f32.mrf.mxu1 }
 0x55f   : > { %v3650_v34 = vrot.slane %v3649_v23, 2  ;;  %v3656_v42 = vmax.f32 %v3654_v60, %v3655_v32  ;;  %v3663_v4 = vmax.f32 %v3661_v12, %v3662_v63  ;;  %v2489_v50 = vrot.slane %v2487_v26, 1 }
 0x560   : > { %v4699_v37 = vsel %vm4687_vm15, %v14500_v47, %v4698_v9  ;;  %v3038_v61 = vadd.f32 %v3037_v17, %v2949_v15  ;;  %v2346_v41 = vsel %vm2290_vm10, %v11108_v21, %v2187_v25  ;;  %v4291_v33 = vmax.f32 %v11286_v2, %v4290_v29 }
 0x561   : > { %v4294_v6 = vmax.f32 %v4292_v7, %v4293_v44  ;;  %v3670_v10 = vmax.f32 %v3668_v30, %v3669_v54  ;;  %v3033_v43 = vadd.f32 %v11267_v8, %v2944_v16  ;;  %v2485_v62 = vshrl.u32 %v11306_v57, 16  ;;  %v3039_v29 = vpop.f32.mrf.mxu2 }
 0x562   : > { %v2618_v48 = vrot.slane %v11306_v57, 1  ;;  %v2491_v46 = vshll.u32 %v2346_v41, 16  ;;  %v2619_v52 = vrot.slane %v2346_v41, 1  ;;  %v4443_v31 = vpack.c.bf16 %v4285_v19, %v4285_v19 }
 0x563   : > { %v4444_v60 = vpack.c.bf16 %v4288_v38, %v4288_v38  ;;  %v3651_v12 = vmax.f32 %v3649_v23, %v3650_v34  ;;  %v3657_v18 = vrot.slane %v3656_v42, 2  ;;  %v2490_v39 = vor.u32 %v2489_v50, %v2485_v62 }
 0x564   : > { %v11342_v1 = vmax.f32 %v3038_v61, 0.0  ;;  %v2493_v21 = vrot.slane %v2491_v46, 1  ;;  %v2620_v2 = vsel %vm1379_vm5, %v2618_v48, %v2619_v52  ;;  %v3664_v7 = vrot.slane %v3663_v4, 2 }
 0x565   : > { %v3671_v30 = vrot.slane %v3670_v10, 2  ;;  %v3094_v8 = vmax.f32 %v3033_v43, 0.0  ;;  %2653 = vrot.lane.b32.xlu1 %v2620_v2, %s9713_s17  ;;  %v4700_v32 = vsel %vm4689_vm1, %v4631_v49, %v4699_v37  ;;  %v4445_v63 = vpack.c.bf16 %v4291_v33, %v4291_v33 }
 0x566   : > { %v2946_v23 = vadd.f32 %v11178_v5, %v11276_v13  ;;  %v2951_v55 = vadd.f32 %v11178_v5, %v2950_v11  ;;  %v2494_v9 = vsel %vm14435_vm6, %v2490_v39, %v2493_v21  ;;  %v4446_v22 = vpack.c.bf16 %v4294_v6, %v4294_v6 }
 0x567   : > { %v11353_v40 = vperm.slane %v4443_v31, 0  ;;  %v3652_v26 = vrot.slane %v3651_v12, 1  ;;  %2541 = vrot.lane.b32.xlu2 %v2494_v9, %s14433_s26  ;;  %v11357_v54 = vperm.slane %v4444_v60, 0  ;;  %v3658_v3 = vmax.f32 %v3656_v42, %v3657_v18 }
 0x568   : > { %v3188_v49 = vrot.slane %v11342_v1, 2  ;;  %v3665_v13 = vmax.f32 %v3663_v4, %v3664_v7  ;;  %v3182_v25 = vrot.slane %v3094_v8, 2  ;;  %v11362_v44 = vsel %vm4691_vm9, %v4632_v14, %v4700_v32 }
 0x569   : > { %v11366_v47 = vsel %vm2290_vm10, %v11292_v0, -inf  ;;  %v11368_v37 = vperm.slane %v4445_v63, 0  ;;  %v3672_v19 = vmax.f32 %v3670_v10, %v3671_v30  ;;  %v3035_v38 = vadd.f32 %v11290_v59, %v2946_v23 }
 0x56a   : > { %v3040_v34 = vadd.f32 %v3039_v29, %v2951_v55  ;;  %v11371_v42 = vperm.slane %v4446_v22, 0  ;;  %v3653_v4 = vmax.f32 %v3651_v12, %v3652_v26  ;;  %v3189_v50 = vrot.slane %v11342_v1, 4 }
 0x56b   : > { %v3659_v61 = vrot.slane %v3658_v3, 1  ;;  %v3183_v41 = vrot.slane %v3094_v8, 4  ;;  %v3738_v0 = vsel %vm3338_vm12, %v3188_v49, -inf  ;;  %v3666_v33 = vrot.slane %v3665_v13, 1 }
 0x56c   : > { %v3184_v6 = vrot.slane %v3094_v8, 6  ;;  %v3675_v10 = vsel %vm3338_vm12, %v3094_v8, -inf  ;;  %v3682_v59 = vsel %vm3338_vm12, %v3182_v25, -inf  ;;  %v3673_v43 = vrot.slane %v3672_v19, 1 }
 0x56d   : > { %v11379_v62 = vmax.f32 %v3035_v38, 0.0  ;;  %v3731_v48 = vsel %vm3338_vm12, %v11342_v1, -inf  ;;  %v11383_v46 = vmax.f32 %v3040_v34, 0.0  ;;  %v4296_v31 = vsel %vm2290_vm10, %v3653_v4, -inf }
 0x56e   : > { %v3739_v60 = vrot.slane %v3738_v0, 4  ;;  %v3745_v12 = vsel %vm3338_vm12, %v3189_v50, -inf  ;;  %v3676_v18 = vrot.slane %v3675_v10, 4  ;;  %v3683_v11 = vrot.slane %v3682_v59, 4 }
 0x56f   : > { %v3689_v39 = vsel %vm3338_vm12, %v3183_v41, -inf  ;;  %v3190_v21 = vrot.slane %v11342_v1, 6  ;;  %v3660_v2 = vmax.f32 %v3658_v3, %v3659_v61  ;;  %v11390_v7 = vmax.f32 %v3665_v13, %v3666_v33 }
 0x570   : > { %v3696_v30 = vsel %vm3338_vm12, %v3184_v6, -inf  ;;  %v3732_v8 = vrot.slane %v3731_v48, 4  ;;  %v11393_v32 = vmax.f32 %v3672_v19, %v3673_v43  ;;  %v3185_v63 = vrot.slane %v11379_v62, 2 }
 0x571   : > { %v3746_v23 = vrot.slane %v3745_v12, 4  ;;  %v3191_v55 = vrot.slane %v11383_v46, 2  ;;  %v11398_v9 = vmax.f32 %v11302_v27, %v4296_v31  ;;  %v3690_v22 = vrot.slane %v3689_v39, 4 }
 0x572   : > { %v3740_v26 = vmax.f32 %v3738_v0, %v3739_v60  ;;  %v3759_v1 = vsel %vm3338_vm12, %v11383_v46, -inf  ;;  %v3677_v3 = vmax.f32 %v3675_v10, %v3676_v18  ;;  %v3684_v49 = vmax.f32 %v3682_v59, %v3683_v11 }
 0x573   : > { %v3697_v13 = vrot.slane %v3696_v30, 4  ;;  %v3752_v25 = vsel %vm3338_vm12, %v3190_v21, -inf  ;;  %v11404_v29 = vsel %vm2290_vm10, %v3660_v2, -inf  ;;  %v3703_v19 = vsel %vm3338_vm12, %v11379_v62, -inf }
 0x574   : > { %v3733_v38 = vmax.f32 %v3731_v48, %v3732_v8  ;;  %v3192_v27 = vrot.slane %v11383_v46, 4  ;;  %v3710_v34 = vsel %vm3338_vm12, %v3185_v63, -inf  ;;  %v3747_v4 = vmax.f32 %v3745_v12, %v3746_v23 }
 0x575   : > { %v3760_v50 = vrot.slane %v3759_v1, 4  ;;  %v3766_v61 = vsel %vm3338_vm12, %v3191_v55, -inf  ;;  %v3691_v41 = vmax.f32 %v3689_v39, %v3690_v22  ;;  %v3186_v0 = vrot.slane %v11379_v62, 4 }
 0x576   : > { %v3741_v33 = vrot.slane %v3740_v26, 2  ;;  %v3753_v6 = vrot.slane %v3752_v25, 4  ;;  %v3678_v10 = vrot.slane %v3677_v3, 2  ;;  %v3685_v59 = vrot.slane %v3684_v49, 2 }
 0x577   : > { %v3698_v43 = vmax.f32 %v3696_v30, %v3697_v13  ;;  %v3704_v31 = vrot.slane %v3703_v19, 4  ;;  %v3711_v60 = vrot.slane %v3710_v34, 4  ;;  %v3734_v18 = vrot.slane %v3733_v38, 2 }
 0x578   : > { %v3767_v48 = vrot.slane %v3766_v61, 4  ;;  %v3773_v11 = vsel %vm3338_vm12, %v3192_v27, -inf  ;;  %v3187_v21 = vrot.slane %v11379_v62, 6  ;;  %v3748_v12 = vrot.slane %v3747_v4, 2 }
 0x579   : > { %v3193_v2 = vrot.slane %v11383_v46, 6  ;;  %v3761_v8 = vmax.f32 %v3759_v1, %v3760_v50  ;;  %v3692_v39 = vrot.slane %v3691_v41, 2  ;;  %v3717_v63 = vsel %vm3338_vm12, %v3186_v0, -inf }
 0x57a   : > { %v3742_v23 = vmax.f32 %v3740_v26, %v3741_v33  ;;  %v3754_v55 = vmax.f32 %v3752_v25, %v3753_v6  ;;  %v3686_v22 = vmax.f32 %v3684_v49, %v3685_v59  ;;  %v3699_v16 = vrot.slane %v3698_v43, 2 }
 0x57b   : > { %v3705_v30 = vmax.f32 %v3703_v19, %v3704_v31  ;;  %v3774_v13 = vrot.slane %v3773_v11, 4  ;;  %v3679_v52 = vmax.f32 %v3677_v3, %v3678_v10  ;;  %v3712_v15 = vmax.f32 %v3710_v34, %v3711_v60 }
 0x57c   : > { %v3735_v14 = vmax.f32 %v3733_v38, %v3734_v18  ;;  %v3768_v17 = vmax.f32 %v3766_v61, %v3767_v48  ;;  %v3718_v27 = vrot.slane %v3717_v63, 4  ;;  %v3749_v57 = vmax.f32 %v3747_v4, %v3748_v12 }
 0x57d   : > { %v3762_v62 = vrot.slane %v3761_v8, 2  ;;  %v3780_v56 = vsel %vm3338_vm12, %v3193_v2, -inf  ;;  %v3693_v46 = vmax.f32 %v3691_v41, %v3692_v39  ;;  %v3724_v1 = vsel %vm3338_vm12, %v3187_v21, -inf }
 0x57e   : > { %v3743_v50 = vrot.slane %v3742_v23, 1  ;;  %v3755_v0 = vrot.slane %v3754_v55, 2  ;;  %v3687_v26 = vrot.slane %v3686_v22, 1  ;;  %v3700_v25 = vmax.f32 %v3698_v43, %v3699_v16 }
 0x57f   : > { %v3706_v49 = vrot.slane %v3705_v30, 2  ;;  %v3775_v33 = vmax.f32 %v3773_v11, %v3774_v13  ;;  %v3713_v19 = vrot.slane %v3712_v15, 2  ;;  %v3736_v6 = vrot.slane %v3735_v14, 1 }
 0x580   : > { %v3769_v3 = vrot.slane %v3768_v17, 2  ;;  %v3781_v34 = vrot.slane %v3780_v56, 4  ;;  %v3680_v38 = vrot.slane %v3679_v52, 1  ;;  %v3719_v61 = vmax.f32 %v3717_v63, %v3718_v27 }
 0x581   : > { %v3750_v10 = vrot.slane %v3749_v57, 1  ;;  %v3763_v4 = vmax.f32 %v3761_v8, %v3762_v62  ;;  %v3694_v59 = vrot.slane %v3693_v46, 1  ;;  %v3725_v31 = vrot.slane %v3724_v1, 4 }
 0x582   : > { %v3744_v60 = vmax.f32 %v3742_v23, %v3743_v50  ;;  %v3756_v41 = vmax.f32 %v3754_v55, %v3755_v0  ;;  %v3688_v18 = vmax.f32 %v3686_v22, %v3687_v26  ;;  %v3701_v48 = vrot.slane %v3700_v25, 1 }
 0x583   : > { %v3707_v21 = vmax.f32 %v3705_v30, %v3706_v49  ;;  %v3776_v12 = vrot.slane %v3775_v33, 2  ;;  %v3714_v2 = vmax.f32 %v3712_v15, %v3713_v19  ;;  %v3737_v16 = vmax.f32 %v3735_v14, %v3736_v6 }
 0x584   : > { %v3770_v43 = vmax.f32 %v3768_v17, %v3769_v3  ;;  %v3782_v11 = vmax.f32 %v3780_v56, %v3781_v34  ;;  %v3681_v39 = vmax.f32 %v3679_v52, %v3680_v38  ;;  %v3720_v13 = vrot.slane %v3719_v61, 2 }
 0x585   : > { %v3751_v53 = vmax.f32 %v3749_v57, %v3750_v10  ;;  %v3764_v45 = vrot.slane %v3763_v4, 1  ;;  %v3695_v58 = vmax.f32 %v3693_v46, %v3694_v59  ;;  %v3726_v63 = vmax.f32 %v3724_v1, %v3725_v31  ;;  %v11424_v1 = vpop.permute.xlu0 %2124 }
 0x586   : > { %v3757_v27 = vrot.slane %v3756_v41, 1  ;;  %v4311_v8 = vsel %vm2290_vm10, %v3744_v60, -inf  ;;  %v3702_v62 = vmax.f32 %v3700_v25, %v3701_v48  ;;  %v4310_v23 = vsel %vm2290_vm10, %v3688_v18, -inf }
 0x587   : > { %v3708_v55 = vrot.slane %v3707_v21, 1  ;;  %v3777_v22 = vmax.f32 %v3775_v33, %v3776_v12  ;;  %v3715_v30 = vrot.slane %v3714_v2, 1  ;;  %v4308_v15 = vsel %vm2290_vm10, %v3737_v16, -inf }
 0x588   : > { %v3771_v14 = vrot.slane %v3770_v43, 1  ;;  %v3783_v17 = vrot.slane %v3782_v11, 2  ;;  %v3721_v56 = vmax.f32 %v3719_v61, %v3720_v13  ;;  %v4312_v52 = vmax.f32 %v4310_v23, %v4311_v8 }
 0x589   : > { %v4314_v57 = vsel %vm2290_vm10, %v3751_v53, -inf  ;;  %v3765_v50 = vmax.f32 %v3763_v4, %v3764_v45  ;;  %v4447_v0 = vpack.c.bf16 %v11398_v9, %v11398_v9  ;;  %v4307_v26 = vsel %vm2290_vm10, %v3681_v39, -inf }
 0x58a   : > { %v11422_v46 = vpop.permute.xlu2 %2649  ;;  %v3727_v25 = vrot.slane %v3726_v63, 2  ;;  %v3758_v49 = vmax.f32 %v3756_v41, %v3757_v27  ;;  %v4313_v33 = vsel %vm2290_vm10, %v3695_v58, -inf  ;;  %v3709_v19 = vmax.f32 %v3707_v21, %v3708_v55 }
 0x58b   : > { %9245 = vmatmul.msk.bf16.gmra.mxu2 %vm1089_vm3, %v11422_v46  ;;  %v4309_v6 = vmax.f32 %v4307_v26, %v4308_v15  ;;  %v3778_v53 = vrot.slane %v3777_v22, 1  ;;  %v4316_v45 = vsel %vm2290_vm10, %v3702_v62, -inf  ;;  %v4315_v3 = vmax.f32 %v4313_v33, %v4314_v57 }
 0x58c   : > { %v3772_v34 = vmax.f32 %v3770_v43, %v3771_v14  ;;  %v3784_v38 = vmax.f32 %v3782_v11, %v3783_v17  ;;  %v3716_v61 = vmax.f32 %v3714_v2, %v3715_v30  ;;  %v3722_v10 = vrot.slane %v3721_v56, 1 }
 0x58d   : > { %v4452_v9 = vpack.c.bf16 %v4312_v52, %v4312_v52  ;;  %v4320_v4 = vsel %vm2290_vm10, %v3765_v50, -inf  ;;  %v3728_v59 = vmax.f32 %v3726_v63, %v3727_v25  ;;  %v4317_v31 = vsel %vm2290_vm10, %v3758_v49, -inf  ;;  %v11447_v55 = vpop.permute.xlu0 %2126 }
 0x58e   : > { %v4300_v60 = vmax.f32 %v11313_v35, %v11404_v29  ;;  %v4302_v58 = vsel %vm2290_vm10, %v11390_v7, -inf  ;;  %v4319_v41 = vsel %vm2290_vm10, %v3709_v19, -inf  ;;  %v4451_v18 = vpack.c.bf16 %v4309_v6, %v4309_v6 }
 0x58f   : > { %v3779_v48 = vmax.f32 %v3777_v22, %v3778_v53  ;;  %v4305_v21 = vsel %vm2290_vm10, %v11393_v32, -inf  ;;  %v4453_v12 = vpack.c.bf16 %v4315_v3, %v4315_v3  ;;  %v3785_v2 = vrot.slane %v3784_v38, 1 }
 0x590   : > { %v4321_v16 = vmax.f32 %v4319_v41, %v4320_v4  ;;  %v4323_v43 = vsel %vm2290_vm10, %v3772_v34, -inf  ;;  %v3723_v11 = vmax.f32 %v3721_v56, %v3722_v10  ;;  %v4318_v39 = vmax.f32 %v4316_v45, %v4317_v31 }
 0x591   : > { %v4580_v13 = vperm.slane %v4452_v9, 0  ;;  %v4303_v35 = vmax.f32 %v11328_v24, %v4302_v58  ;;  %v4575_v29 = vperm.slane %v4447_v0, 0  ;;  %v3729_v63 = vrot.slane %v3728_v59, 1 }
 0x592   : > { %v4322_v7 = vsel %vm2290_vm10, %v3716_v61, -inf  ;;  %v4448_v27 = vpack.c.bf16 %v4300_v60, %v4300_v60  ;;  %v4579_v8 = vperm.slane %v4451_v18, 0  ;;  %v4306_v62 = vmax.f32 %v11366_v47, %v4305_v21  ;;  %v11454_v57 = vpop.permute.xlu2 %2188 }
 0x593   : > { %v4324_v32 = vmax.f32 %v4322_v7, %v4323_v43  ;;  %v4326_v23 = vsel %vm2290_vm10, %v3779_v48, -inf  ;;  %v4581_v22 = vperm.slane %v4453_v12, 0  ;;  %v3786_v30 = vmax.f32 %v3784_v38, %v3785_v2 }
 0x594   : > { %v4455_v15 = vpack.c.bf16 %v4321_v16, %v4321_v16  ;;  %v14501_v14 = vunpack.c.l.b16 %v11353_v40  ;;  %v14502_v24 = vunpack.c.l.b16 %v11357_v54  ;;  %v4454_v56 = vpack.c.bf16 %v4318_v39, %v4318_v39 }
 0x595   : > { %v4644_v52 = vunpack.c.l.b16 %v4580_v13  ;;  %v4449_v50 = vpack.c.bf16 %v4303_v35, %v4303_v35  ;;  %v4325_v47 = vsel %vm2290_vm10, %v3723_v11, -inf  ;;  %v3730_v0 = vmax.f32 %v3728_v59, %v3729_v63  ;;  %v2129_v18 = vpop.permute.xlu0 %2128 }
 0x596   : > { %v4704_v17 = vsel %vm4683_vm13, %v14502_v24, %v14501_v14  ;;  %v14503_v26 = vunpack.c.l.b16 %v11310_v20  ;;  %v4576_v49 = vperm.slane %v4448_v27, 0  ;;  %v4327_v33 = vmax.f32 %v4325_v47, %v4326_v23 }
 0x597   : > { %v4639_v40 = vunpack.c.l.b16 %v4575_v29  ;;  %v4643_v19 = vunpack.c.l.b16 %v4579_v8  ;;  %v14504_v54 = vunpack.c.l.b16 %v11368_v37  ;;  %v4456_v53 = vpack.c.bf16 %v4324_v32, %v4324_v32 }
 0x598   : > { %v4702_v25 = vsel %vm14428_vm7, %v14503_v26, %v11362_v44  ;;  %v4638_v45 = vunpack.c.l.b16 %v11371_v42  ;;  %v4645_v3 = vunpack.c.l.b16 %v4581_v22  ;;  %v4583_v34 = vperm.slane %v4455_v15, 0 }
 0x599   : > { %v4705_v6 = vsel %vm4685_vm14, %v14504_v54, %v4704_v17  ;;  %v4329_v38 = vsel %vm2290_vm10, %v3786_v30, -inf  ;;  %v4582_v61 = vperm.slane %v4454_v56, 0  ;;  %v4450_v10 = vpack.c.bf16 %v4306_v62, %v4306_v62  ;;  %v3042_v30 = vpop.f32.mrf.mxu2 }
 0x59a   : > { %v4577_v20 = vperm.slane %v4449_v50, 0  ;;  %v4711_v44 = vsel %vm4683_vm13, %v4644_v52, %v4643_v19  ;;  %v4640_v9 = vunpack.c.l.b16 %v4576_v49  ;;  %v4706_v4 = vsel %vm4687_vm15, %v4638_v45, %v4705_v6  ;;  %v14507_v50 = vld [vmem:[#allocation10_spill] sm:$0xff] }
 0x59b   : > { %v4328_v59 = vsel %vm2290_vm10, %v3730_v0, -inf  ;;  %v4457_v37 = vpack.c.bf16 %v4327_v33, %v4327_v33  ;;  %v14505_v31 = vunpack.c.l.b16 %v11325_v36  ;;  %v4707_v42 = vsel %vm4689_vm1, %v4639_v40, %v4706_v4  ;;  %v14508_v0 = vld [vmem:[#allocation6_spill] sm:$0xff] }
 0x59c   : > { %v4330_v58 = vmax.f32 %v4328_v59, %v4329_v38  ;;  %v4584_v41 = vperm.slane %v4456_v53, 0  ;;  %v4647_v48 = vunpack.c.l.b16 %v4583_v34  ;;  %v4712_v21 = vsel %vm4685_vm14, %v4645_v3, %v4711_v44 }
 0x59d   : > { %v4703_v60 = vsel %vm14427_vm4, %v14505_v31, %v4702_v25  ;;  %v4646_v12 = vunpack.c.l.b16 %v4582_v61  ;;  %v4641_v2 = vunpack.c.l.b16 %v4577_v20  ;;  %v14506_v16 = vunpack.c.l.b16 %v11119_v51  ;;  %v2131_v26 = vpop.permute.xlu0 %2130  ;;  %v14510_v61 = vld [vmem:[#allocation9_spill] sm:$0xff] }
 0x59e   : > { %v4747_v39 = vpack.c.b16 %v4703_v60, %v4703_v60  ;;  %v4578_v36 = vperm.slane %v4450_v10, 0  ;;  %v4708_v13 = vsel %vm4691_vm9, %v4640_v9, %v4707_v42  ;;  %v4585_v35 = vperm.slane %v4457_v37, 0  ;;  %v14511_v60 = vld [vmem:[#allocation7_spill] sm:$0xff] }
 0x59f   : > { %v4696_v43 = vsel %vm14427_vm4, %v14506_v16, %v11141_v28  ;;  %v11479_v29 = vpop.permute.xlu2 %2651  ;;  %v4458_v63 = vpack.c.bf16 %v4330_v58, %v4330_v58  ;;  %v4648_v7 = vunpack.c.l.b16 %v4584_v41  ;;  %v4713_v27 = vsel %vm4687_vm15, %v4646_v12, %v4712_v21 }
 0x5a0   : > { %9246 = vmatmul.msk.bf16.gmra.mxu2 %vm1089_vm3, %v11479_v29  ;;  %v4746_v8 = vpack.c.b16 %v4696_v43, %v4696_v43  ;;  %v4714_v51 = vsel %vm4689_vm1, %v4647_v48, %v4713_v27  ;;  %v4709_v62 = vsel %vm14428_vm7, %v4641_v2, %v4708_v13  ;;  %v4762_v32 = vshrl.u32 %v4747_v39, 16 }
 0x5a1   : > { %v2953_v11 = vpop.f32.mrf.mxu1  ;;  %v4642_v23 = vunpack.c.l.b16 %v4578_v36  ;;  %v4649_v22 = vunpack.c.l.b16 %v4585_v35  ;;  %v4586_v15 = vperm.slane %v4458_v63, 0  ;;  %v4715_v14 = vsel %vm4691_vm9, %v4648_v7, %v4714_v51  ;;  %v3044_v21 = vpop.f32.mrf.mxu2 }
 0x5a2   : > { %v2954_v28 = vadd.f32 %v11178_v5, %v2953_v11  ;;  %v4755_v56 = vshrl.u32 %v4746_v8, 16  ;;  %v2280_v5 = vsel %vm1089_vm3, %v14508_v0, %v11424_v1  ;;  %v4764_v25 = vrot.slane %v4762_v32, 7  ;;  %v14509_v1 = vld [vmem:[#allocation8_spill] sm:$0xff] }
 0x5a3   : > { %v4710_v17 = vsel %vm14427_vm4, %v4642_v23, %v4709_v62  ;;  %v4716_v49 = vsel %vm14428_vm7, %v4649_v22, %v4715_v14  ;;  %v11497_v33 = vsel %vm2290_vm10, %v2280_v5, %v11454_v57  ;;  %v4650_v6 = vunpack.c.l.b16 %v4586_v15 }
 0x5a4   : > { %v3043_v52 = vadd.f32 %v3042_v30, %v2954_v28  ;;  %v4748_v54 = vpack.c.b16 %v4710_v17, %v4710_v17  ;;  %v4765_v3 = vshll.u32 %v4747_v39, 16  ;;  %v4757_v34 = vrot.slane %v4755_v56, 7  ;;  %v12640_v28 = vld [vmem:[%s14403_s12] ss:$0 sm:$0xff] }
 0x5a5   : > { %v2538_v24 = vpop.permute.xlu1 %2537  ;;  %v2286_v38 = vsel %vm1089_vm3, %v14509_v1, %v2129_v18  ;;  %v2289_v10 = vsel %vm1089_vm3, %v14510_v61, %v2131_v26  ;;  %v4717_v57 = vsel %vm14427_vm4, %v4650_v6, %v4716_v49  ;;  %v2497_v44 = vshll.u32 %v11497_v33, 16 }
 0x5a6   : > { %v2682_v47 = vsel %vm14429_vm8, %v14507_v50, %v2538_v24  ;;  %v3098_v20 = vmax.f32 %v3043_v52, 0.0  ;;  %v4767_v4 = vor.u32 %v4765_v3, %v4764_v25  ;;  %v4769_v31 = vshrl.u32 %v4748_v54, 16 }
 0x5a7   : > { %v9685_v40 = vpop.permute.xlu2 %9684  ;;  %v2726_v19 = vsel %vm2691_vm11, %v2682_v47, %v11422_v46  ;;  %v2283_v42 = vsel %vm1089_vm3, %v14511_v60, %v11447_v55  ;;  %v4758_v18 = vshll.u32 %v4746_v8, 16  ;;  %v4749_v48 = vpack.c.b16 %v4717_v57, %v4717_v57  ;;  %v11526_v55 = vld [vmem:[%s14395_s4] ss:$0 sm:$0xff]  ;;  %v14515_v60 = vld [vmem:[#allocation11_spill] sm:$0xff] }
 0x5a8   : > { %v9687_v53 = vunpack.i.h.bf16 %v9685_v40  ;;  %v9686_v45 = vunpack.i.l.bf16 %v9685_v40  ;;  %2967 = vmatmul.bf16.gmra.mxu1 %v2726_v19  ;;  %v3787_v12 = vsel %vm3338_vm12, %v3098_v20, -inf  ;;  %vm4827_vm4 = vsmask.f32 4352 }
 0x5a9   : > { %v2955_v58 = vpop.f32.mrf.mxu1  ;;  %v2499_v16 = vrot.slane %v2497_v44, 1  ;;  %v3194_v43 = vrot.slane %v3098_v20, 2  ;;  %v4819_v39 = vsel %vm9822_vm2, 0, %v4767_v4  ;;  %v4760_v36 = vor.u32 %v4758_v18, %v4757_v34  ;;  %vm11533_vm7 = vmand %vm4826_vm0, %vm4827_vm4 }
 0x5aa   : > { %v11508_v46 = vsel %vm2290_vm10, %v2289_v10, %v9687_v53  ;;  %v11511_v9 = vsel %vm2290_vm10, %v2286_v38, %v9686_v45  ;;  %v2956_v13 = vadd.f32 %v11526_v55, %v2955_v58  ;;  %v4771_v63 = vrot.slane %v4769_v31, 7  ;;  %v3047_v45 = vpop.f32.mrf.mxu2 }
 0x5ab   : > { %v2624_v59 = vrot.slane %v11511_v9, 1  ;;  %v2625_v37 = vrot.slane %v11508_v46, 1  ;;  %v2507_v7 = vshll.u32 %v11511_v9, 16  ;;  %v2495_v27 = vshrl.u32 %v11497_v33, 16 }
 0x5ac   : > { %v3195_v8 = vrot.slane %v3098_v20, 4  ;;  %v3788_v51 = vrot.slane %v3787_v12, 4  ;;  %v4776_v62 = vshrl.u32 %v4749_v48, 16  ;;  %v2621_v32 = vrot.slane %v11497_v33, 1 }
 0x5ad   : > { %v2191_v41 = vpop.permute.xlu1 %2190  ;;  %v2626_v2 = vsel %vm1379_vm5, %v2624_v59, %v2625_v37  ;;  %v11540_v30 = vsel %vm11533_vm7, %v4819_v39, 0  ;;  %v2500_v15 = vor.u32 %v2499_v16, %v2495_v27  ;;  %v3196_v14 = vrot.slane %v3098_v20, 6 }
 0x5ae   : > { %2657 = vrot.lane.b32.xlu2 %v2626_v2, %s9713_s17  ;;  %v2350_v35 = vsel %vm2290_vm10, %v2283_v42, %v2191_v41  ;;  %v3794_v24 = vsel %vm3338_vm12, %v3194_v43, -inf  ;;  %v4772_v17 = vshll.u32 %v4748_v54, 16  ;;  %v3045_v56 = vadd.f32 %v3044_v21, %v2956_v13 }
 0x5af   : > { %v2501_v23 = vshll.u32 %v2350_v35, 16  ;;  %v2622_v22 = vrot.slane %v2350_v35, 1  ;;  %v2509_v47 = vrot.slane %v2507_v7, 1  ;;  %v3789_v0 = vmax.f32 %v3787_v12, %v3788_v51 }
 0x5b0   : > { %v3801_v5 = vsel %vm3338_vm12, %v3195_v8, -inf  ;;  %v4774_v26 = vor.u32 %v4772_v17, %v4771_v63  ;;  %v4778_v25 = vrot.slane %v4776_v62, 7  ;;  %v3795_v49 = vrot.slane %v3794_v24, 4 }
 0x5b1   : > { %v2503_v52 = vrot.slane %v2501_v23, 1  ;;  %v2623_v50 = vsel %vm1379_vm5, %v2621_v32, %v2622_v22  ;;  %v2505_v19 = vshrl.u32 %v11511_v9, 16  ;;  %v2511_v6 = vshll.u32 %v11508_v46, 16 }
 0x5b2   : > { %2655 = vrot.lane.b32.xlu0 %v2623_v50, %s9713_s17  ;;  %v3808_v54 = vsel %vm3338_vm12, %v3196_v14, -inf  ;;  %v4779_v53 = vshll.u32 %v4749_v48, 16  ;;  %v3802_v3 = vrot.slane %v3801_v5, 4  ;;  %v11553_v34 = vmax.f32 %v3045_v56, 0.0 }
 0x5b3   : > { %v2504_v40 = vsel %vm14435_vm6, %v2500_v15, %v2503_v52  ;;  %v2510_v38 = vor.u32 %v2509_v47, %v2505_v19  ;;  %v4820_v10 = vsel %vm9822_vm2, 0, %v4774_v26  ;;  %v4818_v20 = vsel %vm9822_vm2, 0, %v4760_v36 }
 0x5b4   : > { %2543 = vrot.lane.b32.xlu1 %v2504_v40, %s14433_s26  ;;  %v4781_v57 = vor.u32 %v4779_v53, %v4778_v25  ;;  %v3790_v44 = vrot.slane %v3789_v0, 2  ;;  %v3796_v46 = vmax.f32 %v3794_v24, %v3795_v49  ;;  %v3809_v4 = vrot.slane %v3808_v54, 4  ;;  %v3049_v24 = vpop.f32.mrf.mxu2 }
 0x5b5   : > { %v2513_v37 = vrot.slane %v2511_v6, 1  ;;  %v3803_v58 = vmax.f32 %v3801_v5, %v3802_v3  ;;  %v3197_v41 = vrot.slane %v11553_v34, 2  ;;  %v11568_v12 = vsel %vm11533_vm7, %v4820_v10, 0 }
 0x5b6   : > { %4848 = vrot.lane.b32.xlu2 %v11540_v30, %s9712_s16  ;;  %v11573_v2 = vsel %vm11533_vm7, %v4818_v20, 0  ;;  %v4821_v16 = vsel %vm9822_vm2, 0, %v4781_v57  ;;  %v11577_v43 = vmax.f32 %v3789_v0, %v3790_v44  ;;  %v11579_v39 = vmax.f32 %v3808_v54, %v3809_v4 }
 0x5b7   : > { %v2958_v1 = vpop.f32.mrf.mxu1  ;;  %v2514_v48 = vsel %vm14435_vm6, %v2510_v38, %v2513_v37  ;;  %v3815_v36 = vsel %vm3338_vm12, %v11553_v34, -inf  ;;  %v3804_v27 = vrot.slane %v3803_v58, 2  ;;  %v3198_v8 = vrot.slane %v11553_v34, 4 }
 0x5b8   : > { %v2959_v61 = vadd.f32 %v11526_v55, %v2958_v1  ;;  %v3822_v51 = vsel %vm3338_vm12, %v3197_v41, -inf  ;;  %v3816_v17 = vrot.slane %v3815_v36, 4  ;;  %v3811_v47 = vrot.slane %v11579_v39, 2 }
 0x5b9   : > { %v2540_v59 = vpop.permute.xlu1 %2539  ;;  %v3199_v0 = vrot.slane %v11553_v34, 6  ;;  %v11598_v26 = vsel %vm11533_vm7, %v4821_v16, 0  ;;  %v3823_v25 = vrot.slane %v3822_v51, 4  ;;  %v3792_v6 = vrot.slane %v11577_v43, 1 }
 0x5ba   : > { %v3048_v31 = vadd.f32 %v3047_v45, %v2959_v61  ;;  %v2684_v42 = vsel %vm14429_vm8, %v14515_v60, %v2540_v59  ;;  %2545 = vrot.lane.b32.xlu0 %v2514_v48, %s14433_s26  ;;  %v11601_v53 = vmax.f32 %v3803_v58, %v3804_v27  ;;  %v3817_v3 = vmax.f32 %v3815_v36, %v3816_v17  ;;  %s14601_s26 = smov 48  }
 0x5bb   : > { %v2729_v18 = vsel %vm2691_vm11, %v2684_v42, %v11479_v29  ;;  %v3797_v29 = vrot.slane %v3796_v46, 2  ;;  %v3829_v34 = vsel %vm3338_vm12, %v3198_v8, -inf  ;;  %v3824_v44 = vmax.f32 %v3822_v51, %v3823_v25 }
 0x5bc   : > { %v3100_v21 = vmax.f32 %v3048_v31, 0.0  ;;  %2972 = vmatmul.bf16.gmra.mxu1 %v2729_v18  ;;  %4846 = vrot.lane.b32.xlu1 %v11573_v2, %s9712_s16  ;;  %v3830_v37 = vrot.slane %v3829_v34, 4  ;;  %v3836_v41 = vsel %vm3338_vm12, %v3199_v0, -inf  ;;  %v3812_v17 = vmax.f32 %v11579_v39, %v3811_v47 }
 0x5bd   : > { %v3798_v54 = vmax.f32 %v3796_v46, %v3797_v29  ;;  %v3825_v27 = vrot.slane %v3824_v44, 2  ;;  %vm14517_vm0 = vcmask 1046534   ;;  %vm14518_vm4 = vcmask 1047559  }
 0x5be   : > { %v3200_v13 = vrot.slane %v3100_v21, 2  ;;  %v3201_v35 = vrot.slane %v3100_v21, 4  ;;  %v3202_v63 = vrot.slane %v3100_v21, 6  ;;  %v3843_v7 = vsel %vm3338_vm12, %v3100_v21, -inf  ;;  %4850 = vrot.lane.b32.xlu2 %v11568_v12, %s9712_s16 }
 0x5bf   : > { %v3844_v62 = vrot.slane %v3843_v7, 4  ;;  %v2960_v32 = vpop.f32.mrf.mxu1  ;;  %v3799_v58 = vrot.slane %v3798_v54, 1  ;;  %v3831_v8 = vmax.f32 %v3829_v34, %v3830_v37 }
 0x5c0   : > { %v3850_v23 = vsel %vm3338_vm12, %v3200_v13, -inf  ;;  %v3857_v22 = vsel %vm3338_vm12, %v3201_v35, -inf  ;;  %v3864_v15 = vsel %vm3338_vm12, %v3202_v63, -inf  ;;  %v2961_v14 = vadd.f32 %v11526_v55, %v2960_v32 }
 0x5c1   : > { %v3845_v56 = vmax.f32 %v3843_v7, %v3844_v62  ;;  %v3851_v52 = vrot.slane %v3850_v23, 4  ;;  %v3858_v50 = vrot.slane %v3857_v22, 4  ;;  %v3865_v19 = vrot.slane %v3864_v15, 4 }
 0x5c2   : > { %v3050_v5 = vadd.f32 %v3049_v24, %v2961_v14  ;;  %4863 = vrot.lane.b32.xlu0 %v11540_v30, %s9714_s23  ;;  %v3818_v13 = vrot.slane %v3817_v3, 2  ;;  %v3837_v32 = vrot.slane %v3836_v41, 4  ;;  %v3793_v14 = vmax.f32 %v11577_v43, %v3792_v6 }
 0x5c3   : > { %v3852_v49 = vmax.f32 %v3850_v23, %v3851_v52  ;;  %v3859_v40 = vmax.f32 %v3857_v22, %v3858_v50  ;;  %v3846_v1 = vrot.slane %v3845_v56, 2  ;;  %v3866_v4 = vmax.f32 %v3864_v15, %v3865_v19 }
 0x5c4   : > { %v3101_v45 = vmax.f32 %v3050_v5, 0.0  ;;  %4865 = vrot.lane.b32.xlu1 %v11568_v12, %s9714_s23  ;;  %v3806_v24 = vrot.slane %v11601_v53, 1  ;;  %v3800_v52 = vmax.f32 %v3798_v54, %v3799_v58  ;;  %v3819_v25 = vmax.f32 %v3817_v3, %v3818_v13 }
 0x5c5   : > { %v3853_v38 = vrot.slane %v3852_v49, 2  ;;  %v3860_v61 = vrot.slane %v3859_v40, 2  ;;  %v3847_v18 = vmax.f32 %v3845_v56, %v3846_v1  ;;  %v3867_v63 = vrot.slane %v3866_v4, 2 }
 0x5c6   : > { %v3203_v10 = vrot.slane %v3101_v45, 2  ;;  %v3204_v20 = vrot.slane %v3101_v45, 4  ;;  %v3205_v57 = vrot.slane %v3101_v45, 6  ;;  %v3871_v59 = vsel %vm3338_vm12, %v3101_v45, -inf }
 0x5c7   : > { %v3854_v46 = vmax.f32 %v3852_v49, %v3853_v38  ;;  %v3872_v31 = vrot.slane %v3871_v59, 4  ;;  %v3861_v21 = vmax.f32 %v3859_v40, %v3860_v61  ;;  %v3848_v23 = vrot.slane %v3847_v18, 1 }
 0x5c8   : > { %v3878_v60 = vsel %vm3338_vm12, %v3203_v10, -inf  ;;  %v3885_v42 = vsel %vm3338_vm12, %v3204_v20, -inf  ;;  %v3892_v36 = vsel %vm3338_vm12, %v3205_v57, -inf  ;;  %v3868_v0 = vmax.f32 %v3866_v4, %v3867_v63  ;;  %v2542_v10 = vpop.permute.xlu2 %2541 }
 0x5c9   : > { %v3879_v48 = vrot.slane %v3878_v60, 4  ;;  %v3873_v16 = vmax.f32 %v3871_v59, %v3872_v31  ;;  %v3886_v29 = vrot.slane %v3885_v42, 4  ;;  %v3855_v35 = vrot.slane %v3854_v46, 1 }
 0x5ca   : > { %4852 = vrot.lane.b32.xlu0 %v11598_v26, %s9712_s16  ;;  %v3893_v15 = vrot.slane %v3892_v36, 4  ;;  %v3862_v56 = vrot.slane %v3861_v21, 1  ;;  %v3826_v45 = vmax.f32 %v3824_v44, %v3825_v27  ;;  %v3832_v34 = vrot.slane %v3831_v8, 2 }
 0x5cb   : > { %v3880_v7 = vmax.f32 %v3878_v60, %v3879_v48  ;;  %v3874_v51 = vrot.slane %v3873_v16, 2  ;;  %v3887_v62 = vmax.f32 %v3885_v42, %v3886_v29  ;;  %v3856_v50 = vmax.f32 %v3854_v46, %v3855_v35  ;;  %v14516_v42 = vld [vmem:[#allocation12_spill] sm:$0xff] }
 0x5cc   : > { %4867 = vrot.lane.b32.xlu1 %v11598_v26, %s9714_s23  ;;  %v3894_v19 = vmax.f32 %v3892_v36, %v3893_v15  ;;  %v3838_v1 = vmax.f32 %v3836_v41, %v3837_v32  ;;  %v3849_v43 = vmax.f32 %v3847_v18, %v3848_v23  ;;  %v3813_v6 = vrot.slane %v3812_v17, 1 }
 0x5cd   : > { %v3881_v22 = vrot.slane %v3880_v7, 2  ;;  %v3875_v5 = vmax.f32 %v3873_v16, %v3874_v51  ;;  %v3888_v40 = vrot.slane %v3887_v62, 2  ;;  %v4331_v38 = vsel %vm2290_vm10, %v3793_v14, -inf }
 0x5ce   : > { %v3863_v39 = vmax.f32 %v3861_v21, %v3862_v56  ;;  %v3807_v61 = vmax.f32 %v11601_v53, %v3806_v24  ;;  %v3869_v54 = vrot.slane %v3868_v0, 1  ;;  %v4335_v20 = vsel %vm2290_vm10, %v3856_v50, -inf }
 0x5cf   : > { %v3882_v49 = vmax.f32 %v3880_v7, %v3881_v22  ;;  %v3876_v47 = vrot.slane %v3875_v5, 1  ;;  %v3895_v57 = vrot.slane %v3894_v19, 2  ;;  %v4334_v3 = vsel %vm2290_vm10, %v3800_v52, -inf }
 0x5d0   : > { %v3820_v46 = vrot.slane %v3819_v25, 1  ;;  %v3889_v44 = vmax.f32 %v3887_v62, %v3888_v40  ;;  %v3827_v59 = vrot.slane %v3826_v45, 1  ;;  %v3833_v37 = vmax.f32 %v3831_v8, %v3832_v34 }
 0x5d1   : > { %v3883_v4 = vrot.slane %v3882_v49, 1  ;;  %v3839_v31 = vrot.slane %v3838_v1, 2  ;;  %v4332_v60 = vsel %vm2290_vm10, %v3849_v43, -inf  ;;  %v2686_v58 = vsel %vm14429_vm8, %v14516_v42, %v2542_v10 }
 0x5d2   : > { %v4336_v41 = vmax.f32 %v4334_v3, %v4335_v20  ;;  %v4338_v53 = vsel %vm2290_vm10, %v3863_v39, -inf  ;;  %v3877_v18 = vmax.f32 %v3875_v5, %v3876_v47  ;;  %v4337_v21 = vsel %vm2290_vm10, %v3807_v61, -inf }
 0x5d3   : > { %v3870_v16 = vmax.f32 %v3868_v0, %v3869_v54  ;;  %v3896_v29 = vmax.f32 %v3894_v19, %v3895_v57  ;;  %v3821_v13 = vmax.f32 %v3819_v25, %v3820_v46  ;;  %v4333_v35 = vmax.f32 %v4331_v38, %v4332_v60 }
 0x5d4   : > { %v3884_v63 = vmax.f32 %v3882_v49, %v3883_v4  ;;  %v3890_v7 = vrot.slane %v3889_v44, 1  ;;  %v3814_v27 = vmax.f32 %v3812_v17, %v3813_v6  ;;  %v3840_v8 = vmax.f32 %v3838_v1, %v3839_v31 }
 0x5d5   : > { %v4339_v51 = vmax.f32 %v4337_v21, %v4338_v53  ;;  %v3828_v62 = vmax.f32 %v3826_v45, %v3827_v59  ;;  %v3834_v32 = vrot.slane %v3833_v37, 1  ;;  %v4460_v23 = vpack.c.bf16 %v4336_v41, %v4336_v41 }
 0x5d6   : > { %v4344_v22 = vsel %vm2290_vm10, %v3877_v18, -inf  ;;  %v4341_v15 = vsel %vm2290_vm10, %v3870_v16, -inf  ;;  %v3897_v14 = vrot.slane %v3896_v29, 1  ;;  %v4343_v24 = vsel %vm2290_vm10, %v3821_v13, -inf }
 0x5d7   : > { %v2654_v48 = vpop.permute.xlu1 %2653  ;;  %v4459_v56 = vpack.c.bf16 %v4333_v35, %v4333_v35  ;;  %v3891_v52 = vmax.f32 %v3889_v44, %v3890_v7  ;;  %v4347_v50 = vsel %vm2290_vm10, %v3884_v63, -inf  ;;  %v4340_v0 = vsel %vm2290_vm10, %v3814_v27, -inf }
 0x5d8   : > { %9247 = vmatmul.msk.bf16.gmra.mxu2 %vm1089_vm3, %v2654_v48  ;;  %v2732_v36 = vsel %vm2691_vm11, %v2686_v58, %v2654_v48  ;;  %v3841_v5 = vrot.slane %v3840_v8, 1  ;;  %v4461_v17 = vpack.c.bf16 %v4339_v51, %v4339_v51  ;;  %v4345_v25 = vmax.f32 %v4343_v24, %v4344_v22  ;;  %v2963_v24 = vpop.f32.mrf.mxu1 }
 0x5d9   : > { %2977 = vmatmul.bf16.gmra.mxu1 %v2732_v36  ;;  %v3835_v49 = vmax.f32 %v3833_v37, %v3834_v32  ;;  %v4346_v40 = vsel %vm2290_vm10, %v3828_v62, -inf  ;;  %v4342_v19 = vmax.f32 %v4340_v0, %v4341_v15  ;;  %v4588_v45 = vperm.slane %v4460_v23, 0 }
 0x5da   : > { %v3898_v34 = vmax.f32 %v3896_v29, %v3897_v14  ;;  %v4348_v1 = vmax.f32 %v4346_v40, %v4347_v50  ;;  %v4587_v43 = vperm.slane %v4459_v56, 0  ;;  %v4350_v6 = vsel %vm2290_vm10, %v3891_v52, -inf  ;;  %v3052_v52 = vpop.f32.mrf.mxu2 }
 0x5db   : > { %v3842_v38 = vmax.f32 %v3840_v8, %v3841_v5  ;;  %v4589_v39 = vperm.slane %v4461_v17, 0  ;;  %v4463_v47 = vpack.c.bf16 %v4345_v25, %v4345_v25  ;;  %v4462_v61 = vpack.c.bf16 %v4342_v19, %v4342_v19 }
 0x5dc   : > { %v4652_v10 = vunpack.c.l.b16 %v4588_v45  ;;  %v4349_v54 = vsel %vm2290_vm10, %v3835_v49, -inf  ;;  %v4353_v57 = vsel %vm2290_vm10, %v3898_v34, -inf  ;;  %v4464_v3 = vpack.c.bf16 %v4348_v1, %v4348_v1 }
 0x5dd   : > { %v4351_v20 = vmax.f32 %v4349_v54, %v4350_v6  ;;  %v4651_v46 = vunpack.c.l.b16 %v4587_v43  ;;  %v4653_v4 = vunpack.c.l.b16 %v4589_v39  ;;  %v4591_v44 = vperm.slane %v4463_v47, 0 }
 0x5de   : > { %v4352_v59 = vsel %vm2290_vm10, %v3842_v38, -inf  ;;  %v4590_v37 = vperm.slane %v4462_v61, 0  ;;  %v4592_v58 = vperm.slane %v4464_v3, 0  ;;  %v2964_v56 = vadd.f32 %v11526_v55, %v2963_v24 }
 0x5df   : > { %v4354_v31 = vmax.f32 %v4352_v59, %v4353_v57  ;;  %v4718_v60 = vsel %vm4683_vm13, %v4652_v10, %v4651_v46  ;;  %v4465_v42 = vpack.c.bf16 %v4351_v20, %v4351_v20  ;;  %v4655_v41 = vunpack.c.l.b16 %v4591_v44 }
 0x5e0   : > { %v4719_v53 = vsel %vm4685_vm14, %v4653_v4, %v4718_v60  ;;  %v4654_v18 = vunpack.c.l.b16 %v4590_v37  ;;  %v4656_v16 = vunpack.c.l.b16 %v4592_v58  ;;  %v3053_v50 = vadd.f32 %v3052_v52, %v2964_v56  ;;  %v2965_v5 = vpop.f32.mrf.mxu1 }
 0x5e1   : > { %v4466_v48 = vpack.c.bf16 %v4354_v31, %v4354_v31  ;;  %v4593_v21 = vperm.slane %v4465_v42, 0  ;;  %v2966_v17 = vadd.f32 %v11526_v55, %v2965_v5 }
 0x5e2   : > { %v4720_v36 = vsel %vm4687_vm15, %v4654_v18, %v4719_v53  ;;  %v3102_v0 = vmax.f32 %v3053_v50, 0.0  ;;  %v3054_v19 = vpop.f32.mrf.mxu2 }
 0x5e3   : > { %v4594_v29 = vperm.slane %v4466_v48, 0  ;;  %v4657_v13 = vunpack.c.l.b16 %v4593_v21  ;;  %v4721_v35 = vsel %vm4689_vm1, %v4655_v41, %v4720_v36  ;;  %v3055_v34 = vadd.f32 %v3054_v19, %v2966_v17 }
 0x5e4   : > { %v4722_v7 = vsel %vm4691_vm9, %v4656_v16, %v4721_v35  ;;  %v3206_v25 = vrot.slane %v3102_v0, 2  ;;  %v3207_v49 = vrot.slane %v3102_v0, 4  ;;  %v3899_v40 = vsel %vm3338_vm12, %v3102_v0, -inf }
 0x5e5   : > { %v4658_v63 = vunpack.c.l.b16 %v4594_v29  ;;  %v4723_v27 = vsel %vm14517_vm0, %v4657_v13, %v4722_v7  ;;  %v3208_v45 = vrot.slane %v3102_v0, 6  ;;  %v3900_v1 = vrot.slane %v3899_v40, 4 }
 0x5e6   : > { %v3906_v43 = vsel %vm3338_vm12, %v3206_v25, -inf  ;;  %v3913_v6 = vsel %vm3338_vm12, %v3207_v49, -inf  ;;  %v3103_v47 = vmax.f32 %v3055_v34, 0.0  ;;  %vm4903_vm0 = vcmask 523264  }
 0x5e7   : > { %v4724_v8 = vsel %vm14518_vm4, %v4658_v63, %v4723_v27  ;;  %v3907_v38 = vrot.slane %v3906_v43, 4  ;;  %v3920_v39 = vsel %vm3338_vm12, %v3208_v45, -inf  ;;  %v3901_v61 = vmax.f32 %v3899_v40, %v3900_v1 }
 0x5e8   : > { %v4750_v51 = vpack.c.b16 %v4724_v8, %v4724_v8  ;;  %v3914_v10 = vrot.slane %v3913_v6, 4  ;;  %v3921_v54 = vrot.slane %v3920_v39, 4  ;;  %v3209_v57 = vrot.slane %v3103_v47, 2 }
 0x5e9   : > { %v3908_v20 = vmax.f32 %v3906_v43, %v3907_v38  ;;  %v3902_v3 = vrot.slane %v3901_v61, 2  ;;  %v3210_v4 = vrot.slane %v3103_v47, 4  ;;  %v3927_v44 = vsel %vm3338_vm12, %v3103_v47, -inf }
 0x5ea   : > { %v4783_v62 = vshrl.u32 %v4750_v51, 16  ;;  %v4786_v23 = vshll.u32 %v4750_v51, 16  ;;  %v3915_v46 = vmax.f32 %v3913_v6, %v3914_v10  ;;  %v3922_v59 = vmax.f32 %v3920_v39, %v3921_v54 }
 0x5eb   : > { %v3909_v37 = vrot.slane %v3908_v20, 2  ;;  %v3211_v31 = vrot.slane %v3103_v47, 6  ;;  %v3934_v60 = vsel %vm3338_vm12, %v3209_v57, -inf  ;;  %v3903_v42 = vmax.f32 %v3901_v61, %v3902_v3 }
 0x5ec   : > { %v4785_v32 = vrot.slane %v4783_v62, 7  ;;  %v3916_v58 = vrot.slane %v3915_v46, 2  ;;  %v3928_v41 = vrot.slane %v3927_v44, 4  ;;  %v3941_v53 = vsel %vm3338_vm12, %v3210_v4, -inf }
 0x5ed   : > { %v3923_v18 = vrot.slane %v3922_v59, 2  ;;  %v3935_v48 = vrot.slane %v3934_v60, 4  ;;  %v3910_v29 = vmax.f32 %v3908_v20, %v3909_v37  ;;  %v3948_v36 = vsel %vm3338_vm12, %v3211_v31, -inf }
 0x5ee   : > { %v4788_v22 = vor.u32 %v4786_v23, %v4785_v32  ;;  %v3904_v63 = vrot.slane %v3903_v42, 1  ;;  %v3917_v7 = vmax.f32 %v3915_v46, %v3916_v58  ;;  %v3929_v27 = vmax.f32 %v3927_v44, %v3928_v41 }
 0x5ef   : > { %v3942_v8 = vrot.slane %v3941_v53, 4  ;;  %v11670_v32 = vmax.f32 %v3922_v59, %v3923_v18  ;;  %v11672_v23 = vmax.f32 %v3934_v60, %v3935_v48  ;;  %v3911_v24 = vrot.slane %v3910_v29, 1 }
 0x5f0   : > { %v4822_v15 = vsel %vm9822_vm2, 0, %v4788_v22  ;;  %v3949_v22 = vrot.slane %v3948_v36, 4  ;;  %v11677_v50 = vmax.f32 %v3903_v42, %v3904_v63  ;;  %v3918_v0 = vrot.slane %v3917_v7, 1 }
 0x5f1   : > { %v11652_v14 = vsel %vm11533_vm7, %v4822_v15, 0  ;;  %v3930_v5 = vrot.slane %v3929_v27, 2  ;;  %v11679_v17 = vmax.f32 %v3941_v53, %v3942_v8  ;;  %v3925_v45 = vrot.slane %v11670_v32, 1 }
 0x5f2   : > { %4869 = vrot.lane.b32.xlu2 %v11652_v14, %s9714_s23  ;;  %4854 = vrot.lane.b32.xlu0 %v11652_v14, %s9712_s16  ;;  %v11684_v34 = vmax.f32 %v3948_v36, %v3949_v22  ;;  %v3912_v46 = vmax.f32 %v3910_v29, %v3911_v24  ;;  %v3919_v4 = vmax.f32 %v3917_v7, %v3918_v0  ;;  %vm14520_vm4 = vcmask 1046534  }
 0x5f3   : > { %v11690_v44 = vmax.f32 %v3929_v27, %v3930_v5  ;;  %v3944_v58 = vrot.slane %v11679_v17, 2 }
 0x5f4   : > { %v3951_v41 = vrot.slane %v11684_v34, 2 }
 0x60e   : > { %v3057_v21 = vpop.f32.mrf.mxu2 }
 0x616   : > { %v3059_v61 = vpop.f32.mrf.mxu2 }
 0x624   : > { %v2656_v13 = vpop.permute.xlu0 %2655 }
 0x625   : > { %v2968_v16 = vpop.f32.mrf.mxu1  ;;  %9248 = vmatmul.msk.bf16.gmra.mxu2 %vm1089_vm3, %v2656_v13 }
 0x626   : > { %v2969_v35 = vadd.f32 %v11526_v55, %v2968_v16  ;;  %v2544_v62 = vpop.permute.xlu1 %2543 }
 0x627   : > { %v2688_v15 = vsel %vm14429_vm8, %v11497_v33, %v2544_v62  ;;  %v3937_v33 = vrot.slane %v11672_v23, 2  ;;  %v2658_v62 = vpop.permute.xlu2 %2657 }
 0x628   : > { %v3058_v51 = vadd.f32 %v3057_v21, %v2969_v35  ;;  %v2735_v52 = vsel %vm2691_vm11, %v2688_v15, %v2656_v13 }
 0x629   : > { %2982 = vmatmul.bf16.gmra.mxu1 %v2735_v52 }
 0x62a   : > { %v3104_v56 = vmax.f32 %v3058_v51, 0.0 }
 0x62c   : > { %v3212_v25 = vrot.slane %v3104_v56, 2  ;;  %v3213_v49 = vrot.slane %v3104_v56, 4  ;;  %v3214_v40 = vrot.slane %v3104_v56, 6  ;;  %v3955_v19 = vsel %vm3338_vm12, %v3104_v56, -inf  ;;  %v2546_v3 = vpop.permute.xlu0 %2545 }
 0x62d   : > { %v3956_v1 = vrot.slane %v3955_v19, 4  ;;  %v2970_v43 = vpop.f32.mrf.mxu1  ;;  %v2690_v53 = vsel %vm14429_vm8, %v11511_v9, %v2546_v3  ;;  %vm14521_vm8 = vcmask 1047559  }
 0x62e   : > { %v3962_v6 = vsel %vm3338_vm12, %v3212_v25, -inf  ;;  %v3969_v38 = vsel %vm3338_vm12, %v3213_v49, -inf  ;;  %v3976_v39 = vsel %vm3338_vm12, %v3214_v40, -inf  ;;  %v2971_v47 = vadd.f32 %v11526_v55, %v2970_v43 }
 0x62f   : > { %v3957_v10 = vmax.f32 %v3955_v19, %v3956_v1  ;;  %v3963_v54 = vrot.slane %v3962_v6, 4  ;;  %v3970_v20 = vrot.slane %v3969_v38, 4  ;;  %v3977_v57 = vrot.slane %v3976_v39, 4 }
 0x630   : > { %v3060_v59 = vadd.f32 %v3059_v61, %v2971_v47  ;;  %v3926_v1 = vmax.f32 %v11670_v32, %v3925_v45  ;;  %v3938_v43 = vmax.f32 %v11672_v23, %v3937_v33  ;;  %v4355_v32 = vsel %vm2290_vm10, %v11677_v50, -inf }
 0x631   : > { %v3958_v37 = vrot.slane %v3957_v10, 2  ;;  %v3964_v31 = vmax.f32 %v3962_v6, %v3963_v54  ;;  %v3971_v60 = vmax.f32 %v3969_v38, %v3970_v20  ;;  %v3978_v42 = vmax.f32 %v3976_v39, %v3977_v57 }
 0x632   : > { %v3105_v18 = vmax.f32 %v3060_v59, 0.0  ;;  %v2738_v38 = vsel %vm2691_vm11, %v2690_v53, %v2658_v62  ;;  %v3945_v20 = vmax.f32 %v11679_v17, %v3944_v58  ;;  %v3932_v23 = vrot.slane %v11690_v44, 1 }
 0x633   : > { %v3959_v48 = vmax.f32 %v3957_v10, %v3958_v37  ;;  %v3965_v21 = vrot.slane %v3964_v31, 2  ;;  %v3972_v16 = vrot.slane %v3971_v60, 2  ;;  %v3979_v29 = vrot.slane %v3978_v42, 2 }
 0x634   : > { %v3215_v36 = vrot.slane %v3105_v18, 2  ;;  %v3216_v13 = vrot.slane %v3105_v18, 4  ;;  %v3217_v35 = vrot.slane %v3105_v18, 6  ;;  %v3983_v63 = vsel %vm3338_vm12, %v3105_v18, -inf }
 0x635   : > { %v3960_v7 = vrot.slane %v3959_v48, 1  ;;  %v3966_v27 = vmax.f32 %v3964_v31, %v3965_v21  ;;  %v3973_v8 = vmax.f32 %v3971_v60, %v3972_v16  ;;  %v3980_v51 = vmax.f32 %v3978_v42, %v3979_v29  ;;  %9249 = vmatmul.msk.bf16.gmra.mxu2 %vm1089_vm3, %v2658_v62  ;;  %v3062_v42 = vpop.f32.mrf.mxu2 }
 0x636   : > { %v3984_v22 = vrot.slane %v3983_v63, 4  ;;  %v3990_v15 = vsel %vm3338_vm12, %v3215_v36, -inf  ;;  %v3997_v9 = vsel %vm3338_vm12, %v3216_v13, -inf  ;;  %v4004_v24 = vsel %vm3338_vm12, %v3217_v35, -inf }
 0x637   : > { %v3961_v56 = vmax.f32 %v3959_v48, %v3960_v7  ;;  %v3967_v52 = vrot.slane %v3966_v27, 1  ;;  %v3974_v0 = vrot.slane %v3973_v8, 1  ;;  %v3981_v5 = vrot.slane %v3980_v51, 1 }
 0x638   : > { %v3985_v25 = vmax.f32 %v3983_v63, %v3984_v22  ;;  %v3991_v49 = vrot.slane %v3990_v15, 4  ;;  %v3998_v40 = vrot.slane %v3997_v9, 4  ;;  %v4005_v19 = vrot.slane %v4004_v24, 4 }
 0x639   : > { %v3968_v6 = vmax.f32 %v3966_v27, %v3967_v52  ;;  %v3975_v39 = vmax.f32 %v3973_v8, %v3974_v0  ;;  %v2973_v54 = vpop.f32.mrf.mxu1  ;;  %v3982_v57 = vmax.f32 %v3980_v51, %v3981_v5  ;;  %v4356_v3 = vsel %vm2290_vm10, %v3961_v56, -inf  ;;  %2987 = vmatmul.bf16.gmra.mxu1 %v2738_v38  ;;  %v14519_v5 = vld [vmem:[#allocation4_spill] sm:$0xff] }
 0x63a   : > { %v3986_v47 = vrot.slane %v3985_v25, 2  ;;  %v3992_v61 = vmax.f32 %v3990_v15, %v3991_v49  ;;  %v3999_v10 = vmax.f32 %v3997_v9, %v3998_v40  ;;  %v3952_v45 = vmax.f32 %v11684_v34, %v3951_v41  ;;  %v4847_v49 = vpop.permute.xlu1 %4846 }
 0x63b   : > { %v4359_v59 = vsel %vm2290_vm10, %v3968_v6, -inf  ;;  %v4006_v33 = vmax.f32 %v4004_v24, %v4005_v19  ;;  %v4358_v37 = vsel %vm2290_vm10, %v3912_v46, -inf  ;;  %v4361_v31 = vsel %vm2290_vm10, %v3919_v4, -inf }
 0x63c   : > { %v3987_v60 = vmax.f32 %v3985_v25, %v3986_v47  ;;  %v3993_v17 = vrot.slane %v3992_v61, 2  ;;  %v4357_v58 = vmax.f32 %v4355_v32, %v4356_v3  ;;  %v4360_v53 = vmax.f32 %v4358_v37, %v4359_v59 }
 0x63d   : > { %v4362_v18 = vsel %vm2290_vm10, %v3975_v39, -inf  ;;  %v4000_v48 = vrot.slane %v3999_v10, 2  ;;  %v3939_v21 = vrot.slane %v3938_v43, 1  ;;  %v3946_v16 = vrot.slane %v3945_v20, 1 }
 0x63e   : > { %v4365_v50 = vsel %vm2290_vm10, %v3982_v57, -inf  ;;  %v3988_v29 = vrot.slane %v3987_v60, 1  ;;  %v3933_v34 = vmax.f32 %v11690_v44, %v3932_v23  ;;  %v3953_v41 = vrot.slane %v3952_v45, 1 }
 0x63f   : > { %v3994_v36 = vmax.f32 %v3992_v61, %v3993_v17  ;;  %v4007_v46 = vrot.slane %v4006_v33, 2  ;;  %v4364_v4 = vsel %vm2290_vm10, %v3926_v1, -inf  ;;  %v4363_v13 = vmax.f32 %v4361_v31, %v4362_v18 }
 0x640   : > { %v3989_v35 = vmax.f32 %v3987_v60, %v3988_v29  ;;  %v4366_v63 = vmax.f32 %v4364_v4, %v4365_v50  ;;  %v4467_v7 = vpack.c.bf16 %v4357_v58, %v4357_v58  ;;  %v4468_v27 = vpack.c.bf16 %v4360_v53, %v4360_v53 }
 0x641   : > { %v4001_v8 = vmax.f32 %v3999_v10, %v4000_v48  ;;  %v3940_v51 = vmax.f32 %v3938_v43, %v3939_v21  ;;  %v3947_v62 = vmax.f32 %v3945_v20, %v3946_v16  ;;  %v3954_v15 = vmax.f32 %v3952_v45, %v3953_v41  ;;  %v2975_v56 = vpop.f32.mrf.mxu1  ;;  %v3064_v10 = vpop.f32.mrf.mxu2 }
 0x642   : > { %v4368_v22 = vsel %vm2290_vm10, %v3989_v35, -inf  ;;  %v4367_v9 = vsel %vm2290_vm10, %v3933_v34, -inf  ;;  %v3995_v24 = vrot.slane %v3994_v36, 1  ;;  %v4008_v44 = vmax.f32 %v4006_v33, %v4007_v46 }
 0x643   : > { %v4469_v52 = vpack.c.bf16 %v4363_v13, %v4363_v13  ;;  %v4369_v0 = vmax.f32 %v4367_v9, %v4368_v22  ;;  %v11722_v25 = vsel %vm11533_vm7, %v14519_v5, 0  ;;  %v2974_v40 = vadd.f32 %v11526_v55, %v2973_v54 }
 0x644   : > { %v4470_v19 = vpack.c.bf16 %v4366_v63, %v4366_v63  ;;  %v11725_v1 = vperm.slane %v4467_v7, 0  ;;  %v11727_v43 = vperm.slane %v4468_v27, 0  ;;  %v4002_v6 = vrot.slane %v4001_v8, 1 }
 0x645   : > { %v11730_v38 = vsel %vm2290_vm10, %v3940_v51, -inf  ;;  %v3063_v39 = vadd.f32 %v3062_v42, %v2974_v40  ;;  %v2976_v47 = vadd.f32 %v11526_v55, %v2975_v56  ;;  %v11734_v61 = vsel %vm2290_vm10, %v3947_v62, -inf }
 0x646   : > { %v3996_v20 = vmax.f32 %v3994_v36, %v3995_v24  ;;  %v4009_v57 = vrot.slane %v4008_v44, 1  ;;  %v11738_v54 = vsel %vm2290_vm10, %v11722_v25, %v4847_v49  ;;  %v11741_v3 = vsel %vm2290_vm10, %v3954_v15, -inf }
 0x647   : > { %v11743_v59 = vperm.slane %v4469_v52, 0  ;;  %v4471_v32 = vpack.c.bf16 %v4369_v0, %v4369_v0  ;;  %v3106_v23 = vmax.f32 %v3063_v39, 0.0  ;;  %v3065_v45 = vadd.f32 %v3064_v10, %v2976_v47 }
 0x648   : > { %v11745_v33 = vperm.slane %v4470_v19, 0  ;;  %v4659_v37 = vunpack.c.l.b16 %v11725_v1  ;;  %v4660_v31 = vunpack.c.l.b16 %v11727_v43  ;;  %v4003_v60 = vmax.f32 %v4001_v8, %v4002_v6 }
 0x649   : > { %v3218_v17 = vrot.slane %v3106_v23, 2  ;;  %v3219_v42 = vrot.slane %v3106_v23, 4  ;;  %v3220_v58 = vrot.slane %v3106_v23, 6  ;;  %v4011_v53 = vsel %vm3338_vm12, %v3106_v23, -inf }
 0x64a   : > { %v4010_v18 = vmax.f32 %v4008_v44, %v4009_v57  ;;  %v4371_v48 = vsel %vm2290_vm10, %v3996_v20, -inf  ;;  %v4012_v21 = vrot.slane %v4011_v53, 4  ;;  %v3107_v16 = vmax.f32 %v3065_v45, 0.0 }
 0x64b   : > { %v11751_v50 = vperm.slane %v4471_v32, 0  ;;  %v4018_v29 = vsel %vm3338_vm12, %v3218_v17, -inf  ;;  %v4025_v34 = vsel %vm3338_vm12, %v3219_v42, -inf  ;;  %v4032_v41 = vsel %vm3338_vm12, %v3220_v58, -inf }
 0x64c   : > { %v4013_v36 = vmax.f32 %v4011_v53, %v4012_v21  ;;  %v4019_v46 = vrot.slane %v4018_v29, 4  ;;  %v4026_v4 = vrot.slane %v4025_v34, 4  ;;  %v4033_v13 = vrot.slane %v4032_v41, 4 }
 0x64d   : > { %v3221_v35 = vrot.slane %v3107_v16, 2  ;;  %v3222_v63 = vrot.slane %v3107_v16, 4  ;;  %v3223_v7 = vrot.slane %v3107_v16, 6  ;;  %v4039_v27 = vsel %vm3338_vm12, %v3107_v16, -inf }
 0x64e   : > { %v4014_v8 = vrot.slane %v4013_v36, 2  ;;  %v4020_v51 = vmax.f32 %v4018_v29, %v4019_v46  ;;  %v4027_v62 = vmax.f32 %v4025_v34, %v4026_v4  ;;  %v4034_v22 = vmax.f32 %v4032_v41, %v4033_v13 }
 0x64f   : > { %v4040_v15 = vrot.slane %v4039_v27, 4  ;;  %v4046_v9 = vsel %vm3338_vm12, %v3221_v35, -inf  ;;  %v4053_v24 = vsel %vm3338_vm12, %v3222_v63, -inf  ;;  %v4060_v44 = vsel %vm3338_vm12, %v3223_v7, -inf }
 0x650   : > { %v4015_v56 = vmax.f32 %v4013_v36, %v4014_v8  ;;  %v4021_v52 = vrot.slane %v4020_v51, 2  ;;  %v4028_v0 = vrot.slane %v4027_v62, 2  ;;  %v4035_v49 = vrot.slane %v4034_v22, 2 }
 0x651   : > { %v4041_v40 = vmax.f32 %v4039_v27, %v4040_v15  ;;  %v4047_v19 = vrot.slane %v4046_v9, 4  ;;  %v4054_v6 = vrot.slane %v4053_v24, 4  ;;  %v4061_v39 = vrot.slane %v4060_v44, 4 }
 0x652   : > { %v4016_v47 = vrot.slane %v4015_v56, 1  ;;  %v4022_v10 = vmax.f32 %v4020_v51, %v4021_v52  ;;  %v4029_v20 = vmax.f32 %v4027_v62, %v4028_v0  ;;  %v4036_v57 = vmax.f32 %v4034_v22, %v4035_v49 }
 0x653   : > { %v4042_v32 = vrot.slane %v4041_v40, 2  ;;  %v4048_v23 = vmax.f32 %v4046_v9, %v4047_v19  ;;  %v4055_v45 = vmax.f32 %v4053_v24, %v4054_v6  ;;  %v4062_v17 = vmax.f32 %v4060_v44, %v4061_v39 }
 0x654   : > { %v4023_v58 = vrot.slane %v4022_v10, 1  ;;  %v4030_v53 = vrot.slane %v4029_v20, 1  ;;  %v4374_v21 = vsel %vm2290_vm10, %v4003_v60, -inf  ;;  %v4377_v16 = vsel %vm2290_vm10, %v4010_v18, -inf }
 0x655   : > { %v4043_v29 = vmax.f32 %v4041_v40, %v4042_v32  ;;  %v4049_v34 = vrot.slane %v4048_v23, 2  ;;  %v4056_v41 = vrot.slane %v4055_v45, 2  ;;  %v4063_v36 = vrot.slane %v4062_v17, 2 }
 0x656   : > { %v2978_v42 = vpop.f32.mrf.mxu1  ;;  %v4017_v46 = vmax.f32 %v4015_v56, %v4016_v47  ;;  %v4024_v4 = vmax.f32 %v4022_v10, %v4023_v58  ;;  %v4037_v13 = vrot.slane %v4036_v57, 1  ;;  %v4372_v35 = vmax.f32 %v11730_v38, %v4371_v48  ;;  %v11785_v47 = vld [vmem:[%s14395_s4] ss:$0 sm:$0xff] }
 0x657   : > { %v4044_v63 = vrot.slane %v4043_v29, 1  ;;  %v4050_v7 = vmax.f32 %v4048_v23, %v4049_v34  ;;  %v4057_v27 = vmax.f32 %v4055_v45, %v4056_v41  ;;  %v4064_v8 = vmax.f32 %v4062_v17, %v4063_v36 }
 0x658   : > { %v4661_v51 = vunpack.c.l.b16 %v11743_v59  ;;  %v2979_v62 = vadd.f32 %v11526_v55, %v2978_v42  ;;  %v4375_v18 = vmax.f32 %v11734_v61, %v4374_v21  ;;  %v4378_v22 = vmax.f32 %v11741_v3, %v4377_v16 }
 0x659   : > { %v4031_v15 = vmax.f32 %v4029_v20, %v4030_v53  ;;  %v4051_v9 = vrot.slane %v4050_v7, 1  ;;  %v4058_v24 = vrot.slane %v4057_v27, 1  ;;  %v4065_v44 = vrot.slane %v4064_v8, 1 }
 0x65a   : > { %v4662_v56 = vunpack.c.l.b16 %v11745_v33  ;;  %v4663_v38 = vunpack.c.l.b16 %v11751_v50  ;;  %v4472_v52 = vpack.c.bf16 %v4372_v35, %v4372_v35  ;;  %v4038_v0 = vmax.f32 %v4036_v57, %v4037_v13 }
 0x65b   : > { %v3067_v60 = vpop.f32.mrf.mxu2  ;;  %v4045_v49 = vmax.f32 %v4043_v29, %v4044_v63  ;;  %v11770_v59 = vsel %vm2290_vm10, %v4017_v46, -inf  ;;  %v11773_v55 = vsel %vm2290_vm10, %v4024_v4, -inf  ;;  %v4052_v3 = vmax.f32 %v4050_v7, %v4051_v9 }
 0x65c   : > { %v3068_v48 = vadd.f32 %v3067_v60, %v2979_v62  ;;  %v11775_v40 = vmax.f32 %v4057_v27, %v4058_v24  ;;  %v11777_v19 = vmax.f32 %v4064_v8, %v4065_v44  ;;  %v11780_v39 = vsel %vm2290_vm10, %v4031_v15, -inf }
 0x65d   : > { %v4473_v20 = vpack.c.bf16 %v4375_v18, %v4375_v18  ;;  %v4474_v57 = vpack.c.bf16 %v4378_v22, %v4378_v22  ;;  %v4388_v58 = vsel %vm2290_vm10, %v4038_v0, -inf  ;;  %v11790_v53 = vperm.slane %v4472_v52, 0 }
 0x65e   : > { %v2980_v61 = vpop.f32.mrf.mxu1  ;;  %v3108_v6 = vmax.f32 %v3068_v48, 0.0  ;;  %v4725_v36 = vsel %vm4683_vm13, %v4660_v31, %v4659_v37  ;;  %v11803_v7 = vsel %vm2290_vm10, %v4045_v49, -inf  ;;  %v11806_v27 = vsel %vm2290_vm10, %v4052_v3, -inf }
 0x65f   : > { %v2981_v10 = vadd.f32 %v11785_v47, %v2980_v61  ;;  %v11792_v21 = vperm.slane %v4473_v20, 0  ;;  %v11808_v8 = vperm.slane %v4474_v57, 0  ;;  %v4664_v37 = vunpack.c.l.b16 %v11790_v53 }
 0x660   : > { %v3224_v32 = vrot.slane %v3108_v6, 2  ;;  %v3225_v23 = vrot.slane %v3108_v6, 4  ;;  %v3226_v45 = vrot.slane %v3108_v6, 6  ;;  %v4067_v17 = vsel %vm3338_vm12, %v3108_v6, -inf }
 0x661   : > { %v4068_v42 = vrot.slane %v4067_v17, 4  ;;  %v4665_v31 = vunpack.c.l.b16 %v11792_v21  ;;  %v4726_v22 = vsel %vm4685_vm14, %v4661_v51, %v4725_v36 }
 0x662   : > { %v4074_v16 = vsel %vm3338_vm12, %v3224_v32, -inf  ;;  %v4081_v29 = vsel %vm3338_vm12, %v3225_v23, -inf  ;;  %v4088_v34 = vsel %vm3338_vm12, %v3226_v45, -inf }
 0x663   : > { %v3069_v41 = vpop.f32.mrf.mxu2  ;;  %v4069_v46 = vmax.f32 %v4067_v17, %v4068_v42  ;;  %v4075_v4 = vrot.slane %v4074_v16, 4  ;;  %v4082_v13 = vrot.slane %v4081_v29, 4  ;;  %v4089_v35 = vrot.slane %v4088_v34, 4 }
 0x664   : > { %v3070_v63 = vadd.f32 %v3069_v41, %v2981_v10 }
 0x665   : > { %v4070_v62 = vrot.slane %v4069_v46, 2  ;;  %v4076_v60 = vmax.f32 %v4074_v16, %v4075_v4  ;;  %v4083_v1 = vmax.f32 %v4081_v29, %v4082_v13  ;;  %v4090_v18 = vmax.f32 %v4088_v34, %v4089_v35 }
 0x666   : > { %v3109_v43 = vmax.f32 %v3070_v63, 0.0 }
 0x667   : > { %v4071_v15 = vmax.f32 %v4069_v46, %v4070_v62  ;;  %v4077_v9 = vrot.slane %v4076_v60, 2  ;;  %v4084_v24 = vrot.slane %v4083_v1, 2  ;;  %v4091_v44 = vrot.slane %v4090_v18, 2 }
 0x668   : > { %v3227_v48 = vrot.slane %v3109_v43, 2  ;;  %v3228_v52 = vrot.slane %v3109_v43, 4  ;;  %v3229_v0 = vrot.slane %v3109_v43, 6  ;;  %v4095_v49 = vsel %vm3338_vm12, %v3109_v43, -inf }
 0x669   : > { %v4072_v61 = vrot.slane %v4071_v15, 1  ;;  %v4078_v3 = vmax.f32 %v4076_v60, %v4077_v9  ;;  %v4085_v6 = vmax.f32 %v4083_v1, %v4084_v24  ;;  %v4092_v10 = vmax.f32 %v4090_v18, %v4091_v44 }
 0x66a   : > { %v4096_v20 = vrot.slane %v4095_v49, 4  ;;  %v4102_v57 = vsel %vm3338_vm12, %v3227_v48, -inf  ;;  %v4109_v32 = vsel %vm3338_vm12, %v3228_v52, -inf  ;;  %v4116_v51 = vsel %vm3338_vm12, %v3229_v0, -inf }
 0x66b   : > { %v4073_v23 = vmax.f32 %v4071_v15, %v4072_v61  ;;  %v4079_v45 = vrot.slane %v4078_v3, 1  ;;  %v4086_v17 = vrot.slane %v4085_v6, 1  ;;  %v4093_v42 = vrot.slane %v4092_v10, 1 }
 0x66c   : > { %v4097_v16 = vmax.f32 %v4095_v49, %v4096_v20  ;;  %v4103_v29 = vrot.slane %v4102_v57, 4  ;;  %v4110_v34 = vrot.slane %v4109_v32, 4  ;;  %v4117_v41 = vrot.slane %v4116_v51, 4 }
 0x66d   : > { %v4080_v36 = vmax.f32 %v4078_v3, %v4079_v45  ;;  %v4087_v46 = vmax.f32 %v4085_v6, %v4086_v17  ;;  %v4094_v4 = vmax.f32 %v4092_v10, %v4093_v42  ;;  %v4380_v13 = vsel %vm2290_vm10, %v4073_v23, -inf }
 0x66e   : > { %v4381_v35 = vmax.f32 %v11770_v59, %v4380_v13  ;;  %v4098_v63 = vrot.slane %v4097_v16, 2  ;;  %v4104_v62 = vmax.f32 %v4102_v57, %v4103_v29  ;;  %v4111_v60 = vmax.f32 %v4109_v32, %v4110_v34 }
 0x66f   : > { %v4383_v1 = vsel %vm2290_vm10, %v4080_v36, -inf  ;;  %v4386_v18 = vsel %vm2290_vm10, %v4087_v46, -inf  ;;  %v4389_v43 = vsel %vm2290_vm10, %v4094_v4, -inf  ;;  %v4118_v15 = vmax.f32 %v4116_v51, %v4117_v41 }
 0x670   : > { %v4384_v9 = vmax.f32 %v11773_v55, %v4383_v1  ;;  %v4387_v24 = vmax.f32 %v11780_v39, %v4386_v18  ;;  %v4390_v44 = vmax.f32 %v4388_v58, %v4389_v43  ;;  %v4475_v48 = vpack.c.bf16 %v4381_v35, %v4381_v35  ;;  %v4864_v1 = vpop.permute.xlu0 %4863 }
 0x671   : > { %v4099_v52 = vmax.f32 %v4097_v16, %v4098_v63  ;;  %v4105_v0 = vrot.slane %v4104_v62, 2  ;;  %v4112_v49 = vrot.slane %v4111_v60, 2  ;;  %v4119_v59 = vrot.slane %v4118_v15, 2 }
 0x672   : > { %v4476_v61 = vpack.c.bf16 %v4384_v9, %v4384_v9  ;;  %v4477_v3 = vpack.c.bf16 %v4387_v24, %v4387_v24  ;;  %v4603_v6 = vperm.slane %v4475_v48, 0  ;;  %v4666_v10 = vunpack.c.l.b16 %v11808_v8 }
 0x673   : > { %v4100_v20 = vrot.slane %v4099_v52, 1  ;;  %v4106_v57 = vmax.f32 %v4104_v62, %v4105_v0  ;;  %v4113_v32 = vmax.f32 %v4111_v60, %v4112_v49  ;;  %v4120_v51 = vmax.f32 %v4118_v15, %v4119_v59  ;;  %v4849_v60 = vpop.permute.xlu2 %4848 }
 0x674   : > { %v4478_v23 = vpack.c.bf16 %v4390_v44, %v4390_v44  ;;  %v4604_v55 = vperm.slane %v4476_v61, 0  ;;  %v4605_v45 = vperm.slane %v4477_v3, 0  ;;  %v4727_v39 = vsel %vm4687_vm15, %v4662_v56, %v4726_v22 }
 0x675   : > { %v4101_v58 = vmax.f32 %v4099_v52, %v4100_v20  ;;  %v4107_v17 = vrot.slane %v4106_v57, 1  ;;  %v4114_v42 = vrot.slane %v4113_v32, 1  ;;  %v4121_v16 = vrot.slane %v4120_v51, 1 }
 0x676   : > { %v4667_v29 = vunpack.c.l.b16 %v4603_v6  ;;  %v4668_v34 = vunpack.c.l.b16 %v4604_v55  ;;  %v4669_v41 = vunpack.c.l.b16 %v4605_v45  ;;  %v4728_v8 = vsel %vm4689_vm1, %v4663_v38, %v4727_v39 }
 0x677   : > { %v4108_v36 = vmax.f32 %v4106_v57, %v4107_v17  ;;  %v4115_v46 = vmax.f32 %v4113_v32, %v4114_v42  ;;  %v4122_v4 = vmax.f32 %v4120_v51, %v4121_v16  ;;  %v4392_v13 = vsel %vm2290_vm10, %v4101_v58, -inf }
 0x678   : > { %v4606_v35 = vperm.slane %v4478_v23, 0  ;;  %v4732_v33 = vsel %vm4683_vm13, %v4668_v34, %v4667_v29  ;;  %v4393_v56 = vmax.f32 %v11803_v7, %v4392_v13  ;;  %v4729_v22 = vsel %vm4691_vm9, %v4664_v37, %v4728_v8 }
 0x679   : > { %v4395_v63 = vsel %vm2290_vm10, %v4108_v36, -inf  ;;  %v4398_v50 = vsel %vm2290_vm10, %v4115_v46, -inf  ;;  %v4730_v38 = vsel %vm14520_vm4, %v4665_v31, %v4729_v22  ;;  %v4397_v62 = vsel %vm2290_vm10, %v11775_v40, -inf  ;;  %v4866_v31 = vpop.permute.xlu1 %4865 }
 0x67a   : > { %v4396_v18 = vmax.f32 %v11806_v27, %v4395_v63  ;;  %v4479_v7 = vpack.c.bf16 %v4393_v56, %v4393_v56  ;;  %v4731_v53 = vsel %vm14521_vm8, %v4666_v10, %v4730_v38  ;;  %v4399_v43 = vmax.f32 %v4397_v62, %v4398_v50  ;;  %vm14522_vm8 = vmmov %vm14520_vm4 }
 0x67b   : > { %v4751_v37 = vpack.c.b16 %v4731_v53, %v4731_v53  ;;  %v4400_v15 = vsel %vm2290_vm10, %v11777_v19, -inf  ;;  %v4401_v9 = vsel %vm2290_vm10, %v4122_v4, -inf  ;;  %v4733_v21 = vsel %vm4685_vm14, %v4669_v41, %v4732_v33  ;;  %v4851_v38 = vpop.permute.xlu2 %4850  ;;  %v9606_v53 = vld [vmem:[%s14396_s5 + $0x78] sm:$0xff] }
 0x67c   : > { %v4480_v24 = vpack.c.bf16 %v4396_v18, %v4396_v18  ;;  %v4607_v44 = vperm.slane %v4479_v7, 0  ;;  %v4402_v40 = vmax.f32 %v4400_v15, %v4401_v9  ;;  %v4481_v48 = vpack.c.bf16 %v4399_v43, %v4399_v43  ;;  %v9598_v7 = vld [vmem:[%s14396_s5 + $0x38] sm:$0xff]  ;;  %5345 = vmatpush.bf16.msrb.mxu1 %v9606_v53  ;;  %v4853_v15 = vpop.permute.xlu0 %4852 }
 0x67d   : > { %v4884_v27 = vsel %vm2290_vm10, %v11573_v2, %v4849_v60  ;;  %v11854_v52 = vsel %vm4903_vm0, %v11738_v54, %v4864_v1  ;;  %v4670_v0 = vunpack.c.l.b16 %v4606_v35  ;;  %v4790_v49 = vshrl.u32 %v4751_v37, 16  ;;  %5316 = vmatpush.bf16.msrb.mxu0 %v9598_v7 }
 0x67e   : > { %v4608_v59 = vperm.slane %v4480_v24, 0  ;;  %v4671_v19 = vunpack.c.l.b16 %v4607_v44  ;;  %v4482_v61 = vpack.c.bf16 %v4402_v40, %v4402_v40  ;;  %v4609_v3 = vperm.slane %v4481_v48, 0 }
 0x67f   : > { %v11857_v6 = vsel %vm4903_vm0, %v4884_v27, %v4866_v31  ;;  %v4792_v10 = vrot.slane %v4790_v49, 7  ;;  %v4793_v20 = vshll.u32 %v4751_v37, 16  ;;  %v4734_v57 = vsel %vm4687_vm15, %v4670_v0, %v4733_v21 }
 0x680   : > { %v4610_v32 = vperm.slane %v4482_v61, 0  ;;  %v4672_v51 = vunpack.c.l.b16 %v4608_v59  ;;  %v4673_v2 = vunpack.c.l.b16 %v4609_v3  ;;  %v4735_v23 = vsel %vm4689_vm1, %v4671_v19, %v4734_v57 }
 0x681   : > { %v4795_v54 = vor.u32 %v4793_v20, %v4792_v10  ;;  %v4922_v39 = vshll.u32 %v11854_v52, 16  ;;  %v4928_v58 = vshll.u32 %v11857_v6, 16  ;;  %vm14523_vm4 = vcmask 1047559   ;;  %v4868_v62 = vpop.permute.xlu1 %4867 }
 0x682   : > { %v4674_v55 = vunpack.c.l.b16 %v4610_v32  ;;  %v4736_v45 = vsel %vm4691_vm9, %v4672_v51, %v4735_v23  ;;  %v4920_v46 = vshrl.u32 %v11854_v52, 16  ;;  %v4926_v4 = vshrl.u32 %v11857_v6, 16 }
 0x683   : > { %v4823_v17 = vsel %vm9822_vm2, 0, %v4795_v54  ;;  %v4737_v42 = vsel %vm14522_vm8, %v4673_v2, %v4736_v45  ;;  %v4924_v41 = vrot.slane %v4922_v39, 1  ;;  %v4930_v8 = vrot.slane %v4928_v58, 1  ;;  %v4870_v9 = vpop.permute.xlu2 %4869 }
 0x684   : > { %v11869_v16 = vsel %vm11533_vm7, %v4823_v17, 0  ;;  %v4738_v29 = vsel %vm14523_vm4, %v4674_v55, %v4737_v42  ;;  %v4887_v60 = vsel %vm2290_vm10, %v11540_v30, %v4851_v38  ;;  %v4890_v31 = vsel %vm2290_vm10, %v11568_v12, %v4853_v15 }
 0x685   : > { %4871 = vrot.lane.b32.xlu2 %v11869_v16, %s9714_s23  ;;  %4856 = vrot.lane.b32.xlu1 %v11869_v16, %s9712_s16  ;;  %v4752_v34 = vpack.c.b16 %v4738_v29, %v4738_v29  ;;  %v4925_v33 = vor.u32 %v4924_v41, %v4920_v46  ;;  %v4931_v56 = vor.u32 %v4930_v8, %v4926_v4 }
 0x686   : > { %v11893_v1 = vsel %vm4903_vm0, %v4887_v60, %v4868_v62  ;;  %v11910_v44 = vsel %vm4903_vm0, %v4890_v31, %v4870_v9  ;;  %v9614_v31 = vld [vmem:[%s14396_s5 + $0xb8] sm:$0xff] }
 0x687   : > { %v4797_v36 = vshrl.u32 %v4752_v34, 16  ;;  %v4800_v35 = vshll.u32 %v4752_v34, 16  ;;  %v4934_v18 = vshll.u32 %v11893_v1, 16  ;;  %v4932_v30 = vshrl.u32 %v11893_v1, 16  ;;  %5374 = vmatpush.bf16.msrb.mxu2 %v9614_v31  ;;  %9652 = vmatpush.bf16.msra.mxu3 %v9614_v31 }
 0x688   : > { %v4995_v27 = vrot.slane %v11910_v44, 1 }
 0x689   : > { %v4799_v13 = vrot.slane %v4797_v36, 7  ;;  %v4936_v43 = vrot.slane %v4934_v18, 1 }
 0x68b   : > { %v4802_v22 = vor.u32 %v4800_v35, %v4799_v13  ;;  %v4937_v37 = vor.u32 %v4936_v43, %v4932_v30 }
 0x68d   : > { %4968 = vrot.lane.b32.xlu1 %v4925_v33, %s9713_s17  ;;  %4970 = vrot.lane.b32.xlu2 %v4931_v56, %s9713_s17  ;;  %v4824_v63 = vsel %vm9822_vm2, 0, %v4802_v22 }
 0x68e   : > { %v11884_v50 = vsel %vm11533_vm7, %v4824_v63, 0 }
 0x68f   : > { %4873 = vrot.lane.b32.xlu0 %v11884_v50, %s9714_s23 }
 0x697   : > { %4858 = vrot.lane.b32.xlu0 %v11884_v50, %s9712_s16 }
 0x69f   : > { %4877 = vrot.lane.b32.xlu0 %v11722_v25, %s9714_s23 }
 0x6a6   : > { %v2983_v21 = vpop.f32.mrf.mxu1 }
 0x6a7   : > { %4972 = vrot.lane.b32.xlu0 %v4937_v37, %s9713_s17  ;;  %v2984_v24 = vadd.f32 %v11785_v47, %v2983_v21 }
 0x6a8   : > { %v3072_v40 = vpop.f32.mrf.mxu2 }
 0x6a9   : > { %v3073_v48 = vadd.f32 %v3072_v40, %v2984_v24 }
 0x6ab   : > { %v3110_v0 = vmax.f32 %v3073_v48, 0.0 }
 0x6ad   : > { %v3230_v49 = vrot.slane %v3110_v0, 2  ;;  %v3231_v59 = vrot.slane %v3110_v0, 4  ;;  %v3232_v19 = vrot.slane %v3110_v0, 6  ;;  %v4123_v61 = vsel %vm3338_vm12, %v3110_v0, -inf  ;;  %v4855_v0 = vpop.permute.xlu0 %4854 }
 0x6ae   : > { %v2985_v3 = vpop.f32.mrf.mxu1  ;;  %v4124_v10 = vrot.slane %v4123_v61, 4 }
 0x6af   : > { %5006 = vrot.lane.b32.xlu0 %v4995_v27, %s9714_s23  ;;  %v4130_v12 = vsel %vm3338_vm12, %v3230_v49, -inf  ;;  %v4137_v20 = vsel %vm3338_vm12, %v3231_v59, -inf  ;;  %v2986_v57 = vadd.f32 %v11785_v47, %v2985_v3  ;;  %v4144_v51 = vsel %vm3338_vm12, %v3232_v19, -inf }
 0x6b0   : > { %v4131_v32 = vrot.slane %v4130_v12, 4  ;;  %v3074_v2 = vpop.f32.mrf.mxu2  ;;  %v4138_v54 = vrot.slane %v4137_v20, 4  ;;  %v4125_v55 = vmax.f32 %v4123_v61, %v4124_v10  ;;  %v4145_v39 = vrot.slane %v4144_v51, 4 }
 0x6b1   : > { %v3075_v23 = vadd.f32 %v3074_v2, %v2986_v57  ;;  %v11929_v57 = vsel %vm2290_vm10, %v11598_v26, %v4855_v0 }
 0x6b2   : > { %v4132_v45 = vmax.f32 %v4130_v12, %v4131_v32  ;;  %v4139_v17 = vmax.f32 %v4137_v20, %v4138_v54  ;;  %v4126_v41 = vrot.slane %v4125_v55, 2  ;;  %v4146_v36 = vmax.f32 %v4144_v51, %v4145_v39 }
 0x6b3   : > { %v3111_v58 = vmax.f32 %v3075_v23, 0.0 }
 0x6b4   : > { %v4133_v8 = vrot.slane %v4132_v45, 2  ;;  %v4140_v13 = vrot.slane %v4139_v17, 2  ;;  %v4127_v56 = vmax.f32 %v4125_v55, %v4126_v41  ;;  %v4147_v63 = vrot.slane %v4146_v36, 2 }
 0x6b5   : > { %v3233_v42 = vrot.slane %v3111_v58, 2  ;;  %v3234_v29 = vrot.slane %v3111_v58, 4  ;;  %v4151_v34 = vsel %vm3338_vm12, %v3111_v58, -inf  ;;  %v3235_v46 = vrot.slane %v3111_v58, 6 }
 0x6b6   : > { %v4152_v4 = vrot.slane %v4151_v34, 4  ;;  %v4134_v22 = vmax.f32 %v4132_v45, %v4133_v8  ;;  %v4141_v7 = vmax.f32 %v4139_v17, %v4140_v13  ;;  %v4128_v53 = vrot.slane %v4127_v56, 1  ;;  %v2988_v24 = vpop.f32.mrf.mxu1  ;;  %v9597_v45 = vld [vmem:[%s14396_s5 + $0x30] sm:$0xff] }
 0x6b7   : > { %v4158_v35 = vsel %vm3338_vm12, %v3233_v42, -inf  ;;  %v4165_v33 = vsel %vm3338_vm12, %v3234_v29, -inf  ;;  %v4172_v38 = vsel %vm3338_vm12, %v3235_v46, -inf  ;;  %v4148_v30 = vmax.f32 %v4146_v36, %v4147_v63  ;;  %5317 = vmatpush.bf16.msrb.mxu0 %v9597_v45  ;;  %v9596_v46 = vld [vmem:[%s14396_s5 + $0x28] sm:$0xff] }
 0x6b8   : > { %v4153_v62 = vmax.f32 %v4151_v34, %v4152_v4  ;;  %v4159_v60 = vrot.slane %v4158_v35, 4  ;;  %v4166_v18 = vrot.slane %v4165_v33, 4  ;;  %v4135_v43 = vrot.slane %v4134_v22, 1  ;;  %v3077_v40 = vpop.f32.mrf.mxu2 }
 0x6b9   : > { %v4173_v37 = vrot.slane %v4172_v38, 4  ;;  %v4142_v48 = vrot.slane %v4141_v7, 1  ;;  %v2989_v27 = vadd.f32 %v11785_v47, %v2988_v24  ;;  %v4129_v49 = vmax.f32 %v4127_v56, %v4128_v53 }
 0x6ba   : > { %v4154_v15 = vrot.slane %v4153_v62, 2  ;;  %v4160_v9 = vmax.f32 %v4158_v35, %v4159_v60  ;;  %v4167_v21 = vmax.f32 %v4165_v33, %v4166_v18  ;;  %v4136_v59 = vmax.f32 %v4134_v22, %v4135_v43 }
 0x6bb   : > { %v4149_v19 = vrot.slane %v4148_v30, 1  ;;  %v4174_v61 = vmax.f32 %v4172_v38, %v4173_v37  ;;  %v3078_v3 = vadd.f32 %v3077_v40, %v2989_v27  ;;  %v4143_v32 = vmax.f32 %v4141_v7, %v4142_v48  ;;  %5318 = vmatpush.bf16.msrb.mxu0 %v9596_v46 }
 0x6bc   : > { %v4155_v10 = vmax.f32 %v4153_v62, %v4154_v15  ;;  %v4161_v12 = vrot.slane %v4160_v9, 2  ;;  %v4168_v20 = vrot.slane %v4167_v21, 2  ;;  %v11932_v23 = vsel %vm2290_vm10, %v4129_v49, -inf }
 0x6bd   : > { %v3112_v51 = vmax.f32 %v3078_v3, 0.0  ;;  %v4150_v2 = vmax.f32 %v4148_v30, %v4149_v19  ;;  %v11935_v54 = vsel %vm2290_vm10, %v4136_v59, -inf  ;;  %v4175_v55 = vrot.slane %v4174_v61, 2 }
 0x6be   : > { %v4156_v42 = vrot.slane %v4155_v10, 1  ;;  %v11941_v29 = vmax.f32 %v4160_v9, %v4161_v12  ;;  %v11943_v34 = vmax.f32 %v4167_v21, %v4168_v20  ;;  %v2990_v8 = vpop.f32.mrf.mxu1  ;;  %v4409_v62 = vsel %vm2290_vm10, %v4143_v32, -inf }
 0x6bf   : > { %v3236_v39 = vrot.slane %v3112_v51, 2  ;;  %v3237_v58 = vrot.slane %v3112_v51, 4  ;;  %v3238_v17 = vrot.slane %v3112_v51, 6  ;;  %v4179_v26 = vsel %vm3338_vm12, %v3112_v51, -inf }
 0x6c0   : > { %v4180_v41 = vrot.slane %v4179_v26, 4  ;;  %v3079_v36 = vpop.f32.mrf.mxu2  ;;  %v2991_v33 = vadd.f32 %v11785_v47, %v2990_v8  ;;  %v11954_v60 = vsel %vm2290_vm10, %v4150_v2, -inf  ;;  %v11956_v18 = vmax.f32 %v4174_v61, %v4175_v55  ;;  %v9595_v47 = vld [vmem:[%s14396_s5 + $0x20] sm:$0xff] }
 0x6c1   : > { %v4186_v4 = vsel %vm3338_vm12, %v3236_v39, -inf  ;;  %v4193_v13 = vsel %vm3338_vm12, %v3237_v58, -inf  ;;  %v4200_v35 = vsel %vm3338_vm12, %v3238_v17, -inf  ;;  %v11961_v15 = vmax.f32 %v4155_v10, %v4156_v42  ;;  %5319 = vmatpush.bf16.msrb.mxu0 %v9595_v47  ;;  %v9594_v10 = vld [vmem:[%s14396_s5 + $0x18] sm:$0xff] }
 0x6c2   : > { %v4181_v56 = vmax.f32 %v4179_v26, %v4180_v41  ;;  %v4187_v22 = vrot.slane %v4186_v4, 4  ;;  %v4194_v63 = vrot.slane %v4193_v13, 4  ;;  %v4201_v38 = vrot.slane %v4200_v35, 4 }
 0x6c3   : > { %v3080_v7 = vadd.f32 %v3079_v36, %v2991_v33  ;;  %v4163_v9 = vrot.slane %v11941_v29, 1  ;;  %v4170_v21 = vrot.slane %v11943_v34, 1 }
 0x6c4   : > { %v4182_v53 = vrot.slane %v4181_v56, 2  ;;  %v4188_v43 = vmax.f32 %v4186_v4, %v4187_v22  ;;  %v4195_v30 = vmax.f32 %v4193_v13, %v4194_v63  ;;  %v4202_v37 = vmax.f32 %v4200_v35, %v4201_v38  ;;  %v9605_v63 = vld [vmem:[%s14396_s5 + $0x70] sm:$0xff] }
 0x6c5   : > { %v3113_v31 = vmax.f32 %v3080_v7, 0.0  ;;  %5320 = vmatpush.bf16.msrb.mxu0 %v9594_v10  ;;  %v9593_v38 = vld [vmem:[%s14396_s5 + $0x10] sm:$0xff]  ;;  %5346 = vmatpush.bf16.msrb.mxu1 %v9605_v63 }
 0x6c6   : > { %v4183_v24 = vmax.f32 %v4181_v56, %v4182_v53  ;;  %v4189_v40 = vrot.slane %v4188_v43, 2  ;;  %v4196_v48 = vrot.slane %v4195_v30, 2  ;;  %v4203_v27 = vrot.slane %v4202_v37, 2 }
 0x6c7   : > { %v3239_v0 = vrot.slane %v3113_v31, 2  ;;  %v3240_v49 = vrot.slane %v3113_v31, 4  ;;  %v3241_v59 = vrot.slane %v3113_v31, 6  ;;  %v4207_v19 = vsel %vm3338_vm12, %v3113_v31, -inf }
 0x6c8   : > { %v4184_v61 = vrot.slane %v4183_v24, 1  ;;  %v4190_v3 = vmax.f32 %v4188_v43, %v4189_v40  ;;  %v4197_v12 = vmax.f32 %v4195_v30, %v4196_v48  ;;  %v4204_v20 = vmax.f32 %v4202_v37, %v4203_v27 }
 0x6c9   : > { %v4208_v32 = vrot.slane %v4207_v19, 4  ;;  %v4214_v51 = vsel %vm3338_vm12, %v3239_v0, -inf  ;;  %v4221_v2 = vsel %vm3338_vm12, %v3240_v49, -inf  ;;  %v4228_v55 = vsel %vm3338_vm12, %v3241_v59, -inf  ;;  %5321 = vmatpush.bf16.msrb.mxu0 %v9593_v38  ;;  %v9592_v0 = vld [vmem:[%s14396_s5 + $0x8] sm:$0xff]  ;;  %vm14524_vm12 = vmmov %vm14522_vm8 }
 0x6ca   : > { %v4185_v45 = vmax.f32 %v4183_v24, %v4184_v61  ;;  %v4191_v39 = vrot.slane %v4190_v3, 1  ;;  %v4198_v58 = vrot.slane %v4197_v12, 1  ;;  %v4205_v17 = vrot.slane %v4204_v20, 1  ;;  %vm14525_vm8 = vmmov %vm14523_vm4 }
 0x6cb   : > { %v4209_v26 = vmax.f32 %v4207_v19, %v4208_v32  ;;  %v4215_v42 = vrot.slane %v4214_v51, 4  ;;  %v4222_v41 = vrot.slane %v4221_v2, 4  ;;  %v4229_v8 = vrot.slane %v4228_v55, 4 }
 0x6cc   : > { %v4192_v36 = vmax.f32 %v4190_v3, %v4191_v39  ;;  %v4199_v46 = vmax.f32 %v4197_v12, %v4198_v58  ;;  %v4206_v4 = vmax.f32 %v4204_v20, %v4205_v17  ;;  %v4404_v13 = vsel %vm2290_vm10, %v4185_v45, -inf }
 0x6cd   : > { %v4405_v35 = vmax.f32 %v11932_v23, %v4404_v13  ;;  %v4210_v33 = vrot.slane %v4209_v26, 2  ;;  %v4216_v56 = vmax.f32 %v4214_v51, %v4215_v42  ;;  %v4223_v22 = vmax.f32 %v4221_v2, %v4222_v41  ;;  %5322 = vmatpush.bf16.msrb.mxu0 %v9592_v0 }
 0x6ce   : > { %v4407_v7 = vsel %vm2290_vm10, %v4192_v36, -inf  ;;  %v4410_v53 = vsel %vm2290_vm10, %v4199_v46, -inf  ;;  %v4413_v43 = vsel %vm2290_vm10, %v4206_v4, -inf  ;;  %v4230_v30 = vmax.f32 %v4228_v55, %v4229_v8 }
 0x6cf   : > { %v4177_v23 = vrot.slane %v11956_v18, 1  ;;  %v4408_v37 = vmax.f32 %v11935_v54, %v4407_v7  ;;  %v4411_v47 = vmax.f32 %v4409_v62, %v4410_v53  ;;  %v4483_v31 = vpack.c.bf16 %v4405_v35, %v4405_v35  ;;  %v9591_v35 = vld [vmem:[%s14396_s5] sm:$0xff] }
 0x6d0   : > { %v4211_v24 = vmax.f32 %v4209_v26, %v4210_v33  ;;  %v4217_v40 = vrot.slane %v4216_v56, 2  ;;  %v4224_v48 = vrot.slane %v4223_v22, 2  ;;  %v4231_v27 = vrot.slane %v4230_v30, 2 }
 0x6d1   : > { %v4164_v49 = vmax.f32 %v11941_v29, %v4163_v9  ;;  %v4414_v59 = vmax.f32 %v11954_v60, %v4413_v43  ;;  %v4484_v19 = vpack.c.bf16 %v4408_v37, %v4408_v37  ;;  %v4485_v61 = vpack.c.bf16 %v4411_v47, %v4411_v47  ;;  %5323 = vmatpush.bf16.msrb.mxu0 %v9591_v35 }
 0x6d2   : > { %v4212_v3 = vrot.slane %v4211_v24, 1  ;;  %v4218_v54 = vmax.f32 %v4216_v56, %v4217_v40  ;;  %v4225_v62 = vmax.f32 %v4223_v22, %v4224_v48  ;;  %v4232_v12 = vmax.f32 %v4230_v30, %v4231_v27  ;;  %v9604_v30 = vld [vmem:[%s14396_s5 + $0x68] sm:$0xff] }
 0x6d3   : > { %v4171_v20 = vmax.f32 %v11943_v34, %v4170_v21  ;;  %v4611_v10 = vperm.slane %v4483_v31, 0  ;;  %v4612_v32 = vperm.slane %v4484_v19, 0  ;;  %v4613_v51 = vperm.slane %v4485_v61, 0  ;;  %5347 = vmatpush.bf16.msrb.mxu1 %v9604_v30 }
 0x6d4   : > { %v4213_v55 = vmax.f32 %v4211_v24, %v4212_v3  ;;  %v4219_v45 = vrot.slane %v4218_v54, 1  ;;  %v4226_v39 = vrot.slane %v4225_v62, 1  ;;  %v4233_v58 = vrot.slane %v4232_v12, 1  ;;  %v9612_v3 = vld [vmem:[%s14396_s5 + $0xa8] sm:$0xff] }
 0x6d5   : > { %v4178_v29 = vmax.f32 %v11956_v18, %v4177_v23  ;;  %v4486_v9 = vpack.c.bf16 %v4414_v59, %v4414_v59  ;;  %v4676_v17 = vunpack.c.l.b16 %v4612_v32  ;;  %v4415_v34 = vsel %vm2290_vm10, %v11961_v15, -inf  ;;  %v9613_v15 = vld [vmem:[%s14396_s5 + $0xb0] sm:$0xff] }
 0x6d6   : > { %v4418_v21 = vsel %vm2290_vm10, %v4164_v49, -inf  ;;  %v4220_v42 = vmax.f32 %v4218_v54, %v4219_v45  ;;  %v4675_v41 = vunpack.c.l.b16 %v4611_v10  ;;  %v4227_v8 = vmax.f32 %v4225_v62, %v4226_v39  ;;  %5375 = vmatpush.bf16.msrb.mxu2 %v9613_v15  ;;  %9653 = vmatpush.bf16.msra.mxu3 %v9613_v15 }
 0x6d7   : > { %v4234_v36 = vmax.f32 %v4232_v12, %v4233_v58  ;;  %v4416_v46 = vsel %vm2290_vm10, %v4213_v55, -inf  ;;  %v4421_v18 = vsel %vm2290_vm10, %v4171_v20, -inf  ;;  %v4614_v33 = vperm.slane %v4486_v9, 0 }
 0x6d8   : > { %v4417_v4 = vmax.f32 %v4415_v34, %v4416_v46  ;;  %v4419_v13 = vsel %vm2290_vm10, %v4220_v42, -inf  ;;  %v4739_v56 = vsel %vm4683_vm13, %v4676_v17, %v4675_v41  ;;  %v4422_v63 = vsel %vm2290_vm10, %v4227_v8, -inf }
 0x6d9   : > { %v4420_v22 = vmax.f32 %v4418_v21, %v4419_v13  ;;  %v4423_v7 = vmax.f32 %v4421_v18, %v4422_v63  ;;  %v4424_v53 = vsel %vm2290_vm10, %v4178_v29, -inf  ;;  %v4425_v43 = vsel %vm2290_vm10, %v4234_v36, -inf }
 0x6da   : > { %v4487_v38 = vpack.c.bf16 %v4417_v4, %v4417_v4  ;;  %v4426_v37 = vmax.f32 %v4424_v53, %v4425_v43  ;;  %v4678_v40 = vunpack.c.l.b16 %v4614_v33  ;;  %5376 = vmatpush.bf16.msrb.mxu2 %v9612_v3  ;;  %9654 = vmatpush.bf16.msra.mxu3 %v9612_v3  ;;  %v4992_v21 = vrot.slane %v11854_v52, 1 }
 0x6db   : > { %v4488_v23 = vpack.c.bf16 %v4420_v22, %v4420_v22  ;;  %v4489_v31 = vpack.c.bf16 %v4423_v7, %v4423_v7  ;;  %v4940_v42 = vshll.u32 %v11910_v44, 16  ;;  %v4938_v35 = vshrl.u32 %v11910_v44, 16 }
 0x6dc   : > { %v4615_v47 = vperm.slane %v4487_v38, 0  ;;  %v4490_v27 = vpack.c.bf16 %v4426_v37, %v4426_v37  ;;  %v4994_v33 = vrot.slane %v11893_v1, 1  ;;  %v9602_v37 = vld [vmem:[%s14396_s5 + $0x58] sm:$0xff]  ;;  %vm5467_vm4 = vcmask 517120  }
 0x6dd   : > { %v4616_v48 = vperm.slane %v4488_v23, 0  ;;  %v4617_v49 = vperm.slane %v4489_v31, 0  ;;  %v4942_v4 = vrot.slane %v4940_v42, 1  ;;  %v9601_v31 = vld [vmem:[%s14396_s5 + $0x50] sm:$0xff] }
 0x6de   : > { %v4679_v0 = vunpack.c.l.b16 %v4615_v47  ;;  %v4618_v59 = vperm.slane %v4490_v27, 0  ;;  %v9610_v47 = vld [vmem:[%s14396_s5 + $0x98] sm:$0xff] }
 0x6df   : > { %v4872_v2 = vpop.permute.xlu2 %4871  ;;  %v4680_v19 = vunpack.c.l.b16 %v4616_v48  ;;  %v4681_v54 = vunpack.c.l.b16 %v4617_v49  ;;  %v4943_v63 = vor.u32 %v4942_v4, %v4938_v35 }
 0x6e0   : > { %v11994_v60 = vsel %vm4903_vm0, %v11929_v57, %v4872_v2  ;;  %v4677_v57 = vunpack.c.l.b16 %v4613_v51  ;;  %v4682_v12 = vunpack.c.l.b16 %v4618_v59 }
 0x6e1   : > { %v4996_v26 = vrot.slane %v11994_v60, 1  ;;  %v4944_v7 = vshrl.u32 %v11994_v60, 16 }
 0x6e2   : > { %v4740_v24 = vsel %vm4685_vm14, %v4677_v57, %v4739_v56  ;;  %v9603_v57 = vld [vmem:[%s14396_s5 + $0x60] sm:$0xff]  ;;  %v4946_v56 = vshll.u32 %v11994_v60, 16 }
 0x6e3   : > { %5008 = vrot.lane.b32.xlu0 %v4996_v26, %s9714_s23  ;;  %v4741_v61 = vsel %vm4687_vm15, %v4678_v40, %v4740_v24  ;;  %v4993_v26 = vrot.slane %v11857_v6, 1  ;;  %5348 = vmatpush.bf16.msrb.mxu1 %v9603_v57  ;;  %v9609_v24 = vld [vmem:[%s14396_s5 + $0x90] sm:$0xff] }
 0x6e4   : > { %v4742_v62 = vsel %vm4689_vm1, %v4679_v0, %v4741_v61 }
 0x6e5   : > { %v4743_v20 = vsel %vm4691_vm9, %v4680_v19, %v4742_v62 }
 0x6e6   : > { %v4744_v10 = vsel %vm14524_vm12, %v4681_v54, %v4743_v20 }
 0x6e7   : > { %v4745_v32 = vsel %vm14525_vm8, %v4682_v12, %v4744_v10  ;;  %v12032_v17 = vpop.permute.xlu2 %4970  ;;  %5349 = vmatpush.bf16.msrb.mxu1 %v9602_v37  ;;  %v9600_v12 = vld [vmem:[%s14396_s5 + $0x48] sm:$0xff]  ;;  %vm14526_vm8 = vmmov %vm14524_vm12 }
 0x6e8   : > { %v4753_v51 = vpack.c.b16 %v4745_v32, %v4745_v32  ;;  %v5019_v34 = vsel %vm2691_vm11, %v11857_v6, %v12032_v17  ;;  %v9611_v6 = vld [vmem:[%s14396_s5 + $0xa0] sm:$0xff] }
 0x6e9   : > { %v5067_v36 = vunpack.c.l.b16 %v5019_v34  ;;  %5377 = vmatpush.bf16.msrb.mxu2 %v9611_v6  ;;  %9655 = vmatpush.bf16.msra.mxu3 %v9611_v6  ;;  %v9607_v32 = vld [vmem:[%s14396_s5 + $0x80] sm:$0xff] }
 0x6ea   : > { %v4804_v2 = vshrl.u32 %v4753_v51, 16  ;;  %v4807_v45 = vshll.u32 %v4753_v51, 16  ;;  %v9599_v51 = vld [vmem:[%s14396_s5 + $0x40] sm:$0xff] }
 0x6eb   : > { %5350 = vmatpush.bf16.msrb.mxu1 %v9601_v31 }
 0x6ec   : > { %v4806_v55 = vrot.slane %v4804_v2, 7 }
 0x6ed   : > { %5378 = vmatpush.bf16.msrb.mxu2 %v9610_v47  ;;  %9656 = vmatpush.bf16.msra.mxu3 %v9610_v47 }
 0x6ee   : > { %v4809_v39 = vor.u32 %v4807_v45, %v4806_v55 }
 0x6ef   : > { %5351 = vmatpush.bf16.msrb.mxu1 %v9600_v12 }
 0x6f0   : > { %v4825_v29 = vsel %vm9822_vm2, 0, %v4809_v39 }
 0x6f1   : > { %v4837_v9 = vsel %vm11533_vm7, %v4825_v29, 0  ;;  %5379 = vmatpush.bf16.msrb.mxu2 %v9609_v24  ;;  %9657 = vmatpush.bf16.msra.mxu3 %v9609_v24 }
 0x6f2   : > { %4860 = vrot.lane.b32.xlu1 %v4837_v9, %s9712_s16  ;;  %4875 = vrot.lane.b32.xlu2 %v4837_v9, %s9714_s23 }
 0x6f3   : > { %5352 = vmatpush.bf16.msrb.mxu1 %v9599_v51 }
 0x6f7   : > { %v4857_v58 = vpop.permute.xlu1 %4856 }
 0x6f8   : > { %v4896_v13 = vsel %vm2290_vm10, %v11652_v14, %v4857_v58  ;;  %v4948_v14 = vrot.slane %v4946_v56, 1 }
 0x6fa   : > { %5000 = vrot.lane.b32.xlu1 %v4992_v21, %s9714_s23  ;;  %5002 = vrot.lane.b32.xlu2 %v4993_v26, %s9714_s23  ;;  %v4949_v43 = vor.u32 %v4948_v14, %v4944_v7 }
 0x6ff   : > { %v12040_v41 = vpop.permute.xlu1 %4968 }
 0x700   : > { %v5017_v8 = vsel %vm2691_vm11, %v11854_v52, %v12040_v41 }
 0x701   : > { %v5064_v46 = vunpack.c.l.b16 %v5017_v8  ;;  %v4874_v18 = vpop.permute.xlu0 %4873 }
 0x702   : > { %v12056_v15 = vsel %vm4903_vm0, %v4896_v13, %v4874_v18  ;;  %4974 = vrot.lane.b32.xlu1 %v4943_v63, %s9713_s17  ;;  %5004 = vrot.lane.b32.xlu2 %v4994_v33, %s9714_s23 }
 0x703   : > { %v5088_v52 = vpack.c.b16 %v5067_v36, %v5064_v46  ;;  %v4952_v22 = vshll.u32 %v12056_v15, 16  ;;  %v4950_v53 = vshrl.u32 %v12056_v15, 16  ;;  %v4997_v23 = vrot.slane %v12056_v15, 1 }
 0x705   : > { %5324 = vmatmul.bf16.vlgmr.msrb.gmra.mxu0 %v5088_v52  ;;  %v4954_v38 = vrot.slane %v4952_v22, 1 }
 0x707   : > { %v4955_v30 = vor.u32 %v4954_v38, %v4950_v53 }
 0x709   : > { %v4859_v40 = vpop.permute.xlu0 %4858 }
 0x70a   : > { %4976 = vrot.lane.b32.xlu1 %v4949_v43, %s9713_s17  ;;  %4978 = vrot.lane.b32.xlu2 %v4955_v30, %s9713_s17  ;;  %v4899_v48 = vsel %vm2290_vm10, %v11869_v16, %v4859_v40  ;;  %v9608_v16 = vld [vmem:[%s14396_s5 + $0x88] sm:$0xff] }
 0x70b   : > { %5380 = vmatpush.bf16.msrb.mxu2 %v9608_v16  ;;  %9658 = vmatpush.bf16.msra.mxu3 %v9608_v16 }
 0x70f   : > { %5381 = vmatpush.bf16.msrb.mxu2 %v9607_v32  ;;  %9659 = vmatpush.bf16.msra.mxu3 %v9607_v32 }
 0x711   : > { %v12092_v54 = vpop.permute.xlu0 %4877 }
 0x712   : > { %5010 = vrot.lane.b32.xlu1 %v4997_v23, %s9714_s23 }
 0x719   : > { %v4973_v42 = vpop.permute.xlu0 %4972 }
 0x721   : > { %v5007_v52 = vpop.permute.xlu0 %5006 }
 0x722   : > { %v5075_v38 = vunpack.c.l.b16 %v5007_v52 }
 0x74c   : > { %v4876_v27 = vpop.permute.xlu2 %4875 }
 0x74d   : > { %v12085_v0 = vsel %vm4903_vm0, %v4899_v48, %v4876_v27 }
 0x74e   : > { %v4958_v49 = vshll.u32 %v12085_v0, 16  ;;  %v4998_v59 = vrot.slane %v12085_v0, 1  ;;  %v4956_v19 = vshrl.u32 %v12085_v0, 16 }
 0x750   : > { %v4960_v61 = vrot.slane %v4958_v49, 1  ;;  %5012 = vrot.lane.b32.xlu2 %v4998_v59, %s9714_s23 }
 0x752   : > { %v4961_v3 = vor.u32 %v4960_v61, %v4956_v19 }
 0x754   : > { %4980 = vrot.lane.b32.xlu1 %v4961_v3, %s9713_s17 }
 0x755   : > { %v5009_v40 = vpop.permute.xlu0 %5008 }
 0x756   : > { %v5078_v59 = vunpack.c.l.b16 %v5009_v40 }
 0x764   : > { %v4861_v62 = vpop.permute.xlu1 %4860 }
 0x765   : > { %v4902_v20 = vsel %vm2290_vm10, %v11884_v50, %v4861_v62  ;;  %v5003_v50 = vpop.permute.xlu2 %5002 }
 0x766   : > { %v12104_v10 = vsel %vm4903_vm0, %v4902_v20, %v12092_v54  ;;  %v5035_v58 = vsel %vm4903_vm0, %v12032_v17, %v5003_v50  ;;  %v5069_v34 = vunpack.c.l.b16 %v5003_v50  ;;  %v5021_v17 = vsel %vm2691_vm11, %v11893_v1, %v4973_v42 }
 0x767   : > { %v4964_v2 = vshll.u32 %v12104_v10, 16  ;;  %v4999_v55 = vrot.slane %v12104_v10, 1  ;;  %v4962_v45 = vshrl.u32 %v12104_v10, 16  ;;  %v5068_v8 = vunpack.c.l.b16 %v5035_v58 }
 0x768   : > { %v5070_v4 = vunpack.c.l.b16 %v5021_v17 }
 0x769   : > { %v4966_v39 = vrot.slane %v4964_v2, 1  ;;  %5014 = vrot.lane.b32.xlu0 %v4999_v55, %s9714_s23 }
 0x76b   : > { %v4967_v29 = vor.u32 %v4966_v39, %v4962_v45 }
 0x76c   : > { %v5001_v9 = vpop.permute.xlu1 %5000 }
 0x76d   : > { %v5033_v21 = vsel %vm4903_vm0, %v12040_v41, %v5001_v9  ;;  %v5066_v26 = vunpack.c.l.b16 %v5001_v9  ;;  %4982 = vrot.lane.b32.xlu2 %v4967_v29, %s9713_s17  ;;  %v5005_v41 = vpop.permute.xlu2 %5004 }
 0x76e   : > { %v5065_v36 = vunpack.c.l.b16 %v5033_v21  ;;  %v5037_v56 = vsel %vm4903_vm0, %v4973_v42, %v5005_v41  ;;  %v5072_v22 = vunpack.c.l.b16 %v5005_v41 }
 0x76f   : > { %v5090_v46 = vpack.c.b16 %v5069_v34, %v5066_v26  ;;  %v5071_v7 = vunpack.c.l.b16 %v5037_v56  ;;  %v12146_v26 = vld [vmem:[%s14397_s6] ss:$0 sm:$0xff] }
 0x770   : > { %v5089_v18 = vpack.c.b16 %v5068_v8, %v5065_v36  ;;  %v5093_v1 = vpack.c.b16 %v5075_v38, %v5072_v22 }
 0x771   : > { %9346 = vmatmul.msk.bf16.vlgmr.msrb.gmra.mxu2 %vm2290_vm10, %v5090_v46 }
 0x772   : > { %5353 = vmatmul.bf16.vlgmr.msrb.gmra.mxu1 %v5089_v18 }
 0x774   : > { %v4975_v57 = vpop.permute.xlu1 %4974 }
 0x775   : > { %v5023_v6 = vsel %vm2691_vm11, %v11910_v44, %v4975_v57  ;;  %v5039_v33 = vsel %vm4903_vm0, %v4975_v57, %v5007_v52  ;;  %v4979_v53 = vpop.permute.xlu2 %4978 }
 0x776   : > { %v5073_v13 = vunpack.c.l.b16 %v5023_v6  ;;  %v5074_v63 = vunpack.c.l.b16 %v5039_v33  ;;  %v5027_v30 = vsel %vm2691_vm11, %v12056_v15, %v4979_v53 }
 0x777   : > { %v5079_v37 = vunpack.c.l.b16 %v5027_v30 }
 0x778   : > { %v5091_v35 = vpack.c.b16 %v5073_v13, %v5070_v4  ;;  %v5092_v43 = vpack.c.b16 %v5074_v63, %v5071_v7 }
 0x77a   : > { %5329 = vmatmul.bf16.gmra.mxu0 %v5091_v35 }
 0x77c   : > { %v4977_v14 = vpop.permute.xlu1 %4976 }
 0x77d   : > { %v5025_v44 = vsel %vm2691_vm11, %v11994_v60, %v4977_v14  ;;  %v5041_v48 = vsel %vm4903_vm0, %v4977_v14, %v5009_v40 }
 0x77e   : > { %v5076_v23 = vunpack.c.l.b16 %v5025_v44  ;;  %v5077_v60 = vunpack.c.l.b16 %v5041_v48 }
 0x780   : > { %v5094_v31 = vpack.c.b16 %v5079_v37, %v5076_v23 }
 0x781   : > { %9347 = vmatmul.msk.bf16.gmra.mxu2 %vm2290_vm10, %v5093_v1 }
 0x782   : > { %5358 = vmatmul.bf16.gmra.mxu1 %v5092_v43 }
 0x784   : > { %v5011_v47 = vpop.permute.xlu1 %5010 }
 0x785   : > { %v5043_v24 = vsel %vm4903_vm0, %v4979_v53, %v5011_v47  ;;  %v5081_v27 = vunpack.c.l.b16 %v5011_v47 }
 0x786   : > { %v5080_v49 = vunpack.c.l.b16 %v5043_v24 }
 0x787   : > { %v5096_v19 = vpack.c.b16 %v5081_v27, %v5078_v59 }
 0x788   : > { %v5095_v61 = vpack.c.b16 %v5080_v49, %v5077_v60 }
 0x78a   : > { %5334 = vmatmul.bf16.gmra.mxu0 %v5094_v31 }
 0x791   : > { %9348 = vmatmul.msk.bf16.gmra.mxu2 %vm2290_vm10, %v5096_v19 }
 0x792   : > { %5363 = vmatmul.bf16.gmra.mxu1 %v5095_v61 }
 0x7aa   : > { %v5013_v15 = vpop.permute.xlu2 %5012 }
 0x7ab   : > { %v5084_v50 = vunpack.c.l.b16 %v5013_v15 }
 0x7c6   : > { %v4981_v3 = vpop.permute.xlu1 %4980 }
 0x7c7   : > { %v5029_v62 = vsel %vm2691_vm11, %v12085_v0, %v4981_v3  ;;  %v4983_v16 = vpop.permute.xlu2 %4982  ;;  %v5045_v2 = vsel %vm4903_vm0, %v4981_v3, %v5013_v15  ;;  %v5325_v0 = vpop.f32.mrf.mxu0 }
 0x7c8   : > { %v5082_v12 = vunpack.c.l.b16 %v5029_v62  ;;  %v5031_v20 = vsel %vm2691_vm11, %v12104_v10, %v4983_v16  ;;  %v5083_v58 = vunpack.c.l.b16 %v5045_v2  ;;  %v5326_v46 = vadd.f32 %v12146_v26, %v5325_v0 }
 0x7c9   : > { %v5085_v32 = vunpack.c.l.b16 %v5031_v20 }
 0x7cb   : > { %v5097_v51 = vpack.c.b16 %v5085_v32, %v5082_v12 }
 0x7cd   : > { %5339 = vmatmul.bf16.gmra.mxu0 %v5097_v51 }
 0x7cf   : > { %v5327_v42 = vpop.f32.mrf.mxu0 }
 0x7d0   : > { %v5328_v36 = vadd.f32 %v12146_v26, %v5327_v42 }
 0x7db   : > { %v5015_v55 = vpop.permute.xlu0 %5014 }
 0x7dc   : > { %v5047_v45 = vsel %vm4903_vm0, %v4983_v16, %v5015_v55  ;;  %v5087_v39 = vunpack.c.l.b16 %v5015_v55 }
 0x7dd   : > { %v5086_v29 = vunpack.c.l.b16 %v5047_v45 }
 0x7de   : > { %v5099_v9 = vpack.c.b16 %v5087_v39, %v5084_v50 }
 0x7df   : > { %v5098_v34 = vpack.c.b16 %v5086_v29, %v5083_v58 }
 0x7e0   : > { %9349 = vmatmul.msk.bf16.vlgmr.msra.gmra.mxu3 %vm2290_vm10, %v5099_v9 }
 0x7e1   : > { %5368 = vmatmul.bf16.gmra.mxu1 %v5098_v34 }
 0x7ef   : > { %v5354_v21 = vpop.f32.mrf.mxu1 }
 0x7f0   : > { %v5355_v57 = vadd.f32 %v5354_v21, %v5326_v46 }
 0x7f4   : > { %v5383_v10 = vpop.f32.mrf.mxu2 }
 0x7f5   : > { %v5384_v4 = vadd.f32 %v5383_v10, %v5355_v57 }
 0x7f7   : > { %v5356_v8 = vpop.f32.mrf.mxu1  ;;  %v5403_v13 = vmax.f32 %v5384_v4, 0.0  ;;  %v5330_v38 = vpop.f32.mrf.mxu0 }
 0x7f8   : > { %v5357_v17 = vadd.f32 %v5356_v8, %v5328_v36  ;;  %v5331_v10 = vadd.f32 %v12146_v26, %v5330_v38 }
 0x7f9   : > { %v5419_v35 = vrot.slane %v5403_v13, 2  ;;  %v5420_v63 = vrot.slane %v5403_v13, 4  ;;  %v5421_v14 = vrot.slane %v5403_v13, 6  ;;  %v5468_v7 = vsel %vm5467_vm4, %v5403_v13, -inf }
 0x7fa   : > { %v5469_v37 = vrot.slane %v5468_v7, 4 }
 0x7fb   : > { %v5475_v53 = vsel %vm5467_vm4, %v5419_v35, -inf  ;;  %v5482_v47 = vsel %vm5467_vm4, %v5420_v63, -inf  ;;  %v5489_v31 = vsel %vm5467_vm4, %v5421_v14, -inf }
 0x7fc   : > { %v5385_v18 = vpop.f32.mrf.mxu2  ;;  %v5476_v48 = vrot.slane %v5475_v53, 4  ;;  %v5483_v60 = vrot.slane %v5482_v47, 4  ;;  %v5490_v19 = vrot.slane %v5489_v31, 4  ;;  %v5470_v61 = vmax.f32 %v5468_v7, %v5469_v37 }
 0x7fd   : > { %v5386_v6 = vadd.f32 %v5385_v18, %v5357_v17 }
 0x7fe   : > { %v5477_v3 = vmax.f32 %v5475_v53, %v5476_v48  ;;  %v5484_v32 = vmax.f32 %v5482_v47, %v5483_v60  ;;  %v5491_v51 = vmax.f32 %v5489_v31, %v5490_v19  ;;  %v5471_v2 = vrot.slane %v5470_v61, 2 }
 0x7ff   : > { %v5404_v41 = vmax.f32 %v5386_v6, 0.0  ;;  %v5359_v30 = vpop.f32.mrf.mxu1  ;;  %v5332_v20 = vpop.f32.mrf.mxu0 }
 0x800   : > { %v5478_v45 = vrot.slane %v5477_v3, 2  ;;  %v5333_v58 = vadd.f32 %v12146_v26, %v5332_v20  ;;  %v5485_v0 = vrot.slane %v5484_v32, 2  ;;  %v5492_v21 = vrot.slane %v5491_v51, 2 }
 0x801   : > { %v5422_v52 = vrot.slane %v5404_v41, 2  ;;  %v5423_v33 = vrot.slane %v5404_v41, 4  ;;  %v5424_v56 = vrot.slane %v5404_v41, 6  ;;  %v5496_v22 = vsel %vm5467_vm4, %v5404_v41, -inf }
 0x802   : > { %v5497_v43 = vrot.slane %v5496_v22, 4  ;;  %v5472_v8 = vmax.f32 %v5470_v61, %v5471_v2  ;;  %v5479_v46 = vmax.f32 %v5477_v3, %v5478_v45  ;;  %v5360_v17 = vadd.f32 %v5359_v30, %v5331_v10 }
 0x803   : > { %v5503_v1 = vsel %vm5467_vm4, %v5422_v52, -inf  ;;  %v5510_v44 = vsel %vm5467_vm4, %v5423_v33, -inf  ;;  %v5517_v23 = vsel %vm5467_vm4, %v5424_v56, -inf  ;;  %v5486_v41 = vmax.f32 %v5484_v32, %v5485_v0 }
 0x804   : > { %v5504_v24 = vrot.slane %v5503_v1, 4  ;;  %v5388_v40 = vpop.f32.mrf.mxu2  ;;  %v5511_v27 = vrot.slane %v5510_v44, 4  ;;  %v5498_v49 = vmax.f32 %v5496_v22, %v5497_v43  ;;  %v5518_v59 = vrot.slane %v5517_v23, 4 }
 0x805   : > { %v5493_v13 = vmax.f32 %v5491_v51, %v5492_v21  ;;  %v5389_v52 = vadd.f32 %v5388_v40, %v5360_v17  ;;  %v5473_v35 = vrot.slane %v5472_v8, 1  ;;  %v5480_v22 = vrot.slane %v5479_v46, 1 }
 0x806   : > { %v5505_v15 = vmax.f32 %v5503_v1, %v5504_v24  ;;  %v5512_v62 = vmax.f32 %v5510_v44, %v5511_v27  ;;  %v5499_v16 = vrot.slane %v5498_v49, 2  ;;  %v5519_v12 = vmax.f32 %v5517_v23, %v5518_v59 }
 0x807   : > { %v5361_v50 = vpop.f32.mrf.mxu1  ;;  %v5335_v56 = vpop.f32.mrf.mxu0  ;;  %v5487_v53 = vrot.slane %v5486_v41, 1  ;;  %v5494_v43 = vrot.slane %v5493_v13, 1  ;;  %v5405_v44 = vmax.f32 %v5389_v52, 0.0  ;;  %v5474_v23 = vmax.f32 %v5472_v8, %v5473_v35 }
 0x808   : > { %v5506_v55 = vrot.slane %v5505_v15, 2  ;;  %v5513_v39 = vrot.slane %v5512_v62, 2  ;;  %v5500_v29 = vmax.f32 %v5498_v49, %v5499_v16  ;;  %v5520_v9 = vrot.slane %v5519_v12, 2 }
 0x809   : > { %v5362_v42 = vadd.f32 %v5361_v50, %v5333_v58  ;;  %v5481_v47 = vmax.f32 %v5479_v46, %v5480_v22  ;;  %v5336_v27 = vadd.f32 %v12146_v26, %v5335_v56  ;;  %v5488_v49 = vmax.f32 %v5486_v41, %v5487_v53 }
 0x80a   : > { %v5507_v36 = vmax.f32 %v5505_v15, %v5506_v55  ;;  %v5514_v18 = vmax.f32 %v5512_v62, %v5513_v39  ;;  %v5501_v6 = vrot.slane %v5500_v29, 1  ;;  %v5521_v4 = vmax.f32 %v5519_v12, %v5520_v9 }
 0x80b   : > { %v5495_v59 = vmax.f32 %v5493_v13, %v5494_v43  ;;  %v5524_v60 = vsel %vm5467_vm4, %v5405_v44, -inf  ;;  %v5692_v19 = vsel %vm4903_vm0, %v5474_v23, -inf  ;;  %v5695_v62 = vsel %vm4903_vm0, %v5481_v47, -inf }
 0x80c   : > { %v5390_v34 = vpop.f32.mrf.mxu2  ;;  %v5508_v33 = vrot.slane %v5507_v36, 1  ;;  %v5515_v63 = vrot.slane %v5514_v18, 1  ;;  %v5502_v7 = vmax.f32 %v5500_v29, %v5501_v6  ;;  %v5522_v38 = vrot.slane %v5521_v4, 1 }
 0x80d   : > { %v5391_v57 = vadd.f32 %v5390_v34, %v5362_v42  ;;  %v5425_v51 = vrot.slane %v5405_v44, 2  ;;  %v5525_v2 = vrot.slane %v5524_v60, 4  ;;  %v5698_v45 = vsel %vm4903_vm0, %v5488_v49, -inf }
 0x80e   : > { %v5509_v30 = vmax.f32 %v5507_v36, %v5508_v33  ;;  %v5516_v31 = vmax.f32 %v5514_v18, %v5515_v63  ;;  %v5523_v40 = vmax.f32 %v5521_v4, %v5522_v38  ;;  %v5693_v48 = vsel %vm4903_vm0, %v5502_v7, -inf }
 0x80f   : > { %v5406_v14 = vmax.f32 %v5391_v57, 0.0  ;;  %v5364_v1 = vpop.f32.mrf.mxu1  ;;  %v5694_v16 = vmax.f32 %v5692_v19, %v5693_v48  ;;  %v5337_v55 = vpop.f32.mrf.mxu0  ;;  %v5426_v58 = vrot.slane %v5405_v44, 4  ;;  %v5427_v29 = vrot.slane %v5405_v44, 6 }
 0x810   : > { %v5696_v61 = vsel %vm4903_vm0, %v5509_v30, -inf  ;;  %v5365_v3 = vadd.f32 %v5364_v1, %v5336_v27  ;;  %v5699_v12 = vsel %vm4903_vm0, %v5516_v31, -inf  ;;  %v5702_v32 = vsel %vm4903_vm0, %v5523_v40, -inf }
 0x811   : > { %v5552_v24 = vsel %vm5467_vm4, %v5406_v14, -inf  ;;  %v5428_v20 = vrot.slane %v5406_v14, 2  ;;  %v5697_v39 = vmax.f32 %v5695_v62, %v5696_v61  ;;  %v5701_v9 = vsel %vm4903_vm0, %v5495_v59, -inf }
 0x812   : > { %v5553_v15 = vrot.slane %v5552_v24, 4  ;;  %v5700_v34 = vmax.f32 %v5698_v45, %v5699_v12  ;;  %v5429_v0 = vrot.slane %v5406_v14, 4  ;;  %v5703_v42 = vmax.f32 %v5701_v9, %v5702_v32 }
 0x813   : > { %v5430_v8 = vrot.slane %v5406_v14, 6  ;;  %v5559_v36 = vsel %vm5467_vm4, %v5428_v20, -inf  ;;  %v5338_v46 = vadd.f32 %v12146_v26, %v5337_v55  ;;  %v5740_v18 = vpack.c.bf16 %v5694_v16, %v5694_v16 }
 0x814   : > { %v5393_v37 = vpop.f32.mrf.mxu2  ;;  %v5554_v21 = vmax.f32 %v5552_v24, %v5553_v15  ;;  %v5526_v17 = vmax.f32 %v5524_v60, %v5525_v2  ;;  %v5531_v57 = vsel %vm5467_vm4, %v5425_v51, -inf  ;;  %v5741_v41 = vpack.c.bf16 %v5697_v39, %v5697_v39 }
 0x815   : > { %v5394_v50 = vadd.f32 %v5393_v37, %v5365_v3  ;;  %v5538_v13 = vsel %vm5467_vm4, %v5426_v58, -inf  ;;  %v5545_v52 = vsel %vm5467_vm4, %v5427_v29, -inf  ;;  %v5742_v33 = vpack.c.bf16 %v5700_v34, %v5700_v34 }
 0x816   : > { %v5555_v56 = vrot.slane %v5554_v21, 2  ;;  %v5560_v22 = vrot.slane %v5559_v36, 4  ;;  %v5566_v63 = vsel %vm5467_vm4, %v5429_v0, -inf  ;;  %v5743_v14 = vpack.c.bf16 %v5703_v42, %v5703_v42 }
 0x817   : > { %v5366_v10 = vpop.f32.mrf.mxu1  ;;  %v5407_v6 = vmax.f32 %v5394_v50, 0.0  ;;  %v5532_v7 = vrot.slane %v5531_v57, 4  ;;  %v5573_v38 = vsel %vm5467_vm4, %v5430_v8, -inf  ;;  %v12178_v53 = vperm.slane %v5740_v18, 0 }
 0x818   : > { %v5367_v35 = vadd.f32 %v5366_v10, %v5338_v46  ;;  %v5527_v43 = vrot.slane %v5526_v17, 2  ;;  %v5539_v44 = vrot.slane %v5538_v13, 4  ;;  %v12180_v30 = vperm.slane %v5741_v41, 0 }
 0x819   : > { %v5431_v23 = vrot.slane %v5407_v6, 2  ;;  %v5546_v37 = vrot.slane %v5545_v52, 4  ;;  %v5567_v47 = vrot.slane %v5566_v63, 4  ;;  %v5432_v31 = vrot.slane %v5407_v6, 4 }
 0x81a   : > { %v5556_v24 = vmax.f32 %v5554_v21, %v5555_v56  ;;  %v5561_v40 = vmax.f32 %v5559_v36, %v5560_v22  ;;  %v5574_v48 = vrot.slane %v5573_v38, 4  ;;  %v5433_v27 = vrot.slane %v5407_v6, 6 }
 0x81b   : > { %v12182_v49 = vperm.slane %v5742_v33, 0  ;;  %v12184_v59 = vperm.slane %v5743_v14, 0  ;;  %v5533_v60 = vmax.f32 %v5531_v57, %v5532_v7  ;;  %v5528_v61 = vmax.f32 %v5526_v17, %v5527_v43 }
 0x81c   : > { %v5395_v4 = vpop.f32.mrf.mxu2  ;;  %v5540_v15 = vmax.f32 %v5538_v13, %v5539_v44  ;;  %v5580_v3 = vsel %vm5467_vm4, %v5407_v6, -inf  ;;  %v5587_v62 = vsel %vm5467_vm4, %v5431_v23, -inf  ;;  %v5800_v16 = vunpack.c.l.b16 %v12178_v53  ;;  %v9617_v53 = vld [vmem:[%s14398_s7 + $0x10] sm:$0xff] }
 0x81d   : > { %v5396_v1 = vadd.f32 %v5395_v4, %v5367_v35  ;;  %v5547_v12 = vmax.f32 %v5545_v52, %v5546_v37  ;;  %v5568_v20 = vmax.f32 %v5566_v63, %v5567_v47  ;;  %v5594_v32 = vsel %vm5467_vm4, %v5432_v31, -inf }
 0x81e   : > { %v5557_v51 = vrot.slane %v5556_v24, 1  ;;  %v5562_v2 = vrot.slane %v5561_v40, 2  ;;  %v5575_v55 = vmax.f32 %v5573_v38, %v5574_v48  ;;  %v5601_v50 = vsel %vm5467_vm4, %v5433_v27, -inf }
 0x81f   : > { %v5408_v19 = vmax.f32 %v5396_v1, 0.0  ;;  %v5801_v45 = vunpack.c.l.b16 %v12180_v30  ;;  %v5581_v39 = vrot.slane %v5580_v3, 4  ;;  %v5588_v58 = vrot.slane %v5587_v62, 4 }
 0x820   : > { %v5529_v9 = vrot.slane %v5528_v61, 1  ;;  %v5534_v34 = vrot.slane %v5533_v60, 2  ;;  %v5541_v0 = vrot.slane %v5540_v15, 2  ;;  %v5595_v21 = vrot.slane %v5594_v32, 4 }
 0x821   : > { %v5434_v29 = vrot.slane %v5408_v19, 2  ;;  %v5569_v10 = vrot.slane %v5568_v20, 2  ;;  %v5602_v42 = vrot.slane %v5601_v50, 4  ;;  %v5435_v8 = vrot.slane %v5408_v19, 4 }
 0x822   : > { %v5608_v36 = vsel %vm5467_vm4, %v5408_v19, -inf  ;;  %v5548_v46 = vrot.slane %v5547_v12, 2  ;;  %v5558_v18 = vmax.f32 %v5556_v24, %v5557_v51  ;;  %v5563_v17 = vmax.f32 %v5561_v40, %v5562_v2 }
 0x823   : > { %v5576_v57 = vrot.slane %v5575_v55, 2  ;;  %v5582_v6 = vmax.f32 %v5580_v3, %v5581_v39  ;;  %v5589_v4 = vmax.f32 %v5587_v62, %v5588_v58  ;;  %v5436_v41 = vrot.slane %v5408_v19, 6 }
 0x824   : > { %v5615_v13 = vsel %vm5467_vm4, %v5434_v29, -inf  ;;  %v5535_v52 = vmax.f32 %v5533_v60, %v5534_v34  ;;  %v5542_v35 = vmax.f32 %v5540_v15, %v5541_v0  ;;  %v5596_v33 = vmax.f32 %v5594_v32, %v5595_v21 }
 0x825   : > { %v5609_v56 = vrot.slane %v5608_v36, 4  ;;  %v5530_v22 = vmax.f32 %v5528_v61, %v5529_v9  ;;  %v5570_v63 = vmax.f32 %v5568_v20, %v5569_v10  ;;  %v5603_v14 = vmax.f32 %v5601_v50, %v5602_v42 }
 0x826   : > { %v5622_v7 = vsel %vm5467_vm4, %v5435_v8, -inf  ;;  %v5549_v38 = vmax.f32 %v5547_v12, %v5548_v46  ;;  %v5564_v1 = vrot.slane %v5563_v17, 1  ;;  %v5577_v43 = vmax.f32 %v5575_v55, %v5576_v57 }
 0x827   : > { %v5616_v44 = vrot.slane %v5615_v13, 4  ;;  %v5705_v23 = vsel %vm4903_vm0, %v5558_v18, -inf  ;;  %v5583_v37 = vrot.slane %v5582_v6, 2  ;;  %v5590_v47 = vrot.slane %v5589_v4, 2 }
 0x828   : > { %v5629_v31 = vsel %vm5467_vm4, %v5436_v41, -inf  ;;  %v5536_v24 = vrot.slane %v5535_v52, 1  ;;  %v5597_v40 = vrot.slane %v5596_v33, 2  ;;  %v5610_v48 = vmax.f32 %v5608_v36, %v5609_v56 }
 0x829   : > { %v5623_v27 = vrot.slane %v5622_v7, 4  ;;  %v5543_v60 = vrot.slane %v5542_v35, 1  ;;  %v5704_v19 = vsel %vm4903_vm0, %v5530_v22, -inf  ;;  %v5571_v61 = vrot.slane %v5570_v63, 1 }
 0x82a   : > { %v5604_v15 = vrot.slane %v5603_v14, 2  ;;  %v5565_v3 = vmax.f32 %v5563_v17, %v5564_v1  ;;  %v5706_v62 = vmax.f32 %v5704_v19, %v5705_v23  ;;  %v5617_v12 = vmax.f32 %v5615_v13, %v5616_v44 }
 0x82b   : > { %v5630_v20 = vrot.slane %v5629_v31, 4  ;;  %v5802_v32 = vunpack.c.l.b16 %v12182_v49  ;;  %v5578_v51 = vrot.slane %v5577_v43, 1  ;;  %v5584_v2 = vmax.f32 %v5582_v6, %v5583_v37  ;;  %v9616_v49 = vld [vmem:[%s14398_s7 + $0x8] sm:$0xff] }
 0x82c   : > { %v5591_v55 = vmax.f32 %v5589_v4, %v5590_v47  ;;  %v5537_v50 = vmax.f32 %v5535_v52, %v5536_v24  ;;  %v5598_v39 = vmax.f32 %v5596_v33, %v5597_v40  ;;  %v5611_v58 = vrot.slane %v5610_v48, 2 }
 0x82d   : > { %v5624_v29 = vmax.f32 %v5622_v7, %v5623_v27  ;;  %v5544_v9 = vmax.f32 %v5542_v35, %v5543_v60  ;;  %v5550_v34 = vrot.slane %v5549_v38, 1  ;;  %v5572_v0 = vmax.f32 %v5570_v63, %v5571_v61 }
 0x82e   : > { %v5605_v21 = vmax.f32 %v5603_v14, %v5604_v15  ;;  %v5708_v42 = vsel %vm4903_vm0, %v5565_v3, -inf  ;;  %v5744_v8 = vpack.c.bf16 %v5706_v62, %v5706_v62  ;;  %v5618_v36 = vrot.slane %v5617_v12, 2  ;;  %v9618_v62 = vld [vmem:[%s14398_s7 + $0x18] sm:$0xff] }
 0x82f   : > { %v5631_v46 = vmax.f32 %v5629_v31, %v5630_v20  ;;  %v5803_v18 = vunpack.c.l.b16 %v12184_v59  ;;  %v5579_v17 = vmax.f32 %v5577_v43, %v5578_v51  ;;  %v5585_v57 = vrot.slane %v5584_v2, 1  ;;  %5862 = vmatpush.bf16.msrb.mxu3 %v9618_v62 }
 0x830   : > { %v5592_v6 = vrot.slane %v5591_v55, 1  ;;  %v5707_v4 = vsel %vm4903_vm0, %v5537_v50, -inf  ;;  %v5599_v41 = vrot.slane %v5598_v39, 1  ;;  %v5612_v13 = vmax.f32 %v5610_v48, %v5611_v58 }
 0x831   : > { %v5625_v52 = vrot.slane %v5624_v29, 2  ;;  %v5551_v35 = vmax.f32 %v5549_v38, %v5550_v34  ;;  %v5606_v33 = vrot.slane %v5605_v21, 1  ;;  %v5709_v22 = vmax.f32 %v5707_v4, %v5708_v42 }
 0x832   : > { %v5711_v63 = vsel %vm4903_vm0, %v5572_v0, -inf  ;;  %v12203_v14 = vperm.slane %v5744_v8, 0  ;;  %v5619_v7 = vmax.f32 %v5617_v12, %v5618_v36  ;;  %v5632_v1 = vrot.slane %v5631_v46, 2 }
 0x833   : > { %v5710_v44 = vsel %vm4903_vm0, %v5544_v9, -inf  ;;  %v5586_v43 = vmax.f32 %v5584_v2, %v5585_v57  ;;  %v5593_v23 = vmax.f32 %v5591_v55, %v5592_v6  ;;  %v5714_v47 = vsel %vm4903_vm0, %v5579_v17, -inf  ;;  %5863 = vmatpush.bf16.msrb.mxu3 %v9617_v53 }
 0x834   : > { %v5600_v31 = vmax.f32 %v5598_v39, %v5599_v41  ;;  %v5613_v24 = vrot.slane %v5612_v13, 1  ;;  %v5626_v38 = vmax.f32 %v5624_v29, %v5625_v52  ;;  %v5712_v40 = vmax.f32 %v5710_v44, %v5711_v63 }
 0x835   : > { %v5607_v48 = vmax.f32 %v5605_v21, %v5606_v33  ;;  %v5713_v60 = vsel %vm4903_vm0, %v5551_v35, -inf  ;;  %v5745_v19 = vpack.c.bf16 %v5709_v22, %v5709_v22  ;;  %v5620_v61 = vrot.slane %v5619_v7, 1 }
 0x836   : > { %v5633_v15 = vmax.f32 %v5631_v46, %v5632_v1  ;;  %v12212_v12 = vmax.f32 %v5713_v60, %v5714_v47  ;;  %v5816_v20 = vsel %vm4683_vm13, %v5801_v45, %v5800_v16  ;;  %v5804_v51 = vunpack.c.l.b16 %v12203_v14 }
 0x837   : > { %v5716_v2 = vsel %vm4903_vm0, %v5586_v43, -inf  ;;  %v5719_v55 = vsel %vm4903_vm0, %v5593_v23, -inf  ;;  %v5722_v58 = vsel %vm4903_vm0, %v5600_v31, -inf  ;;  %v5614_v29 = vmax.f32 %v5612_v13, %v5613_v24  ;;  %5864 = vmatpush.bf16.msrb.mxu3 %v9616_v49 }
 0x838   : > { %v5627_v9 = vrot.slane %v5626_v38, 1  ;;  %v5746_v30 = vpack.c.bf16 %v5712_v40, %v5712_v40  ;;  %v12227_v16 = vsel %vm4903_vm0, %v5607_v48, -inf  ;;  %v12229_v34 = vperm.slane %v5745_v19, 0  ;;  %v9615_v40 = vld [vmem:[%s14398_s7] sm:$0xff] }
 0x839   : > { %v5817_v0 = vsel %vm4685_vm14, %v5802_v32, %v5816_v20  ;;  %v5621_v21 = vmax.f32 %v5619_v7, %v5620_v61  ;;  %v5747_v36 = vpack.c.bf16 %v12212_v12, %v12212_v12  ;;  %v5717_v41 = vsel %vm4903_vm0, %v5614_v29, -inf }
 0x83a   : > { %v5628_v4 = vmax.f32 %v5626_v38, %v5627_v9  ;;  %v12242_v32 = vperm.slane %v5746_v30, 0  ;;  %v5718_v48 = vmax.f32 %v5716_v2, %v5717_v41  ;;  %v5818_v19 = vsel %vm4687_vm15, %v5803_v18, %v5817_v0 }
 0x83b   : > { %v5720_v43 = vsel %vm4903_vm0, %v5621_v21, -inf  ;;  %5865 = vmatpush.bf16.msrb.mxu3 %v9615_v40  ;;  %v12261_v59 = vsel %vm4689_vm1, %v5804_v51, %v5818_v19 }
 0x83c   : > { %v5721_v61 = vmax.f32 %v5719_v55, %v5720_v43 }
 0x83e   : > { %v5749_v0 = vpack.c.bf16 %v5721_v61, %v5721_v61 }
 0x84a   : > { %v5340_v10 = vpop.f32.mrf.mxu0 }
 0x84b   : > { %v5341_v37 = vadd.f32 %v12146_v26, %v5340_v10  ;;  %v5634_v10 = vrot.slane %v5633_v15, 1 }
 0x84d   : > { %v5635_v44 = vmax.f32 %v5633_v15, %v5634_v10 }
 0x84f   : > { %v5726_v53 = vsel %vm4903_vm0, %v5635_v44, -inf }
 0x850   : > { %v5727_v14 = vmax.f32 %v12227_v16, %v5726_v53 }
 0x852   : > { %v5342_v50 = vpop.f32.mrf.mxu0 }
 0x853   : > { %v5343_v42 = vadd.f32 %v12146_v26, %v5342_v50 }
 0x85e   : > { %v5369_v56 = vpop.f32.mrf.mxu1 }
 0x85f   : > { %v5370_v27 = vadd.f32 %v5369_v56, %v5341_v37  ;;  %v5805_v37 = vunpack.c.l.b16 %v12229_v34 }
 0x863   : > { %v5398_v3 = vpop.f32.mrf.mxu3 }
 0x864   : > { %v5399_v39 = vadd.f32 %v5398_v3, %v5370_v27  ;;  %v5723_v27 = vsel %vm4903_vm0, %v5628_v4, -inf }
 0x865   : > { %v5724_v9 = vmax.f32 %v5722_v58, %v5723_v27 }
 0x866   : > { %v5409_v45 = vmax.f32 %v5399_v39, 0.0  ;;  %v5371_v8 = vpop.f32.mrf.mxu1 }
 0x867   : > { %v5372_v33 = vadd.f32 %v5371_v8, %v5343_v42  ;;  %v5750_v51 = vpack.c.bf16 %v5724_v9, %v5724_v9 }
 0x868   : > { %v5437_v46 = vrot.slane %v5409_v45, 2  ;;  %v5438_v17 = vrot.slane %v5409_v45, 4  ;;  %v5439_v57 = vrot.slane %v5409_v45, 6  ;;  %v5636_v6 = vsel %vm5467_vm4, %v5409_v45, -inf }
 0x869   : > { %v5637_v13 = vrot.slane %v5636_v6, 4  ;;  %v5794_v43 = vperm.slane %v5750_v51, 0 }
 0x86a   : > { %v5643_v26 = vsel %vm5467_vm4, %v5437_v46, -inf  ;;  %v5650_v52 = vsel %vm5467_vm4, %v5438_v17, -inf  ;;  %v5657_v35 = vsel %vm5467_vm4, %v5439_v57, -inf  ;;  %v5748_v57 = vpack.c.bf16 %v5718_v48, %v5718_v48 }
 0x86b   : > { %v5638_v56 = vmax.f32 %v5636_v6, %v5637_v13  ;;  %v5644_v22 = vrot.slane %v5643_v26, 4  ;;  %v5651_v63 = vrot.slane %v5650_v52, 4  ;;  %v5658_v7 = vrot.slane %v5657_v35, 4  ;;  %v5400_v1 = vpop.f32.mrf.mxu3 }
 0x86c   : > { %v5401_v23 = vadd.f32 %v5400_v1, %v5372_v33  ;;  %v5751_v1 = vpack.c.bf16 %v5727_v14, %v5727_v14  ;;  %v5792_v44 = vperm.slane %v5748_v57, 0 }
 0x86d   : > { %v5639_v47 = vrot.slane %v5638_v56, 2  ;;  %v5645_v31 = vmax.f32 %v5643_v26, %v5644_v22  ;;  %v5652_v24 = vmax.f32 %v5650_v52, %v5651_v63  ;;  %v5659_v38 = vmax.f32 %v5657_v35, %v5658_v7 }
 0x86e   : > { %v5410_v60 = vmax.f32 %v5401_v23, 0.0  ;;  %v5793_v26 = vperm.slane %v5749_v0, 0 }
 0x86f   : > { %v5646_v15 = vrot.slane %v5645_v31, 2  ;;  %v5653_v3 = vrot.slane %v5652_v24, 2  ;;  %v5660_v62 = vrot.slane %v5659_v38, 2  ;;  %v5640_v2 = vmax.f32 %v5638_v56, %v5639_v47 }
 0x870   : > { %v5440_v20 = vrot.slane %v5410_v60, 2  ;;  %v5441_v50 = vrot.slane %v5410_v60, 4  ;;  %v5442_v39 = vrot.slane %v5410_v60, 6  ;;  %v5664_v29 = vsel %vm5467_vm4, %v5410_v60, -inf }
 0x871   : > { %v5665_v18 = vrot.slane %v5664_v29, 4  ;;  %v5647_v21 = vmax.f32 %v5645_v31, %v5646_v15  ;;  %v5654_v10 = vmax.f32 %v5652_v24, %v5653_v3  ;;  %v5661_v58 = vmax.f32 %v5659_v38, %v5660_v62 }
 0x872   : > { %v5671_v55 = vsel %vm5467_vm4, %v5440_v20, -inf  ;;  %v5678_v30 = vsel %vm5467_vm4, %v5441_v50, -inf  ;;  %v5685_v45 = vsel %vm5467_vm4, %v5442_v39, -inf  ;;  %v5641_v6 = vrot.slane %v5640_v2, 1 }
 0x873   : > { %v5666_v42 = vmax.f32 %v5664_v29, %v5665_v18  ;;  %v5672_v8 = vrot.slane %v5671_v55, 4  ;;  %v5679_v46 = vrot.slane %v5678_v30, 4  ;;  %v5686_v17 = vrot.slane %v5685_v45, 4 }
 0x874   : > { %v5648_v52 = vrot.slane %v5647_v21, 1  ;;  %v5655_v35 = vrot.slane %v5654_v10, 1  ;;  %v5662_v33 = vrot.slane %v5661_v58, 1  ;;  %v5642_v23 = vmax.f32 %v5640_v2, %v5641_v6 }
 0x875   : > { %v5667_v4 = vrot.slane %v5666_v42, 2  ;;  %v5673_v41 = vmax.f32 %v5671_v55, %v5672_v8  ;;  %v5680_v13 = vmax.f32 %v5678_v30, %v5679_v46  ;;  %v5687_v49 = vmax.f32 %v5685_v45, %v5686_v17 }
 0x876   : > { %v5809_v38 = vunpack.c.l.b16 %v5793_v26  ;;  %v5649_v40 = vmax.f32 %v5647_v21, %v5648_v52  ;;  %v5656_v48 = vmax.f32 %v5654_v10, %v5655_v35  ;;  %v5663_v27 = vmax.f32 %v5661_v58, %v5662_v33 }
 0x877   : > { %v5668_v56 = vmax.f32 %v5666_v42, %v5667_v4  ;;  %v5674_v22 = vrot.slane %v5673_v41, 2  ;;  %v5681_v63 = vrot.slane %v5680_v13, 2  ;;  %v5688_v7 = vrot.slane %v5687_v49, 2 }
 0x878   : > { %v5795_v3 = vperm.slane %v5751_v1, 0  ;;  %v5808_v62 = vunpack.c.l.b16 %v5792_v44  ;;  %v5810_v20 = vunpack.c.l.b16 %v5794_v43  ;;  %v5728_v50 = vsel %vm4903_vm0, %v5642_v23, -inf  ;;  %v9691_v43 = vld [vmem:[%s14399_s8] ss:$0 sm:$0xff] }
 0x879   : > { %v5669_v16 = vrot.slane %v5668_v56, 1  ;;  %v5675_v47 = vmax.f32 %v5673_v41, %v5674_v22  ;;  %v5682_v31 = vmax.f32 %v5680_v13, %v5681_v63  ;;  %v5689_v24 = vmax.f32 %v5687_v49, %v5688_v7 }
 0x87a   : > { %v5731_v2 = vsel %vm4903_vm0, %v5649_v40, -inf  ;;  %v5734_v55 = vsel %vm4903_vm0, %v5656_v48, -inf  ;;  %v5823_v30 = vsel %vm4683_vm13, %v5809_v38, %v5808_v62  ;;  %v5737_v21 = vsel %vm4903_vm0, %v5663_v27, -inf }
 0x87b   : > { %v5670_v60 = vmax.f32 %v5668_v56, %v5669_v16  ;;  %v5676_v19 = vrot.slane %v5675_v47, 1  ;;  %v5683_v61 = vrot.slane %v5682_v31, 1  ;;  %v5690_v15 = vrot.slane %v5689_v24, 1 }
 0x87c   : > { %v5824_v17 = vsel %vm4685_vm14, %v5810_v20, %v5823_v30  ;;  %v5811_v4 = vunpack.c.l.b16 %v5795_v3  ;;  %v5791_v41 = vperm.slane %v5747_v36, 0  ;;  %v5806_v13 = vunpack.c.l.b16 %v12242_v32 }
 0x87d   : > { %v5677_v39 = vmax.f32 %v5675_v47, %v5676_v19  ;;  %v5684_v29 = vmax.f32 %v5682_v31, %v5683_v61  ;;  %v5691_v9 = vmax.f32 %v5689_v24, %v5690_v15  ;;  %v5729_v53 = vsel %vm4903_vm0, %v5670_v60, -inf }
 0x87e   : > { %v5730_v18 = vmax.f32 %v5728_v50, %v5729_v53  ;;  %v5820_v49 = vsel %vm4691_vm9, %v5805_v37, %v12261_v59  ;;  %v5825_v56 = vsel %vm4687_vm15, %v5811_v4, %v5824_v17  ;;  %v5807_v36 = vunpack.c.l.b16 %v5791_v41 }
 0x87f   : > { %v5732_v45 = vsel %vm4903_vm0, %v5677_v39, -inf  ;;  %v5735_v0 = vsel %vm4903_vm0, %v5684_v29, -inf  ;;  %v5738_v10 = vsel %vm4903_vm0, %v5691_v9, -inf  ;;  %v5821_v12 = vsel %vm14524_vm12, %v5806_v13, %v5820_v49 }
 0x880   : > { %v5752_v58 = vpack.c.bf16 %v5730_v18, %v5730_v18  ;;  %v5733_v42 = vmax.f32 %v5731_v2, %v5732_v45  ;;  %v5736_v8 = vmax.f32 %v5734_v55, %v5735_v0  ;;  %v5739_v46 = vmax.f32 %v5737_v21, %v5738_v10 }
 0x881   : > { %vm14527_vm4 = vcmask 1047559  }
 0x882   : > { %v5796_v14 = vperm.slane %v5752_v58, 0  ;;  %v5753_v57 = vpack.c.bf16 %v5733_v42, %v5733_v42  ;;  %v5754_v51 = vpack.c.bf16 %v5736_v8, %v5736_v8  ;;  %v5755_v6 = vpack.c.bf16 %v5739_v46, %v5739_v46  ;;  %vm14528_vm6 = vmmov %vm14527_vm4 }
 0x883   : > { %v5822_v37 = vsel %vm14527_vm4, %v5807_v36, %v5821_v12 }
 0x884   : > { %v5797_v26 = vperm.slane %v5753_v57, 0  ;;  %v5798_v52 = vperm.slane %v5754_v51, 0  ;;  %v5799_v35 = vperm.slane %v5755_v6, 0  ;;  %v5812_v33 = vunpack.c.l.b16 %v5796_v14 }
 0x886   : > { %v5813_v22 = vunpack.c.l.b16 %v5797_v26  ;;  %v5814_v63 = vunpack.c.l.b16 %v5798_v52  ;;  %v5826_v7 = vsel %vm4689_vm1, %v5812_v33, %v5825_v56  ;;  %v5815_v1 = vunpack.c.l.b16 %v5799_v35 }
 0x888   : > { %v5827_v32 = vsel %vm4691_vm9, %v5813_v22, %v5826_v7  ;;  %vm14529_vm9 = vcmask 1040384  }
 0x889   : > { %v5828_v34 = vsel %vm14526_vm8, %v5814_v63, %v5827_v32 }
 0x88a   : > { %v5829_v59 = vsel %vm14528_vm6, %v5815_v1, %v5828_v34  ;;  %vm14530_vm6 = vmmov %vm14529_vm9 }
 0x88b   : > { %v5830_v44 = vpack.c.b16 %v5829_v59, %v5822_v37  ;;  %vm14532_vm1 = vmmov %vm14530_vm6 }
 0x88d   : > { %9366 = vmatmul.msk.bf16.vlgmr.msrb.gmra.mxu3 %vm4903_vm0, %v5830_v44 }
 0x910   : > { %v5867_v23 = vpop.f32.mrf.mxu3 }
 0x911   : > { %v5868_v16 = vadd.f32 %v9691_v43, %v5867_v23 }
 0x913   : > { %v5872_v47 = vmax.f32 %v5868_v16, 0.0 }
 0x915   : > { %v5874_v31 = vpack.c.bf16 %v5872_v47, %v5872_v47 }
 0x917   : > { %v5878_v24 = vrot.slane %v5874_v31, 3 }
 0x918   : > { %v5869_v38 = vpop.f32.mrf.mxu3 }
 0x919   : > { %v5883_v40 = vsel %vm14529_vm9, %v5874_v31, %v5878_v24  ;;  %v5885_v48 = vsel %vm4683_vm13, %v5874_v31, %v5878_v24  ;;  %v5870_v27 = vadd.f32 %v9691_v43, %v5869_v38  ;;  %v5888_v15 = vsel %vm4685_vm14, %v5874_v31, %v5878_v24 }
 0x91a   : > { %v9367_v60 = vpack.i.b16 %v5883_v40, %v5883_v40  ;;  %v5887_v19 = vrot.slane %v5885_v48, 1  ;;  %v5908_v61 = vunpack.i.h.s16 %v5883_v40  ;;  %v5890_v53 = vrot.slane %v5888_v15, 2 }
 0x91b   : > { %v5873_v39 = vmax.f32 %v5870_v27, 0.0  ;;  %v5891_v30 = vsel %vm4687_vm15, %v5874_v31, %v5878_v24  ;;  %vm14600_vm9 = vsmask.f32 7424 }
 0x91c   : > { %v5939_v3 = vperm.slane %v9367_v60, 0  ;;  %v9368_v62 = vpack.i.b16 %v5887_v19, %v5887_v19  ;;  %v5924_v20 = vpack.i.b16 %v5908_v61, %v5908_v61  ;;  %v5910_v50 = vunpack.i.h.s16 %v5887_v19 }
 0x91d   : > { %v12302_v18 = vpack.c.bf16 %v5873_v39, %v5873_v39  ;;  %v9369_v55 = vpack.i.b16 %v5890_v53, %v5890_v53  ;;  %v5912_v8 = vunpack.i.h.s16 %v5890_v53  ;;  %v5893_v57 = vrot.slane %v5891_v30, 3 }
 0x91e   : > { %5971 = vrot.lane.b32.xlu0 %v5939_v3, %s9713_s17  ;;  %v5941_v29 = vperm.slane %v9368_v62, 0  ;;  %v5940_v9 = vperm.slane %v5924_v20, 0  ;;  %v5926_v2 = vpack.i.b16 %v5910_v50, %v5910_v50 }
 0x91f   : > { %v5879_v0 = vrot.slane %v12302_v18, 3  ;;  %v5943_v21 = vperm.slane %v9369_v55, 0  ;;  %v5928_v17 = vpack.i.b16 %v5912_v8, %v5912_v8  ;;  %v5914_v41 = vunpack.i.h.s16 %v5893_v57 }
 0x920   : > { %5975 = vrot.lane.b32.xlu2 %v5941_v29, %s9713_s17  ;;  %5973 = vrot.lane.b32.xlu1 %v5940_v9, %s9713_s17  ;;  %v5942_v45 = vperm.slane %v5926_v2, 0  ;;  %v9370_v33 = vpack.i.b16 %v5893_v57, %v5893_v57 }
 0x921   : > { %v12310_v10 = vsel %vm4685_vm14, %v12302_v18, %v5879_v0  ;;  %v12314_v58 = vsel %vm4687_vm15, %v12302_v18, %v5879_v0  ;;  %v5944_v14 = vperm.slane %v5928_v17, 0  ;;  %v5930_v49 = vpack.i.b16 %v5914_v41, %v5914_v41 }
 0x922   : > { %v5945_v56 = vperm.slane %v9370_v33, 0  ;;  %v5896_v34 = vsel %vm14530_vm6, %v12302_v18, %v5879_v0  ;;  %v5898_v48 = vsel %vm4683_vm13, %v12302_v18, %v5879_v0 }
 0x923   : > { %v5946_v35 = vperm.slane %v5930_v49, 0  ;;  %v9371_v37 = vpack.i.b16 %v5896_v34, %v5896_v34  ;;  %v5916_v8 = vunpack.i.h.s16 %v5896_v34 }
 0x925   : > { %v12339_v59 = vperm.slane %v9371_v37, 0 }
 0x926   : > { %5977 = vrot.lane.b32.xlu0 %v5942_v45, %s9713_s17 }
 0x928   : > { %5979 = vrot.lane.b32.xlu2 %v5943_v21, %s9713_s17 }
 0x97a   : > { %v5976_v42 = vpop.permute.xlu2 %5975 }
 0x97b   : > { %v6021_v46 = vsel %vm9822_vm2, %v5941_v29, %v5976_v42 }
 0x97c   : > { %6090 = vst [vmem:[#allocation1 + $0x2] ss:$9 sm:$0xff] %v6021_v46  ;;  %6055 = vrot.lane.b32.xlu0 %v6021_v46, %s9714_s23 }
 0x982   : > { %v5980_v22 = vpop.permute.xlu2 %5979 }
 0x983   : > { %v6023_v63 = vsel %vm9822_vm2, %v5943_v21, %v5980_v22 }
 0x984   : > { %5981 = vrot.lane.b32.xlu0 %v5944_v14, %s9713_s17 }
 0x990   : > { %v5972_v51 = vpop.permute.xlu0 %5971 }
 0x991   : > { %v6019_v6 = vsel %vm9822_vm2, %v5939_v3, %v5972_v51  ;;  %v5900_v3 = vrot.slane %v5898_v48, 1 }
 0x992   : > { %6084 = vst [vmem:[#allocation1] ss:$9 sm:$0xff] %v6019_v6  ;;  %6051 = vrot.lane.b32.xlu1 %v6019_v6, %s9714_s23  ;;  %v5974_v4 = vpop.permute.xlu1 %5973 }
 0x993   : > { %v6020_v13 = vsel %vm9822_vm2, %v5940_v9, %v5974_v4  ;;  %v5918_v39 = vunpack.i.h.s16 %v5900_v3  ;;  %v9372_v17 = vpack.i.b16 %v5900_v3, %v5900_v3 }
 0x994   : > { %6087 = vst [vmem:[#allocation1 + $0x1] ss:$9 sm:$0xff] %v6020_v13  ;;  %6053 = vrot.lane.b32.xlu2 %v6020_v13, %s9714_s23 }
 0x995   : > { %v5934_v18 = vpack.i.b16 %v5918_v39, %v5918_v39  ;;  %v5949_v57 = vperm.slane %v9372_v17, 0  ;;  %v5903_v39 = vrot.slane %v12310_v10, 2 }
 0x997   : > { %v5950_v0 = vperm.slane %v5934_v18, 0  ;;  %v9373_v18 = vpack.i.b16 %v5903_v39, %v5903_v39 }
 0x998   : > { %v5978_v26 = vpop.permute.xlu0 %5977 }
 0x999   : > { %v6022_v52 = vsel %vm9822_vm2, %v5942_v45, %v5978_v26 }
 0x99a   : > { %6093 = vst [vmem:[#allocation1 + $0x3] ss:$9 sm:$0xff] %v6022_v52  ;;  %6057 = vrot.lane.b32.xlu1 %v6022_v52, %s9714_s23 }
 0x99c   : > { %5985 = vrot.lane.b32.xlu2 %v5946_v35, %s9713_s17 }
 0x9a1   : > { %v6094_v7 = vld [vmem:[#allocation1] sm:$0xff] }
 0x9a2   : > { %5983 = vrot.lane.b32.xlu1 %v5945_v56, %s9713_s17  ;;  %v6158_v23 = vshrl.u32 %v6094_v7, 16  ;;  %v6161_v40 = vshll.u32 %v6094_v7, 16 }
 0x9a4   : > { %v6160_v47 = vrot.slane %v6158_v23, 7 }
 0x9a6   : > { %v6163_v19 = vor.u32 %v6161_v40, %v6160_v47 }
 0x9a8   : > { %v6214_v20 = vsel %vm9822_vm2, 0, %v6163_v19 }
 0x9a9   : > { %v6222_v53 = vsel %vm11533_vm7, %v6214_v20, 0 }
 0x9aa   : > { %6059 = vrot.lane.b32.xlu1 %v6023_v63, %s9714_s23 }
 0x9ee   : > { %v6056_v12 = vpop.permute.xlu0 %6055  ;;  %v6054_v36 = vpop.permute.xlu2 %6053 }
 0x9ef   : > { %6100 = vst [vmem:[#allocation1 + $0x2] ss:$9 sm:$0xff] %v6056_v12 }
 0x9f0   : > { %6098 = vst [vmem:[#allocation1 + $0x1] ss:$9 sm:$0xff] %v6054_v36 }
 0x9f6   : > { %v5982_v1 = vpop.permute.xlu0 %5981  ;;  %v5986_v16 = vpop.permute.xlu2 %5985 }
 0x9f7   : > { %v6024_v32 = vsel %vm9822_vm2, %v5944_v14, %v5982_v1  ;;  %v6026_v31 = vsel %vm9822_vm2, %v5946_v35, %v5986_v16  ;;  %v5932_v14 = vpack.i.b16 %v5916_v8, %v5916_v8 }
 0x9f8   : > { %6061 = vrot.lane.b32.xlu2 %v6024_v32, %s9714_s23 }
 0x9f9   : > { %v5948_v51 = vperm.slane %v5932_v14, 0  ;;  %v9626_v14 = vld [vmem:[%s14400_s9 + $0x38] sm:$0xff] }
 0x9fa   : > { %6702 = vmatpush.bf16.msra.mxu3 %v9626_v14 }
 0xa00   : > { %5987 = vrot.lane.b32.xlu2 %v12339_v59, %s9713_s17 }
 0xa04   : > { %v6052_v44 = vpop.permute.xlu1 %6051 }
 0xa05   : > { %6096 = vst [vmem:[#allocation1] ss:$9 sm:$0xff] %v6052_v44 }
 0xa0c   : > { %v6058_v43 = vpop.permute.xlu1 %6057 }
 0xa0d   : > { %6102 = vst [vmem:[#allocation1 + $0x3] ss:$9 sm:$0xff] %v6058_v43 }
 0xa14   : > { %v6103_v24 = vld [vmem:[#allocation1] sm:$0xff]  ;;  %v5984_v38 = vpop.permute.xlu1 %5983 }
 0xa15   : > { %6111 = vst [vmem:[#allocation1 + $0x3] ss:$9 sm:$0xff] %v6026_v31  ;;  %v6025_v27 = vsel %vm9822_vm2, %v5945_v56, %v5984_v38  ;;  %v6164_v60 = vshrl.u32 %v6103_v24, 16  ;;  %v6167_v15 = vshll.u32 %v6103_v24, 16 }
 0xa16   : > { %6105 = vst [vmem:[#allocation1] ss:$9 sm:$0xff] %v6023_v63  ;;  %6063 = vrot.lane.b32.xlu0 %v6025_v27, %s9714_s23 }
 0xa17   : > { %6107 = vst [vmem:[#allocation1 + $0x1] ss:$9 sm:$0xff] %v6024_v32  ;;  %v6166_v61 = vrot.slane %v6164_v60, 7 }
 0xa18   : > { %6109 = vst [vmem:[#allocation1 + $0x2] ss:$9 sm:$0xff] %v6025_v27 }
 0xa19   : > { %v6169_v62 = vor.u32 %v6167_v15, %v6166_v61 }
 0xa1b   : > { %v6215_v50 = vsel %vm9822_vm2, 0, %v6169_v62 }
 0xa1c   : > { %v12356_v29 = vsel %vm11533_vm7, %v6215_v50, 0  ;;  %v6060_v9 = vpop.permute.xlu1 %6059 }
 0xa1d   : > { %6254 = vrot.lane.b32.xlu2 %v12356_v29, %s9714_s23  ;;  %6240 = vrot.lane.b32.xlu1 %v12356_v29, %s9712_s16 }
 0xa1e   : > { %6238 = vrot.lane.b32.xlu0 %v6222_v53, %s9712_s16 }
 0xa1f   : > { %v6112_v2 = vld [vmem:[#allocation1] sm:$0xff] }
 0xa20   : > { %6114 = vst [vmem:[#allocation1] ss:$9 sm:$0xff] %v6060_v9  ;;  %v6170_v55 = vshrl.u32 %v6112_v2, 16  ;;  %v6173_v45 = vshll.u32 %v6112_v2, 16 }
 0xa22   : > { %v6172_v30 = vrot.slane %v6170_v55, 7  ;;  %v5906_v55 = vrot.slane %v12314_v58, 3 }
 0xa24   : > { %v6175_v21 = vor.u32 %v6173_v45, %v6172_v30  ;;  %v12429_v30 = vperm.slane %v9373_v18, 0  ;;  %v5922_v10 = vunpack.i.h.s16 %v5906_v55  ;;  %v9374_v45 = vpack.i.b16 %v5906_v55, %v5906_v55 }
 0xa25   : > { %5993 = vrot.lane.b32.xlu2 %v5950_v0, %s9713_s17  ;;  %6065 = vrot.lane.b32.xlu1 %v6026_v31, %s9714_s23 }
 0xa26   : > { %v6216_v42 = vsel %vm9822_vm2, 0, %v6175_v21  ;;  %v12434_v21 = vpack.i.b16 %v5922_v10, %v5922_v10 }
 0xa27   : > { %v12371_v46 = vsel %vm11533_vm7, %v6216_v42, 0  ;;  %v12437_v42 = vperm.slane %v9374_v45, 0 }
 0xa28   : > { %6256 = vrot.lane.b32.xlu0 %v12371_v46, %s9714_s23  ;;  %v5954_v8 = vperm.slane %v12434_v21, 0 }
 0xa2d   : > { %5991 = vrot.lane.b32.xlu1 %v5949_v57, %s9713_s17 }
 0xa30   : > { %5989 = vrot.lane.b32.xlu0 %v5948_v51, %s9713_s17 }
 0xa52   : > { %v6062_v6 = vpop.permute.xlu2 %6061 }
 0xa53   : > { %6116 = vst [vmem:[#allocation1 + $0x1] ss:$9 sm:$0xff] %v6062_v6  ;;  %v9625_v6 = vld [vmem:[%s14400_s9 + $0x30] sm:$0xff] }
 0xa54   : > { %6703 = vmatpush.bf16.msra.mxu3 %v9625_v6 }
 0xa5a   : > { %v5988_v41 = vpop.permute.xlu2 %5987 }
 0xa5b   : > { %v6027_v31 = vsel %vm9822_vm2, %v12339_v59, %v5988_v41  ;;  %v9633_v41 = vld [vmem:[%s14400_s9 + $0x70] sm:$0xff] }
 0xa77   : > { %v6255_v26 = vpop.permute.xlu2 %6254 }
 0xa7f   : > { %v5994_v32 = vpop.permute.xlu2 %5993 }
 0xa80   : > { %v6030_v43 = vsel %vm9822_vm2, %v5950_v0, %v5994_v32  ;;  %v5920_v0 = vunpack.i.h.s16 %v5903_v39  ;;  %v9620_v32 = vld [vmem:[%s14400_s9 + $0x8] sm:$0xff] }
 0xa82   : > { %v12439_v58 = vpack.i.b16 %v5920_v0, %v5920_v0 }
 0xa84   : > { %v5952_v17 = vperm.slane %v12439_v58, 0 }
 0xa88   : > { %v6064_v4 = vpop.permute.xlu0 %6063 }
 0xa89   : > { %6118 = vst [vmem:[#allocation1 + $0x2] ss:$9 sm:$0xff] %v6064_v4  ;;  %v9641_v4 = vld [vmem:[%s14400_s9 + $0xb0] sm:$0xff] }
 0xa8f   : > { %v6241_v13 = vpop.permute.xlu1 %6240 }
 0xa90   : > { %v6239_v49 = vpop.permute.xlu0 %6238  ;;  %v6272_v36 = vsel %vm2290_vm10, %v6222_v53, %v6241_v13  ;;  %v9624_v13 = vld [vmem:[%s14400_s9 + $0x28] sm:$0xff] }
 0xa91   : > { %v6269_v52 = vsel %vm2290_vm10, %v11722_v25, %v6239_v49  ;;  %v9640_v49 = vld [vmem:[%s14400_s9 + $0xa8] sm:$0xff]  ;;  %6704 = vmatpush.bf16.msra.mxu3 %v9624_v13 }
 0xa92   : > { %v12380_v35 = vsel %vm4903_vm0, %v6269_v52, %v6255_v26  ;;  %v9632_v26 = vld [vmem:[%s14400_s9 + $0x68] sm:$0xff]  ;;  %v9623_v52 = vld [vmem:[%s14400_s9 + $0x20] sm:$0xff] }
 0xa93   : > { %v6308_v33 = vshll.u32 %v12380_v35, 16  ;;  %v6378_v56 = vrot.slane %v12380_v35, 1  ;;  %v6306_v22 = vshrl.u32 %v12380_v35, 16 }
 0xa95   : > { %v6310_v63 = vrot.slane %v6308_v33, 1  ;;  %6386 = vrot.lane.b32.xlu2 %v6378_v56, %s9714_s23  ;;  %v9639_v33 = vld [vmem:[%s14400_s9 + $0xa0] sm:$0xff]  ;;  %6705 = vmatpush.bf16.msra.mxu3 %v9623_v52 }
 0xa96   : > { %v9631_v56 = vld [vmem:[%s14400_s9 + $0x60] sm:$0xff] }
 0xa97   : > { %v6066_v7 = vpop.permute.xlu1 %6065  ;;  %v6311_v12 = vor.u32 %v6310_v63, %v6306_v22  ;;  %v9622_v22 = vld [vmem:[%s14400_s9 + $0x18] sm:$0xff] }
 0xa98   : > { %6120 = vst [vmem:[#allocation1 + $0x3] ss:$9 sm:$0xff] %v6066_v7  ;;  %v9638_v63 = vld [vmem:[%s14400_s9 + $0x98] sm:$0xff] }
 0xa99   : > { %6354 = vrot.lane.b32.xlu0 %v6311_v12, %s9713_s17  ;;  %v9630_v7 = vld [vmem:[%s14400_s9 + $0x58] sm:$0xff]  ;;  %6706 = vmatpush.bf16.msra.mxu3 %v9622_v22  ;;  %v9621_v12 = vld [vmem:[%s14400_s9 + $0x10] sm:$0xff] }
 0xa9a   : > { %v6257_v25 = vpop.permute.xlu0 %6256 }
 0xa9b   : > { %v12389_v1 = vsel %vm4903_vm0, %v6272_v36, %v6257_v25  ;;  %v9637_v36 = vld [vmem:[%s14400_s9 + $0x90] sm:$0xff] }
 0xa9c   : > { %v6314_v34 = vshll.u32 %v12389_v1, 16  ;;  %v6312_v37 = vshrl.u32 %v12389_v1, 16  ;;  %v6379_v16 = vrot.slane %v12389_v1, 1  ;;  %v9629_v25 = vld [vmem:[%s14400_s9 + $0x50] sm:$0xff] }
 0xa9d   : > { %6707 = vmatpush.bf16.msra.mxu3 %v9621_v12 }
 0xa9e   : > { %v6316_v44 = vrot.slane %v6314_v34, 1  ;;  %v9636_v34 = vld [vmem:[%s14400_s9 + $0x88] sm:$0xff] }
 0xa9f   : > { %v6121_v23 = vld [vmem:[#allocation1] sm:$0xff]  ;;  %v5992_v47 = vpop.permute.xlu1 %5991 }
 0xaa0   : > { %6129 = vst [vmem:[#allocation1 + $0x3] ss:$9 sm:$0xff] %v6030_v43  ;;  %v6029_v24 = vsel %vm9822_vm2, %v5949_v57, %v5992_v47  ;;  %v6317_v38 = vor.u32 %v6316_v44, %v6312_v37  ;;  %v6176_v40 = vshrl.u32 %v6121_v23, 16  ;;  %v6179_v60 = vshll.u32 %v6121_v23, 16  ;;  %v9642_v57 = vld [vmem:[%s14400_s9 + $0xb8] sm:$0xff]  ;;  %v9628_v37 = vld [vmem:[%s14400_s9 + $0x48] sm:$0xff] }
 0xaa1   : > { %6123 = vst [vmem:[#allocation1] ss:$9 sm:$0xff] %v6027_v31  ;;  %6388 = vrot.lane.b32.xlu0 %v6379_v16, %s9714_s23  ;;  %6760 = vmatpush.bf16.msra.mxu1 %v9642_v57  ;;  %v9619_v44 = vld [vmem:[%s14400_s9] sm:$0xff] }
 0xaa2   : > { %6127 = vst [vmem:[#allocation1 + $0x2] ss:$9 sm:$0xff] %v6029_v24  ;;  %v5990_v48 = vpop.permute.xlu0 %5989  ;;  %6356 = vrot.lane.b32.xlu1 %v6317_v38, %s9713_s17  ;;  %v6178_v27 = vrot.slane %v6176_v40, 7  ;;  %6708 = vmatpush.bf16.msra.mxu3 %v9620_v32  ;;  %v9627_v23 = vld [vmem:[%s14400_s9 + $0x40] sm:$0xff] }
 0xaa3   : > { %v6028_v19 = vsel %vm9822_vm2, %v5948_v51, %v5990_v48  ;;  %v9634_v51 = vld [vmem:[%s14400_s9 + $0x78] sm:$0xff] }
 0xaa4   : > { %6125 = vst [vmem:[#allocation1 + $0x1] ss:$9 sm:$0xff] %v6028_v19  ;;  %v6181_v59 = vor.u32 %v6179_v60, %v6178_v27  ;;  %6731 = vmatpush.bf16.msra.mxu0 %v9634_v51 }
 0xaa5   : > { %6761 = vmatpush.bf16.msra.mxu1 %v9641_v4 }
 0xaa6   : > { %v6217_v61 = vsel %vm9822_vm2, 0, %v6181_v59  ;;  %6709 = vmatpush.bf16.msra.mxu3 %v9619_v44 }
 0xaa7   : > { %v12409_v15 = vsel %vm11533_vm7, %v6217_v61, 0 }
 0xaa8   : > { %6244 = vrot.lane.b32.xlu2 %v12409_v15, %s9712_s16  ;;  %6732 = vmatpush.bf16.msra.mxu0 %v9633_v41 }
 0xaa9   : > { %6258 = vrot.lane.b32.xlu0 %v12409_v15, %s9714_s23  ;;  %6762 = vmatpush.bf16.msra.mxu1 %v9640_v49 }
 0xaaa   : > { %6242 = vrot.lane.b32.xlu1 %v12371_v46, %s9712_s16 }
 0xaab   : > { %v6130_v3 = vld [vmem:[#allocation1] sm:$0xff] }
 0xaac   : > { %v6182_v62 = vshrl.u32 %v6130_v3, 16  ;;  %v6185_v50 = vshll.u32 %v6130_v3, 16  ;;  %6733 = vmatpush.bf16.msra.mxu0 %v9632_v26 }
 0xaad   : > { %6763 = vmatpush.bf16.msra.mxu1 %v9639_v33 }
 0xaae   : > { %v6184_v20 = vrot.slane %v6182_v62, 7 }
 0xab0   : > { %6067 = vrot.lane.b32.xlu2 %v6027_v31, %s9714_s23  ;;  %v6187_v9 = vor.u32 %v6185_v50, %v6184_v20  ;;  %6734 = vmatpush.bf16.msra.mxu0 %v9631_v56 }
 0xab1   : > { %6069 = vrot.lane.b32.xlu0 %v6028_v19, %s9714_s23  ;;  %6764 = vmatpush.bf16.msra.mxu1 %v9638_v63 }
 0xab2   : > { %v6218_v53 = vsel %vm9822_vm2, 0, %v6187_v9 }
 0xab3   : > { %v12424_v2 = vsel %vm11533_vm7, %v6218_v53, 0 }
 0xab4   : > { %6260 = vrot.lane.b32.xlu1 %v12424_v2, %s9714_s23  ;;  %6735 = vmatpush.bf16.msra.mxu0 %v9630_v7 }
 0xab5   : > { %6765 = vmatpush.bf16.msra.mxu1 %v9637_v36 }
 0xab8   : > { %6073 = vrot.lane.b32.xlu2 %v6030_v43, %s9714_s23  ;;  %6736 = vmatpush.bf16.msra.mxu0 %v9629_v25  ;;  %v9635_v43 = vld [vmem:[%s14400_s9 + $0x80] sm:$0xff] }
 0xab9   : > { %5995 = vrot.lane.b32.xlu0 %v12429_v30, %s9713_s17  ;;  %6766 = vmatpush.bf16.msra.mxu1 %v9636_v34 }
 0xabc   : > { %6071 = vrot.lane.b32.xlu1 %v6029_v24, %s9714_s23  ;;  %6737 = vmatpush.bf16.msra.mxu0 %v9628_v37 }
 0xabd   : > { %6767 = vmatpush.bf16.msra.mxu1 %v9635_v43 }
 0xac0   : > { %5999 = vrot.lane.b32.xlu2 %v12437_v42, %s9713_s17  ;;  %6738 = vmatpush.bf16.msra.mxu0 %v9627_v23 }
 0xac1   : > { %6001 = vrot.lane.b32.xlu0 %v5954_v8, %s9713_s17 }
 0xac4   : > { %5997 = vrot.lane.b32.xlu1 %v5952_v17, %s9713_s17 }
 0xac8   : > { %6246 = vrot.lane.b32.xlu2 %v12424_v2, %s9712_s16 }
 0xaef   : > { %v6387_v16 = vpop.permute.xlu2 %6386 }
 0xaf0   : > { %v6452_v60 = vunpack.c.l.b16 %v6387_v16 }
 0xb02   : > { %v6245_v47 = vpop.permute.xlu2 %6244 }
 0xb03   : > { %v6278_v45 = vsel %vm2290_vm10, %v12371_v46, %v6245_v47 }
 0xb0a   : > { %v6068_v31 = vpop.permute.xlu2 %6067 }
 0xb0b   : > { %6132 = vst [vmem:[#allocation1] ss:$9 sm:$0xff] %v6068_v31  ;;  %v6355_v24 = vpop.permute.xlu0 %6354 }
 0xb0c   : > { %v6403_v38 = vsel %vm2691_vm11, %v12380_v35, %v6355_v24  ;;  %v6419_v48 = vsel %vm4903_vm0, %v6355_v24, %v6387_v16  ;;  %v9643_v24 = vld [vmem:[%s14402_s11] sm:$0xff] }
 0xb0d   : > { %v6450_v61 = vunpack.c.l.b16 %v6403_v38  ;;  %v6451_v20 = vunpack.c.l.b16 %v6419_v48  ;;  %6856 = vmatpush.bf16.msra.mxu2 %v9643_v24 }
 0xb12   : > { %v6074_v40 = vpop.permute.xlu2 %6073 }
 0xb13   : > { %6138 = vst [vmem:[#allocation1 + $0x3] ss:$9 sm:$0xff] %v6074_v40  ;;  %v6389_v27 = vpop.permute.xlu0 %6388  ;;  %v12598_v40 = vld [vmem:[%s14401_s10] ss:$0 sm:$0xff] }
 0xb14   : > { %v6357_v19 = vpop.permute.xlu1 %6356  ;;  %v6455_v59 = vunpack.c.l.b16 %v6389_v27 }
 0xb15   : > { %v6405_v3 = vsel %vm2691_vm11, %v12389_v1, %v6357_v19  ;;  %v6421_v62 = vsel %vm4903_vm0, %v6357_v19, %v6389_v27 }
 0xb16   : > { %v6453_v50 = vunpack.c.l.b16 %v6405_v3  ;;  %v6454_v39 = vunpack.c.l.b16 %v6421_v62  ;;  %v6476_v9 = vpack.c.b16 %v6455_v59, %v6452_v60 }
 0xb18   : > { %v6474_v53 = vpack.c.b16 %v6453_v50, %v6450_v61  ;;  %v6475_v35 = vpack.c.b16 %v6454_v39, %v6451_v20  ;;  %9471 = vmatmul.msk.bf16.vlgmr.msra.gmra.mxu1 %vm2290_vm10, %v6476_v9 }
 0xb1a   : > { %6710 = vmatmul.bf16.vlgmr.msra.gmra.mxu3 %v6474_v53  ;;  %6739 = vmatmul.bf16.vlgmr.msra.gmra.mxu0 %v6475_v35  ;;  %v6000_v13 = vpop.permute.xlu2 %5999 }
 0xb1b   : > { %v6259_v18 = vpop.permute.xlu0 %6258  ;;  %v6033_v46 = vsel %vm9822_vm2, %v12437_v42, %v6000_v13 }
 0xb1c   : > { %v6243_v55 = vpop.permute.xlu1 %6242 }
 0xb1d   : > { %v6275_v56 = vsel %vm2290_vm10, %v12356_v29, %v6243_v55 }
 0xb22   : > { %v12593_v38 = vpop.permute.xlu2 %6246 }
 0xb23   : > { %v6070_v10 = vpop.permute.xlu0 %6069 }
 0xb24   : > { %6134 = vst [vmem:[#allocation1 + $0x1] ss:$9 sm:$0xff] %v6070_v10 }
 0xb26   : > { %v6261_v1 = vpop.permute.xlu1 %6260 }
 0xb27   : > { %v12535_v0 = vsel %vm4903_vm0, %v6278_v45, %v6261_v1 }
 0xb28   : > { %v6326_v14 = vshll.u32 %v12535_v0, 16  ;;  %v6324_v57 = vshrl.u32 %v12535_v0, 16  ;;  %v6381_v31 = vrot.slane %v12535_v0, 1 }
 0xb2a   : > { %v6328_v51 = vrot.slane %v6326_v14, 1 }
 0xb2b   : > { %v5996_v6 = vpop.permute.xlu0 %5995 }
 0xb2c   : > { %v6329_v4 = vor.u32 %v6328_v51, %v6324_v57  ;;  %v6031_v22 = vsel %vm9822_vm2, %v12429_v30, %v5996_v6 }
 0xb2e   : > { %6360 = vrot.lane.b32.xlu2 %v6329_v4, %s9713_s17  ;;  %v6072_v41 = vpop.permute.xlu1 %6071 }
 0xb2f   : > { %6136 = vst [vmem:[#allocation1 + $0x2] ss:$9 sm:$0xff] %v6072_v41 }
 0xb33   : > { %v6002_v49 = vpop.permute.xlu0 %6001 }
 0xb34   : > { %v6034_v52 = vsel %vm9822_vm2, %v5954_v8, %v6002_v49  ;;  %v12557_v8 = vsel %vm4903_vm0, %v6275_v56, %v6259_v18 }
 0xb35   : > { %v6320_v12 = vshll.u32 %v12557_v8, 16  ;;  %v6318_v32 = vshrl.u32 %v12557_v8, 16  ;;  %v6380_v44 = vrot.slane %v12557_v8, 1 }
 0xb36   : > { %v6139_v26 = vld [vmem:[#allocation1] sm:$0xff]  ;;  %v5998_v33 = vpop.permute.xlu1 %5997 }
 0xb37   : > { %6145 = vst [vmem:[#allocation1 + $0x2] ss:$9 sm:$0xff] %v6033_v46  ;;  %v6032_v42 = vsel %vm9822_vm2, %v5952_v17, %v5998_v33  ;;  %v6188_v63 = vshrl.u32 %v6139_v26, 16  ;;  %v6191_v7 = vshll.u32 %v6139_v26, 16  ;;  %v6322_v17 = vrot.slane %v6320_v12, 1 }
 0xb38   : > { %6141 = vst [vmem:[#allocation1] ss:$9 sm:$0xff] %v6031_v22 }
 0xb39   : > { %6147 = vst [vmem:[#allocation1 + $0x3] ss:$9 sm:$0xff] %v6034_v52  ;;  %v6190_v21 = vrot.slane %v6188_v63, 7  ;;  %v6323_v43 = vor.u32 %v6322_v17, %v6318_v32 }
 0xb3a   : > { %6143 = vst [vmem:[#allocation1 + $0x1] ss:$9 sm:$0xff] %v6032_v42 }
 0xb3b   : > { %v6193_v29 = vor.u32 %v6191_v7, %v6190_v21 }
 0xb3d   : > { %v6219_v30 = vsel %vm9822_vm2, 0, %v6193_v29 }
 0xb3e   : > { %v12564_v58 = vsel %vm11533_vm7, %v6219_v30, 0 }
 0xb3f   : > { %6262 = vrot.lane.b32.xlu1 %v12564_v58, %s9714_s23  ;;  %6248 = vrot.lane.b32.xlu0 %v12564_v58, %s9712_s16 }
 0xb41   : > { %v6148_v36 = vld [vmem:[#allocation1] sm:$0xff] }
 0xb42   : > { %v6194_v25 = vshrl.u32 %v6148_v36, 16  ;;  %v6197_v37 = vshll.u32 %v6148_v36, 16 }
 0xb44   : > { %v6196_v34 = vrot.slane %v6194_v25, 7 }
 0xb46   : > { %v6199_v23 = vor.u32 %v6197_v37, %v6196_v34 }
 0xb47   : > { %6358 = vrot.lane.b32.xlu1 %v6323_v43, %s9713_s17  ;;  %6390 = vrot.lane.b32.xlu0 %v6380_v44, %s9714_s23 }
 0xb48   : > { %v6220_v16 = vsel %vm9822_vm2, 0, %v6199_v23  ;;  %v6281_v23 = vsel %vm2290_vm10, %v12409_v15, %v12593_v38 }
 0xb49   : > { %v12578_v47 = vsel %vm11533_vm7, %v6220_v16, 0 }
 0xb4a   : > { %6264 = vrot.lane.b32.xlu2 %v12578_v47, %s9714_s23 }
 0xb4f   : > { %6392 = vrot.lane.b32.xlu1 %v6381_v31, %s9714_s23  ;;  %6075 = vrot.lane.b32.xlu0 %v6031_v22, %s9714_s23 }
 0xb52   : > { %6079 = vrot.lane.b32.xlu2 %v6033_v46, %s9714_s23 }
 0xb57   : > { %6081 = vrot.lane.b32.xlu0 %v6034_v52, %s9714_s23  ;;  %6077 = vrot.lane.b32.xlu1 %v6032_v42, %s9714_s23 }
 0xb5a   : > { %6250 = vrot.lane.b32.xlu2 %v12578_v47, %s9712_s16 }
 0xb88   : > { %v6361_v48 = vpop.permute.xlu2 %6360 }
 0xb89   : > { %v6409_v52 = vsel %vm2691_vm11, %v12535_v0, %v6361_v48 }
 0xb8a   : > { %v6459_v63 = vunpack.c.l.b16 %v6409_v52 }
 0xb95   : > { %v6769_v59 = vpop.f32.mrf.mxu1 }
 0xb97   : > { %v6740_v27 = vpop.f32.mrf.mxu0 }
 0xb9d   : > { %v6711_v60 = vpop.f32.mrf.mxu3  ;;  %v6771_v35 = vpop.f32.mrf.mxu1 }
 0xb9e   : > { %v6712_v19 = vadd.f32 %v12598_v40, %v6711_v60 }
 0xb9f   : > { %v6742_v39 = vpop.f32.mrf.mxu0 }
 0xba0   : > { %v6741_v61 = vadd.f32 %v6740_v27, %v6712_v19 }
 0xba2   : > { %v6770_v3 = vadd.f32 %v6769_v59, %v6741_v61 }
 0xba4   : > { %v6265_v62 = vpop.permute.xlu2 %6264  ;;  %v6789_v9 = vmax.f32 %v6770_v3, 0.0 }
 0xba5   : > { %v6713_v20 = vpop.f32.mrf.mxu3 }
 0xba6   : > { %v6714_v50 = vadd.f32 %v12598_v40, %v6713_v20  ;;  %v6797_v55 = vpack.c.bf16 %v6789_v9, %v6789_v9 }
 0xba8   : > { %v6743_v53 = vadd.f32 %v6742_v39, %v6714_v50  ;;  %v6819_v14 = vunpack.c.l.b16 %v6797_v55 }
 0xbaa   : > { %v6772_v18 = vadd.f32 %v6771_v35, %v6743_v53 }
 0xbac   : > { %v6790_v10 = vmax.f32 %v6772_v18, 0.0  ;;  %v6080_v45 = vpop.permute.xlu2 %6079 }
 0xbad   : > { %6154 = vst [vmem:[#allocation1 + $0x2] ss:$9 sm:$0xff] %v6080_v45 }
 0xbae   : > { %v6798_v1 = vpack.c.bf16 %v6790_v10, %v6790_v10 }
 0xbb0   : > { %v6820_v57 = vunpack.c.l.b16 %v6798_v1 }
 0xbb1   : > { %v6249_v51 = vpop.permute.xlu0 %6248  ;;  %v6263_v6 = vpop.permute.xlu1 %6262 }
 0xbb2   : > { %v6827_v4 = vpack.c.b16 %v6820_v57, %v6819_v14  ;;  %v6284_v41 = vsel %vm2290_vm10, %v12424_v2, %v6249_v51  ;;  %v12622_v24 = vsel %vm4903_vm0, %v6281_v23, %v6263_v6 }
 0xbb3   : > { %v12605_v13 = vsel %vm4903_vm0, %v6284_v41, %v6265_v62  ;;  %v6332_v27 = vshll.u32 %v12622_v24, 16  ;;  %v6330_v15 = vshrl.u32 %v12622_v24, 16  ;;  %v6382_v38 = vrot.slane %v12622_v24, 1 }
 0xbb4   : > { %v6338_v49 = vshll.u32 %v12605_v13, 16  ;;  %9479 = vmatmul.msk.bf16.vlgmr.msra.gmra.mxu2 %vm1089_vm3, %v6827_v4  ;;  %v6336_v46 = vshrl.u32 %v12605_v13, 16  ;;  %v6383_v3 = vrot.slane %v12605_v13, 1  ;;  %v6251_v10 = vpop.permute.xlu2 %6250 }
 0xbb5   : > { %v6334_v59 = vrot.slane %v6332_v27, 1  ;;  %v6287_v4 = vsel %vm2290_vm10, %v12564_v58, %v6251_v10 }
 0xbb6   : > { %v6340_v26 = vrot.slane %v6338_v49, 1 }
 0xbb7   : > { %v6335_v61 = vor.u32 %v6334_v59, %v6330_v15 }
 0xbb8   : > { %v6341_v33 = vor.u32 %v6340_v26, %v6336_v46 }
 0xbb9   : > { %v6391_v56 = vpop.permute.xlu0 %6390  ;;  %v6359_v22 = vpop.permute.xlu1 %6358 }
 0xbba   : > { %v6407_v42 = vsel %vm2691_vm11, %v12557_v8, %v6359_v22  ;;  %6364 = vrot.lane.b32.xlu2 %v6341_v33, %s9713_s17  ;;  %v6423_v7 = vsel %vm4903_vm0, %v6359_v22, %v6391_v56  ;;  %v6458_v30 = vunpack.c.l.b16 %v6391_v56 }
 0xbbb   : > { %v6456_v2 = vunpack.c.l.b16 %v6407_v42  ;;  %v6457_v36 = vunpack.c.l.b16 %v6423_v7 }
 0xbbd   : > { %v6477_v21 = vpack.c.b16 %v6459_v63, %v6456_v2 }
 0xbbf   : > { %6715 = vmatmul.bf16.gmra.mxu3 %v6477_v21 }
 0xbc1   : > { %v6076_v29 = vpop.permute.xlu0 %6075  ;;  %v6393_v12 = vpop.permute.xlu1 %6392 }
 0xbc2   : > { %6150 = vst [vmem:[#allocation1] ss:$9 sm:$0xff] %v6076_v29  ;;  %v6425_v0 = vsel %vm4903_vm0, %v6361_v48, %v6393_v12  ;;  %v6461_v17 = vunpack.c.l.b16 %v6393_v12 }
 0xbc3   : > { %v6460_v25 = vunpack.c.l.b16 %v6425_v0 }
 0xbc4   : > { %v6479_v32 = vpack.c.b16 %v6461_v17, %v6458_v30 }
 0xbc5   : > { %v6478_v34 = vpack.c.b16 %v6460_v25, %v6457_v36 }
 0xbc6   : > { %9472 = vmatmul.msk.bf16.gmra.mxu1 %vm2290_vm10, %v6479_v32 }
 0xbc7   : > { %6744 = vmatmul.bf16.gmra.mxu0 %v6478_v34 }
 0xbc9   : > { %v6082_v8 = vpop.permute.xlu0 %6081  ;;  %v6078_v37 = vpop.permute.xlu1 %6077 }
 0xbca   : > { %6156 = vst [vmem:[#allocation1 + $0x3] ss:$9 sm:$0xff] %v6082_v8 }
 0xbcb   : > { %6152 = vst [vmem:[#allocation1 + $0x1] ss:$9 sm:$0xff] %v6078_v37 }
 0xbd2   : > { %v6157_v44 = vld [vmem:[#allocation1] sm:$0xff] }
 0xbd3   : > { %v6200_v43 = vshrl.u32 %v6157_v44, 16  ;;  %v6203_v31 = vshll.u32 %v6157_v44, 16 }
 0xbd5   : > { %v6202_v16 = vrot.slane %v6200_v43, 7 }
 0xbd7   : > { %v6205_v48 = vor.u32 %v6203_v31, %v6202_v16 }
 0xbd9   : > { %v6221_v60 = vsel %vm9822_vm2, 0, %v6205_v48 }
 0xbda   : > { %v6229_v19 = vsel %vm11533_vm7, %v6221_v60, 0  ;;  %vm14531_vm7 = vmmov %vm14530_vm6 }
 0xbdb   : > { %6266 = vrot.lane.b32.xlu1 %v6229_v19, %s9714_s23  ;;  %6252 = vrot.lane.b32.xlu0 %v6229_v19, %s9712_s16  ;;  %s9715_s16 = smov 120  }
 0xbe3   : > { %6362 = vrot.lane.b32.xlu1 %v6335_v61, %s9713_s17  ;;  %6394 = vrot.lane.b32.xlu0 %v6382_v38, %s9714_s23 }
 0xbeb   : > { %6396 = vrot.lane.b32.xlu1 %v6383_v3, %s9714_s23 }
 0xc14   : > { %v6365_v22 = vpop.permute.xlu2 %6364 }
 0xc15   : > { %v6413_v30 = vsel %vm2691_vm11, %v12605_v13, %v6365_v22 }
 0xc16   : > { %v6465_v16 = vunpack.c.l.b16 %v6413_v30 }
 0xc37   : > { %v6858_v62 = vpop.f32.mrf.mxu2 }
 0xc38   : > { %v6859_v20 = vadd.f32 %v12640_v28, %v6858_v62 }
 0xc3a   : > { %v6878_v50 = vmax.f32 %v6859_v20, 0.0 }
 0xc3c   : > { %v6886_v53 = vpack.c.bf16 %v6878_v50, %v6878_v50 }
 0xc3e   : > { %v6902_v45 = vrot.slane %v6886_v53, 3 }
 0xc3f   : > { %v6860_v58 = vpop.f32.mrf.mxu2 }
 0xc40   : > { %v6912_v6 = vsel %vm14531_vm7, %v6886_v53, %v6902_v45  ;;  %v6917_v17 = vsel %vm4685_vm14, %v6886_v53, %v6902_v45  ;;  %v6861_v34 = vadd.f32 %v12640_v28, %v6860_v58  ;;  %v6914_v19 = vsel %vm4683_vm13, %v6886_v53, %v6902_v45 }
 0xc41   : > { %v7015_v63 = vunpack.i.h.s16 %v6912_v6  ;;  %v6919_v31 = vrot.slane %v6917_v17, 2  ;;  %v6920_v38 = vsel %vm4687_vm15, %v6886_v53, %v6902_v45  ;;  %v9483_v3 = vpack.i.b16 %v6912_v6, %v6912_v6 }
 0xc42   : > { %v6716_v39 = vpop.f32.mrf.mxu3  ;;  %v6879_v59 = vmax.f32 %v6861_v34, 0.0  ;;  %v6916_v20 = vrot.slane %v6914_v19, 1 }
 0xc43   : > { %v6717_v9 = vadd.f32 %v12598_v40, %v6716_v39  ;;  %v6774_v35 = vpop.f32.mrf.mxu1  ;;  %v12666_v32 = vpack.i.b16 %v7015_v63, %v7015_v63  ;;  %v9485_v50 = vpack.i.b16 %v6919_v31, %v6919_v31  ;;  %v6922_v39 = vrot.slane %v6920_v38, 3 }
 0xc44   : > { %v6745_v18 = vpop.f32.mrf.mxu0 }
 0xc45   : > { %v6746_v55 = vadd.f32 %v6745_v18, %v6717_v9  ;;  %v7143_v27 = vperm.slane %v12666_v32, 0  ;;  %v6887_v9 = vpack.c.bf16 %v6879_v59, %v6879_v59  ;;  %v12683_v18 = vperm.slane %v9483_v3, 0 }
 0xc46   : > { %v7021_v6 = vunpack.i.h.s16 %v6922_v39 }
 0xc47   : > { %v6775_v1 = vadd.f32 %v6774_v35, %v6746_v55 }
 0xc49   : > { %v6791_v41 = vmax.f32 %v6775_v1, 0.0  ;;  %v9484_v1 = vpack.i.b16 %v6916_v20, %v6916_v20 }
 0xc4a   : > { %v6718_v14 = vpop.f32.mrf.mxu3 }
 0xc4b   : > { %v6719_v57 = vadd.f32 %v12598_v40, %v6718_v14  ;;  %v6776_v52 = vpop.f32.mrf.mxu1  ;;  %v6799_v7 = vpack.c.bf16 %v6791_v41, %v6791_v41 }
 0xc4c   : > { %v6747_v51 = vpop.f32.mrf.mxu0 }
 0xc4d   : > { %v6748_v49 = vadd.f32 %v6747_v51, %v6719_v57  ;;  %v6267_v46 = vpop.permute.xlu1 %6266  ;;  %v6253_v26 = vpop.permute.xlu0 %6252  ;;  %v6821_v8 = vunpack.c.l.b16 %v6799_v7  ;;  %v12688_v51 = vperm.slane %v9485_v50, 0 }
 0xc4e   : > { %v12649_v33 = vsel %vm4903_vm0, %v6287_v4, %v6267_v46  ;;  %v6290_v56 = vsel %vm2290_vm10, %v12578_v47, %v6253_v26  ;;  %v6903_v4 = vrot.slane %v6887_v9, 3  ;;  %v9486_v46 = vpack.i.b16 %v6922_v39, %v6922_v39 }
 0xc4f   : > { %v6777_v42 = vadd.f32 %v6776_v52, %v6748_v49  ;;  %v6384_v2 = vrot.slane %v12649_v33, 1  ;;  %v12656_v21 = vsel %vm4903_vm0, %v6290_v56, %v12092_v54  ;;  %v6344_v47 = vshll.u32 %v12649_v33, 16 }
 0xc50   : > { %v6350_v12 = vshll.u32 %v12656_v21, 16  ;;  %v6385_v0 = vrot.slane %v12656_v21, 1  ;;  %v6348_v54 = vshrl.u32 %v12656_v21, 16  ;;  %v6342_v15 = vshrl.u32 %v12649_v33, 16 }
 0xc51   : > { %v6792_v29 = vmax.f32 %v6777_v42, 0.0  ;;  %6398 = vrot.lane.b32.xlu1 %v6384_v2, %s9714_s23  ;;  %v6346_v43 = vrot.slane %v6344_v47, 1  ;;  %v7144_v26 = vperm.slane %v9484_v1, 0  ;;  %v7019_v52 = vunpack.i.h.s16 %v6919_v31 }
 0xc52   : > { %v6352_v25 = vrot.slane %v6350_v12, 1  ;;  %6400 = vrot.lane.b32.xlu2 %v6385_v0, %s9714_s23  ;;  %v12693_v56 = vpack.i.b16 %v7021_v6, %v7021_v6  ;;  %v12697_v42 = vperm.slane %v9486_v46, 0  ;;  %v7017_v2 = vunpack.i.h.s16 %v6916_v20  ;;  %s14563_s23 = smov 8  }
 0xc53   : > { %v6800_v36 = vpack.c.bf16 %v6792_v29, %v6792_v29  ;;  %v6347_v62 = vor.u32 %v6346_v43, %v6342_v15  ;;  %v7083_v63 = vpack.i.b16 %v7019_v52, %v7019_v52  ;;  %v6930_v29 = vsel %vm4685_vm14, %v6887_v9, %v6903_v4 }
 0xc54   : > { %v6353_v13 = vor.u32 %v6352_v25, %v6348_v54  ;;  %v7149_v58 = vperm.slane %v12693_v56, 0  ;;  %v12706_v12 = vpack.i.b16 %v7017_v2, %v7017_v2  ;;  %v6925_v47 = vsel %vm14532_vm1, %v6887_v9, %v6903_v4 }
 0xc55   : > { %v6822_v37 = vunpack.c.l.b16 %v6800_v36  ;;  %v6363_v44 = vpop.permute.xlu1 %6362  ;;  %v6395_v61 = vpop.permute.xlu0 %6394  ;;  %v7147_v30 = vperm.slane %v7083_v63, 0  ;;  %v6932_v17 = vrot.slane %v6930_v29, 2  ;;  %v7023_v54 = vunpack.i.h.s16 %v6925_v47 }
 0xc56   : > { %v6411_v23 = vsel %vm2691_vm11, %v12622_v24, %v6363_v44  ;;  %6368 = vrot.lane.b32.xlu0 %v6353_v13, %s9713_s17  ;;  %v6427_v35 = vsel %vm4903_vm0, %v6363_v44, %v6395_v61  ;;  %v6464_v55 = vunpack.c.l.b16 %v6395_v61  ;;  %v7145_v36 = vperm.slane %v12706_v12, 0 }
 0xc57   : > { %v6828_v48 = vpack.c.b16 %v6822_v37, %v6821_v8  ;;  %v6462_v60 = vunpack.c.l.b16 %v6411_v23  ;;  %v6463_v14 = vunpack.c.l.b16 %v6427_v35  ;;  %v9487_v25 = vpack.i.b16 %v6925_v47, %v6925_v47 }
 0xc58   : > { %v7027_v8 = vunpack.i.h.s16 %v6932_v17  ;;  %v6933_v37 = vsel %vm4687_vm15, %v6887_v9, %v6903_v4  ;;  %v12719_v44 = vpack.i.b16 %v7023_v54, %v7023_v54 }
 0xc59   : > { %7272 = vrot.lane.b32.xlu1 %v7143_v27, %s9715_s16  ;;  %9480 = vmatmul.msk.bf16.gmra.mxu2 %vm1089_vm3, %v6828_v48  ;;  %v6480_v24 = vpack.c.b16 %v6465_v16, %v6462_v60  ;;  %v12721_v13 = vperm.slane %v9487_v25, 0  ;;  %v6935_v43 = vrot.slane %v6933_v37, 3  ;;  %v9489_v60 = vpack.i.b16 %v6932_v17, %v6932_v17 }
 0xc5a   : > { %6366 = vrot.lane.b32.xlu2 %v6347_v62, %s9713_s17  ;;  %v12723_v23 = vpack.i.b16 %v7027_v8, %v7027_v8  ;;  %v14458_v16 = vperm.slane %v12719_v44, 0  ;;  %s9716_s17 = smov 112  }
 0xc5b   : > { %6720 = vmatmul.bf16.gmra.mxu3 %v6480_v24  ;;  %v9490_v31 = vpack.i.b16 %v6935_v43, %v6935_v43  ;;  %v12739_v15 = vperm.slane %v9489_v60, 0  ;;  %v7029_v38 = vunpack.i.h.s16 %v6935_v43 }
 0xc5c   : > { %v14456_v48 = vperm.slane %v12723_v23, 0 }
 0xc5d   : > { %v6397_v53 = vpop.permute.xlu1 %6396  ;;  %v12735_v19 = vperm.slane %v9490_v31, 0  ;;  %v12745_v24 = vpack.i.b16 %v7029_v38, %v7029_v38 }
 0xc5e   : > { %v6429_v10 = vsel %vm4903_vm0, %v6365_v22, %v6397_v53  ;;  %v6467_v45 = vunpack.c.l.b16 %v6397_v53  ;;  %7270 = vrot.lane.b32.xlu0 %v12683_v18, %s9715_s16  ;;  %v6927_v22 = vsel %vm4683_vm13, %v6887_v9, %v6903_v4 }
 0xc5f   : > { %v6466_v57 = vunpack.c.l.b16 %v6429_v10  ;;  %v6929_v7 = vrot.slane %v6927_v22, 1  ;;  %v14457_v62 = vperm.slane %v12745_v24, 0 }
 0xc60   : > { %v6482_v41 = vpack.c.b16 %v6467_v45, %v6464_v55 }
 0xc61   : > { %7278 = vrot.lane.b32.xlu1 %v12688_v51, %s9715_s16  ;;  %v6481_v49 = vpack.c.b16 %v6466_v57, %v6463_v14  ;;  %v9488_v0 = vpack.i.b16 %v6929_v7, %v6929_v7  ;;  %v7025_v59 = vunpack.i.h.s16 %v6929_v7 }
 0xc62   : > { %9473 = vmatmul.msk.bf16.gmra.mxu1 %vm2290_vm10, %v6482_v41  ;;  %7274 = vrot.lane.b32.xlu2 %v7144_v26, %s9715_s16 }
 0xc63   : > { %6749 = vmatmul.bf16.gmra.mxu0 %v6481_v49  ;;  %v12714_v34 = vperm.slane %v9488_v0, 0  ;;  %v12741_v61 = vpack.i.b16 %v7025_v59, %v7025_v59 }
 0xc65   : > { %v14455_v3 = vperm.slane %v12741_v61, 0 }
 0xc66   : > { %7282 = vrot.lane.b32.xlu0 %v12697_v42, %s9715_s16 }
 0xc69   : > { %7284 = vrot.lane.b32.xlu1 %v7149_v58, %s9715_s16 }
 0xc6a   : > { %7280 = vrot.lane.b32.xlu2 %v7147_v30, %s9715_s16 }
 0xc6e   : > { %7276 = vrot.lane.b32.xlu0 %v7145_v36, %s9715_s16 }
 0xc71   : > { %7290 = vrot.lane.b32.xlu1 %v12714_v34, %s9715_s16 }
 0xc72   : > { %7286 = vrot.lane.b32.xlu2 %v12721_v13, %s9715_s16 }
 0xc76   : > { %7288 = vrot.lane.b32.xlu0 %v14458_v16, %s9715_s16 }
 0xc79   : > { %7296 = vrot.lane.b32.xlu1 %v14456_v48, %s9715_s16 }
 0xc7a   : > { %7298 = vrot.lane.b32.xlu2 %v12735_v19, %s9715_s16 }
 0xc7e   : > { %7294 = vrot.lane.b32.xlu0 %v12739_v15, %s9715_s16 }
 0xc82   : > { %7292 = vrot.lane.b32.xlu2 %v14455_v3, %s9715_s16 }
 0xc86   : > { %7300 = vrot.lane.b32.xlu0 %v14457_v62, %s9715_s16 }
 0xcac   : > { %v6401_v20 = vpop.permute.xlu2 %6400 }
 0xcad   : > { %v6473_v53 = vunpack.c.l.b16 %v6401_v20 }
 0xcb4   : > { %v6367_v50 = vpop.permute.xlu2 %6366 }
 0xcb5   : > { %v6415_v14 = vsel %vm2691_vm11, %v12649_v33, %v6367_v50 }
 0xcb6   : > { %v6468_v52 = vunpack.c.l.b16 %v6415_v14 }
 0xcbc   : > { %v7275_v39 = vpop.permute.xlu2 %7274 }
 0xcbd   : > { %v12757_v9 = vsel %vm9822_vm2, %v7144_v26, %v7275_v39 }
 0xcbe   : > { %7725 = vst [vmem:[#allocation1 + $0x2] ss:$9 sm:$0xff] %v12757_v9 }
 0xcc3   : > { %v6399_v35 = vpop.permute.xlu1 %6398 }
 0xcc4   : > { %v6470_v55 = vunpack.c.l.b16 %v6399_v35  ;;  %v7281_v45 = vpop.permute.xlu2 %7280  ;;  %v6431_v57 = vsel %vm4903_vm0, %v6367_v50, %v6399_v35 }
 0xcc5   : > { %v12762_v1 = vsel %vm9822_vm2, %v7147_v30, %v7281_v45  ;;  %v6469_v49 = vunpack.c.l.b16 %v6431_v57 }
 0xcc6   : > { %v6485_v10 = vpack.c.b16 %v6473_v53, %v6470_v55  ;;  %7734 = vst [vmem:[#allocation1 + $0x5] ss:$9 sm:$0xff] %v12762_v1 }
 0xcc8   : > { %9474 = vmatmul.msk.bf16.gmra.mxu1 %vm2290_vm10, %v6485_v10  ;;  %v6369_v6 = vpop.permute.xlu0 %6368  ;;  %vm14533_vm10 = vmmov %vm14532_vm1 }
 0xcc9   : > { %v6417_v4 = vsel %vm2691_vm11, %v12656_v21, %v6369_v6  ;;  %v6433_v41 = vsel %vm4903_vm0, %v6369_v6, %v6401_v20  ;;  %vm14534_vm11 = vmmov %vm14532_vm1 }
 0xcca   : > { %v6472_v46 = vunpack.c.l.b16 %v6433_v41  ;;  %v6471_v22 = vunpack.c.l.b16 %v6417_v4  ;;  %vm14535_vm0 = vmmov %vm14532_vm1 }
 0xccb   : > { %v7273_v26 = vpop.permute.xlu1 %7272  ;;  %vm14537_vm12 = vmmov %vm14535_vm0 }
 0xccc   : > { %v12776_v33 = vsel %vm9822_vm2, %v7143_v27, %v7273_v26  ;;  %v6483_v2 = vpack.c.b16 %v6471_v22, %v6468_v52  ;;  %v6484_v63 = vpack.c.b16 %v6472_v46, %v6469_v49  ;;  %vm14548_vm8 = vmmov %vm14535_vm0 }
 0xccd   : > { %7722 = vst [vmem:[#allocation1 + $0x1] ss:$9 sm:$0xff] %v12776_v33  ;;  %vm14555_vm4 = vmmov %vm14535_vm0 }
 0xcce   : > { %6725 = vmatmul.bf16.gmra.mxu3 %v6483_v2  ;;  %6754 = vmatmul.bf16.gmra.mxu0 %v6484_v63 }
 0xcd0   : > { %v7271_v21 = vpop.permute.xlu0 %7270 }
 0xcd1   : > { %v12782_v7 = vsel %vm9822_vm2, %v12683_v18, %v7271_v21 }
 0xcd2   : > { %7719 = vst [vmem:[#allocation1] ss:$9 sm:$0xff] %v12782_v7 }
 0xcd3   : > { %v7279_v29 = vpop.permute.xlu1 %7278 }
 0xcd4   : > { %v12788_v32 = vsel %vm9822_vm2, %v12688_v51, %v7279_v29 }
 0xcd5   : > { %7731 = vst [vmem:[#allocation1 + $0x4] ss:$9 sm:$0xff] %v12788_v32 }
 0xcd8   : > { %v7283_v27 = vpop.permute.xlu0 %7282 }
 0xcd9   : > { %v12794_v30 = vsel %vm9822_vm2, %v12697_v42, %v7283_v27 }
 0xcda   : > { %7737 = vst [vmem:[#allocation1 + $0x6] ss:$9 sm:$0xff] %v12794_v30 }
 0xcdb   : > { %v7285_v18 = vpop.permute.xlu1 %7284 }
 0xcdc   : > { %v12801_v47 = vsel %vm9822_vm2, %v7149_v58, %v7285_v18  ;;  %v6863_v0 = vpop.f32.mrf.mxu2 }
 0xcdd   : > { %7740 = vst [vmem:[#allocation1 + $0x7] ss:$9 sm:$0xff] %v12801_v47  ;;  %v6864_v51 = vadd.f32 %v12640_v28, %v6863_v0 }
 0xcde   : > { %v6721_v17 = vpop.f32.mrf.mxu3 }
 0xcdf   : > { %v6880_v54 = vmax.f32 %v6864_v51, 0.0  ;;  %v6722_v25 = vadd.f32 %v12598_v40, %v6721_v17  ;;  %v6779_v42 = vpop.f32.mrf.mxu1 }
 0xce0   : > { %v6750_v8 = vpop.f32.mrf.mxu0  ;;  %v7277_v31 = vpop.permute.xlu0 %7276 }
 0xce1   : > { %v6888_v37 = vpack.c.bf16 %v6880_v54, %v6880_v54  ;;  %v6751_v43 = vadd.f32 %v6750_v8, %v6722_v25  ;;  %v12810_v56 = vsel %vm9822_vm2, %v7145_v36, %v7277_v31 }
 0xce2   : > { %7728 = vst [vmem:[#allocation1 + $0x3] ss:$9 sm:$0xff] %v12810_v56 }
 0xce3   : > { %v6904_v58 = vrot.slane %v6888_v37, 3  ;;  %v6780_v59 = vadd.f32 %v6779_v42, %v6751_v43 }
 0xce4   : > { %v6865_v60 = vpop.f32.mrf.mxu2 }
 0xce5   : > { %v6866_v38 = vadd.f32 %v12640_v28, %v6865_v60  ;;  %v6938_v20 = vsel %vm14533_vm10, %v6888_v37, %v6904_v58  ;;  %v6940_v50 = vsel %vm4683_vm13, %v6888_v37, %v6904_v58  ;;  %v6946_v12 = vsel %vm4687_vm15, %v6888_v37, %v6904_v58  ;;  %vm14610_vm10 = vmmov %vm14600_vm9 }
 0xce6   : > { %v6723_v39 = vpop.f32.mrf.mxu3  ;;  %v9491_v35 = vpack.i.b16 %v6938_v20, %v6938_v20  ;;  %v7031_v53 = vunpack.i.h.s16 %v6938_v20  ;;  %v6942_v55 = vrot.slane %v6940_v50, 1  ;;  %v6948_v45 = vrot.slane %v6946_v12, 3 }
 0xce7   : > { %v6881_v10 = vmax.f32 %v6866_v38, 0.0  ;;  %v6724_v36 = vadd.f32 %v12598_v40, %v6723_v39  ;;  %v6943_v41 = vsel %vm4685_vm14, %v6888_v37, %v6904_v58  ;;  %v6793_v49 = vmax.f32 %v6780_v59, 0.0  ;;  %v6781_v26 = vpop.f32.mrf.mxu1 }
 0xce8   : > { %v6752_v14 = vpop.f32.mrf.mxu0  ;;  %v12818_v57 = vperm.slane %v9491_v35, 0  ;;  %v12820_v6 = vpack.i.b16 %v7031_v53, %v7031_v53  ;;  %v9492_v4 = vpack.i.b16 %v6942_v55, %v6942_v55  ;;  %v6945_v2 = vrot.slane %v6943_v41, 2  ;;  %v13008_v48 = vpop.permute.xlu0 %7288 }
 0xce9   : > { %v6753_v46 = vadd.f32 %v6752_v14, %v6724_v36  ;;  %v6889_v63 = vpack.c.bf16 %v6881_v10, %v6881_v10  ;;  %v9494_v29 = vpack.i.b16 %v6948_v45, %v6948_v45  ;;  %v6801_v18 = vpack.c.bf16 %v6793_v49, %v6793_v49 }
 0xcea   : > { %7302 = vrot.lane.b32.xlu1 %v12818_v57, %s9715_s16  ;;  %v14453_v52 = vperm.slane %v12820_v6, 0  ;;  %v12826_v22 = vperm.slane %v9492_v4, 0  ;;  %v7035_v27 = vunpack.i.h.s16 %v6945_v2  ;;  %v9493_v51 = vpack.i.b16 %v6945_v2, %v6945_v2 }
 0xceb   : > { %v6782_v21 = vadd.f32 %v6781_v26, %v6753_v46  ;;  %v6905_v54 = vrot.slane %v6889_v63, 3  ;;  %v12835_v42 = vperm.slane %v9494_v29, 0  ;;  %v7033_v8 = vunpack.i.h.s16 %v6942_v55 }
 0xcec   : > { %7304 = vrot.lane.b32.xlu2 %v14453_v52, %s9715_s16  ;;  %7306 = vrot.lane.b32.xlu0 %v12826_v22, %s9715_s16  ;;  %v12833_v17 = vpack.i.b16 %v7035_v27, %v7035_v27  ;;  %v6823_v37 = vunpack.c.l.b16 %v6801_v18  ;;  %v12839_v31 = vperm.slane %v9493_v51, 0  ;;  %v7037_v60 = vunpack.i.h.s16 %v6948_v45 }
 0xced   : > { %v6794_v0 = vmax.f32 %v6782_v21, 0.0  ;;  %v6951_v38 = vsel %vm14534_vm11, %v6889_v63, %v6905_v54  ;;  %v12848_v20 = vpack.i.b16 %v7033_v8, %v7033_v8  ;;  %v6953_v35 = vsel %vm4683_vm13, %v6889_v63, %v6905_v54  ;;  %vm14621_vm11 = vmmov %vm14600_vm9 }
 0xcee   : > { %v14450_v58 = vperm.slane %v12833_v17, 0  ;;  %v12851_v50 = vpack.i.b16 %v7037_v60, %v7037_v60  ;;  %v9495_v39 = vpack.i.b16 %v6951_v38, %v6951_v38  ;;  %v6959_v53 = vsel %vm4687_vm15, %v6889_v63, %v6905_v54 }
 0xcef   : > { %v6802_v25 = vpack.c.bf16 %v6794_v0, %v6794_v0  ;;  %v14446_v55 = vperm.slane %v12848_v20, 0  ;;  %v7039_v12 = vunpack.i.h.s16 %v6951_v38  ;;  %v6955_v45 = vrot.slane %v6953_v35, 1 }
 0xcf0   : > { %v14447_v10 = vperm.slane %v12851_v50, 0  ;;  %v12860_v36 = vperm.slane %v9495_v39, 0  ;;  %v6961_v14 = vrot.slane %v6959_v53, 3  ;;  %v6956_v4 = vsel %vm4685_vm14, %v6889_v63, %v6905_v54 }
 0xcf1   : > { %v6824_v43 = vunpack.c.l.b16 %v6802_v25  ;;  %v12868_v41 = vpack.i.b16 %v7039_v12, %v7039_v12  ;;  %v9496_v49 = vpack.i.b16 %v6955_v45, %v6955_v45  ;;  %v6958_v26 = vrot.slane %v6956_v4, 2 }
 0xcf2   : > { %7314 = vrot.lane.b32.xlu1 %v12835_v42, %s9715_s16  ;;  %v9498_v46 = vpack.i.b16 %v6961_v14, %v6961_v14  ;;  %v7041_v27 = vunpack.i.h.s16 %v6955_v45  ;;  %v7045_v25 = vunpack.i.h.s16 %v6961_v14 }
 0xcf3   : > { %v6829_v59 = vpack.c.b16 %v6824_v43, %v6823_v37  ;;  %v14445_v2 = vperm.slane %v12868_v41, 0  ;;  %v12874_v21 = vperm.slane %v9496_v49, 0  ;;  %v7043_v29 = vunpack.i.h.s16 %v6958_v26 }
 0xcf4   : > { %7310 = vrot.lane.b32.xlu2 %v12839_v31, %s9715_s16  ;;  %7312 = vrot.lane.b32.xlu0 %v14450_v58, %s9715_s16  ;;  %v12876_v63 = vperm.slane %v9498_v46, 0  ;;  %v9497_v18 = vpack.i.b16 %v6958_v26, %v6958_v26  ;;  %v12884_v51 = vpack.i.b16 %v7041_v27, %v7041_v27  ;;  %v12898_v43 = vpack.i.b16 %v7045_v25, %v7045_v25 }
 0xcf5   : > { %9481 = vmatmul.msk.bf16.gmra.mxu2 %vm1089_vm3, %v6829_v59  ;;  %v12882_v0 = vpack.i.b16 %v7043_v29, %v7043_v29 }
 0xcf6   : > { %v12886_v54 = vperm.slane %v9497_v18, 0  ;;  %v14440_v37 = vperm.slane %v12884_v51, 0  ;;  %v14441_v60 = vperm.slane %v12898_v43, 0 }
 0xcf7   : > { %v14442_v8 = vperm.slane %v12882_v0, 0 }
 0xcfa   : > { %7308 = vrot.lane.b32.xlu1 %v14446_v55, %s9715_s16 }
 0xcfc   : > { %7316 = vrot.lane.b32.xlu2 %v14447_v10, %s9715_s16  ;;  %7318 = vrot.lane.b32.xlu0 %v12860_v36, %s9715_s16 }
 0xd02   : > { %7320 = vrot.lane.b32.xlu1 %v14445_v2, %s9715_s16 }
 0xd04   : > { %7322 = vrot.lane.b32.xlu2 %v12874_v21, %s9715_s16  ;;  %7330 = vrot.lane.b32.xlu0 %v12876_v63, %s9715_s16 }
 0xd0a   : > { %7326 = vrot.lane.b32.xlu1 %v12886_v54, %s9715_s16 }
 0xd0c   : > { %7328 = vrot.lane.b32.xlu2 %v14442_v8, %s9715_s16  ;;  %7324 = vrot.lane.b32.xlu0 %v14440_v37, %s9715_s16 }
 0xd12   : > { %7332 = vrot.lane.b32.xlu1 %v14441_v60, %s9715_s16 }
 0xd45   : > { %v6784_v35 = vpop.f32.mrf.mxu1 }
 0xd4b   : > { %v6755_v59 = vpop.f32.mrf.mxu0 }
 0xd4d   : > { %v6786_v26 = vpop.f32.mrf.mxu1 }
 0xd51   : > { %v6726_v38 = vpop.f32.mrf.mxu3 }
 0xd52   : > { %v6727_v39 = vadd.f32 %v12598_v40, %v6726_v38 }
 0xd53   : > { %v6757_v4 = vpop.f32.mrf.mxu0 }
 0xd54   : > { %v6756_v53 = vadd.f32 %v6755_v59, %v6727_v39 }
 0xd56   : > { %v6785_v12 = vadd.f32 %v6784_v35, %v6756_v53 }
 0xd58   : > { %v6795_v49 = vmax.f32 %v6785_v12, 0.0 }
 0xd59   : > { %v6728_v45 = vpop.f32.mrf.mxu3 }
 0xd5a   : > { %v6729_v14 = vadd.f32 %v12598_v40, %v6728_v45  ;;  %v6803_v27 = vpack.c.bf16 %v6795_v49, %v6795_v49 }
 0xd5c   : > { %v6758_v46 = vadd.f32 %v6757_v4, %v6729_v14  ;;  %v6825_v37 = vunpack.c.l.b16 %v6803_v27 }
 0xd5e   : > { %v6787_v29 = vadd.f32 %v6786_v26, %v6758_v46 }
 0xd60   : > { %v6796_v18 = vmax.f32 %v6787_v29, 0.0 }
 0xd62   : > { %v6804_v25 = vpack.c.bf16 %v6796_v18, %v6796_v18 }
 0xd64   : > { %v6826_v60 = vunpack.c.l.b16 %v6804_v25 }
 0xd66   : > { %v6830_v8 = vpack.c.b16 %v6826_v60, %v6825_v37 }
 0xd68   : > { %9482 = vmatmul.msk.bf16.gmra.mxu2 %vm1089_vm3, %v6830_v8 }
 0xd78   : > { %v6868_v38 = vpop.f32.mrf.mxu2 }
 0xd79   : > { %v6869_v59 = vadd.f32 %v12640_v28, %v6868_v38 }
 0xd7b   : > { %v6882_v39 = vmax.f32 %v6869_v59, 0.0 }
 0xd7d   : > { %v6890_v35 = vpack.c.bf16 %v6882_v39, %v6882_v39 }
 0xd7f   : > { %v6906_v53 = vrot.slane %v6890_v35, 3 }
 0xd80   : > { %v6870_v40 = vpop.f32.mrf.mxu2 }
 0xd81   : > { %v6871_v12 = vadd.f32 %v12640_v28, %v6870_v40  ;;  %v6964_v45 = vsel %vm14535_vm0, %v6890_v35, %v6906_v53  ;;  %v6966_v14 = vsel %vm4683_vm13, %v6890_v35, %v6906_v53  ;;  %v6972_v4 = vsel %vm4687_vm15, %v6890_v35, %v6906_v53 }
 0xd82   : > { %v9499_v49 = vpack.i.b16 %v6964_v45, %v6964_v45  ;;  %v6968_v46 = vrot.slane %v6966_v14, 1  ;;  %v7047_v37 = vunpack.i.h.s16 %v6964_v45  ;;  %v6969_v8 = vsel %vm4685_vm14, %v6890_v35, %v6906_v53 }
 0xd83   : > { %v6883_v60 = vmax.f32 %v6871_v12, 0.0  ;;  %v6974_v18 = vrot.slane %v6972_v4, 3  ;;  %v6971_v25 = vrot.slane %v6969_v8, 2 }
 0xd84   : > { %v12913_v26 = vperm.slane %v9499_v49, 0  ;;  %v9500_v29 = vpack.i.b16 %v6968_v46, %v6968_v46  ;;  %v12915_v27 = vpack.i.b16 %v7047_v37, %v7047_v37  ;;  %v7049_v4 = vunpack.i.h.s16 %v6968_v46 }
 0xd85   : > { %v6891_v39 = vpack.c.bf16 %v6883_v60, %v6883_v60  ;;  %v7051_v40 = vunpack.i.h.s16 %v6971_v25  ;;  %v9502_v35 = vpack.i.b16 %v6974_v18, %v6974_v18  ;;  %v9501_v12 = vpack.i.b16 %v6971_v25, %v6971_v25 }
 0xd86   : > { %7334 = vrot.lane.b32.xlu2 %v12913_v26, %s9715_s16  ;;  %v12919_v38 = vperm.slane %v9500_v29, 0  ;;  %v14444_v59 = vperm.slane %v12915_v27, 0  ;;  %v7053_v60 = vunpack.i.h.s16 %v6974_v18  ;;  %v12942_v29 = vpack.i.b16 %v7049_v4, %v7049_v4 }
 0xd87   : > { %v12927_v53 = vpack.i.b16 %v7051_v40, %v7051_v40  ;;  %v6907_v45 = vrot.slane %v6891_v39, 3  ;;  %v12929_v14 = vperm.slane %v9502_v35, 0  ;;  %v12934_v37 = vperm.slane %v9501_v12, 0 }
 0xd88   : > { %7338 = vrot.lane.b32.xlu1 %v12919_v38, %s9715_s16  ;;  %7336 = vrot.lane.b32.xlu0 %v14444_v59, %s9715_s16  ;;  %14538 = vst [vmem:[#allocation6_spill] sm:$0xff] %v12942_v29  ;;  %v12944_v25 = vpack.i.b16 %v7053_v60, %v7053_v60  ;;  %v14448_v18 = vperm.slane %v12942_v29, 0 }
 0xd89   : > { %v14443_v49 = vperm.slane %v12927_v53, 0  ;;  %14536 = vst [vmem:[#allocation10_spill] sm:$0xff] %v12934_v37  ;;  %v6977_v8 = vsel %vm14537_vm12, %v6891_v39, %v6907_v45  ;;  %v6985_v40 = vsel %vm4687_vm15, %v6891_v39, %v6907_v45  ;;  %v6979_v35 = vsel %vm4683_vm13, %v6891_v39, %v6907_v45 }
 0xd8a   : > { %v9503_v46 = vpack.i.b16 %v6977_v8, %v6977_v8  ;;  %14539 = vst [vmem:[#allocation8_spill] sm:$0xff] %v12944_v25  ;;  %v7055_v12 = vunpack.i.h.s16 %v6977_v8  ;;  %v14449_v59 = vperm.slane %v12944_v25, 0  ;;  %v6987_v4 = vrot.slane %v6985_v40, 3 }
 0xd8b   : > { %v6981_v2 = vrot.slane %v6979_v35, 1  ;;  %v6982_v60 = vsel %vm4685_vm14, %v6891_v39, %v6907_v45 }
 0xd8c   : > { %v12961_v8 = vpack.i.b16 %v7055_v12, %v7055_v12  ;;  %v9506_v55 = vpack.i.b16 %v6987_v4, %v6987_v4 }
 0xd8d   : > { %v9504_v10 = vpack.i.b16 %v6981_v2, %v6981_v2  ;;  %v7057_v45 = vunpack.i.h.s16 %v6981_v2 }
 0xd8e   : > { %7346 = vrot.lane.b32.xlu2 %v12929_v14, %s9715_s16  ;;  %14541 = vst [vmem:[#allocation7_spill] sm:$0xff] %v12961_v8  ;;  %v12967_v40 = vperm.slane %v9506_v55, 0 }
 0xd8f   : > { %v12969_v39 = vperm.slane %v9504_v10, 0 }
 0xd90   : > { %7344 = vrot.lane.b32.xlu1 %v14443_v49, %s9715_s16  ;;  %7342 = vrot.lane.b32.xlu0 %v12934_v37, %s9715_s16  ;;  %v12952_v49 = vperm.slane %v9503_v46, 0  ;;  %v14451_v46 = vperm.slane %v12961_v8, 0  ;;  %14542 = vst [vmem:[#allocation2_spill] sm:$0xff] %v12967_v40 }
 0xd91   : > { %14543 = vst [vmem:[#allocation11_spill] sm:$0xff] %v12969_v39 }
 0xd92   : > { %14540 = vst [vmem:[#allocation9_spill] sm:$0xff] %v12952_v49 }
 0xd96   : > { %7340 = vrot.lane.b32.xlu2 %v14448_v18, %s9715_s16  ;;  %v6984_v18 = vrot.slane %v6982_v60, 2  ;;  %v12975_v60 = vpack.i.b16 %v7057_v45, %v7057_v45 }
 0xd98   : > { %7350 = vrot.lane.b32.xlu1 %v12952_v49, %s9715_s16  ;;  %7348 = vrot.lane.b32.xlu0 %v14449_v59, %s9715_s16  ;;  %v7059_v35 = vunpack.i.h.s16 %v6984_v18  ;;  %v9505_v12 = vpack.i.b16 %v6984_v18, %v6984_v18  ;;  %14544 = vst [vmem:[#allocation12_spill] sm:$0xff] %v12975_v60  ;;  %v14452_v55 = vperm.slane %v12975_v60, 0 }
 0xd9a   : > { %v12977_v59 = vpack.i.b16 %v7059_v35, %v7059_v35  ;;  %v12979_v58 = vperm.slane %v9505_v12, 0 }
 0xd9c   : > { %14545 = vst [vmem:[#allocation13_spill] sm:$0xff] %v12977_v59  ;;  %v14454_v10 = vperm.slane %v12977_v59, 0 }
 0xd9d   : > { %14546 = vst [vmem:[#allocation14_spill] sm:$0xff] %v12979_v58 }
 0xd9e   : > { %7352 = vrot.lane.b32.xlu2 %v14451_v46, %s9715_s16  ;;  %v7061_v46 = vunpack.i.h.s16 %v6987_v4  ;;  %v12997_v4 = vpop.permute.xlu2 %7286 }
 0xda0   : > { %7362 = vrot.lane.b32.xlu1 %v12967_v40, %s9715_s16  ;;  %7354 = vrot.lane.b32.xlu0 %v12969_v39, %s9715_s16  ;;  %v12991_v2 = vpack.i.b16 %v7061_v46, %v7061_v46  ;;  %v13006_v46 = vpop.permute.xlu1 %7290 }
 0xda2   : > { %14547 = vst [vmem:[#allocation15_spill] sm:$0xff] %v12991_v2  ;;  %v14459_v18 = vperm.slane %v12991_v2, 0 }
 0xda6   : > { %7358 = vrot.lane.b32.xlu2 %v12979_v58, %s9715_s16  ;;  %v12999_v45 = vpop.permute.xlu2 %7298 }
 0xda8   : > { %7356 = vrot.lane.b32.xlu1 %v14452_v55, %s9715_s16  ;;  %7360 = vrot.lane.b32.xlu0 %v14454_v10, %s9715_s16  ;;  %v13026_v37 = vpop.permute.xlu1 %7296 }
 0xdae   : > { %7364 = vrot.lane.b32.xlu2 %v14459_v18, %s9715_s16  ;;  %v13001_v35 = vpop.permute.xlu2 %7292 }
 0xdb6   : > { %v13003_v12 = vpop.permute.xlu2 %7304 }
 0xdbe   : > { %v13010_v16 = vpop.permute.xlu2 %7310 }
 0xdeb   : > { %v6873_v55 = vpop.f32.mrf.mxu2 }
 0xdec   : > { %v6874_v52 = vadd.f32 %v12640_v28, %v6873_v55 }
 0xdee   : > { %v6884_v10 = vmax.f32 %v6874_v52, 0.0 }
 0xdf0   : > { %v6892_v3 = vpack.c.bf16 %v6884_v10, %v6884_v10 }
 0xdf2   : > { %v6908_v62 = vrot.slane %v6892_v3, 3 }
 0xdf3   : > { %v6875_v18 = vpop.f32.mrf.mxu2 }
 0xdf4   : > { %v6876_v5 = vadd.f32 %v12640_v28, %v6875_v18  ;;  %v6990_v2 = vsel %vm14548_vm8, %v6892_v3, %v6908_v62  ;;  %v6995_v59 = vsel %vm4685_vm14, %v6892_v3, %v6908_v62  ;;  %v6992_v60 = vsel %vm4683_vm13, %v6892_v3, %v6908_v62  ;;  %vm14624_vm8 = vmmov %vm14600_vm9 }
 0xdf5   : > { %v9507_v58 = vpack.i.b16 %v6990_v2, %v6990_v2  ;;  %v6997_v55 = vrot.slane %v6995_v59, 2  ;;  %v7063_v52 = vunpack.i.h.s16 %v6990_v2  ;;  %v6998_v10 = vsel %vm4687_vm15, %v6892_v3, %v6908_v62  ;;  %v7295_v2 = vpop.permute.xlu0 %7294  ;;  %v13033_v62 = vpop.permute.xlu2 %7316 }
 0xdf6   : > { %v6885_v39 = vmax.f32 %v6876_v5, 0.0  ;;  %v6994_v49 = vrot.slane %v6992_v60, 1  ;;  %v7000_v29 = vrot.slane %v6998_v10, 3 }
 0xdf7   : > { %v13017_v40 = vperm.slane %v9507_v58, 0  ;;  %v9509_v8 = vpack.i.b16 %v6997_v55, %v6997_v55  ;;  %v13019_v25 = vpack.i.b16 %v7063_v52, %v7063_v52  ;;  %v7067_v10 = vunpack.i.h.s16 %v6997_v55 }
 0xdf8   : > { %v6893_v59 = vpack.c.bf16 %v6885_v39, %v6885_v39  ;;  %v7069_v5 = vunpack.i.h.s16 %v7000_v29  ;;  %v9508_v3 = vpack.i.b16 %v6994_v49, %v6994_v49 }
 0xdf9   : > { %14549 = vst [vmem:[#allocation16_spill] sm:$0xff] %v13017_v40  ;;  %7366 = vrot.lane.b32.xlu2 %v13017_v40, %s9715_s16  ;;  %v13023_v28 = vperm.slane %v9509_v8, 0  ;;  %v14474_v18 = vperm.slane %v13019_v25, 0  ;;  %v9510_v8 = vpack.i.b16 %v7000_v29, %v7000_v29  ;;  %v7065_v40 = vunpack.i.h.s16 %v6994_v49 }
 0xdfa   : > { %14550 = vst [vmem:[#allocation17_spill] sm:$0xff] %v13019_v25  ;;  %v13035_v58 = vpack.i.b16 %v7069_v5, %v7069_v5  ;;  %v6909_v60 = vrot.slane %v6893_v59, 3  ;;  %v13037_v52 = vperm.slane %v9508_v3, 0  ;;  %v13044_v25 = vpop.permute.xlu1 %7302  ;;  %v13054_v29 = vpack.i.b16 %v7067_v10, %v7067_v10 }
 0xdfb   : > { %14551 = vst [vmem:[#allocation18_spill] sm:$0xff] %v13023_v28  ;;  %7374 = vrot.lane.b32.xlu1 %v13023_v28, %s9715_s16  ;;  %7368 = vrot.lane.b32.xlu0 %v14474_v18, %s9715_s16  ;;  %v13042_v28 = vperm.slane %v9510_v8, 0  ;;  %v13058_v3 = vpack.i.b16 %v7065_v40, %v7065_v40 }
 0xdfc   : > { %14552 = vst [vmem:[#allocation19_spill] sm:$0xff] %v13035_v58  ;;  %v14475_v39 = vperm.slane %v13035_v58, 0  ;;  %v13047_v18 = vsel %vm14555_vm4, %v6893_v59, %v6909_v60  ;;  %v14478_v8 = vperm.slane %v13054_v29, 0  ;;  %v13070_v10 = vsel %vm4683_vm13, %v6893_v59, %v6909_v60 }
 0xdfd   : > { %14553 = vst [vmem:[#allocation20_spill] sm:$0xff] %v13037_v52  ;;  %v7301_v55 = vpop.permute.xlu0 %7300  ;;  %v9511_v5 = vpack.i.b16 %v13047_v18, %v13047_v18  ;;  %v13060_v49 = vpop.permute.xlu2 %7322  ;;  %v14481_v58 = vperm.slane %v13058_v3, 0  ;;  %v13081_v40 = vsel %vm4687_vm15, %v6893_v59, %v6909_v60  ;;  %vm14596_vm13 = vcmask 64512  }
 0xdfe   : > { %14554 = vst [vmem:[#allocation21_spill] sm:$0xff] %v13042_v28  ;;  %vm14599_vm15 = vmmov %vm14596_vm13 }
 0xdff   : > { %14556 = vst [vmem:[#allocation22_spill] sm:$0xff] %v13054_v29  ;;  %vm14603_vm6 = vmmov %vm14596_vm13 }
 0xe00   : > { %14557 = vst [vmem:[#allocation23_spill] sm:$0xff] %v13058_v3  ;;  %vm14604_vm7 = vmmov %vm14603_vm6 }
 0xe01   : > { %7370 = vrot.lane.b32.xlu2 %v13037_v52, %s9715_s16  ;;  %14559 = vst [vmem:[#allocation25_spill] sm:$0xff] %v13081_v40  ;;  %vm14609_vm1 = vmmov %vm14603_vm6 }
 0xe02   : > { %vm14622_vm0 = vmmov %vm14609_vm1 }
 0xe03   : > { %7380 = vrot.lane.b32.xlu1 %v14475_v39, %s9715_s16  ;;  %7378 = vrot.lane.b32.xlu0 %v13042_v28, %s9715_s16  ;;  %v13066_v39 = vperm.slane %v9511_v5, 0  ;;  %v13073_v28 = vsel %vm4685_vm14, %v6893_v59, %v6909_v60  ;;  %v13083_v5 = vpop.permute.xlu1 %7314  ;;  %vm14598_vm14 = vmmov %vm14596_vm13 }
 0xe04   : > { %vm14623_vm12 = vmmov %vm14622_vm0 }
 0xe05   : > { %14558 = vst [vmem:[#allocation24_spill] sm:$0xff] %v13066_v39  ;;  %v13085_v29 = vpop.permute.xlu2 %7328  ;;  %vm14625_vm4 = vmmov %vm14622_vm0 }
 0xe09   : > { %7376 = vrot.lane.b32.xlu2 %v14478_v8, %s9715_s16  ;;  %v7307_v8 = vpop.permute.xlu0 %7306 }
 0xe0b   : > { %7382 = vrot.lane.b32.xlu1 %v13066_v39, %s9715_s16  ;;  %7372 = vrot.lane.b32.xlu0 %v14481_v58, %s9715_s16  ;;  %v13093_v39 = vpop.permute.xlu1 %7308 }
 0xe0d   : > { %v13095_v59 = vpop.permute.xlu2 %7334 }
 0xe11   : > { %7594 = vrot.lane.b32.xlu2 %v12757_v9, %s9716_s17  ;;  %v7313_v58 = vpop.permute.xlu0 %7312  ;;  %v14560_v9 = vperm.slane %v12719_v44, 0  ;;  %v13121_v44 = vsel %vm9822_vm2, %v12739_v15, %v7295_v2  ;;  %v7741_v15 = vld [vmem:[#allocation1] sm:$0xff] }
 0xe13   : > { %7592 = vrot.lane.b32.xlu1 %v12776_v33, %s9716_s17  ;;  %7590 = vrot.lane.b32.xlu0 %v12782_v7, %s9716_s17  ;;  %v13108_v33 = vsel %vm9822_vm2, %v14560_v9, %v13008_v48  ;;  %v7321_v7 = vpop.permute.xlu1 %7320  ;;  %v13129_v48 = vsel %vm9822_vm2, %v12721_v13, %v12997_v4  ;;  %v14561_v13 = vperm.slane %v12745_v24, 0  ;;  %v7997_v4 = vshrl.u32 %v7741_v15, 16 }
 0xe15   : > { %v13112_v3 = vpop.permute.xlu2 %7346 }
 0xe19   : > { %7600 = vrot.lane.b32.xlu2 %v12762_v1, %s9716_s17  ;;  %v7319_v60 = vpop.permute.xlu0 %7318  ;;  %v13135_v1 = vsel %vm9822_vm2, %v12714_v34, %v13006_v46  ;;  %v13155_v34 = vsel %vm9822_vm2, %v12735_v19, %v12999_v45  ;;  %v14562_v46 = vperm.slane %v12723_v23, 0  ;;  %v14564_v23 = vperm.slane %v12741_v61, 0 }
 0xe1a   : > { %v13186_v45 = vsel %vm9822_vm2, %v12826_v22, %v7307_v8  ;;  %v14565_v61 = vperm.slane %v12820_v6, 0  ;;  %v13207_v22 = vsel %vm9822_vm2, %v12818_v57, %v13044_v25  ;;  %v13229_v57 = vsel %vm9822_vm2, %v12835_v42, %v13083_v5 }
 0xe1b   : > { %7598 = vrot.lane.b32.xlu1 %v12788_v32, %s9716_s17  ;;  %7602 = vrot.lane.b32.xlu0 %v12794_v30, %s9716_s17  ;;  %v7327_v32 = vpop.permute.xlu1 %7326  ;;  %v13162_v24 = vsel %vm9822_vm2, %v14562_v46, %v13026_v37  ;;  %v13181_v37 = vsel %vm9822_vm2, %v14564_v23, %v13001_v35  ;;  %v8000_v46 = vshll.u32 %v7741_v15, 16  ;;  %v13221_v15 = vsel %vm9822_vm2, %v12839_v31, %v13010_v16 }
 0xe1c   : > { %v13197_v35 = vsel %vm9822_vm2, %v14565_v61, %v13003_v12  ;;  %v14566_v25 = vperm.slane %v12833_v17, 0  ;;  %v14567_v16 = vperm.slane %v12851_v50, 0 }
 0xe1e   : > { %v13248_v42 = vsel %vm9822_vm2, %v14567_v16, %v13033_v62 }
 0xe21   : > { %7608 = vrot.lane.b32.xlu2 %v13108_v33, %s9716_s17  ;;  %v7331_v30 = vpop.permute.xlu0 %7330 }
 0xe23   : > { %7604 = vrot.lane.b32.xlu1 %v12801_v47, %s9716_s17  ;;  %7596 = vrot.lane.b32.xlu0 %v12810_v56, %s9716_s17  ;;  %v13141_v47 = vpop.permute.xlu2 %7340  ;;  %v13147_v56 = vsel %vm9822_vm2, %v14561_v13, %v7301_v55  ;;  %v7333_v2 = vpop.permute.xlu1 %7332  ;;  %v7999_v55 = vrot.slane %v7997_v4, 7 }
 0xe25   : > { %v13172_v19 = vsel %vm9822_vm2, %v7999_v55, 0  ;;  %v8002_v40 = vor.u32 %v8000_v46, %v7999_v55  ;;  %v14569_v46 = vperm.slane %v12868_v41, 0  ;;  %v13282_v41 = vsel %vm9822_vm2, %v12874_v21, %v13060_v49 }
 0xe26   : > { %v13298_v21 = vsel %vm9822_vm2, %v12876_v63, %v7331_v30 }
 0xe27   : > { %v13211_v8 = vsel %vm9822_vm2, 0, %v8002_v40  ;;  %v13235_v40 = vsel %vm9822_vm2, %v14566_v25, %v7313_v58  ;;  %v14568_v58 = vperm.slane %v12848_v20, 0  ;;  %v13263_v50 = vsel %vm9822_vm2, %v14569_v46, %v7321_v7 }
 0xe28   : > { %v13274_v20 = vsel %vm9822_vm2, %v12860_v36, %v7319_v60  ;;  %v14571_v60 = vperm.slane %v12898_v43, 0  ;;  %v14572_v25 = vperm.slane %v12884_v51, 0  ;;  %v13333_v43 = vsel %vm9822_vm2, %v12913_v26, %v13095_v59 }
 0xe29   : > { %7614 = vrot.lane.b32.xlu2 %v13121_v44, %s9716_s17  ;;  %v7325_v9 = vpop.permute.xlu0 %7324  ;;  %v13257_v5 = vsel %vm9822_vm2, %v14568_v58, %v13093_v39  ;;  %v13287_v39 = vsel %vm9822_vm2, %v12886_v54, %v7327_v32  ;;  %v14570_v54 = vperm.slane %v12882_v0, 0  ;;  %v14573_v26 = vperm.slane %v12915_v27, 0 }
 0xe2a   : > { %v13313_v32 = vsel %vm9822_vm2, %v14571_v60, %v7333_v2  ;;  %v14579_v60 = vld [vmem:[#allocation9_spill] sm:$0xff] }
 0xe2b   : > { %7606 = vrot.lane.b32.xlu1 %v13129_v48, %s9716_s17  ;;  %7610 = vrot.lane.b32.xlu0 %v13135_v1, %s9716_s17  ;;  %v13168_v13 = vpop.permute.xlu2 %7352  ;;  %v7339_v4 = vpop.permute.xlu1 %7338  ;;  %v13307_v49 = vsel %vm9822_vm2, %v14570_v54, %v13085_v29  ;;  %v13325_v29 = vsel %vm9822_vm2, %v14572_v25, %v7325_v9 }
 0xe2c   : > { %v13338_v2 = vsel %vm9822_vm2, %v12919_v38, %v7339_v4  ;;  %v13360_v38 = vsel %vm9822_vm2, %v12929_v14, %v13112_v3  ;;  %v14574_v4 = vperm.slane %v12927_v53, 0  ;;  %v14576_v14 = vld [vmem:[#allocation10_spill] sm:$0xff] }
 0xe2d   : > { %v14577_v3 = vld [vmem:[#allocation6_spill] sm:$0xff] }
 0xe31   : > { %7620 = vrot.lane.b32.xlu2 %v13147_v56, %s9716_s17  ;;  %v7337_v52 = vpop.permute.xlu0 %7336 }
 0xe32   : > { %v13352_v59 = vsel %vm9822_vm2, %v14573_v26, %v7337_v52  ;;  %v14581_v26 = vld [vmem:[#allocation8_spill] sm:$0xff] }
 0xe33   : > { %7618 = vrot.lane.b32.xlu1 %v13155_v34, %s9716_s17  ;;  %7616 = vrot.lane.b32.xlu0 %v13162_v24, %s9716_s17  ;;  %v13199_v23 = vpop.permute.xlu2 %7358  ;;  %v7345_v6 = vpop.permute.xlu1 %7344 }
 0xe34   : > { %v13366_v58 = vsel %vm9822_vm2, %v14574_v4, %v7345_v6  ;;  %v14578_v6 = vperm.slane %v14577_v3, 0  ;;  %v14582_v4 = vperm.slane %v14581_v26, 0  ;;  %v14585_v3 = vld [vmem:[#allocation2_spill] sm:$0xff]  ;;  %v14586_v26 = vld [vmem:[#allocation11_spill] sm:$0xff] }
 0xe36   : > { %v13388_v54 = vsel %vm9822_vm2, %v14578_v6, %v13141_v47 }
 0xe39   : > { %8191 = vrot.lane.b32.xlu2 %v13172_v19, %s14563_s23  ;;  %v7343_v12 = vpop.permute.xlu0 %7342 }
 0xe3a   : > { %v13379_v53 = vsel %vm9822_vm2, %v14576_v14, %v7343_v12 }
 0xe3b   : > { %7612 = vrot.lane.b32.xlu1 %v13181_v37, %s9716_s17  ;;  %7626 = vrot.lane.b32.xlu0 %v13186_v45, %s9716_s17  ;;  %v13237_v55 = vpop.permute.xlu2 %7364  ;;  %v7351_v17 = vpop.permute.xlu1 %7350 }
 0xe3c   : > { %v13393_v25 = vsel %vm9822_vm2, %v14579_v60, %v7351_v17  ;;  %v14583_v17 = vld [vmem:[#allocation7_spill] sm:$0xff] }
 0xe41   : > { %7624 = vrot.lane.b32.xlu2 %v13197_v35, %s9716_s17  ;;  %v7349_v31 = vpop.permute.xlu0 %7348 }
 0xe42   : > { %v13407_v47 = vsel %vm9822_vm2, %v14582_v4, %v7349_v31 }
 0xe43   : > { %7622 = vrot.lane.b32.xlu1 %v13207_v22, %s9716_s17  ;;  %8189 = vrot.lane.b32.xlu0 %v13211_v8, %s14563_s23  ;;  %v7363_v7 = vpop.permute.xlu1 %7362 }
 0xe44   : > { %v13421_v6 = vsel %vm9822_vm2, %v14585_v3, %v7363_v7  ;;  %v14587_v7 = vld [vmem:[#allocation14_spill] sm:$0xff] }
 0xe45   : > { %v13438_v4 = vsel %vm9822_vm2, %v14587_v7, %v13199_v23 }
 0xe49   : > { %7630 = vrot.lane.b32.xlu2 %v13221_v15, %s9716_s17  ;;  %v7355_v61 = vpop.permute.xlu0 %7354 }
 0xe4b   : > { %7634 = vrot.lane.b32.xlu1 %v13229_v57, %s9716_s17  ;;  %7632 = vrot.lane.b32.xlu0 %v13235_v40, %s9716_s17  ;;  %v7357_v30 = vpop.permute.xlu1 %7356 }
 0xe51   : > { %7636 = vrot.lane.b32.xlu2 %v13248_v42, %s9716_s17  ;;  %v7361_v0 = vpop.permute.xlu0 %7360 }
 0xe53   : > { %7628 = vrot.lane.b32.xlu1 %v13257_v5, %s9716_s17  ;;  %v13267_v62 = vpop.permute.xlu2 %7366  ;;  %7640 = vrot.lane.b32.xlu0 %v13263_v50, %s9716_s17 }
 0xe59   : > { %7638 = vrot.lane.b32.xlu2 %v13274_v20, %s9716_s17 }
 0xe5b   : > { %7642 = vrot.lane.b32.xlu1 %v13282_v41, %s9716_s17  ;;  %v13291_v36 = vpop.permute.xlu2 %7370  ;;  %7646 = vrot.lane.b32.xlu0 %v13287_v39, %s9716_s17 }
 0xe61   : > { %7650 = vrot.lane.b32.xlu2 %v13298_v21, %s9716_s17 }
 0xe63   : > { %7648 = vrot.lane.b32.xlu1 %v13307_v49, %s9716_s17  ;;  %v13317_v63 = vpop.permute.xlu2 %7376  ;;  %7652 = vrot.lane.b32.xlu0 %v13313_v32, %s9716_s17 }
 0xe69   : > { %7644 = vrot.lane.b32.xlu2 %v13325_v29, %s9716_s17 }
 0xe6b   : > { %7654 = vrot.lane.b32.xlu1 %v13333_v43, %s9716_s17  ;;  %v7595_v51 = vpop.permute.xlu2 %7594  ;;  %7658 = vrot.lane.b32.xlu0 %v13338_v2, %s9716_s17 }
 0xe6c   : > { %7747 = vst [vmem:[#allocation1 + $0x2] ss:$9 sm:$0xff] %v7595_v51 }
 0xe6d   : > { %v13344_v9 = vpop.permute.xlu1 %7374  ;;  %v13346_v16 = vpop.permute.xlu0 %7368 }
 0xe71   : > { %7656 = vrot.lane.b32.xlu2 %v13352_v59, %s9716_s17 }
 0xe73   : > { %7666 = vrot.lane.b32.xlu1 %v13360_v38, %s9716_s17  ;;  %v7601_v27 = vpop.permute.xlu2 %7600  ;;  %7664 = vrot.lane.b32.xlu0 %v13366_v58, %s9716_s17 }
 0xe74   : > { %7753 = vst [vmem:[#allocation1 + $0x5] ss:$9 sm:$0xff] %v7601_v27  ;;  %v14584_v27 = vperm.slane %v14583_v17, 0  ;;  %v14588_v17 = vld [vmem:[#allocation12_spill] sm:$0xff] }
 0xe75   : > { %v13372_v52 = vpop.permute.xlu1 %7380  ;;  %v13374_v46 = vpop.permute.xlu0 %7378 }
 0xe76   : > { %14575 = vst [vmem:[#allocation26_spill] sm:$0xff] %v13372_v52  ;;  %v13416_v14 = vsel %vm9822_vm2, %v14584_v27, %v13168_v13  ;;  %v13430_v13 = vsel %vm9822_vm2, %v14586_v26, %v7355_v61  ;;  %v14589_v27 = vperm.slane %v14588_v17, 0  ;;  %v14590_v26 = vld [vmem:[#allocation13_spill] sm:$0xff] }
 0xe77   : > { %v14591_v23 = vperm.slane %v14590_v26, 0 }
 0xe78   : > { %v13444_v3 = vsel %vm9822_vm2, %v14589_v27, %v7357_v30  ;;  %v14592_v30 = vld [vmem:[#allocation15_spill] sm:$0xff] }
 0xe79   : > { %7662 = vrot.lane.b32.xlu2 %v13379_v53, %s9716_s17  ;;  %v13454_v7 = vsel %vm9822_vm2, %v14591_v23, %v7361_v0  ;;  %v14593_v17 = vperm.slane %v14592_v30, 0 }
 0xe7b   : > { %7660 = vrot.lane.b32.xlu1 %v13388_v54, %s9716_s17  ;;  %7670 = vrot.lane.b32.xlu0 %v13393_v25, %s9716_s17  ;;  %v13463_v27 = vsel %vm9822_vm2, %v14593_v17, %v13237_v55 }
 0xe7d   : > { %v13399_v12 = vpop.permute.xlu1 %7382  ;;  %v13401_v51 = vpop.permute.xlu0 %7372 }
 0xe7e   : > { %14580 = vst [vmem:[#allocation10_spill] sm:$0xff] %v13399_v12 }
 0xe81   : > { %7668 = vrot.lane.b32.xlu2 %v13407_v47, %s9716_s17 }
 0xe83   : > { %7672 = vrot.lane.b32.xlu1 %v13416_v14, %s9716_s17  ;;  %7682 = vrot.lane.b32.xlu0 %v13421_v6, %s9716_s17 }
 0xe85   : > { %v7593_v31 = vpop.permute.xlu1 %7592  ;;  %v7591_v60 = vpop.permute.xlu0 %7590 }
 0xe86   : > { %7745 = vst [vmem:[#allocation1 + $0x1] ss:$9 sm:$0xff] %v7593_v31 }
 0xe87   : > { %7743 = vst [vmem:[#allocation1] ss:$9 sm:$0xff] %v7591_v60  ;;  %v7609_v60 = vpop.permute.xlu2 %7608 }
 0xe89   : > { %7674 = vrot.lane.b32.xlu2 %v13430_v13, %s9716_s17 }
 0xe8b   : > { %7678 = vrot.lane.b32.xlu1 %v13438_v4, %s9716_s17  ;;  %7676 = vrot.lane.b32.xlu0 %v13444_v3, %s9716_s17 }
 0xe8d   : > { %v7599_v61 = vpop.permute.xlu1 %7598  ;;  %v7603_v31 = vpop.permute.xlu0 %7602 }
 0xe8e   : > { %7751 = vst [vmem:[#allocation1 + $0x4] ss:$9 sm:$0xff] %v7599_v61 }
 0xe8f   : > { %7755 = vst [vmem:[#allocation1 + $0x6] ss:$9 sm:$0xff] %v7603_v31  ;;  %v7615_v26 = vpop.permute.xlu2 %7614 }
 0xe91   : > { %7680 = vrot.lane.b32.xlu2 %v13454_v7, %s9716_s17 }
 0xe93   : > { %7684 = vrot.lane.b32.xlu1 %v13463_v27, %s9716_s17 }
 0xe95   : > { %v7605_v61 = vpop.permute.xlu1 %7604  ;;  %v7597_v31 = vpop.permute.xlu0 %7596 }
 0xe96   : > { %7757 = vst [vmem:[#allocation1 + $0x7] ss:$9 sm:$0xff] %v7605_v61 }
 0xe97   : > { %7749 = vst [vmem:[#allocation1 + $0x3] ss:$9 sm:$0xff] %v7597_v31  ;;  %v7621_v17 = vpop.permute.xlu2 %7620 }
 0xe9d   : > { %v7607_v0 = vpop.permute.xlu1 %7606  ;;  %v7611_v23 = vpop.permute.xlu0 %7610 }
 0xe9e   : > { %v7758_v12 = vld [vmem:[#allocation1] sm:$0xff] }
 0xe9f   : > { %7760 = vst [vmem:[#allocation1] ss:$9 sm:$0xff] %v13129_v48  ;;  %v8003_v52 = vshrl.u32 %v7758_v12, 16  ;;  %v8006_v30 = vshll.u32 %v7758_v12, 16 }
 0xea0   : > { %7762 = vst [vmem:[#allocation1 + $0x1] ss:$9 sm:$0xff] %v13108_v33 }
 0xea1   : > { %7764 = vst [vmem:[#allocation1 + $0x2] ss:$9 sm:$0xff] %v13135_v1  ;;  %v8005_v55 = vrot.slane %v8003_v52, 7  ;;  %v13491_v1 = vpop.permute.xlu2 %8191 }
 0xea2   : > { %7766 = vst [vmem:[#allocation1 + $0x3] ss:$9 sm:$0xff] %v13181_v37 }
 0xea3   : > { %7768 = vst [vmem:[#allocation1 + $0x4] ss:$9 sm:$0xff] %v13121_v44  ;;  %v13474_v61 = vsel %vm9822_vm2, %v8005_v55, 0  ;;  %v8008_v31 = vor.u32 %v8006_v30, %v8005_v55 }
 0xea4   : > { %7770 = vst [vmem:[#allocation1 + $0x5] ss:$9 sm:$0xff] %v13162_v24  ;;  %8195 = vrot.lane.b32.xlu2 %v13474_v61, %s14563_s23  ;;  %8255 = vrot.lane.b32.xlu0 %v13474_v61, %s14594_s20 }
 0xea5   : > { %7772 = vst [vmem:[#allocation1 + $0x6] ss:$9 sm:$0xff] %v13155_v34  ;;  %v7619_v33 = vpop.permute.xlu1 %7618  ;;  %v13484_v48 = vsel %vm9822_vm2, 0, %v8008_v31  ;;  %v7617_v44 = vpop.permute.xlu0 %7616 }
 0xea6   : > { %7774 = vst [vmem:[#allocation1 + $0x7] ss:$9 sm:$0xff] %v13147_v56  ;;  %8253 = vrot.lane.b32.xlu1 %v13484_v48, %s14594_s20 }
 0xeac   : > { %8193 = vrot.lane.b32.xlu0 %v13484_v48, %s14563_s23 }
 0xead   : > { %v7775_v24 = vld [vmem:[#allocation1] sm:$0xff]  ;;  %v7613_v37 = vpop.permute.xlu1 %7612  ;;  %v7627_v55 = vpop.permute.xlu0 %7626 }
 0xeae   : > { %7779 = vst [vmem:[#allocation1 + $0x1] ss:$9 sm:$0xff] %v7609_v60  ;;  %v8009_v34 = vshrl.u32 %v7775_v24, 16  ;;  %v8012_v12 = vshll.u32 %v7775_v24, 16 }
 0xeaf   : > { %7785 = vst [vmem:[#allocation1 + $0x4] ss:$9 sm:$0xff] %v7615_v26  ;;  %v7625_v26 = vpop.permute.xlu2 %7624 }
 0xeb0   : > { %7791 = vst [vmem:[#allocation1 + $0x7] ss:$9 sm:$0xff] %v7621_v17  ;;  %v8011_v52 = vrot.slane %v8009_v34, 7 }
 0xeb1   : > { %7777 = vst [vmem:[#allocation1] ss:$9 sm:$0xff] %v7607_v0 }
 0xeb2   : > { %7781 = vst [vmem:[#allocation1 + $0x2] ss:$9 sm:$0xff] %v7611_v23  ;;  %v8014_v56 = vor.u32 %v8012_v12, %v8011_v52  ;;  %v13495_v30 = vsel %vm9822_vm2, %v8011_v52, 0 }
 0xeb3   : > { %7789 = vst [vmem:[#allocation1 + $0x6] ss:$9 sm:$0xff] %v7619_v33 }
 0xeb4   : > { %7787 = vst [vmem:[#allocation1 + $0x5] ss:$9 sm:$0xff] %v7617_v44  ;;  %v13499_v31 = vsel %vm9822_vm2, 0, %v8014_v56  ;;  %8259 = vrot.lane.b32.xlu0 %v13495_v30, %s14594_s20 }
 0xeb5   : > { %7783 = vst [vmem:[#allocation1 + $0x3] ss:$9 sm:$0xff] %v7613_v37  ;;  %8257 = vrot.lane.b32.xlu1 %v13499_v31, %s14594_s20  ;;  %v7623_v60 = vpop.permute.xlu1 %7622  ;;  %v13505_v0 = vpop.permute.xlu0 %8189 }
 0xeb7   : > { %v7631_v24 = vpop.permute.xlu2 %7630 }
 0xebc   : > { %v7792_v23 = vld [vmem:[#allocation1] sm:$0xff]  ;;  %8199 = vrot.lane.b32.xlu0 %v13495_v30, %s14563_s23 }
 0xebd   : > { %7794 = vst [vmem:[#allocation1] ss:$9 sm:$0xff] %v13207_v22  ;;  %8197 = vrot.lane.b32.xlu1 %v13499_v31, %s14563_s23  ;;  %v8015_v17 = vshrl.u32 %v7792_v23, 16  ;;  %v7635_v33 = vpop.permute.xlu1 %7634 }
 0xebe   : > { %7796 = vst [vmem:[#allocation1 + $0x1] ss:$9 sm:$0xff] %v13197_v35  ;;  %v8018_v35 = vshll.u32 %v7792_v23, 16 }
 0xebf   : > { %7798 = vst [vmem:[#allocation1 + $0x2] ss:$9 sm:$0xff] %v13186_v45  ;;  %v8017_v44 = vrot.slane %v8015_v17, 7  ;;  %v7633_v45 = vpop.permute.xlu0 %7632 }
 0xec0   : > { %7800 = vst [vmem:[#allocation1 + $0x3] ss:$9 sm:$0xff] %v13257_v5 }
 0xec1   : > { %7802 = vst [vmem:[#allocation1 + $0x4] ss:$9 sm:$0xff] %v13221_v15  ;;  %v13518_v37 = vsel %vm9822_vm2, %v8017_v44, 0  ;;  %v8020_v22 = vor.u32 %v8018_v35, %v8017_v44 }
 0xec2   : > { %7804 = vst [vmem:[#allocation1 + $0x5] ss:$9 sm:$0xff] %v13235_v40  ;;  %8203 = vrot.lane.b32.xlu2 %v13518_v37, %s14563_s23  ;;  %v7637_v40 = vpop.permute.xlu2 %7636 }
 0xec3   : > { %7806 = vst [vmem:[#allocation1 + $0x6] ss:$9 sm:$0xff] %v13229_v57  ;;  %v13529_v5 = vsel %vm9822_vm2, 0, %v8020_v22 }
 0xec4   : > { %7808 = vst [vmem:[#allocation1 + $0x7] ss:$9 sm:$0xff] %v13248_v42 }
 0xec5   : > { %8263 = vrot.lane.b32.xlu1 %v13518_v37, %s14594_s20  ;;  %v7629_v15 = vpop.permute.xlu1 %7628 }
 0xec7   : > { %v7641_v52 = vpop.permute.xlu0 %7640 }
 0xeca   : > { %8261 = vrot.lane.b32.xlu2 %v13529_v5, %s14594_s20 }
 0xecb   : > { %v7809_v34 = vld [vmem:[#allocation1] sm:$0xff] }
 0xecc   : > { %7813 = vst [vmem:[#allocation1 + $0x1] ss:$9 sm:$0xff] %v7625_v26  ;;  %v8021_v57 = vshrl.u32 %v7809_v34, 16  ;;  %v8024_v12 = vshll.u32 %v7809_v34, 16 }
 0xecd   : > { %7819 = vst [vmem:[#allocation1 + $0x4] ss:$9 sm:$0xff] %v7631_v24  ;;  %8201 = vrot.lane.b32.xlu1 %v13529_v5, %s14563_s23  ;;  %v7643_v56 = vpop.permute.xlu1 %7642 }
 0xece   : > { %7825 = vst [vmem:[#allocation1 + $0x7] ss:$9 sm:$0xff] %v7637_v40  ;;  %v8023_v42 = vrot.slane %v8021_v57, 7 }
 0xecf   : > { %7815 = vst [vmem:[#allocation1 + $0x2] ss:$9 sm:$0xff] %v7627_v55  ;;  %v7639_v55 = vpop.permute.xlu2 %7638 }
 0xed0   : > { %7811 = vst [vmem:[#allocation1] ss:$9 sm:$0xff] %v7623_v60  ;;  %v13537_v23 = vsel %vm9822_vm2, %v8023_v42, 0  ;;  %v8026_v17 = vor.u32 %v8024_v12, %v8023_v42  ;;  %v7647_v60 = vpop.permute.xlu0 %7646 }
 0xed1   : > { %7823 = vst [vmem:[#allocation1 + $0x6] ss:$9 sm:$0xff] %v7635_v33  ;;  %8267 = vrot.lane.b32.xlu0 %v13537_v23, %s14594_s20 }
 0xed2   : > { %7821 = vst [vmem:[#allocation1 + $0x5] ss:$9 sm:$0xff] %v7633_v45  ;;  %8207 = vrot.lane.b32.xlu2 %v13537_v23, %s14563_s23  ;;  %v13545_v26 = vsel %vm9822_vm2, 0, %v8026_v17 }
 0xed3   : > { %7817 = vst [vmem:[#allocation1 + $0x3] ss:$9 sm:$0xff] %v7629_v15 }
 0xed5   : > { %8205 = vrot.lane.b32.xlu1 %v13545_v26, %s14563_s23  ;;  %v7649_v33 = vpop.permute.xlu1 %7648 }
 0xed7   : > { %v7651_v45 = vpop.permute.xlu2 %7650 }
 0xed9   : > { %8265 = vrot.lane.b32.xlu0 %v13545_v26, %s14594_s20 }
 0xeda   : > { %v7826_v44 = vld [vmem:[#allocation1] sm:$0xff] }
 0xedb   : > { %7828 = vst [vmem:[#allocation1] ss:$9 sm:$0xff] %v13274_v20  ;;  %v8027_v24 = vshrl.u32 %v7826_v44, 16  ;;  %v8030_v20 = vshll.u32 %v7826_v44, 16 }
 0xedc   : > { %7830 = vst [vmem:[#allocation1 + $0x1] ss:$9 sm:$0xff] %v13263_v50  ;;  %v7653_v50 = vpop.permute.xlu0 %7652 }
 0xedd   : > { %7832 = vst [vmem:[#allocation1 + $0x2] ss:$9 sm:$0xff] %v13282_v41  ;;  %v8029_v35 = vrot.slane %v8027_v24, 7  ;;  %v7655_v41 = vpop.permute.xlu1 %7654 }
 0xede   : > { %7834 = vst [vmem:[#allocation1 + $0x3] ss:$9 sm:$0xff] %v13325_v29 }
 0xedf   : > { %7836 = vst [vmem:[#allocation1 + $0x4] ss:$9 sm:$0xff] %v13287_v39  ;;  %v13558_v22 = vsel %vm9822_vm2, %v8029_v35, 0  ;;  %v8032_v39 = vor.u32 %v8030_v20, %v8029_v35  ;;  %v7645_v15 = vpop.permute.xlu2 %7644 }
 0xee0   : > { %7838 = vst [vmem:[#allocation1 + $0x5] ss:$9 sm:$0xff] %v13307_v49  ;;  %8211 = vrot.lane.b32.xlu1 %v13558_v22, %s14563_s23 }
 0xee1   : > { %7840 = vst [vmem:[#allocation1 + $0x6] ss:$9 sm:$0xff] %v13298_v21  ;;  %8271 = vrot.lane.b32.xlu0 %v13558_v22, %s14594_s20  ;;  %v13569_v29 = vsel %vm9822_vm2, 0, %v8032_v39  ;;  %v13622_v39 = vrot.slane %v13070_v10, 1 }
 0xee2   : > { %7842 = vst [vmem:[#allocation1 + $0x7] ss:$9 sm:$0xff] %v13313_v32 }
 0xee3   : > { %v9512_v10 = vpack.i.b16 %v13622_v39, %v13622_v39 }
 0xee4   : > { %v7659_v34 = vpop.permute.xlu0 %7658 }
 0xee5   : > { %v7667_v32 = vpop.permute.xlu1 %7666 }
 0xee7   : > { %v7657_v12 = vpop.permute.xlu2 %7656 }
 0xee9   : > { %v7843_v49 = vld [vmem:[#allocation1] sm:$0xff]  ;;  %8269 = vrot.lane.b32.xlu0 %v13569_v29, %s14594_s20 }
 0xeea   : > { %7851 = vst [vmem:[#allocation1 + $0x3] ss:$9 sm:$0xff] %v7645_v15  ;;  %v8033_v21 = vshrl.u32 %v7843_v49, 16  ;;  %v8036_v42 = vshll.u32 %v7843_v49, 16 }
 0xeeb   : > { %7845 = vst [vmem:[#allocation1] ss:$9 sm:$0xff] %v7639_v55 }
 0xeec   : > { %7857 = vst [vmem:[#allocation1 + $0x6] ss:$9 sm:$0xff] %v7651_v45  ;;  %v8035_v40 = vrot.slane %v8033_v21, 7  ;;  %v7665_v17 = vpop.permute.xlu0 %7664 }
 0xeed   : > { %7847 = vst [vmem:[#allocation1 + $0x1] ss:$9 sm:$0xff] %v7641_v52  ;;  %v7661_v55 = vpop.permute.xlu1 %7660 }
 0xeee   : > { %7849 = vst [vmem:[#allocation1 + $0x2] ss:$9 sm:$0xff] %v7643_v56  ;;  %v13575_v57 = vsel %vm9822_vm2, %v8035_v40, 0  ;;  %v8038_v52 = vor.u32 %v8036_v42, %v8035_v40 }
 0xeef   : > { %7853 = vst [vmem:[#allocation1 + $0x4] ss:$9 sm:$0xff] %v7647_v60  ;;  %8275 = vrot.lane.b32.xlu2 %v13575_v57, %s14594_s20  ;;  %8215 = vrot.lane.b32.xlu1 %v13575_v57, %s14563_s23  ;;  %v7663_v24 = vpop.permute.xlu2 %7662 }
 0xef0   : > { %7855 = vst [vmem:[#allocation1 + $0x5] ss:$9 sm:$0xff] %v7649_v33  ;;  %v13585_v56 = vsel %vm9822_vm2, 0, %v8038_v52 }
 0xef1   : > { %7859 = vst [vmem:[#allocation1 + $0x7] ss:$9 sm:$0xff] %v7653_v50  ;;  %8209 = vrot.lane.b32.xlu0 %v13569_v29, %s14563_s23 }
 0xef7   : > { %8273 = vrot.lane.b32.xlu2 %v13585_v56, %s14594_s20 }
 0xef8   : > { %v7860_v60 = vld [vmem:[#allocation1] sm:$0xff] }
 0xef9   : > { %7876 = vst [vmem:[#allocation1 + $0x7] ss:$9 sm:$0xff] %v13407_v47  ;;  %8213 = vrot.lane.b32.xlu0 %v13585_v56, %s14563_s23  ;;  %v8039_v33 = vshrl.u32 %v7860_v60, 16  ;;  %v7669_v47 = vpop.permute.xlu2 %7668 }
 0xefa   : > { %7862 = vst [vmem:[#allocation1] ss:$9 sm:$0xff] %v13333_v43  ;;  %v13605_v43 = vpop.permute.xlu0 %7670 }
 0xefb   : > { %7864 = vst [vmem:[#allocation1 + $0x1] ss:$9 sm:$0xff] %v13352_v59  ;;  %v8041_v44 = vrot.slane %v8039_v33, 7  ;;  %v8042_v59 = vshll.u32 %v7860_v60, 16 }
 0xefc   : > { %7866 = vst [vmem:[#allocation1 + $0x2] ss:$9 sm:$0xff] %v13338_v2  ;;  %v13609_v2 = vpop.permute.xlu1 %7672 }
 0xefd   : > { %7868 = vst [vmem:[#allocation1 + $0x3] ss:$9 sm:$0xff] %v13388_v54  ;;  %v13599_v35 = vsel %vm9822_vm2, %v8041_v44, 0 }
 0xefe   : > { %7870 = vst [vmem:[#allocation1 + $0x4] ss:$9 sm:$0xff] %v13379_v53  ;;  %v8044_v53 = vor.u32 %v8042_v59, %v8041_v44  ;;  %v14595_v59 = vld [vmem:[#allocation3_spill] sm:$0xff] }
 0xeff   : > { %7872 = vst [vmem:[#allocation1 + $0x5] ss:$9 sm:$0xff] %v13366_v58  ;;  %8279 = vrot.lane.b32.xlu2 %v13599_v35, %s14594_s20 }
 0xf00   : > { %7874 = vst [vmem:[#allocation1 + $0x6] ss:$9 sm:$0xff] %v13360_v38  ;;  %v13613_v54 = vsel %vm9822_vm2, 0, %v8044_v53  ;;  %v8316_v53 = vsel %vm14596_vm13, %v14595_v59, %v13491_v1  ;;  %vm14626_vm13 = vmmov %vm14622_vm0 }
 0xf01   : > { %8219 = vrot.lane.b32.xlu0 %v13599_v35, %s14563_s23  ;;  %v7675_v40 = vpop.permute.xlu2 %7674 }
 0xf02   : > { %v13617_v50 = vpop.permute.xlu0 %7682 }
 0xf04   : > { %v13619_v20 = vpop.permute.xlu1 %7678 }
 0xf07   : > { %v7877_v58 = vld [vmem:[#allocation1] sm:$0xff]  ;;  %8277 = vrot.lane.b32.xlu2 %v13613_v54, %s14594_s20 }
 0xf08   : > { %7893 = vst [vmem:[#allocation1 + $0x7] ss:$9 sm:$0xff] %v7669_v47  ;;  %v8045_v38 = vshrl.u32 %v7877_v58, 16  ;;  %v8048_v49 = vshll.u32 %v7877_v58, 16 }
 0xf09   : > { %7881 = vst [vmem:[#allocation1 + $0x1] ss:$9 sm:$0xff] %v7657_v12  ;;  %v7681_v44 = vpop.permute.xlu2 %7680 }
 0xf0a   : > { %7887 = vst [vmem:[#allocation1 + $0x4] ss:$9 sm:$0xff] %v7663_v24  ;;  %v8047_v45 = vrot.slane %v8045_v38, 7  ;;  %v13646_v52 = vpop.permute.xlu0 %7676 }
 0xf0b   : > { %7879 = vst [vmem:[#allocation1] ss:$9 sm:$0xff] %v7655_v41  ;;  %v13637_v41 = vrot.slane %v13073_v28, 2 }
 0xf0c   : > { %7883 = vst [vmem:[#allocation1 + $0x2] ss:$9 sm:$0xff] %v7659_v34  ;;  %v13626_v15 = vsel %vm9822_vm2, %v8047_v45, 0  ;;  %v8050_v21 = vor.u32 %v8048_v49, %v8047_v45  ;;  %v13639_v34 = vperm.slane %v9512_v10, 0  ;;  %v13652_v28 = vpop.permute.xlu1 %7684 }
 0xf0d   : > { %7891 = vst [vmem:[#allocation1 + $0x6] ss:$9 sm:$0xff] %v7667_v32  ;;  %8283 = vrot.lane.b32.xlu1 %v13626_v15, %s14594_s20  ;;  %8223 = vrot.lane.b32.xlu0 %v13626_v15, %s14563_s23  ;;  %v7075_v32 = vunpack.i.h.s16 %v13637_v41 }
 0xf0e   : > { %7889 = vst [vmem:[#allocation1 + $0x5] ss:$9 sm:$0xff] %v7665_v17  ;;  %v13644_v42 = vsel %vm9822_vm2, 0, %v8050_v21 }
 0xf0f   : > { %7885 = vst [vmem:[#allocation1 + $0x3] ss:$9 sm:$0xff] %v7661_v55  ;;  %8217 = vrot.lane.b32.xlu2 %v13613_v54, %s14563_s23  ;;  %v13657_v55 = vpack.i.b16 %v7075_v32, %v7075_v32 }
 0xf11   : > { %v8196_v10 = vpop.permute.xlu2 %8195 }
 0xf15   : > { %8281 = vrot.lane.b32.xlu1 %v13644_v42, %s14594_s20  ;;  %7386 = vrot.lane.b32.xlu0 %v13639_v34, %s9715_s16 }
 0xf16   : > { %v7894_v12 = vld [vmem:[#allocation1] sm:$0xff]  ;;  %v8256_v47 = vpop.permute.xlu0 %8255 }
 0xf17   : > { %7896 = vst [vmem:[#allocation1] ss:$9 sm:$0xff] %v13393_v25  ;;  %v8051_v17 = vshrl.u32 %v7894_v12, 16  ;;  %8221 = vrot.lane.b32.xlu2 %v13644_v42, %s14563_s23  ;;  %v8054_v33 = vshll.u32 %v7894_v12, 16  ;;  %v7203_v25 = vperm.slane %v13657_v55, 0 }
 0xf18   : > { %7898 = vst [vmem:[#allocation1 + $0x1] ss:$9 sm:$0xff] %v13416_v14  ;;  %v14597_v14 = vld [vmem:[#allocation4_spill] sm:$0xff]  ;;  %v8254_v1 = vpop.permute.xlu1 %8253 }
 0xf19   : > { %7900 = vst [vmem:[#allocation1 + $0x2] ss:$9 sm:$0xff] %v13430_v13  ;;  %v8053_v60 = vrot.slane %v8051_v17, 7  ;;  %v8314_v13 = vsel %vm14598_vm14, %v14597_v14, %v13505_v0  ;;  %vm14627_vm14 = vmmov %vm14622_vm0 }
 0xf1a   : > { %7902 = vst [vmem:[#allocation1 + $0x3] ss:$9 sm:$0xff] %v13444_v3 }
 0xf1b   : > { %7904 = vst [vmem:[#allocation1 + $0x4] ss:$9 sm:$0xff] %v13438_v4  ;;  %v8056_v24 = vor.u32 %v8054_v33, %v8053_v60  ;;  %v8410_v4 = vsel %vm1089_vm3, %v8316_v53, %v8256_v47  ;;  %v13692_v12 = vsel %vm9822_vm2, %v8053_v60, 0  ;;  %v7073_v33 = vunpack.i.h.s16 %v13622_v39 }
 0xf1c   : > { %7906 = vst [vmem:[#allocation1 + $0x5] ss:$9 sm:$0xff] %v13454_v7  ;;  %v13684_v7 = vsel %vm1089_vm3, %v8314_v13, %v8254_v1  ;;  %v8694_v38 = vrot.slane %v8410_v4, 1 }
 0xf1d   : > { %7908 = vst [vmem:[#allocation1 + $0x6] ss:$9 sm:$0xff] %v13421_v6  ;;  %v13674_v3 = vsel %vm9822_vm2, 0, %v8056_v24  ;;  %7392 = vrot.lane.b32.xlu0 %v7203_v25, %s9715_s16  ;;  %v8475_v6 = vshll.u32 %v8410_v4, 16  ;;  %v8471_v0 = vshll.u32 %v13684_v7, 16  ;;  %v8693_v58 = vrot.slane %v13684_v7, 1 }
 0xf1e   : > { %7910 = vst [vmem:[#allocation1 + $0x7] ss:$9 sm:$0xff] %v13463_v27  ;;  %8285 = vrot.lane.b32.xlu1 %v13674_v3, %s14594_s20  ;;  %v8469_v45 = vshrl.u32 %v13684_v7, 16  ;;  %v8194_v17 = vpop.permute.xlu0 %8193  ;;  %v7071_v24 = vunpack.i.h.s16 %v13047_v18  ;;  %v13709_v39 = vpack.i.b16 %v7073_v33, %v7073_v33 }
 0xf1f   : > { %v8473_v49 = vrot.slane %v8471_v0, 1  ;;  %v8477_v21 = vrot.slane %v8475_v6, 1  ;;  %v8695_v27 = vsel %vm1379_vm5, %v8693_v58, %v8694_v38  ;;  %v8319_v53 = vsel %vm14599_vm15, %v13211_v8, %v8194_v17  ;;  %v13716_v8 = vpop.permute.xlu2 %8203  ;;  %v14605_v38 = vld [vmem:[#allocation16_spill] sm:$0xff]  ;;  %vm14628_vm15 = vmmov %vm14624_vm8 }
 0xf20   : > { %v13711_v14 = vpack.i.b16 %v7071_v24, %v7071_v24 }
 0xf21   : > { %v8474_v32 = vor.u32 %v8473_v49, %v8469_v45  ;;  %v7510_v45 = vsel %vm9822_vm2, %v14605_v38, %v13267_v62  ;;  %v14619_v38 = vld [vmem:[#allocation19_spill] sm:$0xff] }
 0xf22   : > { %v7199_v4 = vperm.slane %v13711_v14, 0 }
 0xf23   : > { %v8478_v47 = vsel %vm14600_vm9, %v8474_v32, %v8477_v21  ;;  %v14606_v21 = vld [vmem:[#allocation25_spill] sm:$0xff]  ;;  %vm14629_vm9 = vmmov %vm14622_vm0 }
 0xf24   : > { %8629 = vrot.lane.b32.xlu2 %v8478_v47, %s14602_s27  ;;  %v7013_v32 = vrot.slane %v14606_v21, 3  ;;  %v14611_v47 = vld [vmem:[#allocation20_spill] sm:$0xff] }
 0xf25   : > { %v13696_v59 = vld [vmem:[#allocation1] sm:$0xff]  ;;  %8287 = vrot.lane.b32.xlu0 %v13692_v12, %s14594_s20 }
 0xf26   : > { %7917 = vst [vmem:[#allocation1 + $0x2] ss:$9 sm:$0xff] %v7675_v40  ;;  %8741 = vrot.lane.b32.xlu1 %v8695_v27, %s14601_s26  ;;  %v8260_v13 = vpop.permute.xlu0 %8259  ;;  %v14607_v27 = vld [vmem:[#allocation17_spill] sm:$0xff] }
 0xf27   : > { %7923 = vst [vmem:[#allocation1 + $0x5] ss:$9 sm:$0xff] %v7681_v44  ;;  %v8258_v60 = vpop.permute.xlu1 %8257  ;;  %v7201_v44 = vperm.slane %v13709_v39, 0  ;;  %v14608_v17 = vperm.slane %v14607_v27, 0  ;;  %v8262_v24 = vpop.permute.xlu2 %8261 }
 0xf28   : > { %7913 = vst [vmem:[#allocation1] ss:$9 sm:$0xff] %v13605_v43  ;;  %v13707_v18 = vsel %vm1089_vm3, %v8319_v53, %v8258_v60  ;;  %v8322_v43 = vsel %vm14603_vm6, %v13172_v19, %v8196_v10  ;;  %v7512_v60 = vsel %vm9822_vm2, %v14611_v47, %v13291_v36  ;;  %vm14630_vm6 = vmmov %vm14624_vm8 }
 0xf29   : > { %7915 = vst [vmem:[#allocation1 + $0x1] ss:$9 sm:$0xff] %v13609_v2  ;;  %v8481_v40 = vshll.u32 %v13707_v18, 16  ;;  %v8414_v2 = vsel %vm1089_vm3, %v8322_v43, %v8260_v13  ;;  %v7511_v33 = vsel %vm9822_vm2, %v14608_v17, %v13346_v16  ;;  %v14612_v16 = vld [vmem:[#allocation23_spill] sm:$0xff]  ;;  %v7077_v17 = vunpack.i.h.s16 %v7013_v32 }
 0xf2a   : > { %7925 = vst [vmem:[#allocation1 + $0x6] ss:$9 sm:$0xff] %v13617_v50  ;;  %v8485_v50 = vshll.u32 %v8414_v2, 16  ;;  %v8697_v6 = vrot.slane %v8414_v2, 1  ;;  %v14613_v43 = vperm.slane %v14612_v16, 0  ;;  %v14614_v2 = vld [vmem:[#allocation18_spill] sm:$0xff] }
 0xf2b   : > { %7921 = vst [vmem:[#allocation1 + $0x4] ss:$9 sm:$0xff] %v13619_v20  ;;  %v8483_v19 = vrot.slane %v8481_v40, 1  ;;  %v7514_v36 = vsel %vm9822_vm2, %v14614_v2, %v13344_v9  ;;  %v14617_v9 = vld [vmem:[#allocation21_spill] sm:$0xff] }
 0xf2c   : > { %7919 = vst [vmem:[#allocation1 + $0x3] ss:$9 sm:$0xff] %v13646_v52  ;;  %7384 = vrot.lane.b32.xlu2 %v7199_v4, %s9715_s16  ;;  %v8479_v52 = vshrl.u32 %v13707_v18, 16  ;;  %v8487_v1 = vrot.slane %v8485_v50, 1 }
 0xf2d   : > { %7927 = vst [vmem:[#allocation1 + $0x7] ss:$9 sm:$0xff] %v13652_v28  ;;  %v8696_v28 = vrot.slane %v13707_v18, 1 }
 0xf2e   : > { %7388 = vrot.lane.b32.xlu1 %v7201_v44, %s9715_s16  ;;  %v8484_v0 = vor.u32 %v8483_v19, %v8479_v52  ;;  %v8200_v10 = vpop.permute.xlu0 %8199  ;;  %v9514_v19 = vpack.i.b16 %v7013_v32, %v7013_v32  ;;  %v14615_v52 = vld [vmem:[#allocation22_spill] sm:$0xff] }
 0xf2f   : > { %v8198_v20 = vpop.permute.xlu1 %8197  ;;  %v8328_v53 = vsel %vm14609_vm1, %v13474_v61, %v8200_v10  ;;  %v13766_v61 = vsel %vm9822_vm2, %v14613_v43, %v13401_v51  ;;  %vm14634_vm1 = vmmov %vm14622_vm0 }
 0xf30   : > { %v8325_v58 = vsel %vm14604_vm7, %v13484_v48, %v8198_v20  ;;  %v8698_v48 = vsel %vm1379_vm5, %v8696_v28, %v8697_v6  ;;  %v8488_v62 = vsel %vm14610_vm10, %v8484_v0, %v8487_v1  ;;  %v9513_v20 = vpack.i.b16 %v13637_v41, %v13637_v41  ;;  %vm14631_vm7 = vmmov %vm14622_vm0 }
 0xf31   : > { %v13757_v40 = vsel %vm1089_vm3, %v8325_v58, %v8262_v24  ;;  %v14616_v1 = vperm.slane %v14615_v52, 0  ;;  %v13786_v28 = vsel %vm9822_vm2, %v14617_v9, %v13374_v46  ;;  %v14618_v58 = vld [vmem:[#allocation26_spill] sm:$0xff]  ;;  %v14620_v41 = vperm.slane %v14619_v38, 0  ;;  %vm14635_vm10 = vmmov %vm14622_vm0 }
 0xf32   : > { %v8699_v0 = vrot.slane %v13757_v40, 1  ;;  %v13796_v27 = vperm.slane %v9514_v19, 0  ;;  %v13799_v46 = vperm.slane %v9513_v20, 0  ;;  %v8489_v47 = vshrl.u32 %v13757_v40, 16 }
 0xf33   : > { %v7515_v51 = vsel %vm9822_vm2, %v14616_v1, %v13317_v63  ;;  %v7517_v10 = vsel %vm9822_vm2, %v14620_v41, %v14618_v58  ;;  %v8491_v63 = vshll.u32 %v13757_v40, 16  ;;  %v8334_v19 = vsel %vm14622_vm0, %v13495_v30, %v13716_v8 }
 0xf34   : > { %v13740_v49 = vld [vmem:[#allocation1] sm:$0xff]  ;;  %8631 = vrot.lane.b32.xlu2 %v8488_v62, %s14602_s27  ;;  %v8208_v62 = vpop.permute.xlu2 %8207 }
 0xf35   : > { %7930 = vst [vmem:[#allocation1] ss:$9 sm:$0xff] %v7510_v45 }
 0xf36   : > { %7932 = vst [vmem:[#allocation1 + $0x1] ss:$9 sm:$0xff] %v7511_v33  ;;  %8743 = vrot.lane.b32.xlu1 %v8698_v48, %s14601_s26  ;;  %v8493_v48 = vrot.slane %v8491_v63, 1 }
 0xf37   : > { %7934 = vst [vmem:[#allocation1 + $0x2] ss:$9 sm:$0xff] %v7512_v60  ;;  %v8264_v13 = vpop.permute.xlu1 %8263 }
 0xf38   : > { %7936 = vst [vmem:[#allocation1 + $0x3] ss:$9 sm:$0xff] %v13766_v61  ;;  %v8418_v50 = vsel %vm1089_vm3, %v8328_v53, %v8264_v13  ;;  %v13805_v53 = vpack.i.b16 %v7077_v17, %v7077_v17  ;;  %v8494_v13 = vor.u32 %v8493_v48, %v8489_v47 }
 0xf39   : > { %7938 = vst [vmem:[#allocation1 + $0x4] ss:$9 sm:$0xff] %v7514_v36  ;;  %v8700_v6 = vrot.slane %v8418_v50, 1  ;;  %v8495_v24 = vshll.u32 %v8418_v50, 16 }
 0xf3a   : > { %7940 = vst [vmem:[#allocation1 + $0x5] ss:$9 sm:$0xff] %v7515_v51  ;;  %v7205_v32 = vperm.slane %v13805_v53, 0 }
 0xf3b   : > { %7942 = vst [vmem:[#allocation1 + $0x6] ss:$9 sm:$0xff] %v13786_v28  ;;  %v8701_v21 = vsel %vm1379_vm5, %v8699_v0, %v8700_v6  ;;  %v8497_v16 = vrot.slane %v8495_v24, 1 }
 0xf3c   : > { %7944 = vst [vmem:[#allocation1 + $0x7] ss:$9 sm:$0xff] %v7517_v10  ;;  %8745 = vrot.lane.b32.xlu0 %v8701_v21, %s14601_s26  ;;  %7390 = vrot.lane.b32.xlu2 %v13799_v46, %s9715_s16 }
 0xf3d   : > { %v8498_v2 = vsel %vm14621_vm11, %v8494_v13, %v8497_v16  ;;  %v8340_v13 = vsel %vm14626_vm13, %v13518_v37, %v8208_v62  ;;  %vm14636_vm11 = vmmov %vm14630_vm6 }
 0xf3e   : > { %7394 = vrot.lane.b32.xlu1 %v13796_v27, %s9715_s16  ;;  %vm14640_vm13 = vmmov %vm14630_vm6 }
 0xf3f   : > { %v8202_v50 = vpop.permute.xlu1 %8201 }
 0xf43   : > { %v8268_v43 = vpop.permute.xlu0 %8267 }
 0xf44   : > { %7690 = vrot.lane.b32.xlu0 %v7512_v60, %s9716_s17  ;;  %7396 = vrot.lane.b32.xlu2 %v7205_v32, %s9715_s16  ;;  %v8422_v52 = vsel %vm1089_vm3, %v8334_v19, %v8268_v43  ;;  %v8331_v60 = vsel %vm14623_vm12, %v13499_v31, %v8202_v50  ;;  %vm14637_vm12 = vcmask 195584  }
 0xf45   : > { %v8703_v0 = vrot.slane %v8422_v52, 1  ;;  %v8505_v30 = vshll.u32 %v8422_v52, 16 }
 0xf46   : > { %8633 = vrot.lane.b32.xlu1 %v8498_v2, %s14602_s27 }
 0xf47   : > { %v8507_v21 = vrot.slane %v8505_v30, 1 }
 0xf49   : > { %v8276_v20 = vpop.permute.xlu2 %8275 }
 0xf4b   : > { %v8266_v1 = vpop.permute.xlu0 %8265 }
 0xf4c   : > { %v13822_v6 = vsel %vm1089_vm3, %v8331_v60, %v8266_v1  ;;  %7688 = vrot.lane.b32.xlu2 %v7511_v33, %s9716_s17  ;;  %v8057_v33 = vshrl.u32 %v13696_v59, 16 }
 0xf4d   : > { %v8501_v9 = vshll.u32 %v13822_v6, 16  ;;  %v8702_v58 = vrot.slane %v13822_v6, 1  ;;  %v8499_v8 = vshrl.u32 %v13822_v6, 16 }
 0xf4e   : > { %7686 = vrot.lane.b32.xlu1 %v7510_v45, %s9716_s17  ;;  %v8206_v45 = vpop.permute.xlu1 %8205 }
 0xf4f   : > { %v8503_v38 = vrot.slane %v8501_v9, 1  ;;  %v8704_v41 = vsel %vm1379_vm5, %v8702_v58, %v8703_v0  ;;  %v8337_v47 = vsel %vm14625_vm4, %v13529_v5, %v8206_v45  ;;  %v8060_v5 = vshll.u32 %v13696_v59, 16 }
 0xf50   : > { %8747 = vrot.lane.b32.xlu0 %v8704_v41, %s14601_s26  ;;  %vm14639_vm4 = vcmask 588800  }
 0xf51   : > { %v8274_v31 = vpop.permute.xlu2 %8273  ;;  %v8504_v63 = vor.u32 %v8503_v38, %v8499_v8 }
 0xf53   : > { %v8272_v17 = vpop.permute.xlu0 %8271  ;;  %v8508_v24 = vsel %vm14624_vm8, %v8504_v63, %v8507_v21  ;;  %vm14638_vm8 = vcmask 392192  }
 0xf54   : > { %7694 = vrot.lane.b32.xlu2 %v7514_v36, %s9716_s17  ;;  %v8059_v36 = vrot.slane %v8057_v33, 7  ;;  %v8426_v50 = vsel %vm1089_vm3, %v8340_v13, %v8272_v17  ;;  %v9651_v33 = vld [vmem:[%s14404_s13 + $0x38] sm:$0xff] }
 0xf55   : > { %v8515_v19 = vshll.u32 %v8426_v50, 16  ;;  %v8706_v30 = vrot.slane %v8426_v50, 1  ;;  %8937 = vmatpush.bf16.msrb.mxu3 %v9651_v33  ;;  %v8063_v50 = vshrl.u32 %v13740_v49, 16 }
 0xf56   : > { %8635 = vrot.lane.b32.xlu1 %v8508_v24, %s14602_s27  ;;  %v8062_v37 = vor.u32 %v8060_v5, %v8059_v36 }
 0xf57   : > { %v8517_v0 = vrot.slane %v8515_v19, 1  ;;  %v9649_v19 = vld [vmem:[%s14404_s13 + $0x28] sm:$0xff] }
 0xf58   : > { %7696 = vrot.lane.b32.xlu0 %v7515_v51, %s9716_s17 }
 0xf59   : > { %v13836_v48 = vpop.permute.xlu2 %8279 }
 0xf5b   : > { %v8270_v16 = vpop.permute.xlu0 %8269 }
 0xf5c   : > { %v13841_v43 = vsel %vm1089_vm3, %v8337_v47, %v8270_v16  ;;  %7700 = vrot.lane.b32.xlu2 %v7517_v10, %s9716_s17  ;;  %v8212_v10 = vpop.permute.xlu1 %8211 }
 0xf5d   : > { %v8511_v2 = vshll.u32 %v13841_v43, 16  ;;  %v8509_v52 = vshrl.u32 %v13841_v43, 16  ;;  %v8346_v8 = vsel %vm14629_vm9, %v13537_v23, %v8212_v10  ;;  %vm14643_vm9 = vmmov %vm14637_vm12 }
 0xf5e   : > { %7692 = vrot.lane.b32.xlu1 %v13766_v61, %s9716_s17  ;;  %v13858_v61 = vsel %vm9822_vm2, 0, %v8062_v37  ;;  %v8430_v41 = vsel %vm1089_vm3, %v8346_v8, %v8276_v20  ;;  %v13885_v20 = vsel %vm9822_vm2, %v8059_v36, 0  ;;  %v9648_v8 = vld [vmem:[%s14404_s13 + $0x20] sm:$0xff] }
 0xf5f   : > { %v8513_v51 = vrot.slane %v8511_v2, 1  ;;  %v8525_v21 = vshll.u32 %v8430_v41, 16  ;;  %v9650_v2 = vld [vmem:[%s14404_s13 + $0x30] sm:$0xff] }
 0xf60   : > { %8225 = vrot.lane.b32.xlu0 %v13674_v3, %s14563_s23  ;;  %8938 = vmatpush.bf16.msrb.mxu3 %v9650_v2  ;;  %v9645_v2 = vld [vmem:[%s14404_s13 + $0x8] sm:$0xff] }
 0xf61   : > { %v8514_v62 = vor.u32 %v8513_v51, %v8509_v52  ;;  %v8278_v1 = vpop.permute.xlu2 %8277  ;;  %v8527_v45 = vrot.slane %v8525_v21, 1  ;;  %v8709_v51 = vrot.slane %v8430_v41, 1 }
 0xf63   : > { %v8210_v60 = vpop.permute.xlu0 %8209  ;;  %v8518_v59 = vsel %vm14628_vm15, %v8514_v62, %v8517_v0  ;;  %v8065_v62 = vrot.slane %v8063_v50, 7  ;;  %v14633_v0 = vld [vmem:[#allocation24_spill] sm:$0xff]  ;;  %vm14642_vm15 = vmmov %vm14622_vm0 }
 0xf64   : > { %v8343_v9 = vsel %vm14627_vm14, %v13545_v26, %v8210_v60  ;;  %8289 = vrot.lane.b32.xlu2 %v13858_v61, %s14594_s20  ;;  %v8705_v26 = vrot.slane %v13841_v43, 1  ;;  %v8216_v47 = vpop.permute.xlu1 %8215  ;;  %v14632_v60 = vld [vmem:[#allocation10_spill] sm:$0xff]  ;;  %8939 = vmatpush.bf16.msrb.mxu3 %v9649_v19  ;;  %vm14641_vm14 = vmmov %vm14622_vm0 }
 0xf65   : > { %v13866_v58 = vsel %vm1089_vm3, %v8343_v9, %v8274_v31  ;;  %v13914_v9 = vsel %vm9822_vm2, %v14633_v0, %v14632_v60 }
 0xf66   : > { %7698 = vrot.lane.b32.xlu1 %v13786_v28, %s9716_s17  ;;  %v8521_v38 = vshll.u32 %v13866_v58, 16  ;;  %v8707_v28 = vsel %vm1379_vm5, %v8705_v26, %v8706_v30  ;;  %v8519_v23 = vshrl.u32 %v13866_v58, 16  ;;  %v8708_v36 = vrot.slane %v13866_v58, 1 }
 0xf67   : > { %v8066_v26 = vshll.u32 %v13740_v49, 16  ;;  %v9647_v49 = vld [vmem:[%s14404_s13 + $0x18] sm:$0xff] }
 0xf68   : > { %8637 = vrot.lane.b32.xlu0 %v8518_v59, %s14602_s27  ;;  %v8523_v31 = vrot.slane %v8521_v38, 1  ;;  %v8710_v37 = vsel %vm1379_vm5, %v8708_v36, %v8709_v51  ;;  %v8352_v59 = vsel %vm14634_vm1, %v13558_v22, %v8216_v47  ;;  %8940 = vmatpush.bf16.msrb.mxu3 %v9648_v8  ;;  %v13959_v36 = vsel %vm9822_vm2, %v8065_v62, 0  ;;  %vm14646_vm1 = vmmov %vm14643_vm9 }
 0xf69   : > { %v13875_v63 = vpop.permute.xlu2 %8217  ;;  %v8068_v38 = vor.u32 %v8066_v26, %v8065_v62 }
 0xf6a   : > { %v8524_v24 = vor.u32 %v8523_v31, %v8519_v23 }
 0xf6b   : > { %v8214_v17 = vpop.permute.xlu0 %8213  ;;  %v13936_v21 = vsel %vm9822_vm2, 0, %v8068_v38 }
 0xf6c   : > { %8749 = vrot.lane.b32.xlu2 %v8707_v28, %s14601_s26  ;;  %v8528_v16 = vsel %vm14630_vm6, %v8524_v24, %v8527_v45  ;;  %v8349_v52 = vsel %vm14631_vm7, %v13569_v29, %v8214_v17  ;;  %v8434_v28 = vsel %vm1089_vm3, %v8352_v59, %v13836_v48  ;;  %8941 = vmatpush.bf16.msrb.mxu3 %v9647_v49  ;;  %v9646_v24 = vld [vmem:[%s14404_s13 + $0x10] sm:$0xff]  ;;  %vm14644_vm6 = vmmov %vm14638_vm8 }
 0xf6d   : > { %v13920_v30 = vsel %vm1089_vm3, %v8349_v52, %v8278_v1  ;;  %v8712_v1 = vrot.slane %v8434_v28, 1  ;;  %v8535_v47 = vshll.u32 %v8434_v28, 16  ;;  %v9644_v52 = vld [vmem:[%s14404_s13] sm:$0xff]  ;;  %vm14645_vm7 = vmmov %vm14639_vm4 }
 0xf6e   : > { %8227 = vrot.lane.b32.xlu1 %v13692_v12, %s14563_s23  ;;  %v8711_v22 = vrot.slane %v13920_v30, 1  ;;  %v8531_v41 = vshll.u32 %v13920_v30, 16 }
 0xf70   : > { %8229 = vrot.lane.b32.xlu0 %v13858_v61, %s14563_s23  ;;  %v8713_v48 = vsel %vm1379_vm5, %v8711_v22, %v8712_v1  ;;  %v8533_v45 = vrot.slane %v8531_v41, 1  ;;  %8942 = vmatpush.bf16.msrb.mxu3 %v9646_v24 }
 0xf71   : > { %v13895_v13 = vpop.permute.xlu2 %8221 }
 0xf73   : > { %v8220_v5 = vpop.permute.xlu0 %8219 }
 0xf74   : > { %8291 = vrot.lane.b32.xlu2 %v13885_v20, %s14594_s20  ;;  %8943 = vmatpush.bf16.msrb.mxu3 %v9645_v2  ;;  %v8358_v0 = vsel %vm14622_vm0, %v13575_v57, %v8220_v5  ;;  %vm14649_vm0 = vmmov %vm14639_vm4 }
 0xf76   : > { %8231 = vrot.lane.b32.xlu1 %v13885_v20, %s14563_s23 }
 0xf78   : > { %8639 = vrot.lane.b32.xlu0 %v8528_v16, %s14602_s27  ;;  %v8529_v16 = vshrl.u32 %v13920_v30, 16  ;;  %8944 = vmatpush.bf16.msrb.mxu3 %v9644_v52 }
 0xf7a   : > { %v8534_v14 = vor.u32 %v8533_v45, %v8529_v16  ;;  %v8361_v45 = vsel %vm14642_vm15, %v13613_v54, %v13895_v13  ;;  %vm14655_vm15 = vmmov %vm14644_vm6 }
 0xf7c   : > { %8751 = vrot.lane.b32.xlu2 %v8710_v37, %s14601_s26  ;;  %v8355_v37 = vsel %vm14635_vm10, %v13585_v56, %v13875_v63  ;;  %vm14647_vm10 = vmmov %vm14636_vm11 }
 0xf7e   : > { %v8630_v29 = vpop.permute.xlu2 %8629 }
 0xf7f   : > { %v8284_v10 = vpop.permute.xlu1 %8283  ;;  %v8224_v31 = vpop.permute.xlu0 %8223  ;;  %v8774_v63 = vsel %vm14637_vm12, %v13684_v7, %v8630_v29  ;;  %vm14650_vm12 = vmmov %vm14646_vm1 }
 0xf80   : > { %7702 = vrot.lane.b32.xlu0 %v13914_v9, %s9716_s17  ;;  %v8438_v56 = vsel %vm1089_vm3, %v8358_v0, %v8284_v10  ;;  %v8364_v24 = vsel %vm14641_vm14, %v13599_v35, %v8224_v31 }
 0xf81   : > { %v8545_v57 = vshll.u32 %v8438_v56, 16 }
 0xf83   : > { %v8547_v29 = vrot.slane %v8545_v57, 1 }
 0xf84   : > { %8293 = vrot.lane.b32.xlu2 %v13936_v21, %s14594_s20 }
 0xf86   : > { %v7385_v17 = vpop.permute.xlu2 %7384 }
 0xf87   : > { %v8282_v23 = vpop.permute.xlu1 %8281  ;;  %v13949_v33 = vsel %vm9822_vm2, %v7199_v4, %v7385_v17  ;;  %v8537_v4 = vrot.slane %v8535_v47, 1  ;;  %v7387_v50 = vpop.permute.xlu0 %7386  ;;  %v8715_v17 = vrot.slane %v8438_v56, 1 }
 0xf88   : > { %8753 = vrot.lane.b32.xlu0 %v8713_v48, %s14601_s26  ;;  %7704 = vrot.lane.b32.xlu1 %v13949_v33, %s9716_s17  ;;  %v13971_v60 = vsel %vm1089_vm3, %v8355_v37, %v8282_v23  ;;  %v13980_v26 = vsel %vm9822_vm2, %v13639_v34, %v7387_v50 }
 0xf89   : > { %v8538_v62 = vsel %vm14636_vm11, %v8534_v14, %v8537_v4  ;;  %v8541_v59 = vshll.u32 %v13971_v60, 16  ;;  %v8539_v10 = vshrl.u32 %v13971_v60, 16  ;;  %v8714_v23 = vrot.slane %v13971_v60, 1  ;;  %vm14648_vm11 = vmmov %vm14644_vm6 }
 0xf8b   : > { %v8543_v28 = vrot.slane %v8541_v59, 1  ;;  %v8716_v31 = vsel %vm1379_vm5, %v8714_v23, %v8715_v17 }
 0xf8c   : > { %8295 = vrot.lane.b32.xlu2 %v13959_v36, %s14594_s20 }
 0xf8d   : > { %v8544_v7 = vor.u32 %v8543_v28, %v8539_v10 }
 0xf8e   : > { %v8632_v19 = vpop.permute.xlu2 %8631 }
 0xf8f   : > { %v7393_v5 = vpop.permute.xlu0 %7392  ;;  %v8548_v48 = vsel %vm14640_vm13, %v8544_v7, %v8547_v29  ;;  %v8776_v16 = vsel %vm14643_vm9, %v13707_v18, %v8632_v19  ;;  %vm14653_vm13 = vmmov %vm14641_vm14 }
 0xf90   : > { %v8286_v51 = vpop.permute.xlu1 %8285  ;;  %8641 = vrot.lane.b32.xlu1 %v8538_v62, %s14602_s27  ;;  %v14001_v49 = vsel %vm9822_vm2, %v7203_v25, %v7393_v5  ;;  %v7945_v25 = vld [vmem:[#allocation1] sm:$0xff]  ;;  %vm14654_vm14 = vmmov %vm14646_vm1 }
 0xf91   : > { %v14025_v47 = vsel %vm1089_vm3, %v8361_v45, %v8286_v51  ;;  %v8072_v13 = vshll.u32 %v7945_v25, 16  ;;  %vm14656_vm9 = vmmov %vm14649_vm0 }
 0xf92   : > { %v8717_v18 = vrot.slane %v14025_v47, 1 }
 0xf94   : > { %7706 = vrot.lane.b32.xlu2 %v13980_v26, %s9716_s17 }
 0xf96   : > { %v7391_v38 = vpop.permute.xlu2 %7390 }
 0xf97   : > { %v13991_v34 = vsel %vm9822_vm2, %v13799_v46, %v7391_v38  ;;  %v8288_v55 = vpop.permute.xlu0 %8287 }
 0xf98   : > { %v8742_v8 = vpop.permute.xlu1 %8741  ;;  %7710 = vrot.lane.b32.xlu1 %v13991_v34, %s9716_s17  ;;  %v8442_v39 = vsel %vm1089_vm3, %v8364_v24, %v8288_v55 }
 0xf99   : > { %v8806_v22 = vsel %vm14638_vm8, %v8774_v63, %v8742_v8  ;;  %v8718_v4 = vrot.slane %v8442_v39, 1  ;;  %v8555_v62 = vshll.u32 %v8442_v39, 16  ;;  %v8549_v63 = vshrl.u32 %v14025_v47, 16  ;;  %vm14651_vm8 = vmmov %vm14644_vm6 }
 0xf9a   : > { %9547 = vmatmul.msk.bf16.vlgmr.msrb.gmra.mxu3 %vm14639_vm4, %v8806_v22  ;;  %vm14652_vm4 = vmmov %vm14649_vm0 }
 0xf9b   : > { %v8719_v51 = vsel %vm1379_vm5, %v8717_v18, %v8718_v4  ;;  %v8557_v8 = vrot.slane %v8555_v62, 1 }
 0xf9c   : > { %7712 = vrot.lane.b32.xlu2 %v14001_v49, %s9716_s17 }
 0xf9e   : > { %v7397_v1 = vpop.permute.xlu2 %7396 }
 0xf9f   : > { %v14035_v50 = vsel %vm9822_vm2, %v7205_v32, %v7397_v1  ;;  %v8551_v32 = vshll.u32 %v14025_v47, 16 }
 0xfa0   : > { %v7389_v46 = vpop.permute.xlu1 %7388  ;;  %8643 = vrot.lane.b32.xlu1 %v8548_v48, %s14602_s27 }
 0xfa1   : > { %v14009_v41 = vsel %vm9822_vm2, %v7201_v44, %v7389_v46  ;;  %v8069_v44 = vshrl.u32 %v7945_v25, 16  ;;  %v8553_v56 = vrot.slane %v8551_v32, 1 }
 0xfa2   : > { %7708 = vrot.lane.b32.xlu0 %v14009_v41, %s9716_s17 }
 0xfa3   : > { %v8071_v54 = vrot.slane %v8069_v44, 7 }
 0xfa4   : > { %8233 = vrot.lane.b32.xlu2 %v13936_v21, %s14563_s23 }
 0xfa5   : > { %v8074_v53 = vor.u32 %v8072_v13, %v8071_v54  ;;  %v14068_v7 = vsel %vm9822_vm2, %v8071_v54, 0 }
 0xfa6   : > { %v7689_v14 = vpop.permute.xlu2 %7688 }
 0xfa7   : > { %7949 = vst [vmem:[#allocation1 + $0x1] ss:$9 sm:$0xff] %v7689_v14  ;;  %v14054_v59 = vsel %vm9822_vm2, 0, %v8074_v53 }
 0xfa8   : > { %v8744_v2 = vpop.permute.xlu1 %8743  ;;  %7716 = vrot.lane.b32.xlu1 %v14035_v50, %s9716_s17 }
 0xfa9   : > { %v8808_v35 = vsel %vm14644_vm6, %v8776_v16, %v8744_v2  ;;  %vm14657_vm6 = vmmov %vm14653_vm13 }
 0xfaa   : > { %9548 = vmatmul.msk.bf16.gmra.mxu3 %vm14645_vm7, %v8808_v35  ;;  %8755 = vrot.lane.b32.xlu0 %v8716_v31, %s14601_s26  ;;  %vm14658_vm7 = vmmov %vm14647_vm10 }
 0xfac   : > { %8757 = vrot.lane.b32.xlu2 %v8719_v51, %s14601_s26 }
 0xfae   : > { %v8746_v19 = vpop.permute.xlu0 %8745  ;;  %v7695_v37 = vpop.permute.xlu2 %7694 }
 0xfaf   : > { %7955 = vst [vmem:[#allocation1 + $0x4] ss:$9 sm:$0xff] %v7695_v37 }
 0xfb0   : > { %v7395_v52 = vpop.permute.xlu1 %7394  ;;  %8297 = vrot.lane.b32.xlu1 %v14054_v59, %s14594_s20 }
 0xfb1   : > { %v14048_v0 = vsel %vm9822_vm2, %v13796_v27, %v7395_v52  ;;  %v8554_v27 = vor.u32 %v8553_v56, %v8549_v63 }
 0xfb2   : > { %7714 = vrot.lane.b32.xlu0 %v14048_v0, %s9716_s17 }
 0xfb3   : > { %v8558_v22 = vsel %vm14647_vm10, %v8554_v27, %v8557_v8 }
 0xfb4   : > { %8237 = vrot.lane.b32.xlu2 %v14054_v59, %s14563_s23 }
 0xfb6   : > { %v7691_v38 = vpop.permute.xlu0 %7690  ;;  %v7701_v57 = vpop.permute.xlu2 %7700 }
 0xfb7   : > { %7951 = vst [vmem:[#allocation1 + $0x2] ss:$9 sm:$0xff] %v7691_v38 }
 0xfb8   : > { %v8634_v28 = vpop.permute.xlu1 %8633  ;;  %7961 = vst [vmem:[#allocation1 + $0x7] ss:$9 sm:$0xff] %v7701_v57  ;;  %8299 = vrot.lane.b32.xlu1 %v14068_v7, %s14594_s20 }
 0xfb9   : > { %v8778_v5 = vsel %vm14646_vm1, %v13757_v40, %v8634_v28  ;;  %vm14659_vm1 = vmmov %vm14657_vm6 }
 0xfba   : > { %8645 = vrot.lane.b32.xlu0 %v8558_v22, %s14602_s27  ;;  %v8810_v10 = vsel %vm14648_vm11, %v8778_v5, %v8746_v19  ;;  %vm14660_vm10 = vmmov %vm14659_vm1 }
 0xfbb   : > { %9549 = vmatmul.msk.bf16.gmra.mxu3 %vm14649_vm0, %v8810_v10  ;;  %vm14661_vm11 = vmmov %vm14650_vm12 }
 0xfbc   : > { %vm14662_vm0 = vmmov %vm14651_vm8 }
 0xfbe   : > { %v8290_v46 = vpop.permute.xlu2 %8289 }
 0xfc0   : > { %v7687_v29 = vpop.permute.xlu1 %7686 }
 0xfc1   : > { %7947 = vst [vmem:[#allocation1] ss:$9 sm:$0xff] %v7687_v29 }
 0xfc2   : > { %v8748_v40 = vpop.permute.xlu0 %8747  ;;  %8235 = vrot.lane.b32.xlu0 %v13959_v36, %s14563_s23 }
 0xfc6   : > { %v8750_v48 = vpop.permute.xlu2 %8749 }
 0xfc8   : > { %v8636_v1 = vpop.permute.xlu1 %8635 }
 0xfc9   : > { %v8780_v55 = vsel %vm14650_vm12, %v13822_v6, %v8636_v1  ;;  %vm14663_vm12 = vmmov %vm14652_vm4 }
 0xfca   : > { %v7697_v25 = vpop.permute.xlu0 %7696  ;;  %v8812_v23 = vsel %vm14651_vm8, %v8780_v55, %v8748_v40  ;;  %vm14664_vm8 = vmmov %vm14658_vm7 }
 0xfcb   : > { %7957 = vst [vmem:[#allocation1 + $0x5] ss:$9 sm:$0xff] %v7697_v25  ;;  %9550 = vmatmul.msk.bf16.gmra.mxu3 %vm14652_vm4, %v8812_v23  ;;  %vm14665_vm4 = vmmov %vm14661_vm11 }
 0xfce   : > { %v8292_v24 = vpop.permute.xlu2 %8291 }
 0xfd0   : > { %v7693_v17 = vpop.permute.xlu1 %7692 }
 0xfd1   : > { %7953 = vst [vmem:[#allocation1 + $0x3] ss:$9 sm:$0xff] %v7693_v17 }
 0xfd2   : > { %v8226_v39 = vpop.permute.xlu0 %8225 }
 0xfd3   : > { %v8367_v44 = vsel %vm14653_vm13, %v13644_v42, %v8226_v39  ;;  %vm14666_vm13 = vmmov %vm14662_vm0 }
 0xfd4   : > { %v14082_v2 = vsel %vm1089_vm3, %v8367_v44, %v8290_v46 }
 0xfd5   : > { %v8561_v35 = vshll.u32 %v14082_v2, 16  ;;  %v8720_v62 = vrot.slane %v14082_v2, 1 }
 0xfd6   : > { %v8752_v16 = vpop.permute.xlu2 %8751 }
 0xfd7   : > { %v8563_v42 = vrot.slane %v8561_v35, 1 }
 0xfd8   : > { %v7699_v45 = vpop.permute.xlu1 %7698 }
 0xfd9   : > { %7959 = vst [vmem:[#allocation1 + $0x6] ss:$9 sm:$0xff] %v7699_v45 }
 0xfda   : > { %v8638_v6 = vpop.permute.xlu0 %8637 }
 0xfdb   : > { %v8782_v14 = vsel %vm14654_vm14, %v13841_v43, %v8638_v6  ;;  %v8559_v43 = vshrl.u32 %v14082_v2, 16  ;;  %vm14667_vm14 = vmmov %vm14656_vm9 }
 0xfdc   : > { %v8814_v4 = vsel %vm14655_vm15, %v8782_v14, %v8750_v48  ;;  %vm14668_vm15 = vmmov %vm14665_vm4 }
 0xfdd   : > { %9551 = vmatmul.msk.bf16.gmra.mxu3 %vm14656_vm9, %v8814_v4  ;;  %vm14669_vm9 = vmmov %vm14662_vm0 }
 0xfde   : > { %v8294_v54 = vpop.permute.xlu2 %8293 }
 0xfe0   : > { %v8228_v31 = vpop.permute.xlu1 %8227  ;;  %v7962_v18 = vld [vmem:[#allocation1] sm:$0xff] }
 0xfe1   : > { %v8370_v13 = vsel %vm14657_vm6, %v13626_v15, %v8228_v31  ;;  %v8075_v51 = vshrl.u32 %v7962_v18, 16  ;;  %7964 = vst [vmem:[#allocation1] ss:$9 sm:$0xff] %v13914_v9  ;;  %v8078_v56 = vshll.u32 %v7962_v18, 16  ;;  %v8564_v9 = vor.u32 %v8563_v42, %v8559_v43  ;;  %vm14671_vm6 = vmmov %vm14663_vm12 }
 0xfe2   : > { %v8446_v19 = vsel %vm1089_vm3, %v8370_v13, %v8292_v24  ;;  %v8230_v53 = vpop.permute.xlu0 %8229  ;;  %7966 = vst [vmem:[#allocation1 + $0x1] ss:$9 sm:$0xff] %v13949_v33 }
 0xfe3   : > { %v8565_v32 = vshll.u32 %v8446_v19, 16  ;;  %v8721_v52 = vrot.slane %v8446_v19, 1  ;;  %v8077_v37 = vrot.slane %v8075_v51, 7  ;;  %7968 = vst [vmem:[#allocation1 + $0x2] ss:$9 sm:$0xff] %v13980_v26 }
 0xfe4   : > { %7970 = vst [vmem:[#allocation1 + $0x3] ss:$9 sm:$0xff] %v14009_v41  ;;  %v8373_v41 = vsel %vm14659_vm1, %v13674_v3, %v8230_v53  ;;  %v14164_v51 = vld [vmem:[%s14405_s14] ss:$0 sm:$0xff] }
 0xfe5   : > { %v8567_v15 = vrot.slane %v8565_v32, 1  ;;  %7972 = vst [vmem:[#allocation1 + $0x4] ss:$9 sm:$0xff] %v13991_v34  ;;  %v8722_v63 = vsel %vm1379_vm5, %v8720_v62, %v8721_v52  ;;  %v8080_v8 = vor.u32 %v8078_v56, %v8077_v37  ;;  %v14129_v10 = vsel %vm9822_vm2, %v8077_v37, 0 }
 0xfe6   : > { %7974 = vst [vmem:[#allocation1 + $0x5] ss:$9 sm:$0xff] %v14001_v49  ;;  %8759 = vrot.lane.b32.xlu2 %v8722_v63, %s14601_s26  ;;  %v8296_v34 = vpop.permute.xlu2 %8295  ;;  %v14115_v49 = vsel %vm1089_vm3, %v8373_v41, %v8294_v54 }
 0xfe7   : > { %7976 = vst [vmem:[#allocation1 + $0x6] ss:$9 sm:$0xff] %v14048_v0  ;;  %v8568_v33 = vsel %vm14658_vm7, %v8564_v9, %v8567_v15  ;;  %v14106_v38 = vsel %vm9822_vm2, 0, %v8080_v8  ;;  %v8571_v5 = vshll.u32 %v14115_v49, 16  ;;  %v8569_v55 = vshrl.u32 %v14115_v49, 16  ;;  %vm14672_vm7 = vmmov %vm14659_vm1 }
 0xfe8   : > { %v8232_v26 = vpop.permute.xlu1 %8231  ;;  %7978 = vst [vmem:[#allocation1 + $0x7] ss:$9 sm:$0xff] %v14035_v50  ;;  %8647 = vrot.lane.b32.xlu0 %v8568_v33, %s14602_s27  ;;  %8301 = vrot.lane.b32.xlu1 %v14106_v38, %s14594_s20  ;;  %v8723_v23 = vrot.slane %v14115_v49, 1 }
 0xfe9   : > { %v8376_v27 = vsel %vm14660_vm10, %v13692_v12, %v8232_v26  ;;  %v8573_v29 = vrot.slane %v8571_v5, 1  ;;  %vm14673_vm10 = vmmov %vm14659_vm1 }
 0xfea   : > { %v8640_v0 = vpop.permute.xlu0 %8639  ;;  %v8450_v57 = vsel %vm1089_vm3, %v8376_v27, %v8296_v34 }
 0xfeb   : > { %v8784_v28 = vsel %vm14661_vm11, %v13866_v58, %v8640_v0  ;;  %v8575_v3 = vshll.u32 %v8450_v57, 16  ;;  %v8724_v46 = vrot.slane %v8450_v57, 1  ;;  %v8574_v24 = vor.u32 %v8573_v29, %v8569_v55  ;;  %vm14674_vm11 = vmmov %vm14665_vm4 }
 0xfec   : > { %v8816_v50 = vsel %vm14662_vm0, %v8784_v28, %v8752_v16 }
 0xfed   : > { %9552 = vmatmul.msk.bf16.gmra.mxu3 %vm14663_vm12, %v8816_v50  ;;  %v8577_v25 = vrot.slane %v8575_v3, 1  ;;  %v8725_v39 = vsel %vm1379_vm5, %v8723_v23, %v8724_v46  ;;  %vm14675_vm12 = vmmov %vm14671_vm6 }
 0xfee   : > { %8241 = vrot.lane.b32.xlu2 %v14106_v38, %s14563_s23  ;;  %v7707_v12 = vpop.permute.xlu2 %7706 }
 0xfef   : > { %v7979_v22 = vld [vmem:[#allocation1] sm:$0xff]  ;;  %v8578_v44 = vsel %vm14664_vm8, %v8574_v24, %v8577_v25  ;;  %vm14676_vm8 = vmmov %vm14659_vm1 }
 0xff0   : > { %8239 = vrot.lane.b32.xlu0 %v14068_v7, %s14563_s23  ;;  %v8081_v58 = vshrl.u32 %v7979_v22, 16  ;;  %8303 = vrot.lane.b32.xlu1 %v14129_v10, %s14594_s20  ;;  %7985 = vst [vmem:[#allocation1 + $0x2] ss:$9 sm:$0xff] %v7707_v12  ;;  %v8084_v48 = vshll.u32 %v7979_v22, 16 }
 0xff2   : > { %v7703_v40 = vpop.permute.xlu0 %7702  ;;  %v8083_v1 = vrot.slane %v8081_v58, 7 }
 0xff3   : > { %7981 = vst [vmem:[#allocation1] ss:$9 sm:$0xff] %v7703_v40 }
 0xff4   : > { %v8086_v17 = vor.u32 %v8084_v48, %v8083_v1  ;;  %v14151_v14 = vsel %vm9822_vm2, %v8083_v1, 0 }
 0xff6   : > { %8761 = vrot.lane.b32.xlu2 %v8725_v39, %s14601_s26  ;;  %v14142_v45 = vsel %vm9822_vm2, 0, %v8086_v17  ;;  %v7713_v16 = vpop.permute.xlu2 %7712 }
 0xff7   : > { %7991 = vst [vmem:[#allocation1 + $0x5] ss:$9 sm:$0xff] %v7713_v16 }
 0xff8   : > { %8649 = vrot.lane.b32.xlu0 %v8578_v44, %s14602_s27  ;;  %8305 = vrot.lane.b32.xlu1 %v14142_v45, %s14594_s20 }
 0xffa   : > { %v7705_v6 = vpop.permute.xlu1 %7704  ;;  %v8754_v35 = vpop.permute.xlu0 %8753 }
 0xffb   : > { %7983 = vst [vmem:[#allocation1 + $0x1] ss:$9 sm:$0xff] %v7705_v6 }
 0xffe   : > { %8245 = vrot.lane.b32.xlu2 %v14142_v45, %s14563_s23 }
0x1000   : > { %8243 = vrot.lane.b32.xlu0 %v14129_v10, %s14563_s23  ;;  %8307 = vrot.lane.b32.xlu1 %v14151_v14, %s14594_s20 }
0x1002   : > { %v8642_v4 = vpop.permute.xlu1 %8641 }
0x1003   : > { %v8786_v31 = vsel %vm14665_vm4, %v13920_v30, %v8642_v4  ;;  %vm14677_vm4 = vmmov %vm14659_vm1 }
0x1004   : > { %v8818_v54 = vsel %vm14666_vm13, %v8786_v31, %v8754_v35  ;;  %vm14678_vm13 = vmmov %vm14659_vm1 }
0x1005   : > { %9553 = vmatmul.msk.bf16.gmra.mxu3 %vm14667_vm14, %v8818_v54  ;;  %vm14679_vm14 = vsmask.f32 7424 }
0x100a   : > { %v7711_v18 = vpop.permute.xlu1 %7710 }
0x100b   : > { %7989 = vst [vmem:[#allocation1 + $0x4] ss:$9 sm:$0xff] %v7711_v18 }
0x1012   : > { %v8644_v13 = vpop.permute.xlu1 %8643 }
0x1013   : > { %v8788_v19 = vsel %vm14668_vm15, %v13971_v60, %v8644_v13  ;;  %v8234_v60 = vpop.permute.xlu2 %8233  ;;  %vm14680_vm15 = vmmov %vm14659_vm1 }
0x1014   : > { %v7709_v42 = vpop.permute.xlu0 %7708  ;;  %v8379_v8 = vsel %vm14673_vm10, %v13858_v61, %v8234_v60  ;;  %vm14686_vm10 = vmmov %vm14662_vm0 }
0x1015   : > { %7987 = vst [vmem:[#allocation1 + $0x3] ss:$9 sm:$0xff] %v7709_v42 }
0x101a   : > { %v7717_v32 = vpop.permute.xlu1 %7716 }
0x101b   : > { %7995 = vst [vmem:[#allocation1 + $0x7] ss:$9 sm:$0xff] %v7717_v32  ;;  %v8758_v33 = vpop.permute.xlu2 %8757 }
0x101c   : > { %v8756_v53 = vpop.permute.xlu0 %8755 }
0x101d   : > { %v8820_v30 = vsel %vm14669_vm9, %v8788_v19, %v8756_v53  ;;  %v8946_v43 = vpop.f32.mrf.mxu3  ;;  %vm14682_vm9 = vmmov %vm14659_vm1 }
0x101e   : > { %v8947_v52 = vadd.f32 %v14164_v51, %v8946_v43  ;;  %9554 = vmatmul.msk.bf16.gmra.mxu3 %vm14671_vm6, %v8820_v30  ;;  %vm14683_vm6 = vmmov %vm14659_vm1 }
0x1020   : > { %9026 = vst.msk [vmem:[%s14174_s21] sm:$0xff] %vm14672_vm7, %v8947_v52  ;;  %vm14684_vm7 = vmmov %vm14659_vm1 }
0x1022   : > { %v8298_v15 = vpop.permute.xlu1 %8297 }
0x1023   : > { %v14188_v0 = vsel %vm1089_vm3, %v8379_v8, %v8298_v15  ;;  %v8238_v35 = vpop.permute.xlu2 %8237 }
0x1024   : > { %v7715_v37 = vpop.permute.xlu0 %7714  ;;  %v8581_v61 = vshll.u32 %v14188_v0, 16  ;;  %v8579_v1 = vshrl.u32 %v14188_v0, 16  ;;  %v8726_v48 = vrot.slane %v14188_v0, 1  ;;  %v8385_v19 = vsel %vm14684_vm7, %v13936_v21, %v8238_v35 }
0x1025   : > { %7993 = vst [vmem:[#allocation1 + $0x6] ss:$9 sm:$0xff] %v7715_v37  ;;  %v8948_v62 = vpop.f32.mrf.mxu3 }
0x1026   : > { %v8949_v56 = vadd.f32 %v14164_v51, %v8948_v62  ;;  %v8583_v22 = vrot.slane %v8581_v61, 1 }
0x1028   : > { %9027 = vst.msk [vmem:[%s14174_s21 + $0x8] sm:$0xff] %vm14659_vm1, %v8949_v56  ;;  %v8584_v23 = vor.u32 %v8583_v22, %v8579_v1 }
0x102a   : > { %v8300_v12 = vpop.permute.xlu1 %8299 }
0x102c   : > { %v8646_v9 = vpop.permute.xlu0 %8645  ;;  %v7996_v63 = vld [vmem:[#allocation1] sm:$0xff] }
0x102d   : > { %v8790_v26 = vsel %vm14674_vm11, %v14025_v47, %v8646_v9  ;;  %v8951_v34 = vpop.f32.mrf.mxu3  ;;  %v8087_v41 = vshrl.u32 %v7996_v63, 16  ;;  %v8090_v57 = vshll.u32 %v7996_v63, 16 }
0x102e   : > { %v8952_v27 = vadd.f32 %v14164_v51, %v8951_v34  ;;  %v8822_v28 = vsel %vm14662_vm0, %v8790_v26, %v8758_v33 }
0x102f   : > { %9555 = vmatmul.msk.bf16.gmra.mxu3 %vm14675_vm12, %v8822_v28  ;;  %v8089_v50 = vrot.slane %v8087_v41, 7 }
0x1030   : > { %9028 = vst.msk [vmem:[%s14174_s21 + $0x10] sm:$0xff] %vm14676_vm8, %v8952_v27  ;;  %vm14690_vm8 = vmmov %vm14679_vm14 }
0x1031   : > { %v8092_v5 = vor.u32 %v8090_v57, %v8089_v50  ;;  %vm14698_vm7 = vmmov %vm14690_vm8 }
0x1033   : > { %v8140_v47 = vsel %vm9822_vm2, 0, %v8092_v5 }
0x1034   : > { %8309 = vrot.lane.b32.xlu1 %v8140_v47, %s14594_s20  ;;  %v8236_v3 = vpop.permute.xlu0 %8235 }
0x1035   : > { %v8382_v58 = vsel %vm14677_vm4, %v13885_v20, %v8236_v3  ;;  %v8953_v29 = vpop.f32.mrf.mxu3  ;;  %v8156_v20 = vsel %vm9822_vm2, %v8089_v50, 0  ;;  %vm14681_vm2 = vmmov %vm14659_vm1 }
0x1036   : > { %v8454_v46 = vsel %vm1089_vm3, %v8382_v58, %v8300_v12  ;;  %v8954_v40 = vadd.f32 %v14164_v51, %v8953_v29  ;;  %vm14685_vm1 = vmmov %vm14674_vm11 }
0x1037   : > { %v8585_v55 = vshll.u32 %v8454_v46, 16  ;;  %v8727_v25 = vrot.slane %v8454_v46, 1  ;;  %vm14687_vm11 = vmmov %vm14675_vm12 }
0x1038   : > { %9029 = vst.msk [vmem:[%s14174_s21 + $0x18] sm:$0xff] %vm14678_vm13, %v8954_v40  ;;  %vm14688_vm0 = vmmov %vm14681_vm2 }
0x1039   : > { %v8587_v17 = vrot.slane %v8585_v55, 1  ;;  %v8728_v24 = vsel %vm1379_vm5, %v8726_v48, %v8727_v25  ;;  %vm14689_vm12 = vmmov %vm14688_vm0 }
0x103a   : > { %8763 = vrot.lane.b32.xlu2 %v8728_v24, %s14601_s26  ;;  %vm14691_vm4 = vmmov %vm14688_vm0 }
0x103b   : > { %v8588_v39 = vsel %vm14679_vm14, %v8584_v23, %v8587_v17  ;;  %vm14692_vm13 = vmmov %vm14688_vm0 }
0x103c   : > { %8311 = vrot.lane.b32.xlu1 %v8156_v20, %s14594_s20  ;;  %8651 = vrot.lane.b32.xlu0 %v8588_v39, %s14602_s27  ;;  %vm14693_vm14 = vmmov %vm14685_vm1 }
0x103e   : > { %v8956_v44 = vpop.f32.mrf.mxu3 }
0x103f   : > { %v8957_v16 = vadd.f32 %v14164_v51, %v8956_v44 }
0x1040   : > { %v8760_v18 = vpop.permute.xlu2 %8759 }
0x1041   : > { %9030 = vst.msk [vmem:[%s14174_s21 + $0x20] sm:$0xff] %vm14680_vm15, %v8957_v16  ;;  %vm14694_vm15 = vmmov %vm14686_vm10 }
0x1042   : > { %8249 = vrot.lane.b32.xlu2 %v8140_v47, %s14563_s23 }
0x1044   : > { %8247 = vrot.lane.b32.xlu0 %v14151_v14, %s14563_s23 }
0x1046   : > { %v8958_v11 = vpop.f32.mrf.mxu3 }
0x1047   : > { %v8959_v6 = vadd.f32 %v14164_v51, %v8958_v11 }
0x1048   : > { %v8242_v37 = vpop.permute.xlu2 %8241 }
0x1049   : > { %9031 = vst.msk [vmem:[%s14174_s21 + $0x28] sm:$0xff] %vm14681_vm2, %v8959_v6  ;;  %v8391_v61 = vsel %vm14691_vm4, %v14054_v59, %v8242_v37  ;;  %vm14695_vm2 = vmmov %vm14687_vm11 }
0x104a   : > { %8251 = vrot.lane.b32.xlu2 %v8156_v20, %s14563_s23  ;;  %vm14707_vm4 = vmmov %vm14698_vm7 }
0x104e   : > { %v8961_v4 = vpop.f32.mrf.mxu3 }
0x104f   : > { %v8962_v31 = vadd.f32 %v14164_v51, %v8961_v4 }
0x1050   : > { %v8762_v5 = vpop.permute.xlu2 %8761 }
0x1051   : > { %9032 = vst.msk [vmem:[%s14174_s21 + $0x30] sm:$0xff] %vm14682_vm9, %v8962_v31  ;;  %vm14696_vm9 = vmmov %vm14688_vm0 }
0x1056   : > { %v8963_v54 = vpop.f32.mrf.mxu3 }
0x1057   : > { %v8964_v42 = vadd.f32 %v14164_v51, %v8963_v54 }
0x1058   : > { %v8246_v4 = vpop.permute.xlu2 %8245 }
0x1059   : > { %9033 = vst.msk [vmem:[%s14174_s21 + $0x38] sm:$0xff] %vm14683_vm6, %v8964_v42  ;;  %vm14697_vm6 = vmmov %vm14688_vm0 }
0x105a   : > { %v8648_v13 = vpop.permute.xlu0 %8647  ;;  %v8302_v53 = vpop.permute.xlu1 %8301 }
0x105b   : > { %v8792_v30 = vsel %vm14685_vm1, %v14082_v2, %v8648_v13  ;;  %v14235_v43 = vsel %vm1089_vm3, %v8385_v19, %v8302_v53  ;;  %vm14699_vm1 = vmmov %vm14688_vm0  ;;  %v14702_v13 = vld [vmem:[#allocation5_spill] sm:$0xff] }
0x105c   : > { %v8824_v32 = vsel %vm14686_vm10, %v8792_v30, %v8760_v18  ;;  %v8591_v52 = vshll.u32 %v14235_v43, 16  ;;  %v8589_v63 = vshrl.u32 %v14235_v43, 16  ;;  %v8729_v8 = vrot.slane %v14235_v43, 1  ;;  %vm14700_vm10 = vmmov %vm14688_vm0 }
0x105d   : > { %9556 = vmatmul.msk.bf16.gmra.mxu3 %vm14687_vm11, %v8824_v32  ;;  %vm14701_vm11 = vmmov %vm14688_vm0  ;;  %v14703_v19 = vunpack.i.l.bf16 %v14702_v13 }
0x105e   : > { %v8593_v15 = vrot.slane %v8591_v52, 1 }
0x1060   : > { %v8966_v60 = vpop.f32.mrf.mxu3  ;;  %v8594_v34 = vor.u32 %v8593_v15, %v8589_v63 }
0x1061   : > { %v8967_v62 = vadd.f32 %v14164_v51, %v8966_v60 }
0x1062   : > { %v8240_v56 = vpop.permute.xlu0 %8239  ;;  %v8304_v21 = vpop.permute.xlu1 %8303 }
0x1063   : > { %9034 = vst.msk [vmem:[%s14174_s21 + $0x40] sm:$0xff] %vm14688_vm0, %v8967_v62  ;;  %v8388_v2 = vsel %vm14689_vm12, %v13959_v36, %v8240_v56  ;;  %vm14704_vm12 = vmmov %vm14688_vm0 }
0x1064   : > { %v8458_v9 = vsel %vm1089_vm3, %v8388_v2, %v8304_v21 }
0x1065   : > { %v8595_v33 = vshll.u32 %v8458_v9, 16  ;;  %v8730_v26 = vrot.slane %v8458_v9, 1 }
0x1067   : > { %v8597_v41 = vrot.slane %v8595_v33, 1  ;;  %v8731_v27 = vsel %vm1379_vm5, %v8729_v8, %v8730_v26 }
0x1068   : > { %v8968_v28 = vpop.f32.mrf.mxu3  ;;  %8765 = vrot.lane.b32.xlu1 %v8731_v27, %s14601_s26 }
0x1069   : > { %v8969_v50 = vadd.f32 %v14164_v51, %v8968_v28  ;;  %v8598_v36 = vsel %vm14690_vm8, %v8594_v34, %v8597_v41  ;;  %vm14705_vm8 = vmmov %vm14688_vm0 }
0x106a   : > { %8653 = vrot.lane.b32.xlu0 %v8598_v36, %s14602_s27  ;;  %v8650_v57 = vpop.permute.xlu0 %8649  ;;  %v8306_v47 = vpop.permute.xlu1 %8305 }
0x106b   : > { %9035 = vst.msk [vmem:[%s14174_s21 + $0x48] sm:$0xff] %vm14692_vm13, %v8969_v50  ;;  %v8794_v3 = vsel %vm14693_vm14, %v14115_v49, %v8650_v57  ;;  %v14260_v22 = vsel %vm1089_vm3, %v8391_v61, %v8306_v47  ;;  %vm14708_vm13 = vmmov %vm14688_vm0 }
0x106c   : > { %v8826_v12 = vsel %vm14694_vm15, %v8794_v3, %v8762_v5  ;;  %v8601_v58 = vshll.u32 %v14260_v22, 16  ;;  %v8599_v55 = vshrl.u32 %v14260_v22, 16  ;;  %v8732_v25 = vrot.slane %v14260_v22, 1  ;;  %vm14709_vm14 = vmmov %vm14688_vm0 }
0x106d   : > { %9557 = vmatmul.msk.bf16.gmra.mxu3 %vm14695_vm2, %v8826_v12  ;;  %v8397_v34 = vsel %vm14709_vm14, %v14106_v38, %v8246_v4  ;;  %vm14710_vm15 = vcmask 195584   ;;  %vm14711_vm2 = vcmask 392192  }
0x106e   : > { %v8603_v40 = vrot.slane %v8601_v58, 1 }
0x1070   : > { %v8971_v29 = vpop.f32.mrf.mxu3  ;;  %v8604_v24 = vor.u32 %v8603_v40, %v8599_v55 }
0x1071   : > { %v8972_v46 = vadd.f32 %v14164_v51, %v8971_v29 }
0x1072   : > { %v8244_v59 = vpop.permute.xlu0 %8243  ;;  %v8308_v1 = vpop.permute.xlu1 %8307 }
0x1073   : > { %9036 = vst.msk [vmem:[%s14174_s21 + $0x50] sm:$0xff] %vm14696_vm9, %v8972_v46  ;;  %v8394_v49 = vsel %vm14697_vm6, %v14068_v7, %v8244_v59  ;;  %vm14712_vm9 = vcmask 588800   ;;  %vm14713_vm6 = vmmov %vm14688_vm0 }
0x1074   : > { %v8462_v48 = vsel %vm1089_vm3, %v8394_v49, %v8308_v1 }
0x1075   : > { %v8605_v23 = vshll.u32 %v8462_v48, 16  ;;  %v8733_v17 = vrot.slane %v8462_v48, 1 }
0x1077   : > { %v8607_v20 = vrot.slane %v8605_v23, 1  ;;  %v8734_v39 = vsel %vm1379_vm5, %v8732_v25, %v8733_v17 }
0x1078   : > { %v8973_v44 = vpop.f32.mrf.mxu3  ;;  %8767 = vrot.lane.b32.xlu1 %v8734_v39, %s14601_s26 }
0x1079   : > { %v8974_v16 = vadd.f32 %v14164_v51, %v8973_v44  ;;  %v8608_v7 = vsel %vm14698_vm7, %v8604_v24, %v8607_v20  ;;  %vm14714_vm7 = vmmov %vm14688_vm0 }
0x107a   : > { %8655 = vrot.lane.b32.xlu0 %v8608_v7, %s14602_s27 }
0x107b   : > { %9037 = vst.msk [vmem:[%s14174_s21 + $0x58] sm:$0xff] %vm14699_vm1, %v8974_v16  ;;  %vm14715_vm1 = vmmov %vm14688_vm0 }
0x107c   : > { %vm14725_vm14 = vmmov %vm14715_vm1 }
0x1088   : > { %v8976_v11 = vpop.f32.mrf.mxu3 }
0x1089   : > { %v8977_v6 = vadd.f32 %v14164_v51, %v8976_v11 }
0x108b   : > { %9038 = vst.msk [vmem:[%s14174_s21 + $0x60] sm:$0xff] %vm14700_vm10, %v8977_v6  ;;  %vm14716_vm10 = vmmov %vm14707_vm4 }
0x1090   : > { %v8978_v35 = vpop.f32.mrf.mxu3 }
0x1091   : > { %v8979_v31 = vadd.f32 %v14164_v51, %v8978_v35 }
0x1093   : > { %9039 = vst.msk [vmem:[%s14174_s21 + $0x68] sm:$0xff] %vm14701_vm11, %v8979_v31  ;;  %vm14718_vm11 = vmmov %vm14711_vm2 }
0x1094   : > { %v8764_v54 = vpop.permute.xlu2 %8763 }
0x109c   : > { %v8250_v18 = vpop.permute.xlu2 %8249 }
0x109d   : > { %v8403_v42 = vsel %vm14688_vm0, %v14142_v45, %v8250_v18  ;;  %v14706_v45 = vunpack.i.h.bf16 %v14702_v13  ;;  %vm14719_vm0 = vmmov %vm14712_vm9 }
0x109e   : > { %v14291_v53 = vsel %vm1089_vm3, %v8403_v42, %v14703_v19 }
0x109f   : > { %v8621_v30 = vshll.u32 %v14291_v53, 16  ;;  %v8619_v15 = vshrl.u32 %v14291_v53, 16  ;;  %v8738_v55 = vrot.slane %v14291_v53, 1 }
0x10a1   : > { %v8981_v32 = vpop.f32.mrf.mxu3  ;;  %v8623_v37 = vrot.slane %v8621_v30, 1 }
0x10a2   : > { %v8982_v52 = vadd.f32 %v14164_v51, %v8981_v32 }
0x10a3   : > { %v8624_v63 = vor.u32 %v8623_v37, %v8619_v15 }
0x10a4   : > { %9040 = vst.msk [vmem:[%s14174_s21 + $0x70] sm:$0xff] %vm14704_vm12, %v8982_v52  ;;  %v8252_v60 = vpop.permute.xlu2 %8251  ;;  %vm14720_vm12 = vmmov %vm14715_vm1 }
0x10a5   : > { %v8406_v62 = vsel %vm14705_vm8, %v14151_v14, %v8252_v60 }
0x10a6   : > { %v8468_v56 = vsel %vm1089_vm3, %v8406_v62, %v14706_v45  ;;  %v8310_v14 = vpop.permute.xlu1 %8309 }
0x10a7   : > { %v8625_v21 = vshll.u32 %v8468_v56, 16  ;;  %v8464_v27 = vsel %vm1089_vm3, %v8397_v34, %v8310_v14  ;;  %v8739_v48 = vrot.slane %v8468_v56, 1 }
0x10a8   : > { %v8611_v36 = vshll.u32 %v8464_v27, 16  ;;  %v8609_v3 = vshrl.u32 %v8464_v27, 16  ;;  %v8735_v12 = vrot.slane %v8464_v27, 1 }
0x10a9   : > { %v8627_v2 = vrot.slane %v8625_v21, 1  ;;  %v8983_v9 = vpop.f32.mrf.mxu3  ;;  %v8740_v25 = vsel %vm1379_vm5, %v8738_v55, %v8739_v48 }
0x10aa   : > { %v8984_v8 = vadd.f32 %v14164_v51, %v8983_v9  ;;  %v8613_v5 = vrot.slane %v8611_v36, 1 }
0x10ab   : > { %v8628_v33 = vsel %vm14707_vm4, %v8624_v63, %v8627_v2  ;;  %vm14723_vm4 = vmmov %vm14711_vm2 }
0x10ac   : > { %9041 = vst.msk [vmem:[%s14174_s21 + $0x78] sm:$0xff] %vm14708_vm13, %v8984_v8  ;;  %8659 = vrot.lane.b32.xlu1 %v8628_v33, %s14602_s27  ;;  %v8614_v59 = vor.u32 %v8613_v5, %v8609_v3  ;;  %vm14724_vm13 = vmmov %vm14719_vm0 }
0x10ae   : > { %v8652_v26 = vpop.permute.xlu0 %8651  ;;  %v8312_v47 = vpop.permute.xlu1 %8311 }
0x10af   : > { %v8796_v41 = vsel %vm14710_vm15, %v14188_v0, %v8652_v26 }
0x10b0   : > { %v8828_v28 = vsel %vm14711_vm2, %v8796_v41, %v8764_v54 }
0x10b1   : > { %9558 = vmatmul.msk.bf16.gmra.mxu3 %vm14712_vm9, %v8828_v28  ;;  %vm14728_vm9 = vmmov %vm14723_vm4 }
0x10b2   : > { %v8986_v50 = vpop.f32.mrf.mxu3 }
0x10b3   : > { %v8987_v57 = vadd.f32 %v14164_v51, %v8986_v50 }
0x10b5   : > { %9042 = vst.msk [vmem:[%s14174_s21 + $0x80] sm:$0xff] %vm14713_vm6, %v8987_v57  ;;  %vm14729_vm6 = vmmov %vm14719_vm0 }
0x10b6   : > { %v8248_v61 = vpop.permute.xlu0 %8247 }
0x10b7   : > { %v8400_v38 = vsel %vm14714_vm7, %v14129_v10, %v8248_v61  ;;  %vm14730_vm7 = vmmov %vm14715_vm1 }
0x10b8   : > { %v8466_v0 = vsel %vm1089_vm3, %v8400_v38, %v8312_v47  ;;  %vm14717_vm3 = vmmov %vm14710_vm15 }
0x10b9   : > { %v8615_v58 = vshll.u32 %v8466_v0, 16  ;;  %v8736_v29 = vrot.slane %v8466_v0, 1  ;;  %vm14722_vm8 = vmmov %vm14717_vm3 }
0x10ba   : > { %v8988_v46 = vpop.f32.mrf.mxu3  ;;  %vm14726_vm15 = vmmov %vm14715_vm1 }
0x10bb   : > { %v8617_v40 = vrot.slane %v8615_v58, 1  ;;  %v8989_v1 = vadd.f32 %v14164_v51, %v8988_v46  ;;  %v8737_v49 = vsel %vm1379_vm5, %v8735_v12, %v8736_v29  ;;  %vm14721_vm5 = vmmov %vm14715_vm1 }
0x10bc   : > { %8769 = vrot.lane.b32.xlu0 %v8737_v49, %s14601_s26  ;;  %vm14727_vm2 = vmmov %vm14717_vm3 }
0x10bd   : > { %9043 = vst.msk [vmem:[%s14174_s21 + $0x88] sm:$0xff] %vm14715_vm1, %v8989_v1  ;;  %v8618_v10 = vsel %vm14716_vm10, %v8614_v59, %v8617_v40  ;;  %vm14731_vm1 = vmmov %vm14727_vm2 }
0x10be   : > { %8657 = vrot.lane.b32.xlu2 %v8618_v10, %s14602_s27  ;;  %vm14732_vm10 = vmmov %vm14723_vm4 }
0x10c6   : > { %8771 = vrot.lane.b32.xlu2 %v8740_v25, %s14601_s26 }
0x10da   : > { %v8766_v17 = vpop.permute.xlu1 %8765 }
0x10dc   : > { %v8654_v23 = vpop.permute.xlu0 %8653 }
0x10dd   : > { %v8798_v24 = vsel %vm14717_vm3, %v14235_v43, %v8654_v23  ;;  %vm14733_vm3 = vmmov %vm14721_vm5 }
0x10de   : > { %v8830_v20 = vsel %vm14718_vm11, %v8798_v24, %v8766_v17  ;;  %vm14734_vm11 = vmmov %vm14719_vm0 }
0x10df   : > { %9559 = vmatmul.msk.bf16.gmra.mxu3 %vm14719_vm0, %v8830_v20  ;;  %vm14735_vm0 = vmmov %vm14733_vm3 }
0x10e0   : > { %v8991_v39 = vpop.f32.mrf.mxu3 }
0x10e1   : > { %v8992_v44 = vadd.f32 %v14164_v51, %v8991_v39 }
0x10e3   : > { %9044 = vst.msk [vmem:[%s14174_s21 + $0x90] sm:$0xff] %vm14720_vm12, %v8992_v44  ;;  %vm14736_vm12 = vmmov %vm14735_vm0 }
0x10e8   : > { %v8993_v16 = vpop.f32.mrf.mxu3 }
0x10e9   : > { %v8994_v7 = vadd.f32 %v14164_v51, %v8993_v16 }
0x10ea   : > { %v8768_v6 = vpop.permute.xlu1 %8767 }
0x10eb   : > { %9045 = vst.msk [vmem:[%s14174_s21 + $0x98] sm:$0xff] %vm14721_vm5, %v8994_v7  ;;  %vm14737_vm5 = vmmov %vm14735_vm0 }
0x10ec   : > { %v8656_v11 = vpop.permute.xlu0 %8655 }
0x10ed   : > { %v8800_v43 = vsel %vm14722_vm8, %v14260_v22, %v8656_v11  ;;  %vm14738_vm8 = vmmov %vm14735_vm0 }
0x10ee   : > { %v8832_v4 = vsel %vm14723_vm4, %v8800_v43, %v8768_v6  ;;  %vm14739_vm4 = vmmov %vm14735_vm0 }
0x10ef   : > { %9560 = vmatmul.msk.bf16.gmra.mxu3 %vm14724_vm13, %v8832_v4  ;;  %vm14740_vm13 = vmmov %vm14735_vm0 }
0x10f0   : > { %v8996_v35 = vpop.f32.mrf.mxu3 }
0x10f1   : > { %v8997_v31 = vadd.f32 %v14164_v51, %v8996_v35 }
0x10f3   : > { %9046 = vst.msk [vmem:[%s14174_s21 + $0xa0] sm:$0xff] %vm14725_vm14, %v8997_v31  ;;  %vm14741_vm14 = vmmov %vm14735_vm0 }
0x10f8   : > { %v8998_v54 = vpop.f32.mrf.mxu3 }
0x10f9   : > { %v8999_v18 = vadd.f32 %v14164_v51, %v8998_v54 }
0x10fb   : > { %9047 = vst.msk [vmem:[%s14174_s21 + $0xa8] sm:$0xff] %vm14726_vm15, %v8999_v18  ;;  %vm14742_vm15 = vmmov %vm14735_vm0 }
0x1118   : > { %v8658_v42 = vpop.permute.xlu2 %8657 }
0x1119   : > { %v8802_v13 = vsel %vm14727_vm2, %v8464_v27, %v8658_v42 }
0x111e   : > { %v8660_v52 = vpop.permute.xlu1 %8659 }
0x111f   : > { %v8804_v60 = vsel %vm14731_vm1, %v14291_v53, %v8660_v52 }
0x1120   : > { %v8772_v37 = vpop.permute.xlu2 %8771 }
0x1121   : > { %v8836_v56 = vsel %vm14732_vm10, %v8804_v60, %v8772_v37 }
0x112e   : > { %v8770_v22 = vpop.permute.xlu0 %8769 }
0x112f   : > { %v8834_v19 = vsel %vm14728_vm9, %v8802_v13, %v8770_v22 }
0x1130   : > { %9561 = vmatmul.msk.bf16.gmra.mxu3 %vm14729_vm6, %v8834_v19 }
0x1134   : > { %v9001_v30 = vpop.f32.mrf.mxu3 }
0x1135   : > { %v9002_v32 = vadd.f32 %v14164_v51, %v9001_v30 }
0x1137   : > { %9048 = vst.msk [vmem:[%s14174_s21 + $0xb0] sm:$0xff] %vm14730_vm7, %v9002_v32 }
0x113c   : > { %v9003_v62 = vpop.f32.mrf.mxu3 }
0x113d   : > { %v9004_v45 = vadd.f32 %v14164_v51, %v9003_v62 }
0x113f   : > { %9049 = vst.msk [vmem:[%s14174_s21 + $0xb8] sm:$0xff] %vm14733_vm3, %v9004_v45 }
0x1140   : > { %9562 = vmatmul.msk.bf16.gmra.mxu3 %vm14734_vm11, %v8836_v56 }
0x1162   : > { %v9006_v15 = vpop.f32.mrf.mxu3 }
0x1163   : > { %v9007_v21 = vadd.f32 %v14164_v51, %v9006_v15 }
0x1165   : > { %9050 = vst.msk [vmem:[%s14174_s21 + $0xc0] sm:$0xff] %vm14735_vm0, %v9007_v21 }
0x116a   : > { %v9008_v2 = vpop.f32.mrf.mxu3 }
0x116b   : > { %v9009_v53 = vadd.f32 %v14164_v51, %v9008_v2 }
0x116d   : > { %9051 = vst.msk [vmem:[%s14174_s21 + $0xc8] sm:$0xff] %vm14736_vm12, %v9009_v53 }
0x1172   : > { %v9011_v9 = vpop.f32.mrf.mxu3 }
0x1173   : > { %v9012_v63 = vadd.f32 %v14164_v51, %v9011_v9 }
0x1175   : > { %9052 = vst.msk [vmem:[%s14174_s21 + $0xd0] sm:$0xff] %vm14737_vm5, %v9012_v63 }
0x117a   : > { %v9013_v8 = vpop.f32.mrf.mxu3 }
0x117b   : > { %v9014_v33 = vadd.f32 %v14164_v51, %v9013_v8 }
0x117d   : > { %9053 = vst.msk [vmem:[%s14174_s21 + $0xd8] sm:$0xff] %vm14738_vm8, %v9014_v33 }
0x11b3   : > { %v9016_v14 = vpop.f32.mrf.mxu3 }
0x11b4   : > { %v9017_v26 = vadd.f32 %v14164_v51, %v9016_v14 }
0x11b6   : > { %9054 = vst.msk [vmem:[%s14174_s21 + $0xe0] sm:$0xff] %vm14739_vm4, %v9017_v26 }
0x11bb   : > { %v9018_v34 = vpop.f32.mrf.mxu3 }
0x11bc   : > { %v9019_v41 = vadd.f32 %v14164_v51, %v9018_v34 }
0x11be   : > { %9055 = vst.msk [vmem:[%s14174_s21 + $0xe8] sm:$0xff] %vm14740_vm13, %v9019_v41 }
0x11c3   : > { %v9021_v27 = vpop.f32.mrf.mxu3 }
0x11c4   : > { %v9022_v28 = vadd.f32 %v14164_v51, %v9021_v27 }
0x11c6   : > { %9056 = vst.msk [vmem:[%s14174_s21 + $0xf0] sm:$0xff] %vm14741_vm14, %v9022_v28 }
0x11cb   : > { %v9023_v50 = vpop.f32.mrf.mxu3 }
0x11cc   : > { %v9024_v36 = vadd.f32 %v14164_v51, %v9023_v50 }
0x11ce   : > { %9057 = vst.msk [vmem:[%s14174_s21 + $0xf8] sm:$0xff] %vm14742_vm15, %v9024_v36 }
0x11cf PF: > { %s25_s18 = sadd.s32 1, %s9705_s18  }
0x11d0   : > { %p22_p4 = scmp.ge.s32.totalorder %s25_s18, 4  }
0x11d2   :  { %24 = sbr.rel (!%p22_p4) target bundleno = 1 (0x1), region = 120 }

</bundles_post_ra>
